<compile_context>
chip_gen: v7x
topology: tpu7x:2x2x1
jax: 0.10.0
libtpu: 0.0.40
codegen_flags: <defaults>
</compile_context>

<pallas_src>
import jax
import jax.numpy as jnp
from jax.experimental import pallas as pl
from jax.experimental.pallas import tpu as pltpu

N_WIRES = 3606
N_PAD = 3712            # 29 * 128: lane-aligned padding of the wire axis
HIDDEN = 512
TILE_M_MAX = 256        # batch rows per grid step when batch is large


def _round_up(x, m):
    return (x + m - 1) // m * m


def vae_kernel(x_ref, w1_ref, b1_ref, w2_ref, b2_ref,
               w3_ref, b3_ref, w4_ref, b4_ref, o_ref):
    # Encoder: Linear(n_wires, hidden) + LeakyReLU(0.2)
    h = jnp.dot(x_ref[...], w1_ref[...],
                preferred_element_type=jnp.float32) + b1_ref[...]
    h = jnp.where(h > 0, h, 0.2 * h).astype(jnp.bfloat16)
    # Encoder: Linear(hidden, encoded_dim) + Tanh
    z = jnp.dot(h, w2_ref[...], preferred_element_type=jnp.float32) + b2_ref[...]
    z = jnp.tanh(z).astype(jnp.bfloat16)
    # Decoder: Linear(encoded_dim, hidden) + ReLU
    d = jnp.dot(z, w3_ref[...], preferred_element_type=jnp.float32) + b3_ref[...]
    d = jnp.maximum(d, 0.0).astype(jnp.bfloat16)
    # Decoder: Linear(hidden, n_wires)
    o_ref[...] = (jnp.dot(d, w4_ref[...], preferred_element_type=jnp.float32)
                  + b4_ref[...]).astype(o_ref.dtype)


def vae_forward(x, params):
    """x: (B, n_wires) float32. params: padded bf16 weights (in,out) + f32 biases (1,out)."""
    B = x.shape[0]
    enc_dim = params["w2"].shape[1]

    # Batch tiling: small batches run as a single tile; large batches get
    # 256-row tiles iterated (and megacore-split) over the grid.
    tile_m = min(TILE_M_MAX, _round_up(B, 8))
    b_pad = _round_up(B, tile_m)
    grid = (b_pad // tile_m,)

    # Pad batch + wire axes; cast activations to bf16 to halve HBM bytes.
    x_p = jnp.zeros((b_pad, N_PAD), jnp.bfloat16)
    x_p = x_p.at[:B, :N_WIRES].set(x.astype(jnp.bfloat16))

    const = lambda i: (0, 0)          # weight-stationary: same block every step
    in_specs = [
        pl.BlockSpec((tile_m, N_PAD), lambda i: (i, 0)),       # x
        pl.BlockSpec((N_PAD, HIDDEN), const),                  # w1
        pl.BlockSpec((1, HIDDEN), const),                      # b1
        pl.BlockSpec((HIDDEN, enc_dim), const),                # w2
        pl.BlockSpec((1, enc_dim), const),                     # b2
        pl.BlockSpec((enc_dim, HIDDEN), const),                # w3
        pl.BlockSpec((1, HIDDEN), const),                      # b3
        pl.BlockSpec((HIDDEN, N_PAD), const),                  # w4
        pl.BlockSpec((1, N_PAD), const),                       # b4
    ]
    out_specs = pl.BlockSpec((tile_m, N_PAD), lambda i: (i, 0))

    flops = 2 * b_pad * (N_PAD * HIDDEN + HIDDEN * enc_dim
                         + enc_dim * HIDDEN + HIDDEN * N_PAD)
    bytes_accessed = (
        x_p.size * 2                                                   # bf16 x
        + 2 * (params["w1"].size + params["w2"].size
               + params["w3"].size + params["w4"].size)                # bf16 weights
        + 4 * (params["b1"].size + params["b2"].size
               + params["b3"].size + params["b4"].size)                # f32 biases
        + b_pad * N_PAD * 4)                                           # f32 output

    y = pl.pallas_call(
        vae_kernel,
        out_shape=jax.ShapeDtypeStruct((b_pad, N_PAD), jnp.float32),
        grid_spec=pltpu.PrefetchScalarGridSpec(
            num_scalar_prefetch=0,
            grid=grid,
            in_specs=in_specs,
            out_specs=out_specs),
        compiler_params=pltpu.CompilerParams(
            dimension_semantics=("parallel",),
            vmem_limit_bytes=48 << 20),
        cost_estimate=pl.CostEstimate(
            flops=flops,
            transcendentals=b_pad * enc_dim,
            bytes_accessed=bytes_accessed),
    )(x_p,
      params["w1"], params["b1"],
      params["w2"], params["b2"],
      params["w3"], params["b3"],
      params["w4"], params["b4"])
    return y[:B, :N_WIRES]


def init_params(key, encoded_dim):
    """PyTorch-Linear-style U(-1/sqrt(fan_in), +) init.

    Weights stored pre-transposed as (in, out), zero-padded to the lane-aligned
    wire dimension, and cast to bf16 (biases stay f32).
    """
    def linear(key, fan_in, fan_out, pad_in=None, pad_out=None):
        kw, kb = jax.random.split(key)
        bound = 1.0 / jnp.sqrt(fan_in)
        w = jax.random.uniform(kw, (fan_in, fan_out), jnp.float32, -bound, bound)
        b = jax.random.uniform(kb, (1, fan_out), jnp.float32, -bound, bound)
        pi = pad_in or fan_in
        po = pad_out or fan_out
        w_p = jnp.zeros((pi, po), jnp.float32).at[:fan_in, :fan_out].set(w)
        b_p = jnp.zeros((1, po), jnp.float32).at[:, :fan_out].set(b)
        return w_p.astype(jnp.bfloat16), b_p

    k1, k2, k3, k4 = jax.random.split(key, 4)
    w1, b1 = linear(k1, N_WIRES, HIDDEN, pad_in=N_PAD)        # enc.lin1
    w2, b2 = linear(k2, HIDDEN, encoded_dim)                  # enc.lin2
    w3, b3 = linear(k3, encoded_dim, HIDDEN)                  # dec.lin1
    w4, b4 = linear(k4, HIDDEN, N_WIRES, pad_out=N_PAD)       # dec.lin2
    return dict(w1=w1, b1=b1, w2=w2, b2=b2, w3=w3, b3=b3, w4=w4, b4=b4)


def vae_reference(x, p):
    """Pure-JAX reference using the same bf16 weights / cast pattern."""
    xb = jnp.pad(x, ((0, 0), (0, N_PAD - N_WIRES))).astype(jnp.bfloat16)
    h = jnp.dot(xb, p["w1"], preferred_element_type=jnp.float32) + p["b1"]
    h = jnp.where(h > 0, h, 0.2 * h).astype(jnp.bfloat16)
    z = jnp.tanh(jnp.dot(h, p["w2"],
                         preferred_element_type=jnp.float32) + p["b2"]).astype(jnp.bfloat16)
    d = jnp.maximum(jnp.dot(z, p["w3"],
                            preferred_element_type=jnp.float32) + p["b3"],
                    0.0).astype(jnp.bfloat16)
    y = jnp.dot(d, p["w4"], preferred_element_type=jnp.float32) + p["b4"]
    return y[:, :N_WIRES]


if __name__ == "__main__":
    key = jax.random.PRNGKey(0)
    k_param, k_x = jax.random.split(key)

    encoded_dim = 32
    batch = 8

    params = init_params(k_param, encoded_dim)
    x = jax.random.normal(k_x, (batch, N_WIRES), jnp.float32)

    y = vae_forward(x, params)
    y = jax.block_until_ready(y)

    y_ref = vae_reference(x, params)
    assert y.shape == (batch, N_WIRES)
    assert jnp.allclose(y, y_ref, atol=2e-2, rtol=2e-2), (
        float(jnp.max(jnp.abs(y - y_ref))))

    print("KERNEL_OK")
</pallas_src>

<mosaic_0001>
module attributes {stable_mosaic.version = 11 : i64} {
  func.func @vae_kernel(%arg0: i32, %arg1: memref<8x3712xbf16, #tpu.memory_space<vmem>>, %arg2: memref<3712x512xbf16, #tpu.memory_space<vmem>>, %arg3: memref<1x512xf32, #tpu.memory_space<vmem>>, %arg4: memref<512x32xbf16, #tpu.memory_space<vmem>>, %arg5: memref<1x32xf32, #tpu.memory_space<vmem>>, %arg6: memref<32x512xbf16, #tpu.memory_space<vmem>>, %arg7: memref<1x512xf32, #tpu.memory_space<vmem>>, %arg8: memref<512x3712xbf16, #tpu.memory_space<vmem>>, %arg9: memref<1x3712xf32, #tpu.memory_space<vmem>>, %arg10: memref<8x3712xf32, #tpu.memory_space<vmem>>) attributes {dimension_semantics = [#tpu.dimension_semantics<parallel>], iteration_bounds = array<i64: 1>, scalar_prefetch = 0 : i64, scratch_operands = 0 : i64, tpu.core_type = #tpu.core_type<tc>, window_params = [{transform_indices = @transform_0, window_bounds = array<i64: 8, 3712>}, {pipeline_mode = #tpu.pipeline_mode<synchronous>, transform_indices = @transform_1, window_bounds = array<i64: 3712, 512>}, {pipeline_mode = #tpu.pipeline_mode<synchronous>, transform_indices = @transform_2, window_bounds = array<i64: 1, 512>}, {pipeline_mode = #tpu.pipeline_mode<synchronous>, transform_indices = @transform_3, window_bounds = array<i64: 512, 32>}, {pipeline_mode = #tpu.pipeline_mode<synchronous>, transform_indices = @transform_4, window_bounds = array<i64: 1, 32>}, {pipeline_mode = #tpu.pipeline_mode<synchronous>, transform_indices = @transform_5, window_bounds = array<i64: 32, 512>}, {pipeline_mode = #tpu.pipeline_mode<synchronous>, transform_indices = @transform_6, window_bounds = array<i64: 1, 512>}, {pipeline_mode = #tpu.pipeline_mode<synchronous>, transform_indices = @transform_7, window_bounds = array<i64: 512, 3712>}, {pipeline_mode = #tpu.pipeline_mode<synchronous>, transform_indices = @transform_8, window_bounds = array<i64: 1, 3712>}, {transform_indices = @transform_9, window_bounds = array<i64: 8, 3712>}]} {
    %c0 = arith.constant 0 : index
    %c0_0 = arith.constant 0 : index
    %0 = vector.load %arg1[%c0, %c0_0] : memref<8x3712xbf16, #tpu.memory_space<vmem>>, vector<8x3712xbf16>
    %c0_1 = arith.constant 0 : index
    %c0_2 = arith.constant 0 : index
    %1 = vector.load %arg2[%c0_1, %c0_2] : memref<3712x512xbf16, #tpu.memory_space<vmem>>, vector<3712x512xbf16>
    %cst = arith.constant dense<0.000000e+00> : vector<8x512xf32>
    %2 = tpu.matmul %0, %1, %cst {dimension_numbers = #tpu.dot_dimension_numbers<[1], [0], [0], [1], [0, 0, 1, 1], [], []>} : vector<8x3712xbf16>, vector<3712x512xbf16>, vector<8x512xf32> -> vector<8x512xf32>
    %c0_3 = arith.constant 0 : index
    %c0_4 = arith.constant 0 : index
    %3 = vector.load %arg3[%c0_3, %c0_4] : memref<1x512xf32, #tpu.memory_space<vmem>>, vector<1x512xf32>
    %4 = vector.broadcast %3 : vector<1x512xf32> to vector<8x512xf32>
    %5 = arith.addf %2, %4 : vector<8x512xf32>
    %cst_5 = arith.constant 0.000000e+00 : f32
    %6 = vector.broadcast %cst_5 : f32 to vector<8x512xf32>
    %7 = arith.cmpf ogt, %5, %6 : vector<8x512xf32>
    %cst_6 = arith.constant 2.000000e-01 : f32
    %8 = vector.broadcast %cst_6 : f32 to vector<8x512xf32>
    %9 = arith.mulf %8, %5 : vector<8x512xf32>
    %10 = arith.select %7, %5, %9 : vector<8x512xi1>, vector<8x512xf32>
    %11 = arith.truncf %10 : vector<8x512xf32> to vector<8x512xbf16>
    %c0_7 = arith.constant 0 : index
    %c0_8 = arith.constant 0 : index
    %12 = vector.load %arg4[%c0_7, %c0_8] : memref<512x32xbf16, #tpu.memory_space<vmem>>, vector<512x32xbf16>
    %cst_9 = arith.constant dense<0.000000e+00> : vector<8x32xf32>
    %13 = tpu.matmul %11, %12, %cst_9 {dimension_numbers = #tpu.dot_dimension_numbers<[1], [0], [0], [1], [0, 0, 1, 1], [], []>} : vector<8x512xbf16>, vector<512x32xbf16>, vector<8x32xf32> -> vector<8x32xf32>
    %c0_10 = arith.constant 0 : index
    %c0_11 = arith.constant 0 : index
    %14 = vector.load %arg5[%c0_10, %c0_11] : memref<1x32xf32, #tpu.memory_space<vmem>>, vector<1x32xf32>
    %15 = vector.broadcast %14 : vector<1x32xf32> to vector<8x32xf32>
    %16 = arith.addf %13, %15 : vector<8x32xf32>
    %17 = math.tanh %16 : vector<8x32xf32>
    %18 = arith.truncf %17 : vector<8x32xf32> to vector<8x32xbf16>
    %c0_12 = arith.constant 0 : index
    %c0_13 = arith.constant 0 : index
    %19 = vector.load %arg6[%c0_12, %c0_13] : memref<32x512xbf16, #tpu.memory_space<vmem>>, vector<32x512xbf16>
    %cst_14 = arith.constant dense<0.000000e+00> : vector<8x512xf32>
    %20 = tpu.matmul %18, %19, %cst_14 {dimension_numbers = #tpu.dot_dimension_numbers<[1], [0], [0], [1], [0, 0, 1, 1], [], []>} : vector<8x32xbf16>, vector<32x512xbf16>, vector<8x512xf32> -> vector<8x512xf32>
    %c0_15 = arith.constant 0 : index
    %c0_16 = arith.constant 0 : index
    %21 = vector.load %arg7[%c0_15, %c0_16] : memref<1x512xf32, #tpu.memory_space<vmem>>, vector<1x512xf32>
    %22 = vector.broadcast %21 : vector<1x512xf32> to vector<8x512xf32>
    %23 = arith.addf %20, %22 : vector<8x512xf32>
    %cst_17 = arith.constant 0.000000e+00 : f32
    %24 = vector.broadcast %cst_17 : f32 to vector<8x512xf32>
    %25 = arith.maximumf %23, %24 : vector<8x512xf32>
    %26 = arith.truncf %25 : vector<8x512xf32> to vector<8x512xbf16>
    %c0_18 = arith.constant 0 : index
    %c0_19 = arith.constant 0 : index
    %27 = vector.load %arg8[%c0_18, %c0_19] : memref<512x3712xbf16, #tpu.memory_space<vmem>>, vector<512x3712xbf16>
    %cst_20 = arith.constant dense<0.000000e+00> : vector<8x3712xf32>
    %28 = tpu.matmul %26, %27, %cst_20 {dimension_numbers = #tpu.dot_dimension_numbers<[1], [0], [0], [1], [0, 0, 1, 1], [], []>} : vector<8x512xbf16>, vector<512x3712xbf16>, vector<8x3712xf32> -> vector<8x3712xf32>
    %c0_21 = arith.constant 0 : index
    %c0_22 = arith.constant 0 : index
    %29 = vector.load %arg9[%c0_21, %c0_22] : memref<1x3712xf32, #tpu.memory_space<vmem>>, vector<1x3712xf32>
    %30 = vector.broadcast %29 : vector<1x3712xf32> to vector<8x3712xf32>
    %31 = arith.addf %28, %30 : vector<8x3712xf32>
    %c0_23 = arith.constant 0 : index
    %c0_24 = arith.constant 0 : index
    %32 = vector.load %arg10[%c0_23, %c0_24] : memref<8x3712xf32, #tpu.memory_space<vmem>>, vector<8x3712xf32>
    tpu.vector_store %arg10[%c0_23, %c0_24], %31 {strides = array<i32>} : memref<8x3712xf32, #tpu.memory_space<vmem>>, vector<8x3712xf32>,
    return
  }
  func.func @transform_0(%arg0: i32) -> (i32, i32) {
    %c0_i32 = arith.constant 0 : i32
    %c0_i32_0 = arith.constant 0 : i32
    return %arg0, %c0_i32 : i32, i32
  }
  func.func @transform_1(%arg0: i32) -> (i32, i32) {
    %c0_i32 = arith.constant 0 : i32
    %c0_i32_0 = arith.constant 0 : i32
    %c0_i32_1 = arith.constant 0 : i32
    return %c0_i32, %c0_i32_0 : i32, i32
  }
  func.func @transform_2(%arg0: i32) -> (i32, i32) {
    %c0_i32 = arith.constant 0 : i32
    %c0_i32_0 = arith.constant 0 : i32
    %c0_i32_1 = arith.constant 0 : i32
    return %c0_i32, %c0_i32_0 : i32, i32
  }
  func.func @transform_3(%arg0: i32) -> (i32, i32) {
    %c0_i32 = arith.constant 0 : i32
    %c0_i32_0 = arith.constant 0 : i32
    %c0_i32_1 = arith.constant 0 : i32
    return %c0_i32, %c0_i32_0 : i32, i32
  }
  func.func @transform_4(%arg0: i32) -> (i32, i32) {
    %c0_i32 = arith.constant 0 : i32
    %c0_i32_0 = arith.constant 0 : i32
    %c0_i32_1 = arith.constant 0 : i32
    return %c0_i32, %c0_i32_0 : i32, i32
  }
  func.func @transform_5(%arg0: i32) -> (i32, i32) {
    %c0_i32 = arith.constant 0 : i32
    %c0_i32_0 = arith.constant 0 : i32
    %c0_i32_1 = arith.constant 0 : i32
    return %c0_i32, %c0_i32_0 : i32, i32
  }
  func.func @transform_6(%arg0: i32) -> (i32, i32) {
    %c0_i32 = arith.constant 0 : i32
    %c0_i32_0 = arith.constant 0 : i32
    %c0_i32_1 = arith.constant 0 : i32
    return %c0_i32, %c0_i32_0 : i32, i32
  }
  func.func @transform_7(%arg0: i32) -> (i32, i32) {
    %c0_i32 = arith.constant 0 : i32
    %c0_i32_0 = arith.constant 0 : i32
    %c0_i32_1 = arith.constant 0 : i32
    return %c0_i32, %c0_i32_0 : i32, i32
  }
  func.func @transform_8(%arg0: i32) -> (i32, i32) {
    %c0_i32 = arith.constant 0 : i32
    %c0_i32_0 = arith.constant 0 : i32
    %c0_i32_1 = arith.constant 0 : i32
    return %c0_i32, %c0_i32_0 : i32, i32
  }
  func.func @transform_9(%arg0: i32) -> (i32, i32) {
    %c0_i32 = arith.constant 0 : i32
    %c0_i32_0 = arith.constant 0 : i32
    return %arg0, %c0_i32 : i32, i32
  }
}

</mosaic_0001>

<bundles_post_ra>
// kernel: tpu_custom_call.1
= control target key start
LH: loop header
LB: loop body
LE: loop exit
PB: predicated region body
PF: predicated region fallthrough
CT: control target
= control target key end

     0   :  { %14 = vsyncpa [#allocation3], 0  ;;  %s20465_s0 = inlined_call_operand.hbm [shape: bf16[8,3712], index: 0, kind: input, shape index: {}]   ;;  %s20466_s1 = inlined_call_operand.hbm [shape: bf16[3712,512], index: 1, kind: input, shape index: {}]   ;;  %s20467_s2 = inlined_call_operand.hbm [shape: f32[1,512], index: 2, kind: input, shape index: {}]   ;;  %s20468_s3 = inlined_call_operand.vmem [shape: bf16[512,32], index: 3, kind: input, shape index: {}]   ;;  %s20469_s4 = inlined_call_operand.hbm [shape: f32[1,32], index: 4, kind: input, shape index: {}]   ;;  %s20470_s5 = inlined_call_operand.hbm [shape: bf16[32,512], index: 5, kind: input, shape index: {}]   ;;  %s20471_s6 = inlined_call_operand.hbm [shape: f32[1,512], index: 6, kind: input, shape index: {}]   ;;  %s20472_s7 = inlined_call_operand.hbm [shape: bf16[512,3712], index: 7, kind: input, shape index: {}]   ;;  %s20473_s8 = inlined_call_operand.hbm [shape: f32[1,3712], index: 8, kind: input, shape index: {}]   ;;  %s20474_s9 = inlined_call_operand.hbm [shape: f32[8,3712], index: 9, kind: output, shape index: {}]  }
   0x1   :  { %15 = vsyncpa [#allocation6], 0 }
   0x2   :  { %16 = vsyncpa [#allocation9], 0 }
   0x3   :  { %17 = vsyncpa [#allocation12], 0 }
   0x4   :  { %18 = vsyncpa [#allocation15], 0 }
   0x5   :  { %19 = vsyncpa [#allocation4], 0  ;;  %s19939_s30 = smov [#allocation5]   ;;  %s19729_s13 = scalar_lea.hbm %s20466_s1, 118784 }
   0x6   :  { %s35_s10 = sshll.u32 %s19939_s30, 4  ;;  %p19730_p0 = scmp.ne.s32.totalorder %s20466_s1, %s19729_s13  ;;  %s36_s10 = int_to_ptr.vmem [resolvable:$true] %s35_s10 }
   0x7   :  { %p19733_p1 = scmp.lt.u32.totalorder %s19729_s13, %s20466_s1 }
   0x9   :  { %p19735_p2 = pnand %p19733_p1, %p19730_p0 }
   0xb   :  { %19738 = shalt.err (!%p19735_p2)
}
   0xc   :  { %s19739_s18 = scalar_lea.vmem %s36_s10, 118784  ;;  %p19744_p4 = scmp.lt.s32.totalorder %s36_s10, %s36_s10 }
   0xd   :  { %p19740_p3 = scmp.ne.s32.totalorder %s36_s10, %s19739_s18  ;;  %p19745_p5 = scmp.lt.s32.totalorder %s19739_s18, %s19739_s18 }
   0xf   :  { %p19746_p6 = por %p19745_p5, %p19744_p4 }
  0x11   :  { %p19747_p7 = pnand %p19746_p6, %p19740_p3 }
  0x13   :  { %19750 = shalt.err (!%p19747_p7)
}
  0x14   :  { %s19940_s19 = smov 256   ;;  %s19941_s20 = smov 16  }
  0x15   :  { %41 = dma.hbm_to_vmem [thread:$0]  %s20466_s1, 118784, %s36_s10, [#allocation6], %s19940_s19, %s19940_s19, %s19941_s20  }
  0x16   :  { %s19942_s23 = smov [#allocation8]   ;;  %s19943_s25 = smov [#allocation11]  }
  0x17   :  { %s60_s24 = sshll.u32 %s19942_s23, 4  ;;  %s82_s26 = sshll.u32 %s19943_s25, 4  ;;  %s61_s24 = int_to_ptr.vmem [resolvable:$true] %s60_s24  ;;  %s83_s26 = int_to_ptr.vmem [resolvable:$true] %s82_s26 }
  0x18   :  { %s19751_s29 = scalar_lea.hbm %s20469_s4, 16 }
  0x19   :  { %p19752_p8 = scmp.ne.s32.totalorder %s20469_s4, %s19751_s29  ;;  %p19755_p9 = scmp.lt.u32.totalorder %s19751_s29, %s20469_s4 }
  0x1b   :  { %p19757_p10 = pnand %p19755_p9, %p19752_p8 }
  0x1d   :  { %19760 = shalt.err (!%p19757_p10)
}
  0x1e   :  { %s19761_s1 = scalar_lea.vmem %s61_s24, 16  ;;  %s19765_s10 = scalar_lea.vmem %s61_s24, 32 }
  0x1f   :  { %p19762_p11 = scmp.ne.s32.totalorder %s61_s24, %s19761_s1  ;;  %p19766_p12 = scmp.lt.s32.totalorder %s61_s24, %s61_s24 }
  0x20   :  { %p19767_p13 = scmp.lt.s32.totalorder %s19765_s10, %s19761_s1 }
  0x22   :  { %p19768_p0 = por %p19767_p13, %p19766_p12 }
  0x24   :  { %p19769_p1 = pnand %p19768_p0, %p19762_p11 }
  0x26   :  { %19772 = shalt.err (!%p19769_p1)
}
  0x27   :  { %63 = dma.hbm_to_vmem [thread:$0]  %s20469_s4, 16, %s61_s24, [#allocation9]  }
  0x28   :  { %s19773_s18 = scalar_lea.hbm %s20471_s6, 64 }
  0x29   :  { %p19774_p2 = scmp.ne.s32.totalorder %s20471_s6, %s19773_s18  ;;  %p19777_p3 = scmp.lt.u32.totalorder %s19773_s18, %s20471_s6 }
  0x2b   :  { %p19779_p4 = pnand %p19777_p3, %p19774_p2 }
  0x2d   :  { %19782 = shalt.err (!%p19779_p4)
}
  0x2e   :  { %s19783_s27 = scalar_lea.vmem %s83_s26, 64  ;;  %p19788_p6 = scmp.lt.s32.totalorder %s83_s26, %s83_s26 }
  0x2f   :  { %p19784_p5 = scmp.ne.s32.totalorder %s83_s26, %s19783_s27  ;;  %p19789_p7 = scmp.lt.s32.totalorder %s19783_s27, %s19783_s27 }
  0x31   :  { %p19790_p8 = por %p19789_p7, %p19788_p6 }
  0x33   :  { %p19791_p9 = pnand %p19790_p8, %p19784_p5 }
  0x35   :  { %19794 = shalt.err (!%p19791_p9)
}
  0x36   :  { %85 = dma.hbm_to_vmem [thread:$0]  %s20471_s6, 64, %s83_s26, [#allocation12]  }
  0x37   :  { %s19944_s28 = smov [#allocation2]   ;;  %s19945_s30 = smov [#allocation7]  }
  0x38   :  { %s26_s29 = sshll.u32 %s19944_s28, 4  ;;  %s48_s11 = sshll.u32 %s19945_s30, 4  ;;  %s27_s29 = int_to_ptr.vmem [resolvable:$true] %s26_s29  ;;  %s49_s11 = int_to_ptr.vmem [resolvable:$true] %s48_s11 }
  0x39   :  { %s19795_s1 = scalar_lea.hbm %s20465_s0, 1856 }
  0x3a   :  { %p19796_p10 = scmp.ne.s32.totalorder %s20465_s0, %s19795_s1  ;;  %p19799_p11 = scmp.lt.u32.totalorder %s19795_s1, %s20465_s0 }
  0x3c   :  { %p19801_p12 = pnand %p19799_p11, %p19796_p10 }
  0x3e   :  { %19804 = shalt.err (!%p19801_p12)
}
  0x3f   :  { %s19805_s6 = scalar_lea.vmem %s27_s29, 1856  ;;  %p19810_p0 = scmp.lt.s32.totalorder %s27_s29, %s27_s29 }
  0x40   :  { %p19806_p13 = scmp.ne.s32.totalorder %s27_s29, %s19805_s6  ;;  %p19811_p1 = scmp.lt.s32.totalorder %s19805_s6, %s19805_s6 }
  0x42   :  { %p19812_p2 = por %p19811_p1, %p19810_p0 }
  0x44   :  { %p19813_p3 = pnand %p19812_p2, %p19806_p13 }
  0x46   :  { %19816 = shalt.err (!%p19813_p3)
}
  0x47   :  { %29 = dma.hbm_to_vmem [thread:$0]  %s20465_s0, 1856, %s27_s29, [#allocation3]  }
  0x48   :  { %s19817_s22 = scalar_lea.hbm %s20467_s2, 64 }
  0x49   :  { %p19818_p4 = scmp.ne.s32.totalorder %s20467_s2, %s19817_s22  ;;  %p19821_p5 = scmp.lt.u32.totalorder %s19817_s22, %s20467_s2 }
  0x4b   :  { %p19823_p6 = pnand %p19821_p5, %p19818_p4 }
  0x4d   :  { %19826 = shalt.err (!%p19823_p6)
}
  0x4e   :  { %s19827_s24 = scalar_lea.vmem %s49_s11, 64  ;;  %p19832_p8 = scmp.lt.s32.totalorder %s49_s11, %s49_s11 }
  0x4f   :  { %p19828_p7 = scmp.ne.s32.totalorder %s49_s11, %s19827_s24  ;;  %p19833_p9 = scmp.lt.s32.totalorder %s19827_s24, %s19827_s24 }
  0x51   :  { %p19834_p10 = por %p19833_p9, %p19832_p8 }
  0x53   :  { %p19835_p11 = pnand %p19834_p10, %p19828_p7 }
  0x55   :  { %19838 = shalt.err (!%p19835_p11)
}
  0x56   :  { %51 = dma.hbm_to_vmem [thread:$0]  %s20467_s2, 64, %s49_s11, [#allocation6]  }
  0x57   :  { %s19946_s29 = smov [#allocation10]   ;;  %s19947_s12 = smov [#allocation13]  }
  0x58   :  { %s69_s30 = sshll.u32 %s19946_s29, 4  ;;  %s91_s13 = sshll.u32 %s19947_s12, 4  ;;  %s70_s30 = int_to_ptr.vmem [resolvable:$true] %s69_s30  ;;  %s92_s13 = int_to_ptr.vmem [resolvable:$true] %s91_s13 }
  0x59   :  { %s19839_s14 = scalar_lea.hbm %s20470_s5, 1024 }
  0x5a   :  { %p19840_p12 = scmp.ne.s32.totalorder %s20470_s5, %s19839_s14  ;;  %p19843_p13 = scmp.lt.u32.totalorder %s19839_s14, %s20470_s5 }
  0x5c   :  { %p19845_p0 = pnand %p19843_p13, %p19840_p12 }
  0x5e   :  { %19848 = shalt.err (!%p19845_p0)
}
  0x5f   :  { %s19849_s2 = scalar_lea.vmem %s70_s30, 1024  ;;  %p19854_p2 = scmp.lt.s32.totalorder %s70_s30, %s70_s30 }
  0x60   :  { %p19850_p1 = scmp.ne.s32.totalorder %s70_s30, %s19849_s2  ;;  %p19855_p3 = scmp.lt.s32.totalorder %s19849_s2, %s19849_s2 }
  0x62   :  { %p19856_p4 = por %p19855_p3, %p19854_p2 }
  0x64   :  { %p19857_p5 = pnand %p19856_p4, %p19850_p1 }
  0x66   :  { %19860 = shalt.err (!%p19857_p5)
}
  0x67   :  { %75 = dma.hbm_to_vmem [thread:$0]  %s20470_s5, 1024, %s70_s30, [#allocation9], %s19940_s19, %s19940_s19, %s19941_s20  }
  0x68   :  { %s19861_s22 = scalar_lea.hbm %s20472_s7, 118784 }
  0x69   :  { %p19862_p6 = scmp.ne.s32.totalorder %s20472_s7, %s19861_s22  ;;  %p19865_p7 = scmp.lt.u32.totalorder %s19861_s22, %s20472_s7 }
  0x6b   :  { %p19867_p8 = pnand %p19865_p7, %p19862_p6 }
  0x6d   :  { %19870 = shalt.err (!%p19867_p8)
}
  0x6e   :  { %s19871_s24 = scalar_lea.vmem %s92_s13, 118784  ;;  %p19876_p10 = scmp.lt.s32.totalorder %s92_s13, %s92_s13 }
  0x6f   :  { %p19872_p9 = scmp.ne.s32.totalorder %s92_s13, %s19871_s24  ;;  %p19877_p11 = scmp.lt.s32.totalorder %s19871_s24, %s19871_s24 }
  0x71   :  { %p19878_p12 = por %p19877_p11, %p19876_p10 }
  0x73   :  { %p19879_p13 = pnand %p19878_p12, %p19872_p9 }
  0x75   :  { %19882 = shalt.err (!%p19879_p13)
}
  0x76   :  { %s19948_s5 = smov 1856   ;;  %s19949_s19 = smov 116  }
  0x77   :  { %97 = dma.hbm_to_vmem [thread:$0]  %s20472_s7, 118784, %s92_s13, [#allocation12], %s19948_s5, %s19948_s5, %s19949_s19  }
  0x78   :  { %s19950_s28 = smov [#allocation14]   ;;  %s19883_s1 = scalar_lea.hbm %s20473_s8, 464 }
  0x79   :  { %s104_s29 = sshll.u32 %s19950_s28, 4  ;;  %p19884_p0 = scmp.ne.s32.totalorder %s20473_s8, %s19883_s1  ;;  %s105_s29 = int_to_ptr.vmem [resolvable:$true] %s104_s29 }
  0x7a   :  { %p19887_p1 = scmp.lt.u32.totalorder %s19883_s1, %s20473_s8 }
  0x7c   :  { %p19889_p2 = pnand %p19887_p1, %p19884_p0 }
  0x7e   :  { %19892 = shalt.err (!%p19889_p2)
}
  0x7f   :  { %s19893_s6 = scalar_lea.vmem %s105_s29, 464  ;;  %s19897_s7 = scalar_lea.vmem %s105_s29, 480 }
  0x80   :  { %p19894_p3 = scmp.ne.s32.totalorder %s105_s29, %s19893_s6  ;;  %p19898_p4 = scmp.lt.s32.totalorder %s105_s29, %s105_s29 }
  0x81   :  { %p19899_p5 = scmp.lt.s32.totalorder %s19897_s7, %s19893_s6 }
  0x83   :  { %p19900_p6 = por %p19899_p5, %p19898_p4 }
  0x85   :  { %p19901_p7 = pnand %p19900_p6, %p19894_p3 }
  0x87   :  { %19904 = shalt.err (!%p19901_p7)
}
  0x88   :  { %107 = dma.hbm_to_vmem [thread:$0]  %s20473_s8, 464, %s105_s29, [#allocation15]  }
  0x89   :  { %19927 = dma.done.wait [#allocation3], 1856  }
  0x8a   :  { %19928 = vsyncadd [#allocation3], 4294965440 }
  0x8b   :  { %19929 = dma.done.wait [#allocation6], 118848  }
  0x8c   :  { %19930 = vsyncadd [#allocation6], 4294848448 }
  0x8d   :  { %19931 = dma.done.wait [#allocation9], 1040  }
  0x8e   :  { %19932 = vsyncadd [#allocation9], 4294966256 }
  0x8f   :  { %19933 = dma.done.wait [#allocation12], 118848  }
  0x90   :  { %19934 = vsyncadd [#allocation12], 4294848448 }
  0x91   :  { %19935 = dma.done.wait [#allocation15], 464  }
  0x92   :  { %19936 = vsyncadd [#allocation15], 4294966832  ;;  %v16886_v0 = vld [vmem:[#allocation5 + $0x4] ss:$16 sps:$4 sm:$0xff]   ;;  %v16888_v1 = vld [vmem:[#allocation5 + $0xc] ss:$16 sps:$4 sm:$0xff]  }
  0x93   :  { %5840 = vmatprep.subr.bf16.mxu0 %v16886_v0  ;;  %v16890_v2 = vld [vmem:[#allocation5] ss:$16 sps:$4 sm:$0xff]   ;;  %v16891_v3 = vld [vmem:[#allocation5 + $0x8] ss:$16 sps:$4 sm:$0xff]   ;;  %6455 = vmatprep.subr.bf16.mxu1 %v16888_v1  ;;  %v16892_v4 = vld [vmem:[#allocation5 + $0x24] ss:$16 sps:$4 sm:$0xff]  }
  0x94   :  { %5841 = vmatpush1.bf16.msra.mxu0 %v16890_v2  ;;  %6456 = vmatpush1.bf16.msra.mxu1 %v16891_v3  ;;  %v16894_v5 = vld [vmem:[#allocation5 + $0x2c] ss:$16 sps:$4 sm:$0xff]   ;;  %v16896_v6 = vld [vmem:[#allocation5 + $0x20] ss:$16 sps:$4 sm:$0xff]   ;;  %v16897_v7 = vld [vmem:[#allocation5 + $0x28] ss:$16 sps:$4 sm:$0xff]  }
  0x95   :  { %5842 = vmatprep.subr.bf16.mxu0 %v16892_v4  ;;  %6457 = vmatprep.subr.bf16.mxu1 %v16894_v5  ;;  %v16898_v8 = vld [vmem:[#allocation5 + $0x44] ss:$16 sps:$4 sm:$0xff]   ;;  %v16900_v9 = vld [vmem:[#allocation5 + $0x4c] ss:$16 sps:$4 sm:$0xff]   ;;  %v16902_v10 = vld [vmem:[#allocation5 + $0x40] ss:$16 sps:$4 sm:$0xff]  }
  0x96   :  { %v16903_v11 = vld [vmem:[#allocation5 + $0x48] ss:$16 sps:$4 sm:$0xff]   ;;  %v16904_v12 = vld [vmem:[#allocation5 + $0x64] ss:$16 sps:$4 sm:$0xff]   ;;  %v16906_v13 = vld [vmem:[#allocation5 + $0x6c] ss:$16 sps:$4 sm:$0xff]  }
  0x97   :  { %v16908_v14 = vld [vmem:[#allocation5 + $0x60] ss:$16 sps:$4 sm:$0xff]   ;;  %v16909_v15 = vld [vmem:[#allocation5 + $0x68] ss:$16 sps:$4 sm:$0xff]   ;;  %v16910_v16 = vld [vmem:[#allocation5 + $0x84] ss:$16 sps:$4 sm:$0xff]  }
  0x98   :  { %5843 = vmatpush1.bf16.msra.mxu0 %v16896_v6  ;;  %6458 = vmatpush1.bf16.msra.mxu1 %v16897_v7  ;;  %v16912_v17 = vld [vmem:[#allocation5 + $0x8c] ss:$16 sps:$4 sm:$0xff]   ;;  %v16914_v18 = vld [vmem:[#allocation5 + $0x80] ss:$16 sps:$4 sm:$0xff]   ;;  %v16915_v19 = vld [vmem:[#allocation5 + $0x88] ss:$16 sps:$4 sm:$0xff]  }
  0x99   :  { %5844 = vmatprep.subr.bf16.mxu0 %v16898_v8  ;;  %6459 = vmatprep.subr.bf16.mxu1 %v16900_v9  ;;  %v16916_v20 = vld [vmem:[#allocation5 + $0xa4] ss:$16 sps:$4 sm:$0xff]   ;;  %v16918_v21 = vld [vmem:[#allocation5 + $0xac] ss:$16 sps:$4 sm:$0xff]   ;;  %v16920_v22 = vld [vmem:[#allocation5 + $0xa0] ss:$16 sps:$4 sm:$0xff]  }
  0x9a   :  { %v16921_v23 = vld [vmem:[#allocation5 + $0xa8] ss:$16 sps:$4 sm:$0xff]   ;;  %v16922_v24 = vld [vmem:[#allocation5 + $0xc4] ss:$16 sps:$4 sm:$0xff]   ;;  %v16924_v25 = vld [vmem:[#allocation5 + $0xcc] ss:$16 sps:$4 sm:$0xff]  }
  0x9b   :  { %v16926_v26 = vld [vmem:[#allocation5 + $0xc0] ss:$16 sps:$4 sm:$0xff]   ;;  %v16927_v27 = vld [vmem:[#allocation5 + $0xc8] ss:$16 sps:$4 sm:$0xff]   ;;  %v16928_v28 = vld [vmem:[#allocation5 + $0xe4] ss:$16 sps:$4 sm:$0xff]  }
  0x9c   :  { %5845 = vmatpush1.bf16.msra.mxu0 %v16902_v10  ;;  %6460 = vmatpush1.bf16.msra.mxu1 %v16903_v11  ;;  %v16930_v29 = vld [vmem:[#allocation5 + $0xec] ss:$16 sps:$4 sm:$0xff]   ;;  %v16932_v30 = vld [vmem:[#allocation5 + $0xe0] ss:$16 sps:$4 sm:$0xff]   ;;  %v16933_v31 = vld [vmem:[#allocation5 + $0xe8] ss:$16 sps:$4 sm:$0xff]  }
  0x9d   :  { %5846 = vmatprep.subr.bf16.mxu0 %v16904_v12  ;;  %6461 = vmatprep.subr.bf16.mxu1 %v16906_v13  ;;  %v16934_v32 = vld [vmem:[#allocation5 + $0x104] ss:$16 sps:$4 sm:$0xff]   ;;  %v16936_v33 = vld [vmem:[#allocation5 + $0x10c] ss:$16 sps:$4 sm:$0xff]   ;;  %v16938_v34 = vld [vmem:[#allocation5 + $0x100] ss:$16 sps:$4 sm:$0xff]  }
  0x9e   :  { %v16939_v35 = vld [vmem:[#allocation5 + $0x108] ss:$16 sps:$4 sm:$0xff]   ;;  %v16940_v36 = vld [vmem:[#allocation5 + $0x124] ss:$16 sps:$4 sm:$0xff]   ;;  %v16942_v37 = vld [vmem:[#allocation5 + $0x12c] ss:$16 sps:$4 sm:$0xff]  }
  0x9f   :  { %v16944_v38 = vld [vmem:[#allocation5 + $0x120] ss:$16 sps:$4 sm:$0xff]   ;;  %v16945_v39 = vld [vmem:[#allocation5 + $0x128] ss:$16 sps:$4 sm:$0xff]   ;;  %v16946_v40 = vld [vmem:[#allocation5 + $0x144] ss:$16 sps:$4 sm:$0xff]  }
  0xa0   :  { %5847 = vmatpush1.bf16.msra.mxu0 %v16908_v14  ;;  %6462 = vmatpush1.bf16.msra.mxu1 %v16909_v15  ;;  %v16948_v41 = vld [vmem:[#allocation5 + $0x14c] ss:$16 sps:$4 sm:$0xff]   ;;  %v16950_v42 = vld [vmem:[#allocation5 + $0x140] ss:$16 sps:$4 sm:$0xff]   ;;  %v16951_v43 = vld [vmem:[#allocation5 + $0x148] ss:$16 sps:$4 sm:$0xff]  }
  0xa1   :  { %5848 = vmatprep.subr.bf16.mxu0 %v16910_v16  ;;  %6463 = vmatprep.subr.bf16.mxu1 %v16912_v17  ;;  %v16952_v44 = vld [vmem:[#allocation5 + $0x164] ss:$16 sps:$4 sm:$0xff]   ;;  %v16954_v45 = vld [vmem:[#allocation5 + $0x16c] ss:$16 sps:$4 sm:$0xff]   ;;  %v16956_v47 = vld [vmem:[#allocation5 + $0x160] ss:$16 sps:$4 sm:$0xff]  }
  0xa2   :  { %v133_v46 = vld [vmem:[#allocation2] sm:$0xff]  ;;  %v16957_v49 = vld [vmem:[#allocation5 + $0x168] ss:$16 sps:$4 sm:$0xff]   ;;  %v16958_v50 = vld [vmem:[#allocation5 + $0x184] ss:$16 sps:$4 sm:$0xff]   ;;  %vm7501_vm4 = vcmask 261120  }
  0xa3   :  { %v14657_v48 = vcombine.high %v133_v46, %v133_v46  ;;  %v16960_v51 = vld [vmem:[#allocation5 + $0x18c] ss:$16 sps:$4 sm:$0xff]   ;;  %v16962_v52 = vld [vmem:[#allocation5 + $0x180] ss:$16 sps:$4 sm:$0xff]   ;;  %v16963_v53 = vld [vmem:[#allocation5 + $0x188] ss:$16 sps:$4 sm:$0xff]   ;;  %v14656_v4 = vcombine.low %v133_v46, %v133_v46 }
  0xa4   :  { %5849 = vmatpush1.bf16.msra.mxu0 %v16914_v18  ;;  %6464 = vmatpush1.bf16.msra.mxu1 %v16915_v19  ;;  %v16964_v54 = vld [vmem:[#allocation5 + $0x1a4] ss:$16 sps:$4 sm:$0xff]   ;;  %v16966_v55 = vld [vmem:[#allocation5 + $0x1ac] ss:$16 sps:$4 sm:$0xff]   ;;  %v16968_v56 = vld [vmem:[#allocation5 + $0x1a0] ss:$16 sps:$4 sm:$0xff]  }
  0xa5   :  { %5850 = vmatprep.subr.bf16.mxu0 %v16916_v20  ;;  %6465 = vmatprep.subr.bf16.mxu1 %v16918_v21  ;;  %v16969_v57 = vld [vmem:[#allocation5 + $0x1a8] ss:$16 sps:$4 sm:$0xff]   ;;  %v16970_v58 = vld [vmem:[#allocation5 + $0x1c4] ss:$16 sps:$4 sm:$0xff]   ;;  %v16972_v59 = vld [vmem:[#allocation5 + $0x1cc] ss:$16 sps:$4 sm:$0xff]  }
  0xa6   :  { %5872 = vmatprep.mubr.bf16.mxu0 %v14657_v48  ;;  %6487 = vmatprep.mubr.bf16.mxu1 %v14657_v48  ;;  %v16974_v60 = vld [vmem:[#allocation5 + $0x1c0] ss:$16 sps:$4 sm:$0xff]   ;;  %v16975_v61 = vld [vmem:[#allocation5 + $0x1c8] ss:$16 sps:$4 sm:$0xff]   ;;  %v16976_v62 = vld [vmem:[#allocation5 + $0x1e4] ss:$16 sps:$4 sm:$0xff]  }
  0xa7   :  { %v16978_v63 = vld [vmem:[#allocation5 + $0x1ec] ss:$16 sps:$4 sm:$0xff]   ;;  %v16980_v0 = vld [vmem:[#allocation5 + $0x1e0] ss:$16 sps:$4 sm:$0xff]   ;;  %v16981_v1 = vld [vmem:[#allocation5 + $0x1e8] ss:$16 sps:$4 sm:$0xff]  }
  0xa8   :  { %5851 = vmatpush1.bf16.msra.mxu0 %v16920_v22  ;;  %6466 = vmatpush1.bf16.msra.mxu1 %v16921_v23  ;;  %v16986_v2 = vld [vmem:[#allocation5 + $0x204] ss:$16 sps:$4 sm:$0xff]   ;;  %v16989_v3 = vld [vmem:[#allocation5 + $0x20c] ss:$16 sps:$4 sm:$0xff]   ;;  %v16984_v5 = vld [vmem:[#allocation5 + $0x200] ss:$16 sps:$4 sm:$0xff]  }
  0xa9   :  { %5852 = vmatprep.subr.bf16.mxu0 %v16922_v24  ;;  %6467 = vmatprep.subr.bf16.mxu1 %v16924_v25  ;;  %v16987_v6 = vld [vmem:[#allocation5 + $0x208] ss:$16 sps:$4 sm:$0xff]   ;;  %v16992_v7 = vld [vmem:[#allocation5 + $0x224] ss:$16 sps:$4 sm:$0xff]   ;;  %v16995_v8 = vld [vmem:[#allocation5 + $0x22c] ss:$16 sps:$4 sm:$0xff]  }
  0xaa   :  { %v16990_v9 = vld [vmem:[#allocation5 + $0x220] ss:$16 sps:$4 sm:$0xff]   ;;  %v16993_v10 = vld [vmem:[#allocation5 + $0x228] ss:$16 sps:$4 sm:$0xff]   ;;  %v16998_v11 = vld [vmem:[#allocation5 + $0x244] ss:$16 sps:$4 sm:$0xff]  }
  0xab   :  { %v17001_v12 = vld [vmem:[#allocation5 + $0x24c] ss:$16 sps:$4 sm:$0xff]   ;;  %v16996_v13 = vld [vmem:[#allocation5 + $0x240] ss:$16 sps:$4 sm:$0xff]   ;;  %v16999_v14 = vld [vmem:[#allocation5 + $0x248] ss:$16 sps:$4 sm:$0xff]  }
  0xac   :  { %5853 = vmatpush1.bf16.msra.mxu0 %v16926_v26  ;;  %6468 = vmatpush1.bf16.msra.mxu1 %v16927_v27  ;;  %v17004_v15 = vld [vmem:[#allocation5 + $0x264] ss:$16 sps:$4 sm:$0xff]   ;;  %v17007_v16 = vld [vmem:[#allocation5 + $0x26c] ss:$16 sps:$4 sm:$0xff]   ;;  %v17002_v17 = vld [vmem:[#allocation5 + $0x260] ss:$16 sps:$4 sm:$0xff]  }
  0xad   :  { %5854 = vmatprep.subr.bf16.mxu0 %v16928_v28  ;;  %6469 = vmatprep.subr.bf16.mxu1 %v16930_v29  ;;  %v17005_v18 = vld [vmem:[#allocation5 + $0x268] ss:$16 sps:$4 sm:$0xff]   ;;  %v17010_v19 = vld [vmem:[#allocation5 + $0x284] ss:$16 sps:$4 sm:$0xff]   ;;  %v17013_v20 = vld [vmem:[#allocation5 + $0x28c] ss:$16 sps:$4 sm:$0xff]  }
  0xae   :  { %v17008_v21 = vld [vmem:[#allocation5 + $0x280] ss:$16 sps:$4 sm:$0xff]   ;;  %v17011_v22 = vld [vmem:[#allocation5 + $0x288] ss:$16 sps:$4 sm:$0xff]   ;;  %v17016_v23 = vld [vmem:[#allocation5 + $0x2a4] ss:$16 sps:$4 sm:$0xff]  }
  0xaf   :  { %v17019_v24 = vld [vmem:[#allocation5 + $0x2ac] ss:$16 sps:$4 sm:$0xff]   ;;  %v17014_v25 = vld [vmem:[#allocation5 + $0x2a0] ss:$16 sps:$4 sm:$0xff]   ;;  %v17017_v26 = vld [vmem:[#allocation5 + $0x2a8] ss:$16 sps:$4 sm:$0xff]  }
  0xb0   :  { %5855 = vmatpush1.bf16.msra.mxu0 %v16932_v30  ;;  %6470 = vmatpush1.bf16.msra.mxu1 %v16933_v31  ;;  %v17022_v27 = vld [vmem:[#allocation5 + $0x2c4] ss:$16 sps:$4 sm:$0xff]   ;;  %v17025_v28 = vld [vmem:[#allocation5 + $0x2cc] ss:$16 sps:$4 sm:$0xff]   ;;  %v17020_v31 = vld [vmem:[#allocation5 + $0x2c0] ss:$16 sps:$4 sm:$0xff]  }
  0xb1   :  { %5856 = vmatprep.subr.bf16.mxu0 %v16934_v32  ;;  %6471 = vmatprep.subr.bf16.mxu1 %v16936_v33  ;;  %v20105_v29 = vld [vmem:[#allocation2 + $0x8] sm:$0xff]  ;;  %v17049_v46 = vld [vmem:[#allocation5 + $0x34c] ss:$16 sps:$4 sm:$0xff]  }
  0xb2   :  { %v14659_v30 = vcombine.high %v20105_v29, %v20105_v29  ;;  %v17023_v32 = vld [vmem:[#allocation5 + $0x2c8] ss:$16 sps:$4 sm:$0xff]   ;;  %v17028_v33 = vld [vmem:[#allocation5 + $0x2e4] ss:$16 sps:$4 sm:$0xff]  }
  0xb3   :  { %v17047_v48 = vld [vmem:[#allocation5 + $0x348] ss:$16 sps:$4 sm:$0xff]  }
  0xb4   :  { %5857 = vmatpush1.bf16.msra.mxu0 %v16938_v34  ;;  %6472 = vmatpush1.bf16.msra.mxu1 %v16939_v35  ;;  %v17031_v34 = vld [vmem:[#allocation5 + $0x2ec] ss:$16 sps:$4 sm:$0xff]   ;;  %v17026_v35 = vld [vmem:[#allocation5 + $0x2e0] ss:$16 sps:$4 sm:$0xff]  }
  0xb5   :  { %5858 = vmatprep.subr.bf16.mxu0 %v16940_v36  ;;  %6473 = vmatprep.subr.bf16.mxu1 %v16942_v37  ;;  %v17029_v36 = vld [vmem:[#allocation5 + $0x2e8] ss:$16 sps:$4 sm:$0xff]   ;;  %v17034_v37 = vld [vmem:[#allocation5 + $0x304] ss:$16 sps:$4 sm:$0xff]  }
  0xb8   :  { %5859 = vmatpush1.bf16.msra.mxu0 %v16944_v38  ;;  %6474 = vmatpush1.bf16.msra.mxu1 %v16945_v39  ;;  %v17037_v38 = vld [vmem:[#allocation5 + $0x30c] ss:$16 sps:$4 sm:$0xff]   ;;  %v17032_v39 = vld [vmem:[#allocation5 + $0x300] ss:$16 sps:$4 sm:$0xff]  }
  0xb9   :  { %5860 = vmatprep.subr.bf16.mxu0 %v16946_v40  ;;  %6475 = vmatprep.subr.bf16.mxu1 %v16948_v41  ;;  %v17035_v40 = vld [vmem:[#allocation5 + $0x308] ss:$16 sps:$4 sm:$0xff]   ;;  %v17040_v41 = vld [vmem:[#allocation5 + $0x324] ss:$16 sps:$4 sm:$0xff]  }
  0xbc   :  { %5861 = vmatpush1.bf16.msra.mxu0 %v16950_v42  ;;  %6476 = vmatpush1.bf16.msra.mxu1 %v16951_v43  ;;  %v17043_v42 = vld [vmem:[#allocation5 + $0x32c] ss:$16 sps:$4 sm:$0xff]   ;;  %v17038_v43 = vld [vmem:[#allocation5 + $0x320] ss:$16 sps:$4 sm:$0xff]  }
  0xbd   :  { %5862 = vmatprep.subr.bf16.mxu0 %v16952_v44  ;;  %6477 = vmatprep.subr.bf16.mxu1 %v16954_v45  ;;  %v17041_v44 = vld [vmem:[#allocation5 + $0x328] ss:$16 sps:$4 sm:$0xff]   ;;  %v17046_v45 = vld [vmem:[#allocation5 + $0x344] ss:$16 sps:$4 sm:$0xff]  }
  0xc0   :  { %5863 = vmatpush1.bf16.msra.mxu0 %v16956_v47  ;;  %6478 = vmatpush1.bf16.msra.mxu1 %v16957_v49  ;;  %v17044_v47 = vld [vmem:[#allocation5 + $0x340] ss:$16 sps:$4 sm:$0xff]   ;;  %v17052_v49 = vld [vmem:[#allocation5 + $0x364] ss:$16 sps:$4 sm:$0xff]  }
  0xc1   :  { %5864 = vmatprep.subr.bf16.mxu0 %v16958_v50  ;;  %6479 = vmatprep.subr.bf16.mxu1 %v16960_v51  ;;  %v17055_v50 = vld [vmem:[#allocation5 + $0x36c] ss:$16 sps:$4 sm:$0xff]   ;;  %v17050_v51 = vld [vmem:[#allocation5 + $0x360] ss:$16 sps:$4 sm:$0xff]  }
  0xc4   :  { %5865 = vmatpush1.bf16.msra.mxu0 %v16962_v52  ;;  %6480 = vmatpush1.bf16.msra.mxu1 %v16963_v53  ;;  %v17053_v52 = vld [vmem:[#allocation5 + $0x368] ss:$16 sps:$4 sm:$0xff]   ;;  %v17058_v53 = vld [vmem:[#allocation5 + $0x384] ss:$16 sps:$4 sm:$0xff]  }
  0xc5   :  { %5866 = vmatprep.subr.bf16.mxu0 %v16964_v54  ;;  %6481 = vmatprep.subr.bf16.mxu1 %v16966_v55  ;;  %v17061_v54 = vld [vmem:[#allocation5 + $0x38c] ss:$16 sps:$4 sm:$0xff]   ;;  %v17056_v55 = vld [vmem:[#allocation5 + $0x380] ss:$16 sps:$4 sm:$0xff]  }
  0xc8   :  { %5867 = vmatpush1.bf16.msra.mxu0 %v16968_v56  ;;  %6482 = vmatpush1.bf16.msra.mxu1 %v16969_v57  ;;  %v17059_v56 = vld [vmem:[#allocation5 + $0x388] ss:$16 sps:$4 sm:$0xff]   ;;  %v17064_v57 = vld [vmem:[#allocation5 + $0x3a4] ss:$16 sps:$4 sm:$0xff]  }
  0xc9   :  { %5868 = vmatprep.subr.bf16.mxu0 %v16970_v58  ;;  %6483 = vmatprep.subr.bf16.mxu1 %v16972_v59  ;;  %v17067_v58 = vld [vmem:[#allocation5 + $0x3ac] ss:$16 sps:$4 sm:$0xff]   ;;  %v17062_v59 = vld [vmem:[#allocation5 + $0x3a0] ss:$16 sps:$4 sm:$0xff]  }
  0xcc   :  { %5869 = vmatpush1.bf16.msra.mxu0 %v16974_v60  ;;  %6484 = vmatpush1.bf16.msra.mxu1 %v16975_v61  ;;  %v17065_v60 = vld [vmem:[#allocation5 + $0x3a8] ss:$16 sps:$4 sm:$0xff]   ;;  %v17070_v61 = vld [vmem:[#allocation5 + $0x3c4] ss:$16 sps:$4 sm:$0xff]  }
  0xcd   :  { %5870 = vmatprep.subr.bf16.mxu0 %v16976_v62  ;;  %6485 = vmatprep.subr.bf16.mxu1 %v16978_v63  ;;  %v17073_v62 = vld [vmem:[#allocation5 + $0x3cc] ss:$16 sps:$4 sm:$0xff]   ;;  %v17068_v63 = vld [vmem:[#allocation5 + $0x3c0] ss:$16 sps:$4 sm:$0xff]  }
  0xd0   :  { %5871 = vmatpush1.bf16.msra.mxu0 %v16980_v0  ;;  %6486 = vmatpush1.bf16.msra.mxu1 %v16981_v1  ;;  %v17071_v0 = vld [vmem:[#allocation5 + $0x3c8] ss:$16 sps:$4 sm:$0xff]   ;;  %v17076_v1 = vld [vmem:[#allocation5 + $0x3e4] ss:$16 sps:$4 sm:$0xff]  }
  0xd1   :  { %5881 = vmatprep.subr.bf16.mxu0 %v16986_v2  ;;  %6496 = vmatprep.subr.bf16.mxu1 %v16989_v3  ;;  %v17079_v2 = vld [vmem:[#allocation5 + $0x3ec] ss:$16 sps:$4 sm:$0xff]   ;;  %v17074_v3 = vld [vmem:[#allocation5 + $0x3e0] ss:$16 sps:$4 sm:$0xff]  }
  0xd3   :  { %5873 = vmatmul.mubr.bf16.vlgmr.msra.gmra.mrb[0].mxu0 %v14656_v4  ;;  %6488 = vmatmul.mubr.bf16.vlgmr.msra.gmra.mrb[0].mxu1 %v14656_v4  ;;  %v17077_v4 = vld [vmem:[#allocation5 + $0x3e8] ss:$16 sps:$4 sm:$0xff]  }
  0xd4   :  { %5882 = vmatpush1.bf16.msra.mxu0 %v16984_v5  ;;  %6497 = vmatpush1.bf16.msra.mxu1 %v16987_v6  ;;  %v17084_v5 = vld [vmem:[#allocation5 + $0x404] ss:$16 sps:$4 sm:$0xff]   ;;  %v17087_v6 = vld [vmem:[#allocation5 + $0x40c] ss:$16 sps:$4 sm:$0xff]  }
  0xd5   :  { %5883 = vmatprep.subr.bf16.mxu0 %v16992_v7  ;;  %6498 = vmatprep.subr.bf16.mxu1 %v16995_v8  ;;  %v14658_v7 = vcombine.low %v20105_v29, %v20105_v29  ;;  %v17082_v8 = vld [vmem:[#allocation5 + $0x400] ss:$16 sps:$4 sm:$0xff]   ;;  %v17117_v29 = vld [vmem:[#allocation5 + $0x4ac] ss:$16 sps:$4 sm:$0xff]  }
  0xd6   :  { %5913 = vmatprep.mubr.bf16.mxu0 %v14659_v30  ;;  %6528 = vmatprep.mubr.bf16.mxu1 %v14659_v30  ;;  %v17112_v30 = vld [vmem:[#allocation5 + $0x4a0] ss:$16 sps:$4 sm:$0xff]  }
  0xd8   :  { %5884 = vmatpush1.bf16.msra.mxu0 %v16990_v9  ;;  %6499 = vmatpush1.bf16.msra.mxu1 %v16993_v10  ;;  %v17085_v9 = vld [vmem:[#allocation5 + $0x408] ss:$16 sps:$4 sm:$0xff]   ;;  %v17090_v10 = vld [vmem:[#allocation5 + $0x424] ss:$16 sps:$4 sm:$0xff]  }
  0xd9   :  { %5885 = vmatprep.subr.bf16.mxu0 %v16998_v11  ;;  %6500 = vmatprep.subr.bf16.mxu1 %v17001_v12  ;;  %v20111_v11 = vld [vmem:[#allocation2 + $0x10] sm:$0xff] }
  0xda   :  { %v17093_v12 = vld [vmem:[#allocation5 + $0x42c] ss:$16 sps:$4 sm:$0xff]  }
  0xdc   :  { %5886 = vmatpush1.bf16.msra.mxu0 %v16996_v13  ;;  %6501 = vmatpush1.bf16.msra.mxu1 %v16999_v14  ;;  %v14661_v13 = vcombine.high %v20111_v11, %v20111_v11  ;;  %v17088_v14 = vld [vmem:[#allocation5 + $0x420] ss:$16 sps:$4 sm:$0xff]  }
  0xdd   :  { %5887 = vmatprep.subr.bf16.mxu0 %v17004_v15  ;;  %6502 = vmatprep.subr.bf16.mxu1 %v17007_v16  ;;  %v17091_v15 = vld [vmem:[#allocation5 + $0x428] ss:$16 sps:$4 sm:$0xff]   ;;  %v17096_v16 = vld [vmem:[#allocation5 + $0x444] ss:$16 sps:$4 sm:$0xff]  }
  0xe0   :  { %5888 = vmatpush1.bf16.msra.mxu0 %v17002_v17  ;;  %6503 = vmatpush1.bf16.msra.mxu1 %v17005_v18  ;;  %v17099_v17 = vld [vmem:[#allocation5 + $0x44c] ss:$16 sps:$4 sm:$0xff]   ;;  %v17094_v18 = vld [vmem:[#allocation5 + $0x440] ss:$16 sps:$4 sm:$0xff]  }
  0xe1   :  { %5889 = vmatprep.subr.bf16.mxu0 %v17010_v19  ;;  %6504 = vmatprep.subr.bf16.mxu1 %v17013_v20  ;;  %v17097_v19 = vld [vmem:[#allocation5 + $0x448] ss:$16 sps:$4 sm:$0xff]   ;;  %v17102_v20 = vld [vmem:[#allocation5 + $0x464] ss:$16 sps:$4 sm:$0xff]  }
  0xe4   :  { %5890 = vmatpush1.bf16.msra.mxu0 %v17008_v21  ;;  %6505 = vmatpush1.bf16.msra.mxu1 %v17011_v22  ;;  %v17105_v21 = vld [vmem:[#allocation5 + $0x46c] ss:$16 sps:$4 sm:$0xff]   ;;  %v17100_v22 = vld [vmem:[#allocation5 + $0x460] ss:$16 sps:$4 sm:$0xff]  }
  0xe5   :  { %5891 = vmatprep.subr.bf16.mxu0 %v17016_v23  ;;  %6506 = vmatprep.subr.bf16.mxu1 %v17019_v24  ;;  %v17103_v23 = vld [vmem:[#allocation5 + $0x468] ss:$16 sps:$4 sm:$0xff]   ;;  %v17108_v24 = vld [vmem:[#allocation5 + $0x484] ss:$16 sps:$4 sm:$0xff]  }
  0xe8   :  { %5892 = vmatpush1.bf16.msra.mxu0 %v17014_v25  ;;  %6507 = vmatpush1.bf16.msra.mxu1 %v17017_v26  ;;  %v17111_v25 = vld [vmem:[#allocation5 + $0x48c] ss:$16 sps:$4 sm:$0xff]   ;;  %v17106_v26 = vld [vmem:[#allocation5 + $0x480] ss:$16 sps:$4 sm:$0xff]  }
  0xe9   :  { %5893 = vmatprep.subr.bf16.mxu0 %v17022_v27  ;;  %6508 = vmatprep.subr.bf16.mxu1 %v17025_v28  ;;  %v17109_v27 = vld [vmem:[#allocation5 + $0x488] ss:$16 sps:$4 sm:$0xff]   ;;  %v17114_v28 = vld [vmem:[#allocation5 + $0x4a4] ss:$16 sps:$4 sm:$0xff]  }
  0xec   :  { %5894 = vmatpush1.bf16.msra.mxu0 %v17020_v31  ;;  %6509 = vmatpush1.bf16.msra.mxu1 %v17023_v32  ;;  %v17115_v31 = vld [vmem:[#allocation5 + $0x4a8] ss:$16 sps:$4 sm:$0xff]   ;;  %v17120_v32 = vld [vmem:[#allocation5 + $0x4c4] ss:$16 sps:$4 sm:$0xff]  }
  0xed   :  { %5895 = vmatprep.subr.bf16.mxu0 %v17028_v33  ;;  %6510 = vmatprep.subr.bf16.mxu1 %v17031_v34  ;;  %v17123_v33 = vld [vmem:[#allocation5 + $0x4cc] ss:$16 sps:$4 sm:$0xff]   ;;  %v17118_v34 = vld [vmem:[#allocation5 + $0x4c0] ss:$16 sps:$4 sm:$0xff]  }
  0xf0   :  { %5896 = vmatpush1.bf16.msra.mxu0 %v17026_v35  ;;  %6511 = vmatpush1.bf16.msra.mxu1 %v17029_v36  ;;  %v17121_v35 = vld [vmem:[#allocation5 + $0x4c8] ss:$16 sps:$4 sm:$0xff]   ;;  %v17126_v36 = vld [vmem:[#allocation5 + $0x4e4] ss:$16 sps:$4 sm:$0xff]  }
  0xf1   :  { %5897 = vmatprep.subr.bf16.mxu0 %v17034_v37  ;;  %6512 = vmatprep.subr.bf16.mxu1 %v17037_v38  ;;  %v17129_v37 = vld [vmem:[#allocation5 + $0x4ec] ss:$16 sps:$4 sm:$0xff]   ;;  %v17124_v38 = vld [vmem:[#allocation5 + $0x4e0] ss:$16 sps:$4 sm:$0xff]  }
  0xf4   :  { %5898 = vmatpush1.bf16.msra.mxu0 %v17032_v39  ;;  %6513 = vmatpush1.bf16.msra.mxu1 %v17035_v40  ;;  %v17127_v39 = vld [vmem:[#allocation5 + $0x4e8] ss:$16 sps:$4 sm:$0xff]   ;;  %v17132_v40 = vld [vmem:[#allocation5 + $0x504] ss:$16 sps:$4 sm:$0xff]  }
  0xf5   :  { %5899 = vmatprep.subr.bf16.mxu0 %v17040_v41  ;;  %6514 = vmatprep.subr.bf16.mxu1 %v17043_v42  ;;  %v17135_v41 = vld [vmem:[#allocation5 + $0x50c] ss:$16 sps:$4 sm:$0xff]   ;;  %v17130_v42 = vld [vmem:[#allocation5 + $0x500] ss:$16 sps:$4 sm:$0xff]  }
  0xf8   :  { %5900 = vmatpush1.bf16.msra.mxu0 %v17038_v43  ;;  %6515 = vmatpush1.bf16.msra.mxu1 %v17041_v44  ;;  %v17133_v43 = vld [vmem:[#allocation5 + $0x508] ss:$16 sps:$4 sm:$0xff]   ;;  %v17138_v44 = vld [vmem:[#allocation5 + $0x524] ss:$16 sps:$4 sm:$0xff]  }
  0xf9   :  { %5901 = vmatprep.subr.bf16.mxu0 %v17046_v45  ;;  %6516 = vmatprep.subr.bf16.mxu1 %v17049_v46  ;;  %v17141_v45 = vld [vmem:[#allocation5 + $0x52c] ss:$16 sps:$4 sm:$0xff]   ;;  %v17136_v46 = vld [vmem:[#allocation5 + $0x520] ss:$16 sps:$4 sm:$0xff]  }
  0xfc   :  { %5902 = vmatpush1.bf16.msra.mxu0 %v17044_v47  ;;  %6517 = vmatpush1.bf16.msra.mxu1 %v17047_v48  ;;  %v17139_v47 = vld [vmem:[#allocation5 + $0x528] ss:$16 sps:$4 sm:$0xff]   ;;  %v17144_v48 = vld [vmem:[#allocation5 + $0x544] ss:$16 sps:$4 sm:$0xff]  }
  0xfd   :  { %5903 = vmatprep.subr.bf16.mxu0 %v17052_v49  ;;  %6518 = vmatprep.subr.bf16.mxu1 %v17055_v50  ;;  %v17147_v49 = vld [vmem:[#allocation5 + $0x54c] ss:$16 sps:$4 sm:$0xff]   ;;  %v17142_v50 = vld [vmem:[#allocation5 + $0x540] ss:$16 sps:$4 sm:$0xff]  }
 0x100   :  { %5904 = vmatpush1.bf16.msra.mxu0 %v17050_v51  ;;  %6519 = vmatpush1.bf16.msra.mxu1 %v17053_v52  ;;  %v17145_v51 = vld [vmem:[#allocation5 + $0x548] ss:$16 sps:$4 sm:$0xff]   ;;  %v17150_v52 = vld [vmem:[#allocation5 + $0x564] ss:$16 sps:$4 sm:$0xff]  }
 0x101   :  { %5905 = vmatprep.subr.bf16.mxu0 %v17058_v53  ;;  %6520 = vmatprep.subr.bf16.mxu1 %v17061_v54  ;;  %v17153_v53 = vld [vmem:[#allocation5 + $0x56c] ss:$16 sps:$4 sm:$0xff]   ;;  %v17148_v54 = vld [vmem:[#allocation5 + $0x560] ss:$16 sps:$4 sm:$0xff]  }
 0x104   :  { %5906 = vmatpush1.bf16.msra.mxu0 %v17056_v55  ;;  %6521 = vmatpush1.bf16.msra.mxu1 %v17059_v56  ;;  %v17151_v55 = vld [vmem:[#allocation5 + $0x568] ss:$16 sps:$4 sm:$0xff]   ;;  %v17156_v56 = vld [vmem:[#allocation5 + $0x584] ss:$16 sps:$4 sm:$0xff]  }
 0x105   :  { %5907 = vmatprep.subr.bf16.mxu0 %v17064_v57  ;;  %6522 = vmatprep.subr.bf16.mxu1 %v17067_v58  ;;  %v17159_v57 = vld [vmem:[#allocation5 + $0x58c] ss:$16 sps:$4 sm:$0xff]   ;;  %v17154_v58 = vld [vmem:[#allocation5 + $0x580] ss:$16 sps:$4 sm:$0xff]  }
 0x108   :  { %5908 = vmatpush1.bf16.msra.mxu0 %v17062_v59  ;;  %6523 = vmatpush1.bf16.msra.mxu1 %v17065_v60  ;;  %v17157_v59 = vld [vmem:[#allocation5 + $0x588] ss:$16 sps:$4 sm:$0xff]   ;;  %v17162_v60 = vld [vmem:[#allocation5 + $0x5a4] ss:$16 sps:$4 sm:$0xff]  }
 0x109   :  { %5909 = vmatprep.subr.bf16.mxu0 %v17070_v61  ;;  %6524 = vmatprep.subr.bf16.mxu1 %v17073_v62  ;;  %v17165_v61 = vld [vmem:[#allocation5 + $0x5ac] ss:$16 sps:$4 sm:$0xff]   ;;  %v17160_v62 = vld [vmem:[#allocation5 + $0x5a0] ss:$16 sps:$4 sm:$0xff]  }
 0x10c   :  { %5910 = vmatpush1.bf16.msra.mxu0 %v17068_v63  ;;  %6525 = vmatpush1.bf16.msra.mxu1 %v17071_v0  ;;  %v17163_v63 = vld [vmem:[#allocation5 + $0x5a8] ss:$16 sps:$4 sm:$0xff]   ;;  %v17168_v0 = vld [vmem:[#allocation5 + $0x5c4] ss:$16 sps:$4 sm:$0xff]  }
 0x10d   :  { %5911 = vmatprep.subr.bf16.mxu0 %v17076_v1  ;;  %6526 = vmatprep.subr.bf16.mxu1 %v17079_v2  ;;  %v17171_v1 = vld [vmem:[#allocation5 + $0x5cc] ss:$16 sps:$4 sm:$0xff]   ;;  %v17166_v2 = vld [vmem:[#allocation5 + $0x5c0] ss:$16 sps:$4 sm:$0xff]  }
 0x110   :  { %5912 = vmatpush1.bf16.msra.mxu0 %v17074_v3  ;;  %6527 = vmatpush1.bf16.msra.mxu1 %v17077_v4  ;;  %v17169_v3 = vld [vmem:[#allocation5 + $0x5c8] ss:$16 sps:$4 sm:$0xff]   ;;  %v17174_v4 = vld [vmem:[#allocation5 + $0x5e4] ss:$16 sps:$4 sm:$0xff]  }
 0x111   :  { %5922 = vmatprep.subr.bf16.mxu0 %v17084_v5  ;;  %6537 = vmatprep.subr.bf16.mxu1 %v17087_v6  ;;  %v17177_v5 = vld [vmem:[#allocation5 + $0x5ec] ss:$16 sps:$4 sm:$0xff]   ;;  %v17172_v6 = vld [vmem:[#allocation5 + $0x5e0] ss:$16 sps:$4 sm:$0xff]  }
 0x113   :  { %5914 = vmatmul.mubr.bf16.vlgmr.msra.gmra.mrb[0].mxu0 %v14658_v7  ;;  %6529 = vmatmul.mubr.bf16.vlgmr.msra.gmra.mrb[0].mxu1 %v14658_v7  ;;  %v17175_v7 = vld [vmem:[#allocation5 + $0x5e8] ss:$16 sps:$4 sm:$0xff]  }
 0x114   :  { %5923 = vmatpush1.bf16.msra.mxu0 %v17082_v8  ;;  %6538 = vmatpush1.bf16.msra.mxu1 %v17085_v9  ;;  %v17182_v8 = vld [vmem:[#allocation5 + $0x604] ss:$16 sps:$4 sm:$0xff]   ;;  %v17185_v9 = vld [vmem:[#allocation5 + $0x60c] ss:$16 sps:$4 sm:$0xff]  }
 0x115   :  { %5924 = vmatprep.subr.bf16.mxu0 %v17090_v10  ;;  %6539 = vmatprep.subr.bf16.mxu1 %v17093_v12  ;;  %v17180_v10 = vld [vmem:[#allocation5 + $0x600] ss:$16 sps:$4 sm:$0xff]   ;;  %v14660_v12 = vcombine.low %v20111_v11, %v20111_v11  ;;  %v17197_v11 = vld [vmem:[#allocation5 + $0x64c] ss:$16 sps:$4 sm:$0xff]  }
 0x116   :  { %5954 = vmatprep.mubr.bf16.mxu0 %v14661_v13  ;;  %6569 = vmatprep.mubr.bf16.mxu1 %v14661_v13  ;;  %v17183_v13 = vld [vmem:[#allocation5 + $0x608] ss:$16 sps:$4 sm:$0xff]  }
 0x118   :  { %5925 = vmatpush1.bf16.msra.mxu0 %v17088_v14  ;;  %6540 = vmatpush1.bf16.msra.mxu1 %v17091_v15  ;;  %v20117_v14 = vld [vmem:[#allocation2 + $0x18] sm:$0xff] }
 0x119   :  { %5926 = vmatprep.subr.bf16.mxu0 %v17096_v16  ;;  %6541 = vmatprep.subr.bf16.mxu1 %v17099_v17  ;;  %v17188_v15 = vld [vmem:[#allocation5 + $0x624] ss:$16 sps:$4 sm:$0xff]   ;;  %v17191_v16 = vld [vmem:[#allocation5 + $0x62c] ss:$16 sps:$4 sm:$0xff]   ;;  %v14663_v17 = vcombine.high %v20117_v14, %v20117_v14 }
 0x11c   :  { %5927 = vmatpush1.bf16.msra.mxu0 %v17094_v18  ;;  %6542 = vmatpush1.bf16.msra.mxu1 %v17097_v19  ;;  %v17186_v18 = vld [vmem:[#allocation5 + $0x620] ss:$16 sps:$4 sm:$0xff]   ;;  %v17189_v19 = vld [vmem:[#allocation5 + $0x628] ss:$16 sps:$4 sm:$0xff]  }
 0x11d   :  { %5928 = vmatprep.subr.bf16.mxu0 %v17102_v20  ;;  %6543 = vmatprep.subr.bf16.mxu1 %v17105_v21  ;;  %v17194_v20 = vld [vmem:[#allocation5 + $0x644] ss:$16 sps:$4 sm:$0xff]   ;;  %v17192_v21 = vld [vmem:[#allocation5 + $0x640] ss:$16 sps:$4 sm:$0xff]  }
 0x120   :  { %5929 = vmatpush1.bf16.msra.mxu0 %v17100_v22  ;;  %6544 = vmatpush1.bf16.msra.mxu1 %v17103_v23  ;;  %v17195_v22 = vld [vmem:[#allocation5 + $0x648] ss:$16 sps:$4 sm:$0xff]   ;;  %v17200_v23 = vld [vmem:[#allocation5 + $0x664] ss:$16 sps:$4 sm:$0xff]  }
 0x121   :  { %5930 = vmatprep.subr.bf16.mxu0 %v17108_v24  ;;  %6545 = vmatprep.subr.bf16.mxu1 %v17111_v25  ;;  %v17203_v24 = vld [vmem:[#allocation5 + $0x66c] ss:$16 sps:$4 sm:$0xff]   ;;  %v17198_v25 = vld [vmem:[#allocation5 + $0x660] ss:$16 sps:$4 sm:$0xff]  }
 0x124   :  { %5931 = vmatpush1.bf16.msra.mxu0 %v17106_v26  ;;  %6546 = vmatpush1.bf16.msra.mxu1 %v17109_v27  ;;  %v17201_v26 = vld [vmem:[#allocation5 + $0x668] ss:$16 sps:$4 sm:$0xff]   ;;  %v17206_v27 = vld [vmem:[#allocation5 + $0x684] ss:$16 sps:$4 sm:$0xff]  }
 0x125   :  { %5932 = vmatprep.subr.bf16.mxu0 %v17114_v28  ;;  %6547 = vmatprep.subr.bf16.mxu1 %v17117_v29  ;;  %v17209_v28 = vld [vmem:[#allocation5 + $0x68c] ss:$16 sps:$4 sm:$0xff]   ;;  %v17204_v29 = vld [vmem:[#allocation5 + $0x680] ss:$16 sps:$4 sm:$0xff]  }
 0x128   :  { %5933 = vmatpush1.bf16.msra.mxu0 %v17112_v30  ;;  %6548 = vmatpush1.bf16.msra.mxu1 %v17115_v31  ;;  %v17207_v30 = vld [vmem:[#allocation5 + $0x688] ss:$16 sps:$4 sm:$0xff]   ;;  %v17212_v31 = vld [vmem:[#allocation5 + $0x6a4] ss:$16 sps:$4 sm:$0xff]  }
 0x129   :  { %5934 = vmatprep.subr.bf16.mxu0 %v17120_v32  ;;  %6549 = vmatprep.subr.bf16.mxu1 %v17123_v33  ;;  %v17215_v32 = vld [vmem:[#allocation5 + $0x6ac] ss:$16 sps:$4 sm:$0xff]   ;;  %v17210_v33 = vld [vmem:[#allocation5 + $0x6a0] ss:$16 sps:$4 sm:$0xff]  }
 0x12c   :  { %5935 = vmatpush1.bf16.msra.mxu0 %v17118_v34  ;;  %6550 = vmatpush1.bf16.msra.mxu1 %v17121_v35  ;;  %v17213_v34 = vld [vmem:[#allocation5 + $0x6a8] ss:$16 sps:$4 sm:$0xff]   ;;  %v17218_v35 = vld [vmem:[#allocation5 + $0x6c4] ss:$16 sps:$4 sm:$0xff]  }
 0x12d   :  { %5936 = vmatprep.subr.bf16.mxu0 %v17126_v36  ;;  %6551 = vmatprep.subr.bf16.mxu1 %v17129_v37  ;;  %v17221_v36 = vld [vmem:[#allocation5 + $0x6cc] ss:$16 sps:$4 sm:$0xff]   ;;  %v17216_v37 = vld [vmem:[#allocation5 + $0x6c0] ss:$16 sps:$4 sm:$0xff]  }
 0x130   :  { %5937 = vmatpush1.bf16.msra.mxu0 %v17124_v38  ;;  %6552 = vmatpush1.bf16.msra.mxu1 %v17127_v39  ;;  %v17219_v38 = vld [vmem:[#allocation5 + $0x6c8] ss:$16 sps:$4 sm:$0xff]   ;;  %v17224_v39 = vld [vmem:[#allocation5 + $0x6e4] ss:$16 sps:$4 sm:$0xff]  }
 0x131   :  { %5938 = vmatprep.subr.bf16.mxu0 %v17132_v40  ;;  %6553 = vmatprep.subr.bf16.mxu1 %v17135_v41  ;;  %v17227_v40 = vld [vmem:[#allocation5 + $0x6ec] ss:$16 sps:$4 sm:$0xff]   ;;  %v17222_v41 = vld [vmem:[#allocation5 + $0x6e0] ss:$16 sps:$4 sm:$0xff]  }
 0x134   :  { %5939 = vmatpush1.bf16.msra.mxu0 %v17130_v42  ;;  %6554 = vmatpush1.bf16.msra.mxu1 %v17133_v43  ;;  %v17225_v42 = vld [vmem:[#allocation5 + $0x6e8] ss:$16 sps:$4 sm:$0xff]   ;;  %v17230_v43 = vld [vmem:[#allocation5 + $0x704] ss:$16 sps:$4 sm:$0xff]  }
 0x135   :  { %5940 = vmatprep.subr.bf16.mxu0 %v17138_v44  ;;  %6555 = vmatprep.subr.bf16.mxu1 %v17141_v45  ;;  %v17233_v44 = vld [vmem:[#allocation5 + $0x70c] ss:$16 sps:$4 sm:$0xff]   ;;  %v17228_v45 = vld [vmem:[#allocation5 + $0x700] ss:$16 sps:$4 sm:$0xff]  }
 0x138   :  { %5941 = vmatpush1.bf16.msra.mxu0 %v17136_v46  ;;  %6556 = vmatpush1.bf16.msra.mxu1 %v17139_v47  ;;  %v17231_v46 = vld [vmem:[#allocation5 + $0x708] ss:$16 sps:$4 sm:$0xff]   ;;  %v17236_v47 = vld [vmem:[#allocation5 + $0x724] ss:$16 sps:$4 sm:$0xff]  }
 0x139   :  { %5942 = vmatprep.subr.bf16.mxu0 %v17144_v48  ;;  %6557 = vmatprep.subr.bf16.mxu1 %v17147_v49  ;;  %v17239_v48 = vld [vmem:[#allocation5 + $0x72c] ss:$16 sps:$4 sm:$0xff]   ;;  %v17234_v49 = vld [vmem:[#allocation5 + $0x720] ss:$16 sps:$4 sm:$0xff]  }
 0x13c   :  { %5943 = vmatpush1.bf16.msra.mxu0 %v17142_v50  ;;  %6558 = vmatpush1.bf16.msra.mxu1 %v17145_v51  ;;  %v17237_v50 = vld [vmem:[#allocation5 + $0x728] ss:$16 sps:$4 sm:$0xff]   ;;  %v17242_v51 = vld [vmem:[#allocation5 + $0x744] ss:$16 sps:$4 sm:$0xff]  }
 0x13d   :  { %5944 = vmatprep.subr.bf16.mxu0 %v17150_v52  ;;  %6559 = vmatprep.subr.bf16.mxu1 %v17153_v53  ;;  %v17245_v52 = vld [vmem:[#allocation5 + $0x74c] ss:$16 sps:$4 sm:$0xff]   ;;  %v17240_v53 = vld [vmem:[#allocation5 + $0x740] ss:$16 sps:$4 sm:$0xff]  }
 0x140   :  { %5945 = vmatpush1.bf16.msra.mxu0 %v17148_v54  ;;  %6560 = vmatpush1.bf16.msra.mxu1 %v17151_v55  ;;  %v17243_v54 = vld [vmem:[#allocation5 + $0x748] ss:$16 sps:$4 sm:$0xff]   ;;  %v17248_v55 = vld [vmem:[#allocation5 + $0x764] ss:$16 sps:$4 sm:$0xff]  }
 0x141   :  { %5946 = vmatprep.subr.bf16.mxu0 %v17156_v56  ;;  %6561 = vmatprep.subr.bf16.mxu1 %v17159_v57  ;;  %v17251_v56 = vld [vmem:[#allocation5 + $0x76c] ss:$16 sps:$4 sm:$0xff]   ;;  %v17246_v57 = vld [vmem:[#allocation5 + $0x760] ss:$16 sps:$4 sm:$0xff]  }
 0x144   :  { %5947 = vmatpush1.bf16.msra.mxu0 %v17154_v58  ;;  %6562 = vmatpush1.bf16.msra.mxu1 %v17157_v59  ;;  %v17249_v58 = vld [vmem:[#allocation5 + $0x768] ss:$16 sps:$4 sm:$0xff]   ;;  %v17254_v59 = vld [vmem:[#allocation5 + $0x784] ss:$16 sps:$4 sm:$0xff]  }
 0x145   :  { %5948 = vmatprep.subr.bf16.mxu0 %v17162_v60  ;;  %6563 = vmatprep.subr.bf16.mxu1 %v17165_v61  ;;  %v17257_v60 = vld [vmem:[#allocation5 + $0x78c] ss:$16 sps:$4 sm:$0xff]   ;;  %v17252_v61 = vld [vmem:[#allocation5 + $0x780] ss:$16 sps:$4 sm:$0xff]  }
 0x148   :  { %5949 = vmatpush1.bf16.msra.mxu0 %v17160_v62  ;;  %6564 = vmatpush1.bf16.msra.mxu1 %v17163_v63  ;;  %v17255_v62 = vld [vmem:[#allocation5 + $0x788] ss:$16 sps:$4 sm:$0xff]   ;;  %v17260_v63 = vld [vmem:[#allocation5 + $0x7a4] ss:$16 sps:$4 sm:$0xff]  }
 0x149   :  { %5950 = vmatprep.subr.bf16.mxu0 %v17168_v0  ;;  %6565 = vmatprep.subr.bf16.mxu1 %v17171_v1  ;;  %v17263_v0 = vld [vmem:[#allocation5 + $0x7ac] ss:$16 sps:$4 sm:$0xff]   ;;  %v17258_v1 = vld [vmem:[#allocation5 + $0x7a0] ss:$16 sps:$4 sm:$0xff]  }
 0x14c   :  { %5951 = vmatpush1.bf16.msra.mxu0 %v17166_v2  ;;  %6566 = vmatpush1.bf16.msra.mxu1 %v17169_v3  ;;  %v17261_v2 = vld [vmem:[#allocation5 + $0x7a8] ss:$16 sps:$4 sm:$0xff]   ;;  %v17266_v3 = vld [vmem:[#allocation5 + $0x7c4] ss:$16 sps:$4 sm:$0xff]  }
 0x14d   :  { %5952 = vmatprep.subr.bf16.mxu0 %v17174_v4  ;;  %6567 = vmatprep.subr.bf16.mxu1 %v17177_v5  ;;  %v17269_v4 = vld [vmem:[#allocation5 + $0x7cc] ss:$16 sps:$4 sm:$0xff]   ;;  %v17264_v5 = vld [vmem:[#allocation5 + $0x7c0] ss:$16 sps:$4 sm:$0xff]  }
 0x150   :  { %5953 = vmatpush1.bf16.msra.mxu0 %v17172_v6  ;;  %6568 = vmatpush1.bf16.msra.mxu1 %v17175_v7  ;;  %v17267_v6 = vld [vmem:[#allocation5 + $0x7c8] ss:$16 sps:$4 sm:$0xff]   ;;  %v17272_v7 = vld [vmem:[#allocation5 + $0x7e4] ss:$16 sps:$4 sm:$0xff]  }
 0x151   :  { %5963 = vmatprep.subr.bf16.mxu0 %v17182_v8  ;;  %6578 = vmatprep.subr.bf16.mxu1 %v17185_v9  ;;  %v17275_v8 = vld [vmem:[#allocation5 + $0x7ec] ss:$16 sps:$4 sm:$0xff]   ;;  %v17270_v9 = vld [vmem:[#allocation5 + $0x7e0] ss:$16 sps:$4 sm:$0xff]  }
 0x153   :  { %5955 = vmatmul.mubr.bf16.vlgmr.msra.gmra.mrb[0].mxu0 %v14660_v12  ;;  %6570 = vmatmul.mubr.bf16.vlgmr.msra.gmra.mrb[0].mxu1 %v14660_v12  ;;  %v17280_v12 = vld [vmem:[#allocation5 + $0x804] ss:$16 sps:$4 sm:$0xff]  }
 0x154   :  { %5964 = vmatpush1.bf16.msra.mxu0 %v17180_v10  ;;  %6579 = vmatpush1.bf16.msra.mxu1 %v17183_v13  ;;  %v17273_v10 = vld [vmem:[#allocation5 + $0x7e8] ss:$16 sps:$4 sm:$0xff]   ;;  %v17283_v13 = vld [vmem:[#allocation5 + $0x80c] ss:$16 sps:$4 sm:$0xff]  }
 0x155   :  { %5965 = vmatprep.subr.bf16.mxu0 %v17188_v15  ;;  %6580 = vmatprep.subr.bf16.mxu1 %v17191_v16  ;;  %v17278_v15 = vld [vmem:[#allocation5 + $0x800] ss:$16 sps:$4 sm:$0xff]   ;;  %v14662_v16 = vcombine.low %v20117_v14, %v20117_v14  ;;  %v17292_v14 = vld [vmem:[#allocation5 + $0x844] ss:$16 sps:$4 sm:$0xff]  }
 0x156   :  { %5995 = vmatprep.mubr.bf16.mxu0 %v14663_v17  ;;  %6610 = vmatprep.mubr.bf16.mxu1 %v14663_v17  ;;  %v20123_v17 = vld [vmem:[#allocation2 + $0x20] sm:$0xff] }
 0x158   :  { %5966 = vmatpush1.bf16.msra.mxu0 %v17186_v18  ;;  %6581 = vmatpush1.bf16.msra.mxu1 %v17189_v19  ;;  %v17281_v18 = vld [vmem:[#allocation5 + $0x808] ss:$16 sps:$4 sm:$0xff]   ;;  %v17286_v19 = vld [vmem:[#allocation5 + $0x824] ss:$16 sps:$4 sm:$0xff]  }
 0x159   :  { %5967 = vmatprep.subr.bf16.mxu0 %v17194_v20  ;;  %6582 = vmatprep.subr.bf16.mxu1 %v17197_v11  ;;  %v17289_v20 = vld [vmem:[#allocation5 + $0x82c] ss:$16 sps:$4 sm:$0xff]   ;;  %v14665_v11 = vcombine.high %v20123_v17, %v20123_v17 }
 0x15c   :  { %5968 = vmatpush1.bf16.msra.mxu0 %v17192_v21  ;;  %6583 = vmatpush1.bf16.msra.mxu1 %v17195_v22  ;;  %v17284_v21 = vld [vmem:[#allocation5 + $0x820] ss:$16 sps:$4 sm:$0xff]   ;;  %v17287_v22 = vld [vmem:[#allocation5 + $0x828] ss:$16 sps:$4 sm:$0xff]  }
 0x15d   :  { %5969 = vmatprep.subr.bf16.mxu0 %v17200_v23  ;;  %6584 = vmatprep.subr.bf16.mxu1 %v17203_v24  ;;  %v17295_v23 = vld [vmem:[#allocation5 + $0x84c] ss:$16 sps:$4 sm:$0xff]   ;;  %v17290_v24 = vld [vmem:[#allocation5 + $0x840] ss:$16 sps:$4 sm:$0xff]  }
 0x160   :  { %5970 = vmatpush1.bf16.msra.mxu0 %v17198_v25  ;;  %6585 = vmatpush1.bf16.msra.mxu1 %v17201_v26  ;;  %v17293_v25 = vld [vmem:[#allocation5 + $0x848] ss:$16 sps:$4 sm:$0xff]   ;;  %v17298_v26 = vld [vmem:[#allocation5 + $0x864] ss:$16 sps:$4 sm:$0xff]  }
 0x161   :  { %5971 = vmatprep.subr.bf16.mxu0 %v17206_v27  ;;  %6586 = vmatprep.subr.bf16.mxu1 %v17209_v28  ;;  %v17301_v27 = vld [vmem:[#allocation5 + $0x86c] ss:$16 sps:$4 sm:$0xff]   ;;  %v17296_v28 = vld [vmem:[#allocation5 + $0x860] ss:$16 sps:$4 sm:$0xff]  }
 0x164   :  { %5972 = vmatpush1.bf16.msra.mxu0 %v17204_v29  ;;  %6587 = vmatpush1.bf16.msra.mxu1 %v17207_v30  ;;  %v17299_v29 = vld [vmem:[#allocation5 + $0x868] ss:$16 sps:$4 sm:$0xff]   ;;  %v17304_v30 = vld [vmem:[#allocation5 + $0x884] ss:$16 sps:$4 sm:$0xff]  }
 0x165   :  { %5973 = vmatprep.subr.bf16.mxu0 %v17212_v31  ;;  %6588 = vmatprep.subr.bf16.mxu1 %v17215_v32  ;;  %v17307_v31 = vld [vmem:[#allocation5 + $0x88c] ss:$16 sps:$4 sm:$0xff]   ;;  %v17302_v32 = vld [vmem:[#allocation5 + $0x880] ss:$16 sps:$4 sm:$0xff]  }
 0x168   :  { %5974 = vmatpush1.bf16.msra.mxu0 %v17210_v33  ;;  %6589 = vmatpush1.bf16.msra.mxu1 %v17213_v34  ;;  %v17305_v33 = vld [vmem:[#allocation5 + $0x888] ss:$16 sps:$4 sm:$0xff]   ;;  %v17310_v34 = vld [vmem:[#allocation5 + $0x8a4] ss:$16 sps:$4 sm:$0xff]  }
 0x169   :  { %5975 = vmatprep.subr.bf16.mxu0 %v17218_v35  ;;  %6590 = vmatprep.subr.bf16.mxu1 %v17221_v36  ;;  %v17313_v35 = vld [vmem:[#allocation5 + $0x8ac] ss:$16 sps:$4 sm:$0xff]   ;;  %v17308_v36 = vld [vmem:[#allocation5 + $0x8a0] ss:$16 sps:$4 sm:$0xff]  }
 0x16c   :  { %5976 = vmatpush1.bf16.msra.mxu0 %v17216_v37  ;;  %6591 = vmatpush1.bf16.msra.mxu1 %v17219_v38  ;;  %v17311_v37 = vld [vmem:[#allocation5 + $0x8a8] ss:$16 sps:$4 sm:$0xff]   ;;  %v17316_v38 = vld [vmem:[#allocation5 + $0x8c4] ss:$16 sps:$4 sm:$0xff]  }
 0x16d   :  { %5977 = vmatprep.subr.bf16.mxu0 %v17224_v39  ;;  %6592 = vmatprep.subr.bf16.mxu1 %v17227_v40  ;;  %v17319_v39 = vld [vmem:[#allocation5 + $0x8cc] ss:$16 sps:$4 sm:$0xff]   ;;  %v17314_v40 = vld [vmem:[#allocation5 + $0x8c0] ss:$16 sps:$4 sm:$0xff]  }
 0x170   :  { %5978 = vmatpush1.bf16.msra.mxu0 %v17222_v41  ;;  %6593 = vmatpush1.bf16.msra.mxu1 %v17225_v42  ;;  %v17317_v41 = vld [vmem:[#allocation5 + $0x8c8] ss:$16 sps:$4 sm:$0xff]   ;;  %v17322_v42 = vld [vmem:[#allocation5 + $0x8e4] ss:$16 sps:$4 sm:$0xff]  }
 0x171   :  { %5979 = vmatprep.subr.bf16.mxu0 %v17230_v43  ;;  %6594 = vmatprep.subr.bf16.mxu1 %v17233_v44  ;;  %v17325_v43 = vld [vmem:[#allocation5 + $0x8ec] ss:$16 sps:$4 sm:$0xff]   ;;  %v17320_v44 = vld [vmem:[#allocation5 + $0x8e0] ss:$16 sps:$4 sm:$0xff]  }
 0x174   :  { %5980 = vmatpush1.bf16.msra.mxu0 %v17228_v45  ;;  %6595 = vmatpush1.bf16.msra.mxu1 %v17231_v46  ;;  %v17323_v45 = vld [vmem:[#allocation5 + $0x8e8] ss:$16 sps:$4 sm:$0xff]   ;;  %v17328_v46 = vld [vmem:[#allocation5 + $0x904] ss:$16 sps:$4 sm:$0xff]  }
 0x175   :  { %5981 = vmatprep.subr.bf16.mxu0 %v17236_v47  ;;  %6596 = vmatprep.subr.bf16.mxu1 %v17239_v48  ;;  %v17331_v47 = vld [vmem:[#allocation5 + $0x90c] ss:$16 sps:$4 sm:$0xff]   ;;  %v17326_v48 = vld [vmem:[#allocation5 + $0x900] ss:$16 sps:$4 sm:$0xff]  }
 0x178   :  { %5982 = vmatpush1.bf16.msra.mxu0 %v17234_v49  ;;  %6597 = vmatpush1.bf16.msra.mxu1 %v17237_v50  ;;  %v17329_v49 = vld [vmem:[#allocation5 + $0x908] ss:$16 sps:$4 sm:$0xff]   ;;  %v17334_v50 = vld [vmem:[#allocation5 + $0x924] ss:$16 sps:$4 sm:$0xff]  }
 0x179   :  { %5983 = vmatprep.subr.bf16.mxu0 %v17242_v51  ;;  %6598 = vmatprep.subr.bf16.mxu1 %v17245_v52  ;;  %v17337_v51 = vld [vmem:[#allocation5 + $0x92c] ss:$16 sps:$4 sm:$0xff]   ;;  %v17332_v52 = vld [vmem:[#allocation5 + $0x920] ss:$16 sps:$4 sm:$0xff]  }
 0x17c   :  { %5984 = vmatpush1.bf16.msra.mxu0 %v17240_v53  ;;  %6599 = vmatpush1.bf16.msra.mxu1 %v17243_v54  ;;  %v17335_v53 = vld [vmem:[#allocation5 + $0x928] ss:$16 sps:$4 sm:$0xff]   ;;  %v17340_v54 = vld [vmem:[#allocation5 + $0x944] ss:$16 sps:$4 sm:$0xff]  }
 0x17d   :  { %5985 = vmatprep.subr.bf16.mxu0 %v17248_v55  ;;  %6600 = vmatprep.subr.bf16.mxu1 %v17251_v56  ;;  %v17343_v55 = vld [vmem:[#allocation5 + $0x94c] ss:$16 sps:$4 sm:$0xff]   ;;  %v17338_v56 = vld [vmem:[#allocation5 + $0x940] ss:$16 sps:$4 sm:$0xff]  }
 0x180   :  { %5986 = vmatpush1.bf16.msra.mxu0 %v17246_v57  ;;  %6601 = vmatpush1.bf16.msra.mxu1 %v17249_v58  ;;  %v17341_v57 = vld [vmem:[#allocation5 + $0x948] ss:$16 sps:$4 sm:$0xff]   ;;  %v17346_v58 = vld [vmem:[#allocation5 + $0x964] ss:$16 sps:$4 sm:$0xff]  }
 0x181   :  { %5987 = vmatprep.subr.bf16.mxu0 %v17254_v59  ;;  %6602 = vmatprep.subr.bf16.mxu1 %v17257_v60  ;;  %v17349_v59 = vld [vmem:[#allocation5 + $0x96c] ss:$16 sps:$4 sm:$0xff]   ;;  %v17344_v60 = vld [vmem:[#allocation5 + $0x960] ss:$16 sps:$4 sm:$0xff]  }
 0x184   :  { %5988 = vmatpush1.bf16.msra.mxu0 %v17252_v61  ;;  %6603 = vmatpush1.bf16.msra.mxu1 %v17255_v62  ;;  %v17347_v61 = vld [vmem:[#allocation5 + $0x968] ss:$16 sps:$4 sm:$0xff]   ;;  %v17352_v62 = vld [vmem:[#allocation5 + $0x984] ss:$16 sps:$4 sm:$0xff]  }
 0x185   :  { %5989 = vmatprep.subr.bf16.mxu0 %v17260_v63  ;;  %6604 = vmatprep.subr.bf16.mxu1 %v17263_v0  ;;  %v17355_v63 = vld [vmem:[#allocation5 + $0x98c] ss:$16 sps:$4 sm:$0xff]   ;;  %v17350_v0 = vld [vmem:[#allocation5 + $0x980] ss:$16 sps:$4 sm:$0xff]  }
 0x188   :  { %5990 = vmatpush1.bf16.msra.mxu0 %v17258_v1  ;;  %6605 = vmatpush1.bf16.msra.mxu1 %v17261_v2  ;;  %v17353_v1 = vld [vmem:[#allocation5 + $0x988] ss:$16 sps:$4 sm:$0xff]   ;;  %v17358_v2 = vld [vmem:[#allocation5 + $0x9a4] ss:$16 sps:$4 sm:$0xff]  }
 0x189   :  { %5991 = vmatprep.subr.bf16.mxu0 %v17266_v3  ;;  %6606 = vmatprep.subr.bf16.mxu1 %v17269_v4  ;;  %v17361_v3 = vld [vmem:[#allocation5 + $0x9ac] ss:$16 sps:$4 sm:$0xff]   ;;  %v17356_v4 = vld [vmem:[#allocation5 + $0x9a0] ss:$16 sps:$4 sm:$0xff]  }
 0x18c   :  { %5992 = vmatpush1.bf16.msra.mxu0 %v17264_v5  ;;  %6607 = vmatpush1.bf16.msra.mxu1 %v17267_v6  ;;  %v17359_v5 = vld [vmem:[#allocation5 + $0x9a8] ss:$16 sps:$4 sm:$0xff]   ;;  %v17364_v6 = vld [vmem:[#allocation5 + $0x9c4] ss:$16 sps:$4 sm:$0xff]  }
 0x18d   :  { %5993 = vmatprep.subr.bf16.mxu0 %v17272_v7  ;;  %6608 = vmatprep.subr.bf16.mxu1 %v17275_v8  ;;  %v17367_v7 = vld [vmem:[#allocation5 + $0x9cc] ss:$16 sps:$4 sm:$0xff]   ;;  %v17362_v8 = vld [vmem:[#allocation5 + $0x9c0] ss:$16 sps:$4 sm:$0xff]  }
 0x190   :  { %5994 = vmatpush1.bf16.msra.mxu0 %v17270_v9  ;;  %6609 = vmatpush1.bf16.msra.mxu1 %v17273_v10  ;;  %v17365_v9 = vld [vmem:[#allocation5 + $0x9c8] ss:$16 sps:$4 sm:$0xff]   ;;  %v17370_v10 = vld [vmem:[#allocation5 + $0x9e4] ss:$16 sps:$4 sm:$0xff]  }
 0x191   :  { %6004 = vmatprep.subr.bf16.mxu0 %v17280_v12  ;;  %6619 = vmatprep.subr.bf16.mxu1 %v17283_v13  ;;  %v17373_v12 = vld [vmem:[#allocation5 + $0x9ec] ss:$16 sps:$4 sm:$0xff]   ;;  %v17368_v13 = vld [vmem:[#allocation5 + $0x9e0] ss:$16 sps:$4 sm:$0xff]  }
 0x193   :  { %5996 = vmatmul.mubr.bf16.vlgmr.msra.gmra.mrb[0].mxu0 %v14662_v16  ;;  %6611 = vmatmul.mubr.bf16.vlgmr.msra.gmra.mrb[0].mxu1 %v14662_v16  ;;  %v17378_v16 = vld [vmem:[#allocation5 + $0xa04] ss:$16 sps:$4 sm:$0xff]  }
 0x194   :  { %6005 = vmatpush1.bf16.msra.mxu0 %v17278_v15  ;;  %6620 = vmatpush1.bf16.msra.mxu1 %v17281_v18  ;;  %v17371_v15 = vld [vmem:[#allocation5 + $0x9e8] ss:$16 sps:$4 sm:$0xff]   ;;  %v17381_v18 = vld [vmem:[#allocation5 + $0xa0c] ss:$16 sps:$4 sm:$0xff]  }
 0x195   :  { %6006 = vmatprep.subr.bf16.mxu0 %v17286_v19  ;;  %6621 = vmatprep.subr.bf16.mxu1 %v17289_v20  ;;  %v20127_v19 = vld [vmem:[#allocation2 + $0x28] sm:$0xff]  ;;  %v14664_v20 = vcombine.low %v20123_v17, %v20123_v17 }
 0x196   :  { %6036 = vmatprep.mubr.bf16.mxu0 %v14665_v11  ;;  %6651 = vmatprep.mubr.bf16.mxu1 %v14665_v11  ;;  %v17376_v11 = vld [vmem:[#allocation5 + $0xa00] ss:$16 sps:$4 sm:$0xff]   ;;  %v17390_v17 = vld [vmem:[#allocation5 + $0xa44] ss:$16 sps:$4 sm:$0xff]  }
 0x198   :  { %6007 = vmatpush1.bf16.msra.mxu0 %v17284_v21  ;;  %6622 = vmatpush1.bf16.msra.mxu1 %v17287_v22  ;;  %v17379_v21 = vld [vmem:[#allocation5 + $0xa08] ss:$16 sps:$4 sm:$0xff]   ;;  %v17384_v22 = vld [vmem:[#allocation5 + $0xa24] ss:$16 sps:$4 sm:$0xff]  }
 0x199   :  { %6008 = vmatprep.subr.bf16.mxu0 %v17292_v14  ;;  %6623 = vmatprep.subr.bf16.mxu1 %v17295_v23  ;;  %v17387_v14 = vld [vmem:[#allocation5 + $0xa2c] ss:$16 sps:$4 sm:$0xff]   ;;  %v14667_v23 = vcombine.high %v20127_v19, %v20127_v19 }
 0x19c   :  { %6009 = vmatpush1.bf16.msra.mxu0 %v17290_v24  ;;  %6624 = vmatpush1.bf16.msra.mxu1 %v17293_v25  ;;  %v17382_v24 = vld [vmem:[#allocation5 + $0xa20] ss:$16 sps:$4 sm:$0xff]   ;;  %v17385_v25 = vld [vmem:[#allocation5 + $0xa28] ss:$16 sps:$4 sm:$0xff]  }
 0x19d   :  { %6010 = vmatprep.subr.bf16.mxu0 %v17298_v26  ;;  %6625 = vmatprep.subr.bf16.mxu1 %v17301_v27  ;;  %v17393_v26 = vld [vmem:[#allocation5 + $0xa4c] ss:$16 sps:$4 sm:$0xff]   ;;  %v17388_v27 = vld [vmem:[#allocation5 + $0xa40] ss:$16 sps:$4 sm:$0xff]  }
 0x1a0   :  { %6011 = vmatpush1.bf16.msra.mxu0 %v17296_v28  ;;  %6626 = vmatpush1.bf16.msra.mxu1 %v17299_v29  ;;  %v17391_v28 = vld [vmem:[#allocation5 + $0xa48] ss:$16 sps:$4 sm:$0xff]   ;;  %v17396_v29 = vld [vmem:[#allocation5 + $0xa64] ss:$16 sps:$4 sm:$0xff]  }
 0x1a1   :  { %6012 = vmatprep.subr.bf16.mxu0 %v17304_v30  ;;  %6627 = vmatprep.subr.bf16.mxu1 %v17307_v31  ;;  %v17399_v30 = vld [vmem:[#allocation5 + $0xa6c] ss:$16 sps:$4 sm:$0xff]   ;;  %v17394_v31 = vld [vmem:[#allocation5 + $0xa60] ss:$16 sps:$4 sm:$0xff]  }
 0x1a4   :  { %6013 = vmatpush1.bf16.msra.mxu0 %v17302_v32  ;;  %6628 = vmatpush1.bf16.msra.mxu1 %v17305_v33  ;;  %v17397_v32 = vld [vmem:[#allocation5 + $0xa68] ss:$16 sps:$4 sm:$0xff]   ;;  %v17402_v33 = vld [vmem:[#allocation5 + $0xa84] ss:$16 sps:$4 sm:$0xff]  }
 0x1a5   :  { %6014 = vmatprep.subr.bf16.mxu0 %v17310_v34  ;;  %6629 = vmatprep.subr.bf16.mxu1 %v17313_v35  ;;  %v17405_v34 = vld [vmem:[#allocation5 + $0xa8c] ss:$16 sps:$4 sm:$0xff]   ;;  %v17400_v35 = vld [vmem:[#allocation5 + $0xa80] ss:$16 sps:$4 sm:$0xff]  }
 0x1a8   :  { %6015 = vmatpush1.bf16.msra.mxu0 %v17308_v36  ;;  %6630 = vmatpush1.bf16.msra.mxu1 %v17311_v37  ;;  %v17403_v36 = vld [vmem:[#allocation5 + $0xa88] ss:$16 sps:$4 sm:$0xff]   ;;  %v17408_v37 = vld [vmem:[#allocation5 + $0xaa4] ss:$16 sps:$4 sm:$0xff]  }
 0x1a9   :  { %6016 = vmatprep.subr.bf16.mxu0 %v17316_v38  ;;  %6631 = vmatprep.subr.bf16.mxu1 %v17319_v39  ;;  %v17411_v38 = vld [vmem:[#allocation5 + $0xaac] ss:$16 sps:$4 sm:$0xff]   ;;  %v17406_v39 = vld [vmem:[#allocation5 + $0xaa0] ss:$16 sps:$4 sm:$0xff]  }
 0x1ac   :  { %6017 = vmatpush1.bf16.msra.mxu0 %v17314_v40  ;;  %6632 = vmatpush1.bf16.msra.mxu1 %v17317_v41  ;;  %v17409_v40 = vld [vmem:[#allocation5 + $0xaa8] ss:$16 sps:$4 sm:$0xff]   ;;  %v17414_v41 = vld [vmem:[#allocation5 + $0xac4] ss:$16 sps:$4 sm:$0xff]  }
 0x1ad   :  { %6018 = vmatprep.subr.bf16.mxu0 %v17322_v42  ;;  %6633 = vmatprep.subr.bf16.mxu1 %v17325_v43  ;;  %v17417_v42 = vld [vmem:[#allocation5 + $0xacc] ss:$16 sps:$4 sm:$0xff]   ;;  %v17412_v43 = vld [vmem:[#allocation5 + $0xac0] ss:$16 sps:$4 sm:$0xff]  }
 0x1b0   :  { %6019 = vmatpush1.bf16.msra.mxu0 %v17320_v44  ;;  %6634 = vmatpush1.bf16.msra.mxu1 %v17323_v45  ;;  %v17415_v44 = vld [vmem:[#allocation5 + $0xac8] ss:$16 sps:$4 sm:$0xff]   ;;  %v17420_v45 = vld [vmem:[#allocation5 + $0xae4] ss:$16 sps:$4 sm:$0xff]  }
 0x1b1   :  { %6020 = vmatprep.subr.bf16.mxu0 %v17328_v46  ;;  %6635 = vmatprep.subr.bf16.mxu1 %v17331_v47  ;;  %v17423_v46 = vld [vmem:[#allocation5 + $0xaec] ss:$16 sps:$4 sm:$0xff]   ;;  %v17418_v47 = vld [vmem:[#allocation5 + $0xae0] ss:$16 sps:$4 sm:$0xff]  }
 0x1b4   :  { %6021 = vmatpush1.bf16.msra.mxu0 %v17326_v48  ;;  %6636 = vmatpush1.bf16.msra.mxu1 %v17329_v49  ;;  %v17421_v48 = vld [vmem:[#allocation5 + $0xae8] ss:$16 sps:$4 sm:$0xff]   ;;  %v17426_v49 = vld [vmem:[#allocation5 + $0xb04] ss:$16 sps:$4 sm:$0xff]  }
 0x1b5   :  { %6022 = vmatprep.subr.bf16.mxu0 %v17334_v50  ;;  %6637 = vmatprep.subr.bf16.mxu1 %v17337_v51  ;;  %v17429_v50 = vld [vmem:[#allocation5 + $0xb0c] ss:$16 sps:$4 sm:$0xff]   ;;  %v17424_v51 = vld [vmem:[#allocation5 + $0xb00] ss:$16 sps:$4 sm:$0xff]  }
 0x1b8   :  { %6023 = vmatpush1.bf16.msra.mxu0 %v17332_v52  ;;  %6638 = vmatpush1.bf16.msra.mxu1 %v17335_v53  ;;  %v17427_v52 = vld [vmem:[#allocation5 + $0xb08] ss:$16 sps:$4 sm:$0xff]   ;;  %v17432_v53 = vld [vmem:[#allocation5 + $0xb24] ss:$16 sps:$4 sm:$0xff]  }
 0x1b9   :  { %6024 = vmatprep.subr.bf16.mxu0 %v17340_v54  ;;  %6639 = vmatprep.subr.bf16.mxu1 %v17343_v55  ;;  %v17435_v54 = vld [vmem:[#allocation5 + $0xb2c] ss:$16 sps:$4 sm:$0xff]   ;;  %v17430_v55 = vld [vmem:[#allocation5 + $0xb20] ss:$16 sps:$4 sm:$0xff]  }
 0x1bc   :  { %6025 = vmatpush1.bf16.msra.mxu0 %v17338_v56  ;;  %6640 = vmatpush1.bf16.msra.mxu1 %v17341_v57  ;;  %v17433_v56 = vld [vmem:[#allocation5 + $0xb28] ss:$16 sps:$4 sm:$0xff]   ;;  %v17438_v57 = vld [vmem:[#allocation5 + $0xb44] ss:$16 sps:$4 sm:$0xff]  }
 0x1bd   :  { %6026 = vmatprep.subr.bf16.mxu0 %v17346_v58  ;;  %6641 = vmatprep.subr.bf16.mxu1 %v17349_v59  ;;  %v17441_v58 = vld [vmem:[#allocation5 + $0xb4c] ss:$16 sps:$4 sm:$0xff]   ;;  %v17436_v59 = vld [vmem:[#allocation5 + $0xb40] ss:$16 sps:$4 sm:$0xff]  }
 0x1c0   :  { %6027 = vmatpush1.bf16.msra.mxu0 %v17344_v60  ;;  %6642 = vmatpush1.bf16.msra.mxu1 %v17347_v61  ;;  %v17439_v60 = vld [vmem:[#allocation5 + $0xb48] ss:$16 sps:$4 sm:$0xff]   ;;  %v17444_v61 = vld [vmem:[#allocation5 + $0xb64] ss:$16 sps:$4 sm:$0xff]  }
 0x1c1   :  { %6028 = vmatprep.subr.bf16.mxu0 %v17352_v62  ;;  %6643 = vmatprep.subr.bf16.mxu1 %v17355_v63  ;;  %v17447_v62 = vld [vmem:[#allocation5 + $0xb6c] ss:$16 sps:$4 sm:$0xff]   ;;  %v17442_v63 = vld [vmem:[#allocation5 + $0xb60] ss:$16 sps:$4 sm:$0xff]  }
 0x1c4   :  { %6029 = vmatpush1.bf16.msra.mxu0 %v17350_v0  ;;  %6644 = vmatpush1.bf16.msra.mxu1 %v17353_v1  ;;  %v17445_v0 = vld [vmem:[#allocation5 + $0xb68] ss:$16 sps:$4 sm:$0xff]   ;;  %v17450_v1 = vld [vmem:[#allocation5 + $0xb84] ss:$16 sps:$4 sm:$0xff]  }
 0x1c5   :  { %6030 = vmatprep.subr.bf16.mxu0 %v17358_v2  ;;  %6645 = vmatprep.subr.bf16.mxu1 %v17361_v3  ;;  %v17453_v2 = vld [vmem:[#allocation5 + $0xb8c] ss:$16 sps:$4 sm:$0xff]   ;;  %v17448_v3 = vld [vmem:[#allocation5 + $0xb80] ss:$16 sps:$4 sm:$0xff]  }
 0x1c8   :  { %6031 = vmatpush1.bf16.msra.mxu0 %v17356_v4  ;;  %6646 = vmatpush1.bf16.msra.mxu1 %v17359_v5  ;;  %v17451_v4 = vld [vmem:[#allocation5 + $0xb88] ss:$16 sps:$4 sm:$0xff]   ;;  %v17456_v5 = vld [vmem:[#allocation5 + $0xba4] ss:$16 sps:$4 sm:$0xff]  }
 0x1c9   :  { %6032 = vmatprep.subr.bf16.mxu0 %v17364_v6  ;;  %6647 = vmatprep.subr.bf16.mxu1 %v17367_v7  ;;  %v17459_v6 = vld [vmem:[#allocation5 + $0xbac] ss:$16 sps:$4 sm:$0xff]   ;;  %v17454_v7 = vld [vmem:[#allocation5 + $0xba0] ss:$16 sps:$4 sm:$0xff]  }
 0x1cc   :  { %6033 = vmatpush1.bf16.msra.mxu0 %v17362_v8  ;;  %6648 = vmatpush1.bf16.msra.mxu1 %v17365_v9  ;;  %v17457_v8 = vld [vmem:[#allocation5 + $0xba8] ss:$16 sps:$4 sm:$0xff]   ;;  %v17462_v9 = vld [vmem:[#allocation5 + $0xbc4] ss:$16 sps:$4 sm:$0xff]  }
 0x1cd   :  { %6034 = vmatprep.subr.bf16.mxu0 %v17370_v10  ;;  %6649 = vmatprep.subr.bf16.mxu1 %v17373_v12  ;;  %v17465_v10 = vld [vmem:[#allocation5 + $0xbcc] ss:$16 sps:$4 sm:$0xff]   ;;  %v17460_v12 = vld [vmem:[#allocation5 + $0xbc0] ss:$16 sps:$4 sm:$0xff]  }
 0x1d0   :  { %6035 = vmatpush1.bf16.msra.mxu0 %v17368_v13  ;;  %6650 = vmatpush1.bf16.msra.mxu1 %v17371_v15  ;;  %v17463_v13 = vld [vmem:[#allocation5 + $0xbc8] ss:$16 sps:$4 sm:$0xff]   ;;  %v17468_v15 = vld [vmem:[#allocation5 + $0xbe4] ss:$16 sps:$4 sm:$0xff]  }
 0x1d1   :  { %6045 = vmatprep.subr.bf16.mxu0 %v17378_v16  ;;  %6660 = vmatprep.subr.bf16.mxu1 %v17381_v18  ;;  %v17471_v16 = vld [vmem:[#allocation5 + $0xbec] ss:$16 sps:$4 sm:$0xff]   ;;  %v17466_v18 = vld [vmem:[#allocation5 + $0xbe0] ss:$16 sps:$4 sm:$0xff]  }
 0x1d3   :  { %6037 = vmatmul.mubr.bf16.vlgmr.msra.gmra.mrb[0].mxu0 %v14664_v20  ;;  %6652 = vmatmul.mubr.bf16.vlgmr.msra.gmra.mrb[0].mxu1 %v14664_v20  ;;  %v17469_v20 = vld [vmem:[#allocation5 + $0xbe8] ss:$16 sps:$4 sm:$0xff]  }
 0x1d4   :  { %6046 = vmatpush1.bf16.msra.mxu0 %v17376_v11  ;;  %6661 = vmatpush1.bf16.msra.mxu1 %v17379_v21  ;;  %v17476_v11 = vld [vmem:[#allocation5 + $0xc04] ss:$16 sps:$4 sm:$0xff]   ;;  %v17479_v21 = vld [vmem:[#allocation5 + $0xc0c] ss:$16 sps:$4 sm:$0xff]  }
 0x1d5   :  { %6047 = vmatprep.subr.bf16.mxu0 %v17384_v22  ;;  %6662 = vmatprep.subr.bf16.mxu1 %v17387_v14  ;;  %v20133_v22 = vld [vmem:[#allocation2 + $0x30] sm:$0xff]  ;;  %v14666_v14 = vcombine.low %v20127_v19, %v20127_v19  ;;  %v17488_v19 = vld [vmem:[#allocation5 + $0xc44] ss:$16 sps:$4 sm:$0xff]  }
 0x1d6   :  { %6077 = vmatprep.mubr.bf16.mxu0 %v14667_v23  ;;  %6692 = vmatprep.mubr.bf16.mxu1 %v14667_v23  ;;  %v17474_v23 = vld [vmem:[#allocation5 + $0xc00] ss:$16 sps:$4 sm:$0xff]  }
 0x1d8   :  { %6048 = vmatpush1.bf16.msra.mxu0 %v17382_v24  ;;  %6663 = vmatpush1.bf16.msra.mxu1 %v17385_v25  ;;  %v17477_v24 = vld [vmem:[#allocation5 + $0xc08] ss:$16 sps:$4 sm:$0xff]   ;;  %v17482_v25 = vld [vmem:[#allocation5 + $0xc24] ss:$16 sps:$4 sm:$0xff]  }
 0x1d9   :  { %6049 = vmatprep.subr.bf16.mxu0 %v17390_v17  ;;  %6664 = vmatprep.subr.bf16.mxu1 %v17393_v26  ;;  %v17485_v17 = vld [vmem:[#allocation5 + $0xc2c] ss:$16 sps:$4 sm:$0xff]   ;;  %v14669_v26 = vcombine.high %v20133_v22, %v20133_v22 }
 0x1dc   :  { %6050 = vmatpush1.bf16.msra.mxu0 %v17388_v27  ;;  %6665 = vmatpush1.bf16.msra.mxu1 %v17391_v28  ;;  %v17480_v27 = vld [vmem:[#allocation5 + $0xc20] ss:$16 sps:$4 sm:$0xff]   ;;  %v17483_v28 = vld [vmem:[#allocation5 + $0xc28] ss:$16 sps:$4 sm:$0xff]  }
 0x1dd   :  { %6051 = vmatprep.subr.bf16.mxu0 %v17396_v29  ;;  %6666 = vmatprep.subr.bf16.mxu1 %v17399_v30  ;;  %v17491_v29 = vld [vmem:[#allocation5 + $0xc4c] ss:$16 sps:$4 sm:$0xff]   ;;  %v17486_v30 = vld [vmem:[#allocation5 + $0xc40] ss:$16 sps:$4 sm:$0xff]  }
 0x1e0   :  { %6052 = vmatpush1.bf16.msra.mxu0 %v17394_v31  ;;  %6667 = vmatpush1.bf16.msra.mxu1 %v17397_v32  ;;  %v17489_v31 = vld [vmem:[#allocation5 + $0xc48] ss:$16 sps:$4 sm:$0xff]   ;;  %v17494_v32 = vld [vmem:[#allocation5 + $0xc64] ss:$16 sps:$4 sm:$0xff]  }
 0x1e1   :  { %6053 = vmatprep.subr.bf16.mxu0 %v17402_v33  ;;  %6668 = vmatprep.subr.bf16.mxu1 %v17405_v34  ;;  %v17497_v33 = vld [vmem:[#allocation5 + $0xc6c] ss:$16 sps:$4 sm:$0xff]   ;;  %v17492_v34 = vld [vmem:[#allocation5 + $0xc60] ss:$16 sps:$4 sm:$0xff]  }
 0x1e4   :  { %6054 = vmatpush1.bf16.msra.mxu0 %v17400_v35  ;;  %6669 = vmatpush1.bf16.msra.mxu1 %v17403_v36  ;;  %v17495_v35 = vld [vmem:[#allocation5 + $0xc68] ss:$16 sps:$4 sm:$0xff]   ;;  %v17500_v36 = vld [vmem:[#allocation5 + $0xc84] ss:$16 sps:$4 sm:$0xff]  }
 0x1e5   :  { %6055 = vmatprep.subr.bf16.mxu0 %v17408_v37  ;;  %6670 = vmatprep.subr.bf16.mxu1 %v17411_v38  ;;  %v17503_v37 = vld [vmem:[#allocation5 + $0xc8c] ss:$16 sps:$4 sm:$0xff]   ;;  %v17498_v38 = vld [vmem:[#allocation5 + $0xc80] ss:$16 sps:$4 sm:$0xff]  }
 0x1e8   :  { %6056 = vmatpush1.bf16.msra.mxu0 %v17406_v39  ;;  %6671 = vmatpush1.bf16.msra.mxu1 %v17409_v40  ;;  %v17501_v39 = vld [vmem:[#allocation5 + $0xc88] ss:$16 sps:$4 sm:$0xff]   ;;  %v17506_v40 = vld [vmem:[#allocation5 + $0xca4] ss:$16 sps:$4 sm:$0xff]  }
 0x1e9   :  { %6057 = vmatprep.subr.bf16.mxu0 %v17414_v41  ;;  %6672 = vmatprep.subr.bf16.mxu1 %v17417_v42  ;;  %v17509_v41 = vld [vmem:[#allocation5 + $0xcac] ss:$16 sps:$4 sm:$0xff]   ;;  %v17504_v42 = vld [vmem:[#allocation5 + $0xca0] ss:$16 sps:$4 sm:$0xff]  }
 0x1ec   :  { %6058 = vmatpush1.bf16.msra.mxu0 %v17412_v43  ;;  %6673 = vmatpush1.bf16.msra.mxu1 %v17415_v44  ;;  %v17507_v43 = vld [vmem:[#allocation5 + $0xca8] ss:$16 sps:$4 sm:$0xff]   ;;  %v17512_v44 = vld [vmem:[#allocation5 + $0xcc4] ss:$16 sps:$4 sm:$0xff]  }
 0x1ed   :  { %6059 = vmatprep.subr.bf16.mxu0 %v17420_v45  ;;  %6674 = vmatprep.subr.bf16.mxu1 %v17423_v46  ;;  %v17515_v45 = vld [vmem:[#allocation5 + $0xccc] ss:$16 sps:$4 sm:$0xff]   ;;  %v17510_v46 = vld [vmem:[#allocation5 + $0xcc0] ss:$16 sps:$4 sm:$0xff]  }
 0x1f0   :  { %6060 = vmatpush1.bf16.msra.mxu0 %v17418_v47  ;;  %6675 = vmatpush1.bf16.msra.mxu1 %v17421_v48  ;;  %v17513_v47 = vld [vmem:[#allocation5 + $0xcc8] ss:$16 sps:$4 sm:$0xff]   ;;  %v17518_v48 = vld [vmem:[#allocation5 + $0xce4] ss:$16 sps:$4 sm:$0xff]  }
 0x1f1   :  { %6061 = vmatprep.subr.bf16.mxu0 %v17426_v49  ;;  %6676 = vmatprep.subr.bf16.mxu1 %v17429_v50  ;;  %v17521_v49 = vld [vmem:[#allocation5 + $0xcec] ss:$16 sps:$4 sm:$0xff]   ;;  %v17516_v50 = vld [vmem:[#allocation5 + $0xce0] ss:$16 sps:$4 sm:$0xff]  }
 0x1f4   :  { %6062 = vmatpush1.bf16.msra.mxu0 %v17424_v51  ;;  %6677 = vmatpush1.bf16.msra.mxu1 %v17427_v52  ;;  %v17519_v51 = vld [vmem:[#allocation5 + $0xce8] ss:$16 sps:$4 sm:$0xff]   ;;  %v17524_v52 = vld [vmem:[#allocation5 + $0xd04] ss:$16 sps:$4 sm:$0xff]  }
 0x1f5   :  { %6063 = vmatprep.subr.bf16.mxu0 %v17432_v53  ;;  %6678 = vmatprep.subr.bf16.mxu1 %v17435_v54  ;;  %v17527_v53 = vld [vmem:[#allocation5 + $0xd0c] ss:$16 sps:$4 sm:$0xff]   ;;  %v17522_v54 = vld [vmem:[#allocation5 + $0xd00] ss:$16 sps:$4 sm:$0xff]  }
 0x1f8   :  { %6064 = vmatpush1.bf16.msra.mxu0 %v17430_v55  ;;  %6679 = vmatpush1.bf16.msra.mxu1 %v17433_v56  ;;  %v17525_v55 = vld [vmem:[#allocation5 + $0xd08] ss:$16 sps:$4 sm:$0xff]   ;;  %v17530_v56 = vld [vmem:[#allocation5 + $0xd24] ss:$16 sps:$4 sm:$0xff]  }
 0x1f9   :  { %6065 = vmatprep.subr.bf16.mxu0 %v17438_v57  ;;  %6680 = vmatprep.subr.bf16.mxu1 %v17441_v58  ;;  %v17533_v57 = vld [vmem:[#allocation5 + $0xd2c] ss:$16 sps:$4 sm:$0xff]   ;;  %v17528_v58 = vld [vmem:[#allocation5 + $0xd20] ss:$16 sps:$4 sm:$0xff]  }
 0x1fc   :  { %6066 = vmatpush1.bf16.msra.mxu0 %v17436_v59  ;;  %6681 = vmatpush1.bf16.msra.mxu1 %v17439_v60  ;;  %v17531_v59 = vld [vmem:[#allocation5 + $0xd28] ss:$16 sps:$4 sm:$0xff]   ;;  %v17536_v60 = vld [vmem:[#allocation5 + $0xd44] ss:$16 sps:$4 sm:$0xff]  }
 0x1fd   :  { %6067 = vmatprep.subr.bf16.mxu0 %v17444_v61  ;;  %6682 = vmatprep.subr.bf16.mxu1 %v17447_v62  ;;  %v17539_v61 = vld [vmem:[#allocation5 + $0xd4c] ss:$16 sps:$4 sm:$0xff]   ;;  %v17534_v62 = vld [vmem:[#allocation5 + $0xd40] ss:$16 sps:$4 sm:$0xff]  }
 0x200   :  { %6068 = vmatpush1.bf16.msra.mxu0 %v17442_v63  ;;  %6683 = vmatpush1.bf16.msra.mxu1 %v17445_v0  ;;  %v17537_v63 = vld [vmem:[#allocation5 + $0xd48] ss:$16 sps:$4 sm:$0xff]   ;;  %v17542_v0 = vld [vmem:[#allocation5 + $0xd64] ss:$16 sps:$4 sm:$0xff]  }
 0x201   :  { %6069 = vmatprep.subr.bf16.mxu0 %v17450_v1  ;;  %6684 = vmatprep.subr.bf16.mxu1 %v17453_v2  ;;  %v17545_v1 = vld [vmem:[#allocation5 + $0xd6c] ss:$16 sps:$4 sm:$0xff]   ;;  %v17540_v2 = vld [vmem:[#allocation5 + $0xd60] ss:$16 sps:$4 sm:$0xff]  }
 0x204   :  { %6070 = vmatpush1.bf16.msra.mxu0 %v17448_v3  ;;  %6685 = vmatpush1.bf16.msra.mxu1 %v17451_v4  ;;  %v17543_v3 = vld [vmem:[#allocation5 + $0xd68] ss:$16 sps:$4 sm:$0xff]   ;;  %v17548_v4 = vld [vmem:[#allocation5 + $0xd84] ss:$16 sps:$4 sm:$0xff]  }
 0x205   :  { %6071 = vmatprep.subr.bf16.mxu0 %v17456_v5  ;;  %6686 = vmatprep.subr.bf16.mxu1 %v17459_v6  ;;  %v17551_v5 = vld [vmem:[#allocation5 + $0xd8c] ss:$16 sps:$4 sm:$0xff]   ;;  %v17546_v6 = vld [vmem:[#allocation5 + $0xd80] ss:$16 sps:$4 sm:$0xff]  }
 0x208   :  { %6072 = vmatpush1.bf16.msra.mxu0 %v17454_v7  ;;  %6687 = vmatpush1.bf16.msra.mxu1 %v17457_v8  ;;  %v17549_v7 = vld [vmem:[#allocation5 + $0xd88] ss:$16 sps:$4 sm:$0xff]   ;;  %v17554_v8 = vld [vmem:[#allocation5 + $0xda4] ss:$16 sps:$4 sm:$0xff]  }
 0x209   :  { %6073 = vmatprep.subr.bf16.mxu0 %v17462_v9  ;;  %6688 = vmatprep.subr.bf16.mxu1 %v17465_v10  ;;  %v17557_v9 = vld [vmem:[#allocation5 + $0xdac] ss:$16 sps:$4 sm:$0xff]   ;;  %v17552_v10 = vld [vmem:[#allocation5 + $0xda0] ss:$16 sps:$4 sm:$0xff]  }
 0x20c   :  { %6074 = vmatpush1.bf16.msra.mxu0 %v17460_v12  ;;  %6689 = vmatpush1.bf16.msra.mxu1 %v17463_v13  ;;  %v17555_v12 = vld [vmem:[#allocation5 + $0xda8] ss:$16 sps:$4 sm:$0xff]   ;;  %v17560_v13 = vld [vmem:[#allocation5 + $0xdc4] ss:$16 sps:$4 sm:$0xff]  }
 0x20d   :  { %6075 = vmatprep.subr.bf16.mxu0 %v17468_v15  ;;  %6690 = vmatprep.subr.bf16.mxu1 %v17471_v16  ;;  %v17563_v15 = vld [vmem:[#allocation5 + $0xdcc] ss:$16 sps:$4 sm:$0xff]   ;;  %v17558_v16 = vld [vmem:[#allocation5 + $0xdc0] ss:$16 sps:$4 sm:$0xff]  }
 0x210   :  { %6076 = vmatpush1.bf16.msra.mxu0 %v17466_v18  ;;  %6691 = vmatpush1.bf16.msra.mxu1 %v17469_v20  ;;  %v17561_v18 = vld [vmem:[#allocation5 + $0xdc8] ss:$16 sps:$4 sm:$0xff]   ;;  %v17566_v20 = vld [vmem:[#allocation5 + $0xde4] ss:$16 sps:$4 sm:$0xff]  }
 0x211   :  { %6086 = vmatprep.subr.bf16.mxu0 %v17476_v11  ;;  %6701 = vmatprep.subr.bf16.mxu1 %v17479_v21  ;;  %v17569_v11 = vld [vmem:[#allocation5 + $0xdec] ss:$16 sps:$4 sm:$0xff]   ;;  %v17564_v21 = vld [vmem:[#allocation5 + $0xde0] ss:$16 sps:$4 sm:$0xff]  }
 0x213   :  { %6078 = vmatmul.mubr.bf16.vlgmr.msra.gmra.mrb[0].mxu0 %v14666_v14  ;;  %6693 = vmatmul.mubr.bf16.vlgmr.msra.gmra.mrb[0].mxu1 %v14666_v14  ;;  %v17567_v14 = vld [vmem:[#allocation5 + $0xde8] ss:$16 sps:$4 sm:$0xff]  }
 0x214   :  { %6087 = vmatpush1.bf16.msra.mxu0 %v17474_v23  ;;  %6702 = vmatpush1.bf16.msra.mxu1 %v17477_v24  ;;  %v17574_v23 = vld [vmem:[#allocation5 + $0xe04] ss:$16 sps:$4 sm:$0xff]   ;;  %v17577_v24 = vld [vmem:[#allocation5 + $0xe0c] ss:$16 sps:$4 sm:$0xff]  }
 0x215   :  { %6088 = vmatprep.subr.bf16.mxu0 %v17482_v25  ;;  %6703 = vmatprep.subr.bf16.mxu1 %v17485_v17  ;;  %v20139_v25 = vld [vmem:[#allocation2 + $0x38] sm:$0xff]  ;;  %v14668_v17 = vcombine.low %v20133_v22, %v20133_v22 }
 0x216   :  { %6118 = vmatprep.mubr.bf16.mxu0 %v14669_v26  ;;  %6733 = vmatprep.mubr.bf16.mxu1 %v14669_v26  ;;  %v17572_v26 = vld [vmem:[#allocation5 + $0xe00] ss:$16 sps:$4 sm:$0xff]   ;;  %v17586_v22 = vld [vmem:[#allocation5 + $0xe44] ss:$16 sps:$4 sm:$0xff]  }
 0x218   :  { %6089 = vmatpush1.bf16.msra.mxu0 %v17480_v27  ;;  %6704 = vmatpush1.bf16.msra.mxu1 %v17483_v28  ;;  %v17575_v27 = vld [vmem:[#allocation5 + $0xe08] ss:$16 sps:$4 sm:$0xff]   ;;  %v17580_v28 = vld [vmem:[#allocation5 + $0xe24] ss:$16 sps:$4 sm:$0xff]  }
 0x219   :  { %6090 = vmatprep.subr.bf16.mxu0 %v17488_v19  ;;  %6705 = vmatprep.subr.bf16.mxu1 %v17491_v29  ;;  %v17583_v19 = vld [vmem:[#allocation5 + $0xe2c] ss:$16 sps:$4 sm:$0xff]   ;;  %v14671_v29 = vcombine.high %v20139_v25, %v20139_v25 }
 0x21c   :  { %6091 = vmatpush1.bf16.msra.mxu0 %v17486_v30  ;;  %6706 = vmatpush1.bf16.msra.mxu1 %v17489_v31  ;;  %v17578_v30 = vld [vmem:[#allocation5 + $0xe20] ss:$16 sps:$4 sm:$0xff]   ;;  %v17581_v31 = vld [vmem:[#allocation5 + $0xe28] ss:$16 sps:$4 sm:$0xff]  }
 0x21d   :  { %6092 = vmatprep.subr.bf16.mxu0 %v17494_v32  ;;  %6707 = vmatprep.subr.bf16.mxu1 %v17497_v33  ;;  %v17589_v32 = vld [vmem:[#allocation5 + $0xe4c] ss:$16 sps:$4 sm:$0xff]   ;;  %v17584_v33 = vld [vmem:[#allocation5 + $0xe40] ss:$16 sps:$4 sm:$0xff]  }
 0x220   :  { %6093 = vmatpush1.bf16.msra.mxu0 %v17492_v34  ;;  %6708 = vmatpush1.bf16.msra.mxu1 %v17495_v35  ;;  %v17587_v34 = vld [vmem:[#allocation5 + $0xe48] ss:$16 sps:$4 sm:$0xff]   ;;  %v17592_v35 = vld [vmem:[#allocation5 + $0xe64] ss:$16 sps:$4 sm:$0xff]  }
 0x221   :  { %6094 = vmatprep.subr.bf16.mxu0 %v17500_v36  ;;  %6709 = vmatprep.subr.bf16.mxu1 %v17503_v37  ;;  %v17595_v36 = vld [vmem:[#allocation5 + $0xe6c] ss:$16 sps:$4 sm:$0xff]   ;;  %v17590_v37 = vld [vmem:[#allocation5 + $0xe60] ss:$16 sps:$4 sm:$0xff]  }
 0x224   :  { %6095 = vmatpush1.bf16.msra.mxu0 %v17498_v38  ;;  %6710 = vmatpush1.bf16.msra.mxu1 %v17501_v39  ;;  %v17593_v38 = vld [vmem:[#allocation5 + $0xe68] ss:$16 sps:$4 sm:$0xff]   ;;  %v17598_v39 = vld [vmem:[#allocation5 + $0xe84] ss:$16 sps:$4 sm:$0xff]  }
 0x225   :  { %6096 = vmatprep.subr.bf16.mxu0 %v17506_v40  ;;  %6711 = vmatprep.subr.bf16.mxu1 %v17509_v41  ;;  %v17601_v40 = vld [vmem:[#allocation5 + $0xe8c] ss:$16 sps:$4 sm:$0xff]   ;;  %v17596_v41 = vld [vmem:[#allocation5 + $0xe80] ss:$16 sps:$4 sm:$0xff]  }
 0x228   :  { %6097 = vmatpush1.bf16.msra.mxu0 %v17504_v42  ;;  %6712 = vmatpush1.bf16.msra.mxu1 %v17507_v43  ;;  %v17599_v42 = vld [vmem:[#allocation5 + $0xe88] ss:$16 sps:$4 sm:$0xff]   ;;  %v17604_v43 = vld [vmem:[#allocation5 + $0xea4] ss:$16 sps:$4 sm:$0xff]  }
 0x229   :  { %6098 = vmatprep.subr.bf16.mxu0 %v17512_v44  ;;  %6713 = vmatprep.subr.bf16.mxu1 %v17515_v45  ;;  %v17607_v44 = vld [vmem:[#allocation5 + $0xeac] ss:$16 sps:$4 sm:$0xff]   ;;  %v17602_v45 = vld [vmem:[#allocation5 + $0xea0] ss:$16 sps:$4 sm:$0xff]  }
 0x22c   :  { %6099 = vmatpush1.bf16.msra.mxu0 %v17510_v46  ;;  %6714 = vmatpush1.bf16.msra.mxu1 %v17513_v47  ;;  %v17605_v46 = vld [vmem:[#allocation5 + $0xea8] ss:$16 sps:$4 sm:$0xff]   ;;  %v17610_v47 = vld [vmem:[#allocation5 + $0xec4] ss:$16 sps:$4 sm:$0xff]  }
 0x22d   :  { %6100 = vmatprep.subr.bf16.mxu0 %v17518_v48  ;;  %6715 = vmatprep.subr.bf16.mxu1 %v17521_v49  ;;  %v17613_v48 = vld [vmem:[#allocation5 + $0xecc] ss:$16 sps:$4 sm:$0xff]   ;;  %v17608_v49 = vld [vmem:[#allocation5 + $0xec0] ss:$16 sps:$4 sm:$0xff]  }
 0x230   :  { %6101 = vmatpush1.bf16.msra.mxu0 %v17516_v50  ;;  %6716 = vmatpush1.bf16.msra.mxu1 %v17519_v51  ;;  %v17611_v50 = vld [vmem:[#allocation5 + $0xec8] ss:$16 sps:$4 sm:$0xff]   ;;  %v17616_v51 = vld [vmem:[#allocation5 + $0xee4] ss:$16 sps:$4 sm:$0xff]  }
 0x231   :  { %6102 = vmatprep.subr.bf16.mxu0 %v17524_v52  ;;  %6717 = vmatprep.subr.bf16.mxu1 %v17527_v53  ;;  %v17619_v52 = vld [vmem:[#allocation5 + $0xeec] ss:$16 sps:$4 sm:$0xff]   ;;  %v17614_v53 = vld [vmem:[#allocation5 + $0xee0] ss:$16 sps:$4 sm:$0xff]  }
 0x234   :  { %6103 = vmatpush1.bf16.msra.mxu0 %v17522_v54  ;;  %6718 = vmatpush1.bf16.msra.mxu1 %v17525_v55  ;;  %v17617_v54 = vld [vmem:[#allocation5 + $0xee8] ss:$16 sps:$4 sm:$0xff]   ;;  %v17622_v55 = vld [vmem:[#allocation5 + $0xf04] ss:$16 sps:$4 sm:$0xff]  }
 0x235   :  { %6104 = vmatprep.subr.bf16.mxu0 %v17530_v56  ;;  %6719 = vmatprep.subr.bf16.mxu1 %v17533_v57  ;;  %v17625_v56 = vld [vmem:[#allocation5 + $0xf0c] ss:$16 sps:$4 sm:$0xff]   ;;  %v17620_v57 = vld [vmem:[#allocation5 + $0xf00] ss:$16 sps:$4 sm:$0xff]  }
 0x238   :  { %6105 = vmatpush1.bf16.msra.mxu0 %v17528_v58  ;;  %6720 = vmatpush1.bf16.msra.mxu1 %v17531_v59  ;;  %v17623_v58 = vld [vmem:[#allocation5 + $0xf08] ss:$16 sps:$4 sm:$0xff]   ;;  %v17628_v59 = vld [vmem:[#allocation5 + $0xf24] ss:$16 sps:$4 sm:$0xff]  }
 0x239   :  { %6106 = vmatprep.subr.bf16.mxu0 %v17536_v60  ;;  %6721 = vmatprep.subr.bf16.mxu1 %v17539_v61  ;;  %v17631_v60 = vld [vmem:[#allocation5 + $0xf2c] ss:$16 sps:$4 sm:$0xff]   ;;  %v17626_v61 = vld [vmem:[#allocation5 + $0xf20] ss:$16 sps:$4 sm:$0xff]  }
 0x23c   :  { %6107 = vmatpush1.bf16.msra.mxu0 %v17534_v62  ;;  %6722 = vmatpush1.bf16.msra.mxu1 %v17537_v63  ;;  %v17629_v62 = vld [vmem:[#allocation5 + $0xf28] ss:$16 sps:$4 sm:$0xff]   ;;  %v17634_v63 = vld [vmem:[#allocation5 + $0xf44] ss:$16 sps:$4 sm:$0xff]  }
 0x23d   :  { %6108 = vmatprep.subr.bf16.mxu0 %v17542_v0  ;;  %6723 = vmatprep.subr.bf16.mxu1 %v17545_v1  ;;  %v17637_v0 = vld [vmem:[#allocation5 + $0xf4c] ss:$16 sps:$4 sm:$0xff]   ;;  %v17632_v1 = vld [vmem:[#allocation5 + $0xf40] ss:$16 sps:$4 sm:$0xff]  }
 0x240   :  { %6109 = vmatpush1.bf16.msra.mxu0 %v17540_v2  ;;  %6724 = vmatpush1.bf16.msra.mxu1 %v17543_v3  ;;  %v17635_v2 = vld [vmem:[#allocation5 + $0xf48] ss:$16 sps:$4 sm:$0xff]   ;;  %v17640_v3 = vld [vmem:[#allocation5 + $0xf64] ss:$16 sps:$4 sm:$0xff]  }
 0x241   :  { %6110 = vmatprep.subr.bf16.mxu0 %v17548_v4  ;;  %6725 = vmatprep.subr.bf16.mxu1 %v17551_v5  ;;  %v17643_v4 = vld [vmem:[#allocation5 + $0xf6c] ss:$16 sps:$4 sm:$0xff]   ;;  %v17638_v5 = vld [vmem:[#allocation5 + $0xf60] ss:$16 sps:$4 sm:$0xff]  }
 0x244   :  { %6111 = vmatpush1.bf16.msra.mxu0 %v17546_v6  ;;  %6726 = vmatpush1.bf16.msra.mxu1 %v17549_v7  ;;  %v17641_v6 = vld [vmem:[#allocation5 + $0xf68] ss:$16 sps:$4 sm:$0xff]   ;;  %v17646_v7 = vld [vmem:[#allocation5 + $0xf84] ss:$16 sps:$4 sm:$0xff]  }
 0x245   :  { %6112 = vmatprep.subr.bf16.mxu0 %v17554_v8  ;;  %6727 = vmatprep.subr.bf16.mxu1 %v17557_v9  ;;  %v17649_v8 = vld [vmem:[#allocation5 + $0xf8c] ss:$16 sps:$4 sm:$0xff]   ;;  %v17644_v9 = vld [vmem:[#allocation5 + $0xf80] ss:$16 sps:$4 sm:$0xff]  }
 0x248   :  { %6113 = vmatpush1.bf16.msra.mxu0 %v17552_v10  ;;  %6728 = vmatpush1.bf16.msra.mxu1 %v17555_v12  ;;  %v17647_v10 = vld [vmem:[#allocation5 + $0xf88] ss:$16 sps:$4 sm:$0xff]   ;;  %v17652_v12 = vld [vmem:[#allocation5 + $0xfa4] ss:$16 sps:$4 sm:$0xff]  }
 0x249   :  { %6114 = vmatprep.subr.bf16.mxu0 %v17560_v13  ;;  %6729 = vmatprep.subr.bf16.mxu1 %v17563_v15  ;;  %v17655_v13 = vld [vmem:[#allocation5 + $0xfac] ss:$16 sps:$4 sm:$0xff]   ;;  %v17650_v15 = vld [vmem:[#allocation5 + $0xfa0] ss:$16 sps:$4 sm:$0xff]  }
 0x24c   :  { %6115 = vmatpush1.bf16.msra.mxu0 %v17558_v16  ;;  %6730 = vmatpush1.bf16.msra.mxu1 %v17561_v18  ;;  %v17653_v16 = vld [vmem:[#allocation5 + $0xfa8] ss:$16 sps:$4 sm:$0xff]   ;;  %v17658_v18 = vld [vmem:[#allocation5 + $0xfc4] ss:$16 sps:$4 sm:$0xff]  }
 0x24d   :  { %6116 = vmatprep.subr.bf16.mxu0 %v17566_v20  ;;  %6731 = vmatprep.subr.bf16.mxu1 %v17569_v11  ;;  %v17661_v20 = vld [vmem:[#allocation5 + $0xfcc] ss:$16 sps:$4 sm:$0xff]   ;;  %v17656_v11 = vld [vmem:[#allocation5 + $0xfc0] ss:$16 sps:$4 sm:$0xff]  }
 0x250   :  { %6117 = vmatpush1.bf16.msra.mxu0 %v17564_v21  ;;  %6732 = vmatpush1.bf16.msra.mxu1 %v17567_v14  ;;  %v17659_v21 = vld [vmem:[#allocation5 + $0xfc8] ss:$16 sps:$4 sm:$0xff]   ;;  %v17664_v14 = vld [vmem:[#allocation5 + $0xfe4] ss:$16 sps:$4 sm:$0xff]  }
 0x251   :  { %6127 = vmatprep.subr.bf16.mxu0 %v17574_v23  ;;  %6742 = vmatprep.subr.bf16.mxu1 %v17577_v24  ;;  %v17667_v23 = vld [vmem:[#allocation5 + $0xfec] ss:$16 sps:$4 sm:$0xff]   ;;  %v17662_v24 = vld [vmem:[#allocation5 + $0xfe0] ss:$16 sps:$4 sm:$0xff]  }
 0x253   :  { %6119 = vmatmul.mubr.bf16.vlgmr.msra.gmra.mrb[0].mxu0 %v14668_v17  ;;  %6734 = vmatmul.mubr.bf16.vlgmr.msra.gmra.mrb[0].mxu1 %v14668_v17  ;;  %v17665_v17 = vld [vmem:[#allocation5 + $0xfe8] ss:$16 sps:$4 sm:$0xff]  }
 0x254   :  { %6128 = vmatpush1.bf16.msra.mxu0 %v17572_v26  ;;  %6743 = vmatpush1.bf16.msra.mxu1 %v17575_v27  ;;  %v17672_v26 = vld [vmem:[#allocation5 + $0x1004] ss:$16 sps:$4 sm:$0xff]   ;;  %v17675_v27 = vld [vmem:[#allocation5 + $0x100c] ss:$16 sps:$4 sm:$0xff]  }
 0x255   :  { %6129 = vmatprep.subr.bf16.mxu0 %v17580_v28  ;;  %6744 = vmatprep.subr.bf16.mxu1 %v17583_v19  ;;  %v20145_v28 = vld [vmem:[#allocation2 + $0x40] sm:$0xff]  ;;  %v14670_v19 = vcombine.low %v20139_v25, %v20139_v25  ;;  %v17684_v25 = vld [vmem:[#allocation5 + $0x1044] ss:$16 sps:$4 sm:$0xff]  }
 0x256   :  { %6159 = vmatprep.mubr.bf16.mxu0 %v14671_v29  ;;  %6774 = vmatprep.mubr.bf16.mxu1 %v14671_v29  ;;  %v17670_v29 = vld [vmem:[#allocation5 + $0x1000] ss:$16 sps:$4 sm:$0xff]  }
 0x258   :  { %6130 = vmatpush1.bf16.msra.mxu0 %v17578_v30  ;;  %6745 = vmatpush1.bf16.msra.mxu1 %v17581_v31  ;;  %v17673_v30 = vld [vmem:[#allocation5 + $0x1008] ss:$16 sps:$4 sm:$0xff]   ;;  %v17678_v31 = vld [vmem:[#allocation5 + $0x1024] ss:$16 sps:$4 sm:$0xff]  }
 0x259   :  { %6131 = vmatprep.subr.bf16.mxu0 %v17586_v22  ;;  %6746 = vmatprep.subr.bf16.mxu1 %v17589_v32  ;;  %v17681_v22 = vld [vmem:[#allocation5 + $0x102c] ss:$16 sps:$4 sm:$0xff]   ;;  %v14673_v32 = vcombine.high %v20145_v28, %v20145_v28 }
 0x25c   :  { %6132 = vmatpush1.bf16.msra.mxu0 %v17584_v33  ;;  %6747 = vmatpush1.bf16.msra.mxu1 %v17587_v34  ;;  %v17676_v33 = vld [vmem:[#allocation5 + $0x1020] ss:$16 sps:$4 sm:$0xff]   ;;  %v17679_v34 = vld [vmem:[#allocation5 + $0x1028] ss:$16 sps:$4 sm:$0xff]  }
 0x25d   :  { %6133 = vmatprep.subr.bf16.mxu0 %v17592_v35  ;;  %6748 = vmatprep.subr.bf16.mxu1 %v17595_v36  ;;  %v17687_v35 = vld [vmem:[#allocation5 + $0x104c] ss:$16 sps:$4 sm:$0xff]   ;;  %v17682_v36 = vld [vmem:[#allocation5 + $0x1040] ss:$16 sps:$4 sm:$0xff]  }
 0x260   :  { %6134 = vmatpush1.bf16.msra.mxu0 %v17590_v37  ;;  %6749 = vmatpush1.bf16.msra.mxu1 %v17593_v38  ;;  %v17685_v37 = vld [vmem:[#allocation5 + $0x1048] ss:$16 sps:$4 sm:$0xff]   ;;  %v17690_v38 = vld [vmem:[#allocation5 + $0x1064] ss:$16 sps:$4 sm:$0xff]  }
 0x261   :  { %6135 = vmatprep.subr.bf16.mxu0 %v17598_v39  ;;  %6750 = vmatprep.subr.bf16.mxu1 %v17601_v40  ;;  %v17693_v39 = vld [vmem:[#allocation5 + $0x106c] ss:$16 sps:$4 sm:$0xff]   ;;  %v17688_v40 = vld [vmem:[#allocation5 + $0x1060] ss:$16 sps:$4 sm:$0xff]  }
 0x264   :  { %6136 = vmatpush1.bf16.msra.mxu0 %v17596_v41  ;;  %6751 = vmatpush1.bf16.msra.mxu1 %v17599_v42  ;;  %v17691_v41 = vld [vmem:[#allocation5 + $0x1068] ss:$16 sps:$4 sm:$0xff]   ;;  %v17696_v42 = vld [vmem:[#allocation5 + $0x1084] ss:$16 sps:$4 sm:$0xff]  }
 0x265   :  { %6137 = vmatprep.subr.bf16.mxu0 %v17604_v43  ;;  %6752 = vmatprep.subr.bf16.mxu1 %v17607_v44  ;;  %v17699_v43 = vld [vmem:[#allocation5 + $0x108c] ss:$16 sps:$4 sm:$0xff]   ;;  %v17694_v44 = vld [vmem:[#allocation5 + $0x1080] ss:$16 sps:$4 sm:$0xff]  }
 0x268   :  { %6138 = vmatpush1.bf16.msra.mxu0 %v17602_v45  ;;  %6753 = vmatpush1.bf16.msra.mxu1 %v17605_v46  ;;  %v17697_v45 = vld [vmem:[#allocation5 + $0x1088] ss:$16 sps:$4 sm:$0xff]   ;;  %v17702_v46 = vld [vmem:[#allocation5 + $0x10a4] ss:$16 sps:$4 sm:$0xff]  }
 0x269   :  { %6139 = vmatprep.subr.bf16.mxu0 %v17610_v47  ;;  %6754 = vmatprep.subr.bf16.mxu1 %v17613_v48  ;;  %v17705_v47 = vld [vmem:[#allocation5 + $0x10ac] ss:$16 sps:$4 sm:$0xff]   ;;  %v17700_v48 = vld [vmem:[#allocation5 + $0x10a0] ss:$16 sps:$4 sm:$0xff]  }
 0x26c   :  { %6140 = vmatpush1.bf16.msra.mxu0 %v17608_v49  ;;  %6755 = vmatpush1.bf16.msra.mxu1 %v17611_v50  ;;  %v17703_v49 = vld [vmem:[#allocation5 + $0x10a8] ss:$16 sps:$4 sm:$0xff]   ;;  %v17708_v50 = vld [vmem:[#allocation5 + $0x10c4] ss:$16 sps:$4 sm:$0xff]  }
 0x26d   :  { %6141 = vmatprep.subr.bf16.mxu0 %v17616_v51  ;;  %6756 = vmatprep.subr.bf16.mxu1 %v17619_v52  ;;  %v17711_v51 = vld [vmem:[#allocation5 + $0x10cc] ss:$16 sps:$4 sm:$0xff]   ;;  %v17706_v52 = vld [vmem:[#allocation5 + $0x10c0] ss:$16 sps:$4 sm:$0xff]  }
 0x270   :  { %6142 = vmatpush1.bf16.msra.mxu0 %v17614_v53  ;;  %6757 = vmatpush1.bf16.msra.mxu1 %v17617_v54  ;;  %v17709_v53 = vld [vmem:[#allocation5 + $0x10c8] ss:$16 sps:$4 sm:$0xff]   ;;  %v17714_v54 = vld [vmem:[#allocation5 + $0x10e4] ss:$16 sps:$4 sm:$0xff]  }
 0x271   :  { %6143 = vmatprep.subr.bf16.mxu0 %v17622_v55  ;;  %6758 = vmatprep.subr.bf16.mxu1 %v17625_v56  ;;  %v17717_v55 = vld [vmem:[#allocation5 + $0x10ec] ss:$16 sps:$4 sm:$0xff]   ;;  %v17712_v56 = vld [vmem:[#allocation5 + $0x10e0] ss:$16 sps:$4 sm:$0xff]  }
 0x274   :  { %6144 = vmatpush1.bf16.msra.mxu0 %v17620_v57  ;;  %6759 = vmatpush1.bf16.msra.mxu1 %v17623_v58  ;;  %v17715_v57 = vld [vmem:[#allocation5 + $0x10e8] ss:$16 sps:$4 sm:$0xff]   ;;  %v17720_v58 = vld [vmem:[#allocation5 + $0x1104] ss:$16 sps:$4 sm:$0xff]  }
 0x275   :  { %6145 = vmatprep.subr.bf16.mxu0 %v17628_v59  ;;  %6760 = vmatprep.subr.bf16.mxu1 %v17631_v60  ;;  %v17723_v59 = vld [vmem:[#allocation5 + $0x110c] ss:$16 sps:$4 sm:$0xff]   ;;  %v17718_v60 = vld [vmem:[#allocation5 + $0x1100] ss:$16 sps:$4 sm:$0xff]  }
 0x278   :  { %6146 = vmatpush1.bf16.msra.mxu0 %v17626_v61  ;;  %6761 = vmatpush1.bf16.msra.mxu1 %v17629_v62  ;;  %v17721_v61 = vld [vmem:[#allocation5 + $0x1108] ss:$16 sps:$4 sm:$0xff]   ;;  %v17726_v62 = vld [vmem:[#allocation5 + $0x1124] ss:$16 sps:$4 sm:$0xff]  }
 0x279   :  { %6147 = vmatprep.subr.bf16.mxu0 %v17634_v63  ;;  %6762 = vmatprep.subr.bf16.mxu1 %v17637_v0  ;;  %v17729_v63 = vld [vmem:[#allocation5 + $0x112c] ss:$16 sps:$4 sm:$0xff]   ;;  %v17724_v0 = vld [vmem:[#allocation5 + $0x1120] ss:$16 sps:$4 sm:$0xff]  }
 0x27c   :  { %6148 = vmatpush1.bf16.msra.mxu0 %v17632_v1  ;;  %6763 = vmatpush1.bf16.msra.mxu1 %v17635_v2  ;;  %v17727_v1 = vld [vmem:[#allocation5 + $0x1128] ss:$16 sps:$4 sm:$0xff]   ;;  %v17732_v2 = vld [vmem:[#allocation5 + $0x1144] ss:$16 sps:$4 sm:$0xff]  }
 0x27d   :  { %6149 = vmatprep.subr.bf16.mxu0 %v17640_v3  ;;  %6764 = vmatprep.subr.bf16.mxu1 %v17643_v4  ;;  %v17735_v3 = vld [vmem:[#allocation5 + $0x114c] ss:$16 sps:$4 sm:$0xff]   ;;  %v17730_v4 = vld [vmem:[#allocation5 + $0x1140] ss:$16 sps:$4 sm:$0xff]  }
 0x280   :  { %6150 = vmatpush1.bf16.msra.mxu0 %v17638_v5  ;;  %6765 = vmatpush1.bf16.msra.mxu1 %v17641_v6  ;;  %v17733_v5 = vld [vmem:[#allocation5 + $0x1148] ss:$16 sps:$4 sm:$0xff]   ;;  %v17738_v6 = vld [vmem:[#allocation5 + $0x1164] ss:$16 sps:$4 sm:$0xff]  }
 0x281   :  { %6151 = vmatprep.subr.bf16.mxu0 %v17646_v7  ;;  %6766 = vmatprep.subr.bf16.mxu1 %v17649_v8  ;;  %v17741_v7 = vld [vmem:[#allocation5 + $0x116c] ss:$16 sps:$4 sm:$0xff]   ;;  %v17736_v8 = vld [vmem:[#allocation5 + $0x1160] ss:$16 sps:$4 sm:$0xff]  }
 0x284   :  { %6152 = vmatpush1.bf16.msra.mxu0 %v17644_v9  ;;  %6767 = vmatpush1.bf16.msra.mxu1 %v17647_v10  ;;  %v17739_v9 = vld [vmem:[#allocation5 + $0x1168] ss:$16 sps:$4 sm:$0xff]   ;;  %v17744_v10 = vld [vmem:[#allocation5 + $0x1184] ss:$16 sps:$4 sm:$0xff]  }
 0x285   :  { %6153 = vmatprep.subr.bf16.mxu0 %v17652_v12  ;;  %6768 = vmatprep.subr.bf16.mxu1 %v17655_v13  ;;  %v17747_v12 = vld [vmem:[#allocation5 + $0x118c] ss:$16 sps:$4 sm:$0xff]   ;;  %v17742_v13 = vld [vmem:[#allocation5 + $0x1180] ss:$16 sps:$4 sm:$0xff]  }
 0x288   :  { %6154 = vmatpush1.bf16.msra.mxu0 %v17650_v15  ;;  %6769 = vmatpush1.bf16.msra.mxu1 %v17653_v16  ;;  %v17745_v15 = vld [vmem:[#allocation5 + $0x1188] ss:$16 sps:$4 sm:$0xff]   ;;  %v17750_v16 = vld [vmem:[#allocation5 + $0x11a4] ss:$16 sps:$4 sm:$0xff]  }
 0x289   :  { %6155 = vmatprep.subr.bf16.mxu0 %v17658_v18  ;;  %6770 = vmatprep.subr.bf16.mxu1 %v17661_v20  ;;  %v17753_v18 = vld [vmem:[#allocation5 + $0x11ac] ss:$16 sps:$4 sm:$0xff]   ;;  %v17748_v20 = vld [vmem:[#allocation5 + $0x11a0] ss:$16 sps:$4 sm:$0xff]  }
 0x28c   :  { %6156 = vmatpush1.bf16.msra.mxu0 %v17656_v11  ;;  %6771 = vmatpush1.bf16.msra.mxu1 %v17659_v21  ;;  %v17751_v11 = vld [vmem:[#allocation5 + $0x11a8] ss:$16 sps:$4 sm:$0xff]   ;;  %v17756_v21 = vld [vmem:[#allocation5 + $0x11c4] ss:$16 sps:$4 sm:$0xff]  }
 0x28d   :  { %6157 = vmatprep.subr.bf16.mxu0 %v17664_v14  ;;  %6772 = vmatprep.subr.bf16.mxu1 %v17667_v23  ;;  %v17759_v14 = vld [vmem:[#allocation5 + $0x11cc] ss:$16 sps:$4 sm:$0xff]   ;;  %v17754_v23 = vld [vmem:[#allocation5 + $0x11c0] ss:$16 sps:$4 sm:$0xff]  }
 0x290   :  { %6158 = vmatpush1.bf16.msra.mxu0 %v17662_v24  ;;  %6773 = vmatpush1.bf16.msra.mxu1 %v17665_v17  ;;  %v17757_v24 = vld [vmem:[#allocation5 + $0x11c8] ss:$16 sps:$4 sm:$0xff]   ;;  %v17762_v17 = vld [vmem:[#allocation5 + $0x11e4] ss:$16 sps:$4 sm:$0xff]  }
 0x291   :  { %6168 = vmatprep.subr.bf16.mxu0 %v17672_v26  ;;  %6783 = vmatprep.subr.bf16.mxu1 %v17675_v27  ;;  %v17765_v26 = vld [vmem:[#allocation5 + $0x11ec] ss:$16 sps:$4 sm:$0xff]   ;;  %v17760_v27 = vld [vmem:[#allocation5 + $0x11e0] ss:$16 sps:$4 sm:$0xff]  }
 0x293   :  { %6160 = vmatmul.mubr.bf16.vlgmr.msra.gmra.mrb[0].mxu0 %v14670_v19  ;;  %6775 = vmatmul.mubr.bf16.vlgmr.msra.gmra.mrb[0].mxu1 %v14670_v19  ;;  %v17763_v19 = vld [vmem:[#allocation5 + $0x11e8] ss:$16 sps:$4 sm:$0xff]  }
 0x294   :  { %6169 = vmatpush1.bf16.msra.mxu0 %v17670_v29  ;;  %6784 = vmatpush1.bf16.msra.mxu1 %v17673_v30  ;;  %v17770_v29 = vld [vmem:[#allocation5 + $0x1204] ss:$16 sps:$4 sm:$0xff]   ;;  %v17773_v30 = vld [vmem:[#allocation5 + $0x120c] ss:$16 sps:$4 sm:$0xff]  }
 0x295   :  { %6170 = vmatprep.subr.bf16.mxu0 %v17678_v31  ;;  %6785 = vmatprep.subr.bf16.mxu1 %v17681_v22  ;;  %v20151_v31 = vld [vmem:[#allocation2 + $0x48] sm:$0xff]  ;;  %v14672_v22 = vcombine.low %v20145_v28, %v20145_v28 }
 0x296   :  { %6200 = vmatprep.mubr.bf16.mxu0 %v14673_v32  ;;  %6815 = vmatprep.mubr.bf16.mxu1 %v14673_v32  ;;  %v17768_v32 = vld [vmem:[#allocation5 + $0x1200] ss:$16 sps:$4 sm:$0xff]   ;;  %v17782_v28 = vld [vmem:[#allocation5 + $0x1244] ss:$16 sps:$4 sm:$0xff]  }
 0x298   :  { %6171 = vmatpush1.bf16.msra.mxu0 %v17676_v33  ;;  %6786 = vmatpush1.bf16.msra.mxu1 %v17679_v34  ;;  %v17771_v33 = vld [vmem:[#allocation5 + $0x1208] ss:$16 sps:$4 sm:$0xff]   ;;  %v17776_v34 = vld [vmem:[#allocation5 + $0x1224] ss:$16 sps:$4 sm:$0xff]  }
 0x299   :  { %6172 = vmatprep.subr.bf16.mxu0 %v17684_v25  ;;  %6787 = vmatprep.subr.bf16.mxu1 %v17687_v35  ;;  %v17779_v25 = vld [vmem:[#allocation5 + $0x122c] ss:$16 sps:$4 sm:$0xff]   ;;  %v14675_v35 = vcombine.high %v20151_v31, %v20151_v31 }
 0x29c   :  { %6173 = vmatpush1.bf16.msra.mxu0 %v17682_v36  ;;  %6788 = vmatpush1.bf16.msra.mxu1 %v17685_v37  ;;  %v17774_v36 = vld [vmem:[#allocation5 + $0x1220] ss:$16 sps:$4 sm:$0xff]   ;;  %v17777_v37 = vld [vmem:[#allocation5 + $0x1228] ss:$16 sps:$4 sm:$0xff]  }
 0x29d   :  { %6174 = vmatprep.subr.bf16.mxu0 %v17690_v38  ;;  %6789 = vmatprep.subr.bf16.mxu1 %v17693_v39  ;;  %v17785_v38 = vld [vmem:[#allocation5 + $0x124c] ss:$16 sps:$4 sm:$0xff]   ;;  %v17780_v39 = vld [vmem:[#allocation5 + $0x1240] ss:$16 sps:$4 sm:$0xff]  }
 0x2a0   :  { %6175 = vmatpush1.bf16.msra.mxu0 %v17688_v40  ;;  %6790 = vmatpush1.bf16.msra.mxu1 %v17691_v41  ;;  %v17783_v40 = vld [vmem:[#allocation5 + $0x1248] ss:$16 sps:$4 sm:$0xff]   ;;  %v17788_v41 = vld [vmem:[#allocation5 + $0x1264] ss:$16 sps:$4 sm:$0xff]  }
 0x2a1   :  { %6176 = vmatprep.subr.bf16.mxu0 %v17696_v42  ;;  %6791 = vmatprep.subr.bf16.mxu1 %v17699_v43  ;;  %v17791_v42 = vld [vmem:[#allocation5 + $0x126c] ss:$16 sps:$4 sm:$0xff]   ;;  %v17786_v43 = vld [vmem:[#allocation5 + $0x1260] ss:$16 sps:$4 sm:$0xff]  }
 0x2a4   :  { %6177 = vmatpush1.bf16.msra.mxu0 %v17694_v44  ;;  %6792 = vmatpush1.bf16.msra.mxu1 %v17697_v45  ;;  %v17789_v44 = vld [vmem:[#allocation5 + $0x1268] ss:$16 sps:$4 sm:$0xff]   ;;  %v17794_v45 = vld [vmem:[#allocation5 + $0x1284] ss:$16 sps:$4 sm:$0xff]  }
 0x2a5   :  { %6178 = vmatprep.subr.bf16.mxu0 %v17702_v46  ;;  %6793 = vmatprep.subr.bf16.mxu1 %v17705_v47  ;;  %v17797_v46 = vld [vmem:[#allocation5 + $0x128c] ss:$16 sps:$4 sm:$0xff]   ;;  %v17792_v47 = vld [vmem:[#allocation5 + $0x1280] ss:$16 sps:$4 sm:$0xff]  }
 0x2a8   :  { %6179 = vmatpush1.bf16.msra.mxu0 %v17700_v48  ;;  %6794 = vmatpush1.bf16.msra.mxu1 %v17703_v49  ;;  %v17795_v48 = vld [vmem:[#allocation5 + $0x1288] ss:$16 sps:$4 sm:$0xff]   ;;  %v17800_v49 = vld [vmem:[#allocation5 + $0x12a4] ss:$16 sps:$4 sm:$0xff]  }
 0x2a9   :  { %6180 = vmatprep.subr.bf16.mxu0 %v17708_v50  ;;  %6795 = vmatprep.subr.bf16.mxu1 %v17711_v51  ;;  %v17803_v50 = vld [vmem:[#allocation5 + $0x12ac] ss:$16 sps:$4 sm:$0xff]   ;;  %v17798_v51 = vld [vmem:[#allocation5 + $0x12a0] ss:$16 sps:$4 sm:$0xff]  }
 0x2ac   :  { %6181 = vmatpush1.bf16.msra.mxu0 %v17706_v52  ;;  %6796 = vmatpush1.bf16.msra.mxu1 %v17709_v53  ;;  %v17801_v52 = vld [vmem:[#allocation5 + $0x12a8] ss:$16 sps:$4 sm:$0xff]   ;;  %v17806_v53 = vld [vmem:[#allocation5 + $0x12c4] ss:$16 sps:$4 sm:$0xff]  }
 0x2ad   :  { %6182 = vmatprep.subr.bf16.mxu0 %v17714_v54  ;;  %6797 = vmatprep.subr.bf16.mxu1 %v17717_v55  ;;  %v17809_v54 = vld [vmem:[#allocation5 + $0x12cc] ss:$16 sps:$4 sm:$0xff]   ;;  %v17804_v55 = vld [vmem:[#allocation5 + $0x12c0] ss:$16 sps:$4 sm:$0xff]  }
 0x2b0   :  { %6183 = vmatpush1.bf16.msra.mxu0 %v17712_v56  ;;  %6798 = vmatpush1.bf16.msra.mxu1 %v17715_v57  ;;  %v17807_v56 = vld [vmem:[#allocation5 + $0x12c8] ss:$16 sps:$4 sm:$0xff]   ;;  %v17812_v57 = vld [vmem:[#allocation5 + $0x12e4] ss:$16 sps:$4 sm:$0xff]  }
 0x2b1   :  { %6184 = vmatprep.subr.bf16.mxu0 %v17720_v58  ;;  %6799 = vmatprep.subr.bf16.mxu1 %v17723_v59  ;;  %v17815_v58 = vld [vmem:[#allocation5 + $0x12ec] ss:$16 sps:$4 sm:$0xff]   ;;  %v17810_v59 = vld [vmem:[#allocation5 + $0x12e0] ss:$16 sps:$4 sm:$0xff]  }
 0x2b4   :  { %6185 = vmatpush1.bf16.msra.mxu0 %v17718_v60  ;;  %6800 = vmatpush1.bf16.msra.mxu1 %v17721_v61  ;;  %v17813_v60 = vld [vmem:[#allocation5 + $0x12e8] ss:$16 sps:$4 sm:$0xff]   ;;  %v17818_v61 = vld [vmem:[#allocation5 + $0x1304] ss:$16 sps:$4 sm:$0xff]  }
 0x2b5   :  { %6186 = vmatprep.subr.bf16.mxu0 %v17726_v62  ;;  %6801 = vmatprep.subr.bf16.mxu1 %v17729_v63  ;;  %v17821_v62 = vld [vmem:[#allocation5 + $0x130c] ss:$16 sps:$4 sm:$0xff]   ;;  %v17816_v63 = vld [vmem:[#allocation5 + $0x1300] ss:$16 sps:$4 sm:$0xff]  }
 0x2b8   :  { %6187 = vmatpush1.bf16.msra.mxu0 %v17724_v0  ;;  %6802 = vmatpush1.bf16.msra.mxu1 %v17727_v1  ;;  %v17819_v0 = vld [vmem:[#allocation5 + $0x1308] ss:$16 sps:$4 sm:$0xff]   ;;  %v17824_v1 = vld [vmem:[#allocation5 + $0x1324] ss:$16 sps:$4 sm:$0xff]  }
 0x2b9   :  { %6188 = vmatprep.subr.bf16.mxu0 %v17732_v2  ;;  %6803 = vmatprep.subr.bf16.mxu1 %v17735_v3  ;;  %v17827_v2 = vld [vmem:[#allocation5 + $0x132c] ss:$16 sps:$4 sm:$0xff]   ;;  %v17822_v3 = vld [vmem:[#allocation5 + $0x1320] ss:$16 sps:$4 sm:$0xff]  }
 0x2bc   :  { %6189 = vmatpush1.bf16.msra.mxu0 %v17730_v4  ;;  %6804 = vmatpush1.bf16.msra.mxu1 %v17733_v5  ;;  %v17825_v4 = vld [vmem:[#allocation5 + $0x1328] ss:$16 sps:$4 sm:$0xff]   ;;  %v17830_v5 = vld [vmem:[#allocation5 + $0x1344] ss:$16 sps:$4 sm:$0xff]  }
 0x2bd   :  { %6190 = vmatprep.subr.bf16.mxu0 %v17738_v6  ;;  %6805 = vmatprep.subr.bf16.mxu1 %v17741_v7  ;;  %v17833_v6 = vld [vmem:[#allocation5 + $0x134c] ss:$16 sps:$4 sm:$0xff]   ;;  %v17828_v7 = vld [vmem:[#allocation5 + $0x1340] ss:$16 sps:$4 sm:$0xff]  }
 0x2c0   :  { %6191 = vmatpush1.bf16.msra.mxu0 %v17736_v8  ;;  %6806 = vmatpush1.bf16.msra.mxu1 %v17739_v9  ;;  %v17831_v8 = vld [vmem:[#allocation5 + $0x1348] ss:$16 sps:$4 sm:$0xff]   ;;  %v17836_v9 = vld [vmem:[#allocation5 + $0x1364] ss:$16 sps:$4 sm:$0xff]  }
 0x2c1   :  { %6192 = vmatprep.subr.bf16.mxu0 %v17744_v10  ;;  %6807 = vmatprep.subr.bf16.mxu1 %v17747_v12  ;;  %v17839_v10 = vld [vmem:[#allocation5 + $0x136c] ss:$16 sps:$4 sm:$0xff]   ;;  %v17834_v12 = vld [vmem:[#allocation5 + $0x1360] ss:$16 sps:$4 sm:$0xff]  }
 0x2c4   :  { %6193 = vmatpush1.bf16.msra.mxu0 %v17742_v13  ;;  %6808 = vmatpush1.bf16.msra.mxu1 %v17745_v15  ;;  %v17837_v13 = vld [vmem:[#allocation5 + $0x1368] ss:$16 sps:$4 sm:$0xff]   ;;  %v17842_v15 = vld [vmem:[#allocation5 + $0x1384] ss:$16 sps:$4 sm:$0xff]  }
 0x2c5   :  { %6194 = vmatprep.subr.bf16.mxu0 %v17750_v16  ;;  %6809 = vmatprep.subr.bf16.mxu1 %v17753_v18  ;;  %v17845_v16 = vld [vmem:[#allocation5 + $0x138c] ss:$16 sps:$4 sm:$0xff]   ;;  %v17840_v18 = vld [vmem:[#allocation5 + $0x1380] ss:$16 sps:$4 sm:$0xff]  }
 0x2c8   :  { %6195 = vmatpush1.bf16.msra.mxu0 %v17748_v20  ;;  %6810 = vmatpush1.bf16.msra.mxu1 %v17751_v11  ;;  %v17843_v20 = vld [vmem:[#allocation5 + $0x1388] ss:$16 sps:$4 sm:$0xff]   ;;  %v17848_v11 = vld [vmem:[#allocation5 + $0x13a4] ss:$16 sps:$4 sm:$0xff]  }
 0x2c9   :  { %6196 = vmatprep.subr.bf16.mxu0 %v17756_v21  ;;  %6811 = vmatprep.subr.bf16.mxu1 %v17759_v14  ;;  %v17851_v21 = vld [vmem:[#allocation5 + $0x13ac] ss:$16 sps:$4 sm:$0xff]   ;;  %v17846_v14 = vld [vmem:[#allocation5 + $0x13a0] ss:$16 sps:$4 sm:$0xff]  }
 0x2cc   :  { %6197 = vmatpush1.bf16.msra.mxu0 %v17754_v23  ;;  %6812 = vmatpush1.bf16.msra.mxu1 %v17757_v24  ;;  %v17849_v23 = vld [vmem:[#allocation5 + $0x13a8] ss:$16 sps:$4 sm:$0xff]   ;;  %v17854_v24 = vld [vmem:[#allocation5 + $0x13c4] ss:$16 sps:$4 sm:$0xff]  }
 0x2cd   :  { %6198 = vmatprep.subr.bf16.mxu0 %v17762_v17  ;;  %6813 = vmatprep.subr.bf16.mxu1 %v17765_v26  ;;  %v17857_v17 = vld [vmem:[#allocation5 + $0x13cc] ss:$16 sps:$4 sm:$0xff]   ;;  %v17852_v26 = vld [vmem:[#allocation5 + $0x13c0] ss:$16 sps:$4 sm:$0xff]  }
 0x2d0   :  { %6199 = vmatpush1.bf16.msra.mxu0 %v17760_v27  ;;  %6814 = vmatpush1.bf16.msra.mxu1 %v17763_v19  ;;  %v17855_v27 = vld [vmem:[#allocation5 + $0x13c8] ss:$16 sps:$4 sm:$0xff]   ;;  %v17860_v19 = vld [vmem:[#allocation5 + $0x13e4] ss:$16 sps:$4 sm:$0xff]  }
 0x2d1   :  { %6209 = vmatprep.subr.bf16.mxu0 %v17770_v29  ;;  %6824 = vmatprep.subr.bf16.mxu1 %v17773_v30  ;;  %v17863_v29 = vld [vmem:[#allocation5 + $0x13ec] ss:$16 sps:$4 sm:$0xff]   ;;  %v17858_v30 = vld [vmem:[#allocation5 + $0x13e0] ss:$16 sps:$4 sm:$0xff]  }
 0x2d3   :  { %6201 = vmatmul.mubr.bf16.vlgmr.msra.gmra.mrb[0].mxu0 %v14672_v22  ;;  %6816 = vmatmul.mubr.bf16.vlgmr.msra.gmra.mrb[0].mxu1 %v14672_v22  ;;  %v17861_v22 = vld [vmem:[#allocation5 + $0x13e8] ss:$16 sps:$4 sm:$0xff]  }
 0x2d4   :  { %6210 = vmatpush1.bf16.msra.mxu0 %v17768_v32  ;;  %6825 = vmatpush1.bf16.msra.mxu1 %v17771_v33  ;;  %v17868_v32 = vld [vmem:[#allocation5 + $0x1404] ss:$16 sps:$4 sm:$0xff]   ;;  %v17871_v33 = vld [vmem:[#allocation5 + $0x140c] ss:$16 sps:$4 sm:$0xff]  }
 0x2d5   :  { %6211 = vmatprep.subr.bf16.mxu0 %v17776_v34  ;;  %6826 = vmatprep.subr.bf16.mxu1 %v17779_v25  ;;  %v20157_v34 = vld [vmem:[#allocation2 + $0x50] sm:$0xff]  ;;  %v14674_v25 = vcombine.low %v20151_v31, %v20151_v31  ;;  %v17880_v31 = vld [vmem:[#allocation5 + $0x1444] ss:$16 sps:$4 sm:$0xff]  }
 0x2d6   :  { %6241 = vmatprep.mubr.bf16.mxu0 %v14675_v35  ;;  %6856 = vmatprep.mubr.bf16.mxu1 %v14675_v35  ;;  %v17866_v35 = vld [vmem:[#allocation5 + $0x1400] ss:$16 sps:$4 sm:$0xff]  }
 0x2d8   :  { %6212 = vmatpush1.bf16.msra.mxu0 %v17774_v36  ;;  %6827 = vmatpush1.bf16.msra.mxu1 %v17777_v37  ;;  %v17869_v36 = vld [vmem:[#allocation5 + $0x1408] ss:$16 sps:$4 sm:$0xff]   ;;  %v17874_v37 = vld [vmem:[#allocation5 + $0x1424] ss:$16 sps:$4 sm:$0xff]  }
 0x2d9   :  { %6213 = vmatprep.subr.bf16.mxu0 %v17782_v28  ;;  %6828 = vmatprep.subr.bf16.mxu1 %v17785_v38  ;;  %v17877_v28 = vld [vmem:[#allocation5 + $0x142c] ss:$16 sps:$4 sm:$0xff]   ;;  %v14677_v38 = vcombine.high %v20157_v34, %v20157_v34 }
 0x2dc   :  { %6214 = vmatpush1.bf16.msra.mxu0 %v17780_v39  ;;  %6829 = vmatpush1.bf16.msra.mxu1 %v17783_v40  ;;  %v17872_v39 = vld [vmem:[#allocation5 + $0x1420] ss:$16 sps:$4 sm:$0xff]   ;;  %v17875_v40 = vld [vmem:[#allocation5 + $0x1428] ss:$16 sps:$4 sm:$0xff]  }
 0x2dd   :  { %6215 = vmatprep.subr.bf16.mxu0 %v17788_v41  ;;  %6830 = vmatprep.subr.bf16.mxu1 %v17791_v42  ;;  %v17883_v41 = vld [vmem:[#allocation5 + $0x144c] ss:$16 sps:$4 sm:$0xff]   ;;  %v17878_v42 = vld [vmem:[#allocation5 + $0x1440] ss:$16 sps:$4 sm:$0xff]  }
 0x2e0   :  { %6216 = vmatpush1.bf16.msra.mxu0 %v17786_v43  ;;  %6831 = vmatpush1.bf16.msra.mxu1 %v17789_v44  ;;  %v17881_v43 = vld [vmem:[#allocation5 + $0x1448] ss:$16 sps:$4 sm:$0xff]   ;;  %v17886_v44 = vld [vmem:[#allocation5 + $0x1464] ss:$16 sps:$4 sm:$0xff]  }
 0x2e1   :  { %6217 = vmatprep.subr.bf16.mxu0 %v17794_v45  ;;  %6832 = vmatprep.subr.bf16.mxu1 %v17797_v46  ;;  %v17889_v45 = vld [vmem:[#allocation5 + $0x146c] ss:$16 sps:$4 sm:$0xff]   ;;  %v17884_v46 = vld [vmem:[#allocation5 + $0x1460] ss:$16 sps:$4 sm:$0xff]  }
 0x2e4   :  { %6218 = vmatpush1.bf16.msra.mxu0 %v17792_v47  ;;  %6833 = vmatpush1.bf16.msra.mxu1 %v17795_v48  ;;  %v17887_v47 = vld [vmem:[#allocation5 + $0x1468] ss:$16 sps:$4 sm:$0xff]   ;;  %v17892_v48 = vld [vmem:[#allocation5 + $0x1484] ss:$16 sps:$4 sm:$0xff]  }
 0x2e5   :  { %6219 = vmatprep.subr.bf16.mxu0 %v17800_v49  ;;  %6834 = vmatprep.subr.bf16.mxu1 %v17803_v50  ;;  %v17895_v49 = vld [vmem:[#allocation5 + $0x148c] ss:$16 sps:$4 sm:$0xff]   ;;  %v17890_v50 = vld [vmem:[#allocation5 + $0x1480] ss:$16 sps:$4 sm:$0xff]  }
 0x2e8   :  { %6220 = vmatpush1.bf16.msra.mxu0 %v17798_v51  ;;  %6835 = vmatpush1.bf16.msra.mxu1 %v17801_v52  ;;  %v17893_v51 = vld [vmem:[#allocation5 + $0x1488] ss:$16 sps:$4 sm:$0xff]   ;;  %v17898_v52 = vld [vmem:[#allocation5 + $0x14a4] ss:$16 sps:$4 sm:$0xff]  }
 0x2e9   :  { %6221 = vmatprep.subr.bf16.mxu0 %v17806_v53  ;;  %6836 = vmatprep.subr.bf16.mxu1 %v17809_v54  ;;  %v17901_v53 = vld [vmem:[#allocation5 + $0x14ac] ss:$16 sps:$4 sm:$0xff]   ;;  %v17896_v54 = vld [vmem:[#allocation5 + $0x14a0] ss:$16 sps:$4 sm:$0xff]  }
 0x2ec   :  { %6222 = vmatpush1.bf16.msra.mxu0 %v17804_v55  ;;  %6837 = vmatpush1.bf16.msra.mxu1 %v17807_v56  ;;  %v17899_v55 = vld [vmem:[#allocation5 + $0x14a8] ss:$16 sps:$4 sm:$0xff]   ;;  %v17904_v56 = vld [vmem:[#allocation5 + $0x14c4] ss:$16 sps:$4 sm:$0xff]  }
 0x2ed   :  { %6223 = vmatprep.subr.bf16.mxu0 %v17812_v57  ;;  %6838 = vmatprep.subr.bf16.mxu1 %v17815_v58  ;;  %v17907_v57 = vld [vmem:[#allocation5 + $0x14cc] ss:$16 sps:$4 sm:$0xff]   ;;  %v17902_v58 = vld [vmem:[#allocation5 + $0x14c0] ss:$16 sps:$4 sm:$0xff]  }
 0x2f0   :  { %6224 = vmatpush1.bf16.msra.mxu0 %v17810_v59  ;;  %6839 = vmatpush1.bf16.msra.mxu1 %v17813_v60  ;;  %v17905_v59 = vld [vmem:[#allocation5 + $0x14c8] ss:$16 sps:$4 sm:$0xff]   ;;  %v17910_v60 = vld [vmem:[#allocation5 + $0x14e4] ss:$16 sps:$4 sm:$0xff]  }
 0x2f1   :  { %6225 = vmatprep.subr.bf16.mxu0 %v17818_v61  ;;  %6840 = vmatprep.subr.bf16.mxu1 %v17821_v62  ;;  %v17913_v61 = vld [vmem:[#allocation5 + $0x14ec] ss:$16 sps:$4 sm:$0xff]   ;;  %v17908_v62 = vld [vmem:[#allocation5 + $0x14e0] ss:$16 sps:$4 sm:$0xff]  }
 0x2f4   :  { %6226 = vmatpush1.bf16.msra.mxu0 %v17816_v63  ;;  %6841 = vmatpush1.bf16.msra.mxu1 %v17819_v0  ;;  %v17911_v63 = vld [vmem:[#allocation5 + $0x14e8] ss:$16 sps:$4 sm:$0xff]   ;;  %v17916_v0 = vld [vmem:[#allocation5 + $0x1504] ss:$16 sps:$4 sm:$0xff]  }
 0x2f5   :  { %6227 = vmatprep.subr.bf16.mxu0 %v17824_v1  ;;  %6842 = vmatprep.subr.bf16.mxu1 %v17827_v2  ;;  %v17919_v1 = vld [vmem:[#allocation5 + $0x150c] ss:$16 sps:$4 sm:$0xff]   ;;  %v17914_v2 = vld [vmem:[#allocation5 + $0x1500] ss:$16 sps:$4 sm:$0xff]  }
 0x2f8   :  { %6228 = vmatpush1.bf16.msra.mxu0 %v17822_v3  ;;  %6843 = vmatpush1.bf16.msra.mxu1 %v17825_v4  ;;  %v17917_v3 = vld [vmem:[#allocation5 + $0x1508] ss:$16 sps:$4 sm:$0xff]   ;;  %v17922_v4 = vld [vmem:[#allocation5 + $0x1524] ss:$16 sps:$4 sm:$0xff]  }
 0x2f9   :  { %6229 = vmatprep.subr.bf16.mxu0 %v17830_v5  ;;  %6844 = vmatprep.subr.bf16.mxu1 %v17833_v6  ;;  %v17925_v5 = vld [vmem:[#allocation5 + $0x152c] ss:$16 sps:$4 sm:$0xff]   ;;  %v17920_v6 = vld [vmem:[#allocation5 + $0x1520] ss:$16 sps:$4 sm:$0xff]  }
 0x2fc   :  { %6230 = vmatpush1.bf16.msra.mxu0 %v17828_v7  ;;  %6845 = vmatpush1.bf16.msra.mxu1 %v17831_v8  ;;  %v17923_v7 = vld [vmem:[#allocation5 + $0x1528] ss:$16 sps:$4 sm:$0xff]   ;;  %v17928_v8 = vld [vmem:[#allocation5 + $0x1544] ss:$16 sps:$4 sm:$0xff]  }
 0x2fd   :  { %6231 = vmatprep.subr.bf16.mxu0 %v17836_v9  ;;  %6846 = vmatprep.subr.bf16.mxu1 %v17839_v10  ;;  %v17931_v9 = vld [vmem:[#allocation5 + $0x154c] ss:$16 sps:$4 sm:$0xff]   ;;  %v17926_v10 = vld [vmem:[#allocation5 + $0x1540] ss:$16 sps:$4 sm:$0xff]  }
 0x300   :  { %6232 = vmatpush1.bf16.msra.mxu0 %v17834_v12  ;;  %6847 = vmatpush1.bf16.msra.mxu1 %v17837_v13  ;;  %v17929_v12 = vld [vmem:[#allocation5 + $0x1548] ss:$16 sps:$4 sm:$0xff]   ;;  %v17934_v13 = vld [vmem:[#allocation5 + $0x1564] ss:$16 sps:$4 sm:$0xff]  }
 0x301   :  { %6233 = vmatprep.subr.bf16.mxu0 %v17842_v15  ;;  %6848 = vmatprep.subr.bf16.mxu1 %v17845_v16  ;;  %v17937_v15 = vld [vmem:[#allocation5 + $0x156c] ss:$16 sps:$4 sm:$0xff]   ;;  %v17932_v16 = vld [vmem:[#allocation5 + $0x1560] ss:$16 sps:$4 sm:$0xff]  }
 0x304   :  { %6234 = vmatpush1.bf16.msra.mxu0 %v17840_v18  ;;  %6849 = vmatpush1.bf16.msra.mxu1 %v17843_v20  ;;  %v17935_v18 = vld [vmem:[#allocation5 + $0x1568] ss:$16 sps:$4 sm:$0xff]   ;;  %v17940_v20 = vld [vmem:[#allocation5 + $0x1584] ss:$16 sps:$4 sm:$0xff]  }
 0x305   :  { %6235 = vmatprep.subr.bf16.mxu0 %v17848_v11  ;;  %6850 = vmatprep.subr.bf16.mxu1 %v17851_v21  ;;  %v17943_v11 = vld [vmem:[#allocation5 + $0x158c] ss:$16 sps:$4 sm:$0xff]   ;;  %v17938_v21 = vld [vmem:[#allocation5 + $0x1580] ss:$16 sps:$4 sm:$0xff]  }
 0x308   :  { %6236 = vmatpush1.bf16.msra.mxu0 %v17846_v14  ;;  %6851 = vmatpush1.bf16.msra.mxu1 %v17849_v23  ;;  %v17941_v14 = vld [vmem:[#allocation5 + $0x1588] ss:$16 sps:$4 sm:$0xff]   ;;  %v17946_v23 = vld [vmem:[#allocation5 + $0x15a4] ss:$16 sps:$4 sm:$0xff]  }
 0x309   :  { %6237 = vmatprep.subr.bf16.mxu0 %v17854_v24  ;;  %6852 = vmatprep.subr.bf16.mxu1 %v17857_v17  ;;  %v17949_v24 = vld [vmem:[#allocation5 + $0x15ac] ss:$16 sps:$4 sm:$0xff]   ;;  %v17944_v17 = vld [vmem:[#allocation5 + $0x15a0] ss:$16 sps:$4 sm:$0xff]  }
 0x30c   :  { %6238 = vmatpush1.bf16.msra.mxu0 %v17852_v26  ;;  %6853 = vmatpush1.bf16.msra.mxu1 %v17855_v27  ;;  %v17947_v26 = vld [vmem:[#allocation5 + $0x15a8] ss:$16 sps:$4 sm:$0xff]   ;;  %v17952_v27 = vld [vmem:[#allocation5 + $0x15c4] ss:$16 sps:$4 sm:$0xff]  }
 0x30d   :  { %6239 = vmatprep.subr.bf16.mxu0 %v17860_v19  ;;  %6854 = vmatprep.subr.bf16.mxu1 %v17863_v29  ;;  %v17955_v19 = vld [vmem:[#allocation5 + $0x15cc] ss:$16 sps:$4 sm:$0xff]   ;;  %v17950_v29 = vld [vmem:[#allocation5 + $0x15c0] ss:$16 sps:$4 sm:$0xff]  }
 0x310   :  { %6240 = vmatpush1.bf16.msra.mxu0 %v17858_v30  ;;  %6855 = vmatpush1.bf16.msra.mxu1 %v17861_v22  ;;  %v17953_v30 = vld [vmem:[#allocation5 + $0x15c8] ss:$16 sps:$4 sm:$0xff]   ;;  %v17958_v22 = vld [vmem:[#allocation5 + $0x15e4] ss:$16 sps:$4 sm:$0xff]  }
 0x311   :  { %6250 = vmatprep.subr.bf16.mxu0 %v17868_v32  ;;  %6865 = vmatprep.subr.bf16.mxu1 %v17871_v33  ;;  %v17961_v32 = vld [vmem:[#allocation5 + $0x15ec] ss:$16 sps:$4 sm:$0xff]   ;;  %v17956_v33 = vld [vmem:[#allocation5 + $0x15e0] ss:$16 sps:$4 sm:$0xff]  }
 0x313   :  { %6242 = vmatmul.mubr.bf16.vlgmr.msra.gmra.mrb[0].mxu0 %v14674_v25  ;;  %6857 = vmatmul.mubr.bf16.vlgmr.msra.gmra.mrb[0].mxu1 %v14674_v25  ;;  %v17959_v25 = vld [vmem:[#allocation5 + $0x15e8] ss:$16 sps:$4 sm:$0xff]  }
 0x314   :  { %6251 = vmatpush1.bf16.msra.mxu0 %v17866_v35  ;;  %6866 = vmatpush1.bf16.msra.mxu1 %v17869_v36  ;;  %v17966_v35 = vld [vmem:[#allocation5 + $0x1604] ss:$16 sps:$4 sm:$0xff]   ;;  %v17969_v36 = vld [vmem:[#allocation5 + $0x160c] ss:$16 sps:$4 sm:$0xff]  }
 0x315   :  { %6252 = vmatprep.subr.bf16.mxu0 %v17874_v37  ;;  %6867 = vmatprep.subr.bf16.mxu1 %v17877_v28  ;;  %v20163_v37 = vld [vmem:[#allocation2 + $0x58] sm:$0xff]  ;;  %v14676_v28 = vcombine.low %v20157_v34, %v20157_v34 }
 0x316   :  { %6282 = vmatprep.mubr.bf16.mxu0 %v14677_v38  ;;  %6897 = vmatprep.mubr.bf16.mxu1 %v14677_v38  ;;  %v17964_v38 = vld [vmem:[#allocation5 + $0x1600] ss:$16 sps:$4 sm:$0xff]   ;;  %v17978_v34 = vld [vmem:[#allocation5 + $0x1644] ss:$16 sps:$4 sm:$0xff]  }
 0x318   :  { %6253 = vmatpush1.bf16.msra.mxu0 %v17872_v39  ;;  %6868 = vmatpush1.bf16.msra.mxu1 %v17875_v40  ;;  %v17967_v39 = vld [vmem:[#allocation5 + $0x1608] ss:$16 sps:$4 sm:$0xff]   ;;  %v17972_v40 = vld [vmem:[#allocation5 + $0x1624] ss:$16 sps:$4 sm:$0xff]  }
 0x319   :  { %6254 = vmatprep.subr.bf16.mxu0 %v17880_v31  ;;  %6869 = vmatprep.subr.bf16.mxu1 %v17883_v41  ;;  %v17975_v31 = vld [vmem:[#allocation5 + $0x162c] ss:$16 sps:$4 sm:$0xff]   ;;  %v14679_v41 = vcombine.high %v20163_v37, %v20163_v37 }
 0x31c   :  { %6255 = vmatpush1.bf16.msra.mxu0 %v17878_v42  ;;  %6870 = vmatpush1.bf16.msra.mxu1 %v17881_v43  ;;  %v17970_v42 = vld [vmem:[#allocation5 + $0x1620] ss:$16 sps:$4 sm:$0xff]   ;;  %v17973_v43 = vld [vmem:[#allocation5 + $0x1628] ss:$16 sps:$4 sm:$0xff]  }
 0x31d   :  { %6256 = vmatprep.subr.bf16.mxu0 %v17886_v44  ;;  %6871 = vmatprep.subr.bf16.mxu1 %v17889_v45  ;;  %v17981_v44 = vld [vmem:[#allocation5 + $0x164c] ss:$16 sps:$4 sm:$0xff]   ;;  %v17976_v45 = vld [vmem:[#allocation5 + $0x1640] ss:$16 sps:$4 sm:$0xff]  }
 0x320   :  { %6257 = vmatpush1.bf16.msra.mxu0 %v17884_v46  ;;  %6872 = vmatpush1.bf16.msra.mxu1 %v17887_v47  ;;  %v17979_v46 = vld [vmem:[#allocation5 + $0x1648] ss:$16 sps:$4 sm:$0xff]   ;;  %v17984_v47 = vld [vmem:[#allocation5 + $0x1664] ss:$16 sps:$4 sm:$0xff]  }
 0x321   :  { %6258 = vmatprep.subr.bf16.mxu0 %v17892_v48  ;;  %6873 = vmatprep.subr.bf16.mxu1 %v17895_v49  ;;  %v17987_v48 = vld [vmem:[#allocation5 + $0x166c] ss:$16 sps:$4 sm:$0xff]   ;;  %v17982_v49 = vld [vmem:[#allocation5 + $0x1660] ss:$16 sps:$4 sm:$0xff]  }
 0x324   :  { %6259 = vmatpush1.bf16.msra.mxu0 %v17890_v50  ;;  %6874 = vmatpush1.bf16.msra.mxu1 %v17893_v51  ;;  %v17985_v50 = vld [vmem:[#allocation5 + $0x1668] ss:$16 sps:$4 sm:$0xff]   ;;  %v17990_v51 = vld [vmem:[#allocation5 + $0x1684] ss:$16 sps:$4 sm:$0xff]  }
 0x325   :  { %6260 = vmatprep.subr.bf16.mxu0 %v17898_v52  ;;  %6875 = vmatprep.subr.bf16.mxu1 %v17901_v53  ;;  %v17993_v52 = vld [vmem:[#allocation5 + $0x168c] ss:$16 sps:$4 sm:$0xff]   ;;  %v17988_v53 = vld [vmem:[#allocation5 + $0x1680] ss:$16 sps:$4 sm:$0xff]  }
 0x328   :  { %6261 = vmatpush1.bf16.msra.mxu0 %v17896_v54  ;;  %6876 = vmatpush1.bf16.msra.mxu1 %v17899_v55  ;;  %v17991_v54 = vld [vmem:[#allocation5 + $0x1688] ss:$16 sps:$4 sm:$0xff]   ;;  %v17996_v55 = vld [vmem:[#allocation5 + $0x16a4] ss:$16 sps:$4 sm:$0xff]  }
 0x329   :  { %6262 = vmatprep.subr.bf16.mxu0 %v17904_v56  ;;  %6877 = vmatprep.subr.bf16.mxu1 %v17907_v57  ;;  %v17999_v56 = vld [vmem:[#allocation5 + $0x16ac] ss:$16 sps:$4 sm:$0xff]   ;;  %v17994_v57 = vld [vmem:[#allocation5 + $0x16a0] ss:$16 sps:$4 sm:$0xff]  }
 0x32c   :  { %6263 = vmatpush1.bf16.msra.mxu0 %v17902_v58  ;;  %6878 = vmatpush1.bf16.msra.mxu1 %v17905_v59  ;;  %v17997_v58 = vld [vmem:[#allocation5 + $0x16a8] ss:$16 sps:$4 sm:$0xff]   ;;  %v18002_v59 = vld [vmem:[#allocation5 + $0x16c4] ss:$16 sps:$4 sm:$0xff]  }
 0x32d   :  { %6264 = vmatprep.subr.bf16.mxu0 %v17910_v60  ;;  %6879 = vmatprep.subr.bf16.mxu1 %v17913_v61  ;;  %v18005_v60 = vld [vmem:[#allocation5 + $0x16cc] ss:$16 sps:$4 sm:$0xff]   ;;  %v18000_v61 = vld [vmem:[#allocation5 + $0x16c0] ss:$16 sps:$4 sm:$0xff]  }
 0x330   :  { %6265 = vmatpush1.bf16.msra.mxu0 %v17908_v62  ;;  %6880 = vmatpush1.bf16.msra.mxu1 %v17911_v63  ;;  %v18003_v62 = vld [vmem:[#allocation5 + $0x16c8] ss:$16 sps:$4 sm:$0xff]   ;;  %v18008_v63 = vld [vmem:[#allocation5 + $0x16e4] ss:$16 sps:$4 sm:$0xff]  }
 0x331   :  { %6266 = vmatprep.subr.bf16.mxu0 %v17916_v0  ;;  %6881 = vmatprep.subr.bf16.mxu1 %v17919_v1  ;;  %v18011_v0 = vld [vmem:[#allocation5 + $0x16ec] ss:$16 sps:$4 sm:$0xff]   ;;  %v18006_v1 = vld [vmem:[#allocation5 + $0x16e0] ss:$16 sps:$4 sm:$0xff]  }
 0x334   :  { %6267 = vmatpush1.bf16.msra.mxu0 %v17914_v2  ;;  %6882 = vmatpush1.bf16.msra.mxu1 %v17917_v3  ;;  %v18009_v2 = vld [vmem:[#allocation5 + $0x16e8] ss:$16 sps:$4 sm:$0xff]   ;;  %v18014_v3 = vld [vmem:[#allocation5 + $0x1704] ss:$16 sps:$4 sm:$0xff]  }
 0x335   :  { %6268 = vmatprep.subr.bf16.mxu0 %v17922_v4  ;;  %6883 = vmatprep.subr.bf16.mxu1 %v17925_v5  ;;  %v18017_v4 = vld [vmem:[#allocation5 + $0x170c] ss:$16 sps:$4 sm:$0xff]   ;;  %v18012_v5 = vld [vmem:[#allocation5 + $0x1700] ss:$16 sps:$4 sm:$0xff]  }
 0x338   :  { %6269 = vmatpush1.bf16.msra.mxu0 %v17920_v6  ;;  %6884 = vmatpush1.bf16.msra.mxu1 %v17923_v7  ;;  %v18015_v6 = vld [vmem:[#allocation5 + $0x1708] ss:$16 sps:$4 sm:$0xff]   ;;  %v18020_v7 = vld [vmem:[#allocation5 + $0x1724] ss:$16 sps:$4 sm:$0xff]  }
 0x339   :  { %6270 = vmatprep.subr.bf16.mxu0 %v17928_v8  ;;  %6885 = vmatprep.subr.bf16.mxu1 %v17931_v9  ;;  %v18023_v8 = vld [vmem:[#allocation5 + $0x172c] ss:$16 sps:$4 sm:$0xff]   ;;  %v18018_v9 = vld [vmem:[#allocation5 + $0x1720] ss:$16 sps:$4 sm:$0xff]  }
 0x33c   :  { %6271 = vmatpush1.bf16.msra.mxu0 %v17926_v10  ;;  %6886 = vmatpush1.bf16.msra.mxu1 %v17929_v12  ;;  %v18021_v10 = vld [vmem:[#allocation5 + $0x1728] ss:$16 sps:$4 sm:$0xff]   ;;  %v18026_v12 = vld [vmem:[#allocation5 + $0x1744] ss:$16 sps:$4 sm:$0xff]  }
 0x33d   :  { %6272 = vmatprep.subr.bf16.mxu0 %v17934_v13  ;;  %6887 = vmatprep.subr.bf16.mxu1 %v17937_v15  ;;  %v18029_v13 = vld [vmem:[#allocation5 + $0x174c] ss:$16 sps:$4 sm:$0xff]   ;;  %v18024_v15 = vld [vmem:[#allocation5 + $0x1740] ss:$16 sps:$4 sm:$0xff]  }
 0x340   :  { %6273 = vmatpush1.bf16.msra.mxu0 %v17932_v16  ;;  %6888 = vmatpush1.bf16.msra.mxu1 %v17935_v18  ;;  %v18027_v16 = vld [vmem:[#allocation5 + $0x1748] ss:$16 sps:$4 sm:$0xff]   ;;  %v18032_v18 = vld [vmem:[#allocation5 + $0x1764] ss:$16 sps:$4 sm:$0xff]  }
 0x341   :  { %6274 = vmatprep.subr.bf16.mxu0 %v17940_v20  ;;  %6889 = vmatprep.subr.bf16.mxu1 %v17943_v11  ;;  %v18035_v20 = vld [vmem:[#allocation5 + $0x176c] ss:$16 sps:$4 sm:$0xff]   ;;  %v18030_v11 = vld [vmem:[#allocation5 + $0x1760] ss:$16 sps:$4 sm:$0xff]  }
 0x344   :  { %6275 = vmatpush1.bf16.msra.mxu0 %v17938_v21  ;;  %6890 = vmatpush1.bf16.msra.mxu1 %v17941_v14  ;;  %v18033_v21 = vld [vmem:[#allocation5 + $0x1768] ss:$16 sps:$4 sm:$0xff]   ;;  %v18038_v14 = vld [vmem:[#allocation5 + $0x1784] ss:$16 sps:$4 sm:$0xff]  }
 0x345   :  { %6276 = vmatprep.subr.bf16.mxu0 %v17946_v23  ;;  %6891 = vmatprep.subr.bf16.mxu1 %v17949_v24  ;;  %v18041_v23 = vld [vmem:[#allocation5 + $0x178c] ss:$16 sps:$4 sm:$0xff]   ;;  %v18036_v24 = vld [vmem:[#allocation5 + $0x1780] ss:$16 sps:$4 sm:$0xff]  }
 0x348   :  { %6277 = vmatpush1.bf16.msra.mxu0 %v17944_v17  ;;  %6892 = vmatpush1.bf16.msra.mxu1 %v17947_v26  ;;  %v18039_v17 = vld [vmem:[#allocation5 + $0x1788] ss:$16 sps:$4 sm:$0xff]   ;;  %v18044_v26 = vld [vmem:[#allocation5 + $0x17a4] ss:$16 sps:$4 sm:$0xff]  }
 0x349   :  { %6278 = vmatprep.subr.bf16.mxu0 %v17952_v27  ;;  %6893 = vmatprep.subr.bf16.mxu1 %v17955_v19  ;;  %v18047_v27 = vld [vmem:[#allocation5 + $0x17ac] ss:$16 sps:$4 sm:$0xff]   ;;  %v18042_v19 = vld [vmem:[#allocation5 + $0x17a0] ss:$16 sps:$4 sm:$0xff]  }
 0x34c   :  { %6279 = vmatpush1.bf16.msra.mxu0 %v17950_v29  ;;  %6894 = vmatpush1.bf16.msra.mxu1 %v17953_v30  ;;  %v18045_v29 = vld [vmem:[#allocation5 + $0x17a8] ss:$16 sps:$4 sm:$0xff]   ;;  %v18050_v30 = vld [vmem:[#allocation5 + $0x17c4] ss:$16 sps:$4 sm:$0xff]  }
 0x34d   :  { %6280 = vmatprep.subr.bf16.mxu0 %v17958_v22  ;;  %6895 = vmatprep.subr.bf16.mxu1 %v17961_v32  ;;  %v18053_v22 = vld [vmem:[#allocation5 + $0x17cc] ss:$16 sps:$4 sm:$0xff]   ;;  %v18048_v32 = vld [vmem:[#allocation5 + $0x17c0] ss:$16 sps:$4 sm:$0xff]  }
 0x350   :  { %6281 = vmatpush1.bf16.msra.mxu0 %v17956_v33  ;;  %6896 = vmatpush1.bf16.msra.mxu1 %v17959_v25  ;;  %v18051_v33 = vld [vmem:[#allocation5 + $0x17c8] ss:$16 sps:$4 sm:$0xff]   ;;  %v18056_v25 = vld [vmem:[#allocation5 + $0x17e4] ss:$16 sps:$4 sm:$0xff]  }
 0x351   :  { %6291 = vmatprep.subr.bf16.mxu0 %v17966_v35  ;;  %6906 = vmatprep.subr.bf16.mxu1 %v17969_v36  ;;  %v18059_v35 = vld [vmem:[#allocation5 + $0x17ec] ss:$16 sps:$4 sm:$0xff]   ;;  %v18054_v36 = vld [vmem:[#allocation5 + $0x17e0] ss:$16 sps:$4 sm:$0xff]  }
 0x353   :  { %6283 = vmatmul.mubr.bf16.vlgmr.msra.gmra.mrb[0].mxu0 %v14676_v28  ;;  %6898 = vmatmul.mubr.bf16.vlgmr.msra.gmra.mrb[0].mxu1 %v14676_v28  ;;  %v18057_v28 = vld [vmem:[#allocation5 + $0x17e8] ss:$16 sps:$4 sm:$0xff]  }
 0x354   :  { %6292 = vmatpush1.bf16.msra.mxu0 %v17964_v38  ;;  %6907 = vmatpush1.bf16.msra.mxu1 %v17967_v39  ;;  %v18064_v38 = vld [vmem:[#allocation5 + $0x1804] ss:$16 sps:$4 sm:$0xff]   ;;  %v18067_v39 = vld [vmem:[#allocation5 + $0x180c] ss:$16 sps:$4 sm:$0xff]  }
 0x355   :  { %6293 = vmatprep.subr.bf16.mxu0 %v17972_v40  ;;  %6908 = vmatprep.subr.bf16.mxu1 %v17975_v31  ;;  %v20169_v40 = vld [vmem:[#allocation2 + $0x60] sm:$0xff]  ;;  %v14678_v31 = vcombine.low %v20163_v37, %v20163_v37  ;;  %v18076_v37 = vld [vmem:[#allocation5 + $0x1844] ss:$16 sps:$4 sm:$0xff]  }
 0x356   :  { %6323 = vmatprep.mubr.bf16.mxu0 %v14679_v41  ;;  %6938 = vmatprep.mubr.bf16.mxu1 %v14679_v41  ;;  %v18062_v41 = vld [vmem:[#allocation5 + $0x1800] ss:$16 sps:$4 sm:$0xff]  }
 0x358   :  { %6294 = vmatpush1.bf16.msra.mxu0 %v17970_v42  ;;  %6909 = vmatpush1.bf16.msra.mxu1 %v17973_v43  ;;  %v18065_v42 = vld [vmem:[#allocation5 + $0x1808] ss:$16 sps:$4 sm:$0xff]   ;;  %v18070_v43 = vld [vmem:[#allocation5 + $0x1824] ss:$16 sps:$4 sm:$0xff]  }
 0x359   :  { %6295 = vmatprep.subr.bf16.mxu0 %v17978_v34  ;;  %6910 = vmatprep.subr.bf16.mxu1 %v17981_v44  ;;  %v18073_v34 = vld [vmem:[#allocation5 + $0x182c] ss:$16 sps:$4 sm:$0xff]   ;;  %v14681_v44 = vcombine.high %v20169_v40, %v20169_v40 }
 0x35c   :  { %6296 = vmatpush1.bf16.msra.mxu0 %v17976_v45  ;;  %6911 = vmatpush1.bf16.msra.mxu1 %v17979_v46  ;;  %v18068_v45 = vld [vmem:[#allocation5 + $0x1820] ss:$16 sps:$4 sm:$0xff]   ;;  %v18071_v46 = vld [vmem:[#allocation5 + $0x1828] ss:$16 sps:$4 sm:$0xff]  }
 0x35d   :  { %6297 = vmatprep.subr.bf16.mxu0 %v17984_v47  ;;  %6912 = vmatprep.subr.bf16.mxu1 %v17987_v48  ;;  %v18079_v47 = vld [vmem:[#allocation5 + $0x184c] ss:$16 sps:$4 sm:$0xff]   ;;  %v18074_v48 = vld [vmem:[#allocation5 + $0x1840] ss:$16 sps:$4 sm:$0xff]  }
 0x360   :  { %6298 = vmatpush1.bf16.msra.mxu0 %v17982_v49  ;;  %6913 = vmatpush1.bf16.msra.mxu1 %v17985_v50  ;;  %v18077_v49 = vld [vmem:[#allocation5 + $0x1848] ss:$16 sps:$4 sm:$0xff]   ;;  %v18082_v50 = vld [vmem:[#allocation5 + $0x1864] ss:$16 sps:$4 sm:$0xff]  }
 0x361   :  { %6299 = vmatprep.subr.bf16.mxu0 %v17990_v51  ;;  %6914 = vmatprep.subr.bf16.mxu1 %v17993_v52  ;;  %v18085_v51 = vld [vmem:[#allocation5 + $0x186c] ss:$16 sps:$4 sm:$0xff]   ;;  %v18080_v52 = vld [vmem:[#allocation5 + $0x1860] ss:$16 sps:$4 sm:$0xff]  }
 0x364   :  { %6300 = vmatpush1.bf16.msra.mxu0 %v17988_v53  ;;  %6915 = vmatpush1.bf16.msra.mxu1 %v17991_v54  ;;  %v18083_v53 = vld [vmem:[#allocation5 + $0x1868] ss:$16 sps:$4 sm:$0xff]   ;;  %v18088_v54 = vld [vmem:[#allocation5 + $0x1884] ss:$16 sps:$4 sm:$0xff]  }
 0x365   :  { %6301 = vmatprep.subr.bf16.mxu0 %v17996_v55  ;;  %6916 = vmatprep.subr.bf16.mxu1 %v17999_v56  ;;  %v18091_v55 = vld [vmem:[#allocation5 + $0x188c] ss:$16 sps:$4 sm:$0xff]   ;;  %v18086_v56 = vld [vmem:[#allocation5 + $0x1880] ss:$16 sps:$4 sm:$0xff]  }
 0x368   :  { %6302 = vmatpush1.bf16.msra.mxu0 %v17994_v57  ;;  %6917 = vmatpush1.bf16.msra.mxu1 %v17997_v58  ;;  %v18089_v57 = vld [vmem:[#allocation5 + $0x1888] ss:$16 sps:$4 sm:$0xff]   ;;  %v18094_v58 = vld [vmem:[#allocation5 + $0x18a4] ss:$16 sps:$4 sm:$0xff]  }
 0x369   :  { %6303 = vmatprep.subr.bf16.mxu0 %v18002_v59  ;;  %6918 = vmatprep.subr.bf16.mxu1 %v18005_v60  ;;  %v18097_v59 = vld [vmem:[#allocation5 + $0x18ac] ss:$16 sps:$4 sm:$0xff]   ;;  %v18092_v60 = vld [vmem:[#allocation5 + $0x18a0] ss:$16 sps:$4 sm:$0xff]  }
 0x36c   :  { %6304 = vmatpush1.bf16.msra.mxu0 %v18000_v61  ;;  %6919 = vmatpush1.bf16.msra.mxu1 %v18003_v62  ;;  %v18095_v61 = vld [vmem:[#allocation5 + $0x18a8] ss:$16 sps:$4 sm:$0xff]   ;;  %v18100_v62 = vld [vmem:[#allocation5 + $0x18c4] ss:$16 sps:$4 sm:$0xff]  }
 0x36d   :  { %6305 = vmatprep.subr.bf16.mxu0 %v18008_v63  ;;  %6920 = vmatprep.subr.bf16.mxu1 %v18011_v0  ;;  %v18103_v63 = vld [vmem:[#allocation5 + $0x18cc] ss:$16 sps:$4 sm:$0xff]   ;;  %v18098_v0 = vld [vmem:[#allocation5 + $0x18c0] ss:$16 sps:$4 sm:$0xff]  }
 0x370   :  { %6306 = vmatpush1.bf16.msra.mxu0 %v18006_v1  ;;  %6921 = vmatpush1.bf16.msra.mxu1 %v18009_v2  ;;  %v18101_v1 = vld [vmem:[#allocation5 + $0x18c8] ss:$16 sps:$4 sm:$0xff]   ;;  %v18106_v2 = vld [vmem:[#allocation5 + $0x18e4] ss:$16 sps:$4 sm:$0xff]  }
 0x371   :  { %6307 = vmatprep.subr.bf16.mxu0 %v18014_v3  ;;  %6922 = vmatprep.subr.bf16.mxu1 %v18017_v4  ;;  %v18109_v3 = vld [vmem:[#allocation5 + $0x18ec] ss:$16 sps:$4 sm:$0xff]   ;;  %v18104_v4 = vld [vmem:[#allocation5 + $0x18e0] ss:$16 sps:$4 sm:$0xff]  }
 0x374   :  { %6308 = vmatpush1.bf16.msra.mxu0 %v18012_v5  ;;  %6923 = vmatpush1.bf16.msra.mxu1 %v18015_v6  ;;  %v18107_v5 = vld [vmem:[#allocation5 + $0x18e8] ss:$16 sps:$4 sm:$0xff]   ;;  %v18112_v6 = vld [vmem:[#allocation5 + $0x1904] ss:$16 sps:$4 sm:$0xff]  }
 0x375   :  { %6309 = vmatprep.subr.bf16.mxu0 %v18020_v7  ;;  %6924 = vmatprep.subr.bf16.mxu1 %v18023_v8  ;;  %v18115_v7 = vld [vmem:[#allocation5 + $0x190c] ss:$16 sps:$4 sm:$0xff]   ;;  %v18110_v8 = vld [vmem:[#allocation5 + $0x1900] ss:$16 sps:$4 sm:$0xff]  }
 0x378   :  { %6310 = vmatpush1.bf16.msra.mxu0 %v18018_v9  ;;  %6925 = vmatpush1.bf16.msra.mxu1 %v18021_v10  ;;  %v18113_v9 = vld [vmem:[#allocation5 + $0x1908] ss:$16 sps:$4 sm:$0xff]   ;;  %v18118_v10 = vld [vmem:[#allocation5 + $0x1924] ss:$16 sps:$4 sm:$0xff]  }
 0x379   :  { %6311 = vmatprep.subr.bf16.mxu0 %v18026_v12  ;;  %6926 = vmatprep.subr.bf16.mxu1 %v18029_v13  ;;  %v18121_v12 = vld [vmem:[#allocation5 + $0x192c] ss:$16 sps:$4 sm:$0xff]   ;;  %v18116_v13 = vld [vmem:[#allocation5 + $0x1920] ss:$16 sps:$4 sm:$0xff]  }
 0x37c   :  { %6312 = vmatpush1.bf16.msra.mxu0 %v18024_v15  ;;  %6927 = vmatpush1.bf16.msra.mxu1 %v18027_v16  ;;  %v18119_v15 = vld [vmem:[#allocation5 + $0x1928] ss:$16 sps:$4 sm:$0xff]   ;;  %v18124_v16 = vld [vmem:[#allocation5 + $0x1944] ss:$16 sps:$4 sm:$0xff]  }
 0x37d   :  { %6313 = vmatprep.subr.bf16.mxu0 %v18032_v18  ;;  %6928 = vmatprep.subr.bf16.mxu1 %v18035_v20  ;;  %v18127_v18 = vld [vmem:[#allocation5 + $0x194c] ss:$16 sps:$4 sm:$0xff]   ;;  %v18122_v20 = vld [vmem:[#allocation5 + $0x1940] ss:$16 sps:$4 sm:$0xff]  }
 0x380   :  { %6314 = vmatpush1.bf16.msra.mxu0 %v18030_v11  ;;  %6929 = vmatpush1.bf16.msra.mxu1 %v18033_v21  ;;  %v18125_v11 = vld [vmem:[#allocation5 + $0x1948] ss:$16 sps:$4 sm:$0xff]   ;;  %v18130_v21 = vld [vmem:[#allocation5 + $0x1964] ss:$16 sps:$4 sm:$0xff]  }
 0x381   :  { %6315 = vmatprep.subr.bf16.mxu0 %v18038_v14  ;;  %6930 = vmatprep.subr.bf16.mxu1 %v18041_v23  ;;  %v18133_v14 = vld [vmem:[#allocation5 + $0x196c] ss:$16 sps:$4 sm:$0xff]   ;;  %v18128_v23 = vld [vmem:[#allocation5 + $0x1960] ss:$16 sps:$4 sm:$0xff]  }
 0x384   :  { %6316 = vmatpush1.bf16.msra.mxu0 %v18036_v24  ;;  %6931 = vmatpush1.bf16.msra.mxu1 %v18039_v17  ;;  %v18131_v24 = vld [vmem:[#allocation5 + $0x1968] ss:$16 sps:$4 sm:$0xff]   ;;  %v18136_v17 = vld [vmem:[#allocation5 + $0x1984] ss:$16 sps:$4 sm:$0xff]  }
 0x385   :  { %6317 = vmatprep.subr.bf16.mxu0 %v18044_v26  ;;  %6932 = vmatprep.subr.bf16.mxu1 %v18047_v27  ;;  %v18139_v26 = vld [vmem:[#allocation5 + $0x198c] ss:$16 sps:$4 sm:$0xff]   ;;  %v18134_v27 = vld [vmem:[#allocation5 + $0x1980] ss:$16 sps:$4 sm:$0xff]  }
 0x388   :  { %6318 = vmatpush1.bf16.msra.mxu0 %v18042_v19  ;;  %6933 = vmatpush1.bf16.msra.mxu1 %v18045_v29  ;;  %v18137_v19 = vld [vmem:[#allocation5 + $0x1988] ss:$16 sps:$4 sm:$0xff]   ;;  %v18142_v29 = vld [vmem:[#allocation5 + $0x19a4] ss:$16 sps:$4 sm:$0xff]  }
 0x389   :  { %6319 = vmatprep.subr.bf16.mxu0 %v18050_v30  ;;  %6934 = vmatprep.subr.bf16.mxu1 %v18053_v22  ;;  %v18145_v30 = vld [vmem:[#allocation5 + $0x19ac] ss:$16 sps:$4 sm:$0xff]   ;;  %v18140_v22 = vld [vmem:[#allocation5 + $0x19a0] ss:$16 sps:$4 sm:$0xff]  }
 0x38c   :  { %6320 = vmatpush1.bf16.msra.mxu0 %v18048_v32  ;;  %6935 = vmatpush1.bf16.msra.mxu1 %v18051_v33  ;;  %v18143_v32 = vld [vmem:[#allocation5 + $0x19a8] ss:$16 sps:$4 sm:$0xff]   ;;  %v18148_v33 = vld [vmem:[#allocation5 + $0x19c4] ss:$16 sps:$4 sm:$0xff]  }
 0x38d   :  { %6321 = vmatprep.subr.bf16.mxu0 %v18056_v25  ;;  %6936 = vmatprep.subr.bf16.mxu1 %v18059_v35  ;;  %v18151_v25 = vld [vmem:[#allocation5 + $0x19cc] ss:$16 sps:$4 sm:$0xff]   ;;  %v18146_v35 = vld [vmem:[#allocation5 + $0x19c0] ss:$16 sps:$4 sm:$0xff]  }
 0x390   :  { %6322 = vmatpush1.bf16.msra.mxu0 %v18054_v36  ;;  %6937 = vmatpush1.bf16.msra.mxu1 %v18057_v28  ;;  %v18149_v36 = vld [vmem:[#allocation5 + $0x19c8] ss:$16 sps:$4 sm:$0xff]   ;;  %v18154_v28 = vld [vmem:[#allocation5 + $0x19e4] ss:$16 sps:$4 sm:$0xff]  }
 0x391   :  { %6332 = vmatprep.subr.bf16.mxu0 %v18064_v38  ;;  %6947 = vmatprep.subr.bf16.mxu1 %v18067_v39  ;;  %v18157_v38 = vld [vmem:[#allocation5 + $0x19ec] ss:$16 sps:$4 sm:$0xff]   ;;  %v18152_v39 = vld [vmem:[#allocation5 + $0x19e0] ss:$16 sps:$4 sm:$0xff]  }
 0x393   :  { %6324 = vmatmul.mubr.bf16.vlgmr.msra.gmra.mrb[0].mxu0 %v14678_v31  ;;  %6939 = vmatmul.mubr.bf16.vlgmr.msra.gmra.mrb[0].mxu1 %v14678_v31  ;;  %v18155_v31 = vld [vmem:[#allocation5 + $0x19e8] ss:$16 sps:$4 sm:$0xff]  }
 0x394   :  { %6333 = vmatpush1.bf16.msra.mxu0 %v18062_v41  ;;  %6948 = vmatpush1.bf16.msra.mxu1 %v18065_v42  ;;  %v18162_v41 = vld [vmem:[#allocation5 + $0x1a04] ss:$16 sps:$4 sm:$0xff]   ;;  %v18165_v42 = vld [vmem:[#allocation5 + $0x1a0c] ss:$16 sps:$4 sm:$0xff]  }
 0x395   :  { %6334 = vmatprep.subr.bf16.mxu0 %v18070_v43  ;;  %6949 = vmatprep.subr.bf16.mxu1 %v18073_v34  ;;  %v20175_v43 = vld [vmem:[#allocation2 + $0x68] sm:$0xff]  ;;  %v18160_v34 = vld [vmem:[#allocation5 + $0x1a00] ss:$16 sps:$4 sm:$0xff]  }
 0x396   :  { %6364 = vmatprep.mubr.bf16.mxu0 %v14681_v44  ;;  %6979 = vmatprep.mubr.bf16.mxu1 %v14681_v44  ;;  %v18163_v44 = vld [vmem:[#allocation5 + $0x1a08] ss:$16 sps:$4 sm:$0xff]  }
 0x398   :  { %6335 = vmatpush1.bf16.msra.mxu0 %v18068_v45  ;;  %6950 = vmatpush1.bf16.msra.mxu1 %v18071_v46  ;;  %v14680_v45 = vcombine.low %v20169_v40, %v20169_v40  ;;  %v18168_v46 = vld [vmem:[#allocation5 + $0x1a24] ss:$16 sps:$4 sm:$0xff]   ;;  %v18172_v40 = vld [vmem:[#allocation5 + $0x1a40] ss:$16 sps:$4 sm:$0xff]  }
 0x399   :  { %6336 = vmatprep.subr.bf16.mxu0 %v18076_v37  ;;  %6951 = vmatprep.subr.bf16.mxu1 %v18079_v47  ;;  %v18171_v37 = vld [vmem:[#allocation5 + $0x1a2c] ss:$16 sps:$4 sm:$0xff]   ;;  %v18166_v47 = vld [vmem:[#allocation5 + $0x1a20] ss:$16 sps:$4 sm:$0xff]  }
 0x39c   :  { %6337 = vmatpush1.bf16.msra.mxu0 %v18074_v48  ;;  %6952 = vmatpush1.bf16.msra.mxu1 %v18077_v49  ;;  %v18169_v48 = vld [vmem:[#allocation5 + $0x1a28] ss:$16 sps:$4 sm:$0xff]   ;;  %v14683_v49 = vcombine.high %v20175_v43, %v20175_v43 }
 0x39d   :  { %6338 = vmatprep.subr.bf16.mxu0 %v18082_v50  ;;  %6953 = vmatprep.subr.bf16.mxu1 %v18085_v51  ;;  %v18174_v50 = vld [vmem:[#allocation5 + $0x1a44] ss:$16 sps:$4 sm:$0xff]   ;;  %v18177_v51 = vld [vmem:[#allocation5 + $0x1a4c] ss:$16 sps:$4 sm:$0xff]  }
 0x3a0   :  { %6339 = vmatpush1.bf16.msra.mxu0 %v18080_v52  ;;  %6954 = vmatpush1.bf16.msra.mxu1 %v18083_v53  ;;  %v18175_v52 = vld [vmem:[#allocation5 + $0x1a48] ss:$16 sps:$4 sm:$0xff]   ;;  %v18180_v53 = vld [vmem:[#allocation5 + $0x1a64] ss:$16 sps:$4 sm:$0xff]  }
 0x3a1   :  { %6340 = vmatprep.subr.bf16.mxu0 %v18088_v54  ;;  %6955 = vmatprep.subr.bf16.mxu1 %v18091_v55  ;;  %v18183_v54 = vld [vmem:[#allocation5 + $0x1a6c] ss:$16 sps:$4 sm:$0xff]   ;;  %v18178_v55 = vld [vmem:[#allocation5 + $0x1a60] ss:$16 sps:$4 sm:$0xff]  }
 0x3a4   :  { %6341 = vmatpush1.bf16.msra.mxu0 %v18086_v56  ;;  %6956 = vmatpush1.bf16.msra.mxu1 %v18089_v57  ;;  %v18181_v56 = vld [vmem:[#allocation5 + $0x1a68] ss:$16 sps:$4 sm:$0xff]   ;;  %v18186_v57 = vld [vmem:[#allocation5 + $0x1a84] ss:$16 sps:$4 sm:$0xff]  }
 0x3a5   :  { %6342 = vmatprep.subr.bf16.mxu0 %v18094_v58  ;;  %6957 = vmatprep.subr.bf16.mxu1 %v18097_v59  ;;  %v18189_v58 = vld [vmem:[#allocation5 + $0x1a8c] ss:$16 sps:$4 sm:$0xff]   ;;  %v18184_v59 = vld [vmem:[#allocation5 + $0x1a80] ss:$16 sps:$4 sm:$0xff]  }
 0x3a8   :  { %6343 = vmatpush1.bf16.msra.mxu0 %v18092_v60  ;;  %6958 = vmatpush1.bf16.msra.mxu1 %v18095_v61  ;;  %v18187_v60 = vld [vmem:[#allocation5 + $0x1a88] ss:$16 sps:$4 sm:$0xff]   ;;  %v18192_v61 = vld [vmem:[#allocation5 + $0x1aa4] ss:$16 sps:$4 sm:$0xff]  }
 0x3a9   :  { %6344 = vmatprep.subr.bf16.mxu0 %v18100_v62  ;;  %6959 = vmatprep.subr.bf16.mxu1 %v18103_v63  ;;  %v18195_v62 = vld [vmem:[#allocation5 + $0x1aac] ss:$16 sps:$4 sm:$0xff]   ;;  %v18190_v63 = vld [vmem:[#allocation5 + $0x1aa0] ss:$16 sps:$4 sm:$0xff]  }
 0x3ac   :  { %6345 = vmatpush1.bf16.msra.mxu0 %v18098_v0  ;;  %6960 = vmatpush1.bf16.msra.mxu1 %v18101_v1  ;;  %v18193_v0 = vld [vmem:[#allocation5 + $0x1aa8] ss:$16 sps:$4 sm:$0xff]   ;;  %v18198_v1 = vld [vmem:[#allocation5 + $0x1ac4] ss:$16 sps:$4 sm:$0xff]  }
 0x3ad   :  { %6346 = vmatprep.subr.bf16.mxu0 %v18106_v2  ;;  %6961 = vmatprep.subr.bf16.mxu1 %v18109_v3  ;;  %v18201_v2 = vld [vmem:[#allocation5 + $0x1acc] ss:$16 sps:$4 sm:$0xff]   ;;  %v18196_v3 = vld [vmem:[#allocation5 + $0x1ac0] ss:$16 sps:$4 sm:$0xff]  }
 0x3b0   :  { %6347 = vmatpush1.bf16.msra.mxu0 %v18104_v4  ;;  %6962 = vmatpush1.bf16.msra.mxu1 %v18107_v5  ;;  %v18199_v4 = vld [vmem:[#allocation5 + $0x1ac8] ss:$16 sps:$4 sm:$0xff]   ;;  %v18204_v5 = vld [vmem:[#allocation5 + $0x1ae4] ss:$16 sps:$4 sm:$0xff]  }
 0x3b1   :  { %6348 = vmatprep.subr.bf16.mxu0 %v18112_v6  ;;  %6963 = vmatprep.subr.bf16.mxu1 %v18115_v7  ;;  %v18207_v6 = vld [vmem:[#allocation5 + $0x1aec] ss:$16 sps:$4 sm:$0xff]   ;;  %v18202_v7 = vld [vmem:[#allocation5 + $0x1ae0] ss:$16 sps:$4 sm:$0xff]  }
 0x3b4   :  { %6349 = vmatpush1.bf16.msra.mxu0 %v18110_v8  ;;  %6964 = vmatpush1.bf16.msra.mxu1 %v18113_v9  ;;  %v18205_v8 = vld [vmem:[#allocation5 + $0x1ae8] ss:$16 sps:$4 sm:$0xff]   ;;  %v18210_v9 = vld [vmem:[#allocation5 + $0x1b04] ss:$16 sps:$4 sm:$0xff]  }
 0x3b5   :  { %6350 = vmatprep.subr.bf16.mxu0 %v18118_v10  ;;  %6965 = vmatprep.subr.bf16.mxu1 %v18121_v12  ;;  %v18213_v10 = vld [vmem:[#allocation5 + $0x1b0c] ss:$16 sps:$4 sm:$0xff]   ;;  %v18208_v12 = vld [vmem:[#allocation5 + $0x1b00] ss:$16 sps:$4 sm:$0xff]  }
 0x3b8   :  { %6351 = vmatpush1.bf16.msra.mxu0 %v18116_v13  ;;  %6966 = vmatpush1.bf16.msra.mxu1 %v18119_v15  ;;  %v18211_v13 = vld [vmem:[#allocation5 + $0x1b08] ss:$16 sps:$4 sm:$0xff]   ;;  %v18216_v15 = vld [vmem:[#allocation5 + $0x1b24] ss:$16 sps:$4 sm:$0xff]  }
 0x3b9   :  { %6352 = vmatprep.subr.bf16.mxu0 %v18124_v16  ;;  %6967 = vmatprep.subr.bf16.mxu1 %v18127_v18  ;;  %v18219_v16 = vld [vmem:[#allocation5 + $0x1b2c] ss:$16 sps:$4 sm:$0xff]   ;;  %v18214_v18 = vld [vmem:[#allocation5 + $0x1b20] ss:$16 sps:$4 sm:$0xff]  }
 0x3bc   :  { %6353 = vmatpush1.bf16.msra.mxu0 %v18122_v20  ;;  %6968 = vmatpush1.bf16.msra.mxu1 %v18125_v11  ;;  %v18217_v20 = vld [vmem:[#allocation5 + $0x1b28] ss:$16 sps:$4 sm:$0xff]   ;;  %v18222_v11 = vld [vmem:[#allocation5 + $0x1b44] ss:$16 sps:$4 sm:$0xff]  }
 0x3bd   :  { %6354 = vmatprep.subr.bf16.mxu0 %v18130_v21  ;;  %6969 = vmatprep.subr.bf16.mxu1 %v18133_v14  ;;  %v18225_v21 = vld [vmem:[#allocation5 + $0x1b4c] ss:$16 sps:$4 sm:$0xff]   ;;  %v18220_v14 = vld [vmem:[#allocation5 + $0x1b40] ss:$16 sps:$4 sm:$0xff]  }
 0x3c0   :  { %6355 = vmatpush1.bf16.msra.mxu0 %v18128_v23  ;;  %6970 = vmatpush1.bf16.msra.mxu1 %v18131_v24  ;;  %v18223_v23 = vld [vmem:[#allocation5 + $0x1b48] ss:$16 sps:$4 sm:$0xff]   ;;  %v18228_v24 = vld [vmem:[#allocation5 + $0x1b64] ss:$16 sps:$4 sm:$0xff]  }
 0x3c1   :  { %6356 = vmatprep.subr.bf16.mxu0 %v18136_v17  ;;  %6971 = vmatprep.subr.bf16.mxu1 %v18139_v26  ;;  %v18231_v17 = vld [vmem:[#allocation5 + $0x1b6c] ss:$16 sps:$4 sm:$0xff]   ;;  %v18226_v26 = vld [vmem:[#allocation5 + $0x1b60] ss:$16 sps:$4 sm:$0xff]  }
 0x3c4   :  { %6357 = vmatpush1.bf16.msra.mxu0 %v18134_v27  ;;  %6972 = vmatpush1.bf16.msra.mxu1 %v18137_v19  ;;  %v18229_v27 = vld [vmem:[#allocation5 + $0x1b68] ss:$16 sps:$4 sm:$0xff]   ;;  %v18234_v19 = vld [vmem:[#allocation5 + $0x1b84] ss:$16 sps:$4 sm:$0xff]  }
 0x3c5   :  { %6358 = vmatprep.subr.bf16.mxu0 %v18142_v29  ;;  %6973 = vmatprep.subr.bf16.mxu1 %v18145_v30  ;;  %v18237_v29 = vld [vmem:[#allocation5 + $0x1b8c] ss:$16 sps:$4 sm:$0xff]   ;;  %v18232_v30 = vld [vmem:[#allocation5 + $0x1b80] ss:$16 sps:$4 sm:$0xff]  }
 0x3c8   :  { %6359 = vmatpush1.bf16.msra.mxu0 %v18140_v22  ;;  %6974 = vmatpush1.bf16.msra.mxu1 %v18143_v32  ;;  %v18235_v22 = vld [vmem:[#allocation5 + $0x1b88] ss:$16 sps:$4 sm:$0xff]   ;;  %v18240_v32 = vld [vmem:[#allocation5 + $0x1ba4] ss:$16 sps:$4 sm:$0xff]  }
 0x3c9   :  { %6360 = vmatprep.subr.bf16.mxu0 %v18148_v33  ;;  %6975 = vmatprep.subr.bf16.mxu1 %v18151_v25  ;;  %v18243_v33 = vld [vmem:[#allocation5 + $0x1bac] ss:$16 sps:$4 sm:$0xff]   ;;  %v18238_v25 = vld [vmem:[#allocation5 + $0x1ba0] ss:$16 sps:$4 sm:$0xff]  }
 0x3cc   :  { %6361 = vmatpush1.bf16.msra.mxu0 %v18146_v35  ;;  %6976 = vmatpush1.bf16.msra.mxu1 %v18149_v36  ;;  %v18241_v35 = vld [vmem:[#allocation5 + $0x1ba8] ss:$16 sps:$4 sm:$0xff]   ;;  %v18246_v36 = vld [vmem:[#allocation5 + $0x1bc4] ss:$16 sps:$4 sm:$0xff]  }
 0x3cd   :  { %6362 = vmatprep.subr.bf16.mxu0 %v18154_v28  ;;  %6977 = vmatprep.subr.bf16.mxu1 %v18157_v38  ;;  %v18249_v28 = vld [vmem:[#allocation5 + $0x1bcc] ss:$16 sps:$4 sm:$0xff]   ;;  %v18244_v38 = vld [vmem:[#allocation5 + $0x1bc0] ss:$16 sps:$4 sm:$0xff]  }
 0x3d0   :  { %6363 = vmatpush1.bf16.msra.mxu0 %v18152_v39  ;;  %6978 = vmatpush1.bf16.msra.mxu1 %v18155_v31  ;;  %v18247_v39 = vld [vmem:[#allocation5 + $0x1bc8] ss:$16 sps:$4 sm:$0xff]   ;;  %v18252_v31 = vld [vmem:[#allocation5 + $0x1be4] ss:$16 sps:$4 sm:$0xff]  }
 0x3d1   :  { %6373 = vmatprep.subr.bf16.mxu0 %v18162_v41  ;;  %6988 = vmatprep.subr.bf16.mxu1 %v18165_v42  ;;  %v18255_v41 = vld [vmem:[#allocation5 + $0x1bec] ss:$16 sps:$4 sm:$0xff]   ;;  %v18250_v42 = vld [vmem:[#allocation5 + $0x1be0] ss:$16 sps:$4 sm:$0xff]  }
 0x3d3   :  { %6365 = vmatmul.mubr.bf16.vlgmr.msra.gmra.mrb[0].mxu0 %v14680_v45  ;;  %6980 = vmatmul.mubr.bf16.vlgmr.msra.gmra.mrb[0].mxu1 %v14680_v45  ;;  %v18263_v45 = vld [vmem:[#allocation5 + $0x1c0c] ss:$16 sps:$4 sm:$0xff]  }
 0x3d4   :  { %6374 = vmatpush1.bf16.msra.mxu0 %v18160_v34  ;;  %6989 = vmatpush1.bf16.msra.mxu1 %v18163_v44  ;;  %v18253_v34 = vld [vmem:[#allocation5 + $0x1be8] ss:$16 sps:$4 sm:$0xff]   ;;  %v18260_v44 = vld [vmem:[#allocation5 + $0x1c04] ss:$16 sps:$4 sm:$0xff]  }
 0x3d5   :  { %6375 = vmatprep.subr.bf16.mxu0 %v18168_v46  ;;  %6990 = vmatprep.subr.bf16.mxu1 %v18171_v37  ;;  %v18258_v46 = vld [vmem:[#allocation5 + $0x1c00] ss:$16 sps:$4 sm:$0xff]   ;;  %v18261_v37 = vld [vmem:[#allocation5 + $0x1c08] ss:$16 sps:$4 sm:$0xff]  }
 0x3d6   :  { %6405 = vmatprep.mubr.bf16.mxu0 %v14683_v49  ;;  %7020 = vmatprep.mubr.bf16.mxu1 %v14683_v49  ;;  %v18269_v49 = vld [vmem:[#allocation5 + $0x1c2c] ss:$16 sps:$4 sm:$0xff]  }
 0x3d8   :  { %6376 = vmatpush1.bf16.msra.mxu0 %v18166_v47  ;;  %6991 = vmatpush1.bf16.msra.mxu1 %v18169_v48  ;;  %v14682_v47 = vcombine.low %v20175_v43, %v20175_v43  ;;  %v18266_v48 = vld [vmem:[#allocation5 + $0x1c24] ss:$16 sps:$4 sm:$0xff]  }
 0x3d9   :  { %6377 = vmatprep.subr.bf16.mxu0 %v18174_v50  ;;  %6992 = vmatprep.subr.bf16.mxu1 %v18177_v51  ;;  %v18264_v50 = vld [vmem:[#allocation5 + $0x1c20] ss:$16 sps:$4 sm:$0xff]   ;;  %v18267_v51 = vld [vmem:[#allocation5 + $0x1c28] ss:$16 sps:$4 sm:$0xff]   ;;  %v18278_v43 = vld [vmem:[#allocation5 + $0x1c64] ss:$16 sps:$4 sm:$0xff]  }
 0x3dc   :  { %6378 = vmatpush1.bf16.msra.mxu0 %v18172_v40  ;;  %6993 = vmatpush1.bf16.msra.mxu1 %v18175_v52  ;;  %v18272_v40 = vld [vmem:[#allocation5 + $0x1c44] ss:$16 sps:$4 sm:$0xff]   ;;  %v18275_v52 = vld [vmem:[#allocation5 + $0x1c4c] ss:$16 sps:$4 sm:$0xff]  }
 0x3dd   :  { %6379 = vmatprep.subr.bf16.mxu0 %v18180_v53  ;;  %6994 = vmatprep.subr.bf16.mxu1 %v18183_v54  ;;  %v18270_v53 = vld [vmem:[#allocation5 + $0x1c40] ss:$16 sps:$4 sm:$0xff]   ;;  %v18273_v54 = vld [vmem:[#allocation5 + $0x1c48] ss:$16 sps:$4 sm:$0xff]  }
 0x3e0   :  { %6380 = vmatpush1.bf16.msra.mxu0 %v18178_v55  ;;  %6995 = vmatpush1.bf16.msra.mxu1 %v18181_v56  ;;  %v19951_v55 = vmov 0   ;;  %v18281_v56 = vld [vmem:[#allocation5 + $0x1c6c] ss:$16 sps:$4 sm:$0xff]  }
 0x3e1   :  { %6381 = vmatprep.subr.bf16.mxu0 %v18186_v57  ;;  %6996 = vmatprep.subr.bf16.mxu1 %v18189_v58  ;;  %v18276_v57 = vld [vmem:[#allocation5 + $0x1c60] ss:$16 sps:$4 sm:$0xff]   ;;  %v18279_v58 = vld [vmem:[#allocation5 + $0x1c68] ss:$16 sps:$4 sm:$0xff]  }
 0x3e4   :  { %6382 = vmatpush1.bf16.msra.mxu0 %v18184_v59  ;;  %6997 = vmatpush1.bf16.msra.mxu1 %v18187_v60  ;;  %v18284_v59 = vld [vmem:[#allocation5 + $0x1c84] ss:$16 sps:$4 sm:$0xff]   ;;  %v18287_v60 = vld [vmem:[#allocation5 + $0x1c8c] ss:$16 sps:$4 sm:$0xff]  }
 0x3e5   :  { %6383 = vmatprep.subr.bf16.mxu0 %v18192_v61  ;;  %6998 = vmatprep.subr.bf16.mxu1 %v18195_v62  ;;  %v18282_v61 = vld [vmem:[#allocation5 + $0x1c80] ss:$16 sps:$4 sm:$0xff]   ;;  %v18285_v62 = vld [vmem:[#allocation5 + $0x1c88] ss:$16 sps:$4 sm:$0xff]  }
 0x3e8   :  { %6384 = vmatpush1.bf16.msra.mxu0 %v18190_v63  ;;  %6999 = vmatpush1.bf16.msra.mxu1 %v18193_v0  ;;  %v18290_v63 = vld [vmem:[#allocation5 + $0x1ca4] ss:$16 sps:$4 sm:$0xff]   ;;  %v18293_v0 = vld [vmem:[#allocation5 + $0x1cac] ss:$16 sps:$4 sm:$0xff]  }
 0x3e9   :  { %6385 = vmatprep.subr.bf16.mxu0 %v18198_v1  ;;  %7000 = vmatprep.subr.bf16.mxu1 %v18201_v2  ;;  %v18288_v1 = vld [vmem:[#allocation5 + $0x1ca0] ss:$16 sps:$4 sm:$0xff]   ;;  %v18291_v2 = vld [vmem:[#allocation5 + $0x1ca8] ss:$16 sps:$4 sm:$0xff]  }
 0x3ec   :  { %6386 = vmatpush1.bf16.msra.mxu0 %v18196_v3  ;;  %7001 = vmatpush1.bf16.msra.mxu1 %v18199_v4  ;;  %v18296_v3 = vld [vmem:[#allocation5 + $0x1cc4] ss:$16 sps:$4 sm:$0xff]   ;;  %v18299_v4 = vld [vmem:[#allocation5 + $0x1ccc] ss:$16 sps:$4 sm:$0xff]  }
 0x3ed   :  { %6387 = vmatprep.subr.bf16.mxu0 %v18204_v5  ;;  %7002 = vmatprep.subr.bf16.mxu1 %v18207_v6  ;;  %v18294_v5 = vld [vmem:[#allocation5 + $0x1cc0] ss:$16 sps:$4 sm:$0xff]   ;;  %v18297_v6 = vld [vmem:[#allocation5 + $0x1cc8] ss:$16 sps:$4 sm:$0xff]  }
 0x3f0   :  { %6388 = vmatpush1.bf16.msra.mxu0 %v18202_v7  ;;  %7003 = vmatpush1.bf16.msra.mxu1 %v18205_v8  ;;  %v18302_v7 = vld [vmem:[#allocation5 + $0x1ce4] ss:$16 sps:$4 sm:$0xff]   ;;  %v18305_v8 = vld [vmem:[#allocation5 + $0x1cec] ss:$16 sps:$4 sm:$0xff]  }
 0x3f1   :  { %6389 = vmatprep.subr.bf16.mxu0 %v18210_v9  ;;  %7004 = vmatprep.subr.bf16.mxu1 %v18213_v10  ;;  %v18300_v9 = vld [vmem:[#allocation5 + $0x1ce0] ss:$16 sps:$4 sm:$0xff]   ;;  %v18303_v10 = vld [vmem:[#allocation5 + $0x1ce8] ss:$16 sps:$4 sm:$0xff]  }
 0x3f4   :  { %6390 = vmatpush1.bf16.msra.mxu0 %v18208_v12  ;;  %7005 = vmatpush1.bf16.msra.mxu1 %v18211_v13  ;;  %v18307_v12 = vld [vmem:[%s20468_s3 + $0x40] sm:$0xff]  }
 0x3f5   :  { %6391 = vmatprep.subr.bf16.mxu0 %v18216_v15  ;;  %7006 = vmatprep.subr.bf16.mxu1 %v18219_v16  ;;  %v18308_v13 = vld [vmem:[%s20468_s3 + $0xc0] sm:$0xff]   ;;  %v18306_v15 = vld [vmem:[#allocation2 + $0x70] ss:$0 sps:$4 sm:$0xff]  }
 0x3f6   :  { %v18309_v16 = vld [vmem:[%s20468_s3] sm:$0xff]  }
 0x3f8   :  { %6392 = vmatpush1.bf16.msra.mxu0 %v18214_v18  ;;  %7007 = vmatpush1.bf16.msra.mxu1 %v18217_v20  ;;  %v18310_v18 = vld [vmem:[%s20468_s3 + $0x80] sm:$0xff]   ;;  %v18311_v20 = vld [vmem:[%s20468_s3 + $0x48] sm:$0xff]  }
 0x3f9   :  { %6393 = vmatprep.subr.bf16.mxu0 %v18222_v11  ;;  %7008 = vmatprep.subr.bf16.mxu1 %v18225_v21  ;;  %v18312_v11 = vld [vmem:[%s20468_s3 + $0xc8] sm:$0xff]  }
 0x3fa   :  { %v18313_v21 = vld [vmem:[%s20468_s3 + $0x8] sm:$0xff]  }
 0x3fc   :  { %6394 = vmatpush1.bf16.msra.mxu0 %v18220_v14  ;;  %7009 = vmatpush1.bf16.msra.mxu1 %v18223_v23  ;;  %v18314_v14 = vld [vmem:[%s20468_s3 + $0x88] sm:$0xff]   ;;  %v18315_v23 = vld [vmem:[%s20468_s3 + $0x50] sm:$0xff]  }
 0x3fd   :  { %6395 = vmatprep.subr.bf16.mxu0 %v18228_v24  ;;  %7010 = vmatprep.subr.bf16.mxu1 %v18231_v17  ;;  %v18316_v24 = vld [vmem:[%s20468_s3 + $0xd0] sm:$0xff]  }
 0x3fe   :  { %v18317_v17 = vld [vmem:[%s20468_s3 + $0x10] sm:$0xff]  }
 0x400   :  { %6396 = vmatpush1.bf16.msra.mxu0 %v18226_v26  ;;  %7011 = vmatpush1.bf16.msra.mxu1 %v18229_v27  ;;  %v18318_v26 = vld [vmem:[%s20468_s3 + $0x90] sm:$0xff]   ;;  %v18319_v27 = vld [vmem:[%s20468_s3 + $0x58] sm:$0xff]  }
 0x401   :  { %6397 = vmatprep.subr.bf16.mxu0 %v18234_v19  ;;  %7012 = vmatprep.subr.bf16.mxu1 %v18237_v29  ;;  %v18320_v19 = vld [vmem:[%s20468_s3 + $0xd8] sm:$0xff]  }
 0x402   :  { %v18321_v29 = vld [vmem:[%s20468_s3 + $0x18] sm:$0xff]  }
 0x404   :  { %6398 = vmatpush1.bf16.msra.mxu0 %v18232_v30  ;;  %7013 = vmatpush1.bf16.msra.mxu1 %v18235_v22  ;;  %v18322_v30 = vld [vmem:[%s20468_s3 + $0x98] sm:$0xff]   ;;  %v18323_v22 = vld [vmem:[%s20468_s3 + $0x60] sm:$0xff]  }
 0x405   :  { %6399 = vmatprep.subr.bf16.mxu0 %v18240_v32  ;;  %7014 = vmatprep.subr.bf16.mxu1 %v18243_v33  ;;  %v18324_v32 = vld [vmem:[%s20468_s3 + $0xe0] sm:$0xff]  }
 0x406   :  { %v18325_v33 = vld [vmem:[%s20468_s3 + $0x20] sm:$0xff]  }
 0x408   :  { %6400 = vmatpush1.bf16.msra.mxu0 %v18238_v25  ;;  %7015 = vmatpush1.bf16.msra.mxu1 %v18241_v35  ;;  %v18326_v25 = vld [vmem:[%s20468_s3 + $0xa0] sm:$0xff]   ;;  %v18327_v35 = vld [vmem:[%s20468_s3 + $0x68] sm:$0xff]  }
 0x409   :  { %6401 = vmatprep.subr.bf16.mxu0 %v18246_v36  ;;  %7016 = vmatprep.subr.bf16.mxu1 %v18249_v28  ;;  %v18328_v36 = vld [vmem:[%s20468_s3 + $0xe8] sm:$0xff]  }
 0x40a   :  { %v18329_v28 = vld [vmem:[%s20468_s3 + $0x28] sm:$0xff]  }
 0x40c   :  { %6402 = vmatpush1.bf16.msra.mxu0 %v18244_v38  ;;  %7017 = vmatpush1.bf16.msra.mxu1 %v18247_v39  ;;  %v18330_v38 = vld [vmem:[%s20468_s3 + $0xa8] sm:$0xff]   ;;  %v18331_v39 = vld [vmem:[%s20468_s3 + $0x70] sm:$0xff]  }
 0x40d   :  { %6403 = vmatprep.subr.bf16.mxu0 %v18252_v31  ;;  %7018 = vmatprep.subr.bf16.mxu1 %v18255_v41  ;;  %v18332_v31 = vld [vmem:[%s20468_s3 + $0xf0] sm:$0xff]  }
 0x40e   :  { %v18333_v41 = vld [vmem:[%s20468_s3 + $0x30] sm:$0xff]  }
 0x410   :  { %6404 = vmatpush1.bf16.msra.mxu0 %v18250_v42  ;;  %7019 = vmatpush1.bf16.msra.mxu1 %v18253_v34  ;;  %v18334_v42 = vld [vmem:[%s20468_s3 + $0xb0] sm:$0xff]   ;;  %v18335_v34 = vld [vmem:[%s20468_s3 + $0x78] sm:$0xff]  }
 0x411   :  { %6414 = vmatprep.subr.bf16.mxu0 %v18260_v44  ;;  %7029 = vmatprep.subr.bf16.mxu1 %v18263_v45  ;;  %v18336_v44 = vld [vmem:[%s20468_s3 + $0xf8] sm:$0xff]  }
 0x412   :  { %v18337_v45 = vld [vmem:[%s20468_s3 + $0x38] sm:$0xff]  }
 0x413   :  { %6406 = vmatmul.mubr.bf16.vlgmr.msra.gmra.mrb[0].mxu0 %v14682_v47  ;;  %7021 = vmatmul.mubr.bf16.vlgmr.msra.gmra.mrb[0].mxu1 %v14682_v47 }
 0x414   :  { %6415 = vmatpush1.bf16.msra.mxu0 %v18258_v46  ;;  %7030 = vmatpush1.bf16.msra.mxu1 %v18261_v37  ;;  %v18338_v46 = vld [vmem:[%s20468_s3 + $0xb8] sm:$0xff]   ;;  %v1078_v37 = vlaneseq  ;;  %s19952_s3 = smov [#allocation16]  }
 0x415   :  { %6416 = vmatprep.subr.bf16.mxu0 %v18266_v48  ;;  %7031 = vmatprep.subr.bf16.mxu1 %v18269_v49  ;;  %s14643_s22 = sshll.u32 %s19952_s3, 4  ;;  %s14644_s22 = int_to_ptr.vmem [resolvable:$true] %s14643_s22 }
 0x416   :  { %6446 = vmatprep.mubr.bf16.mxu0 %v19951_v55  ;;  %7061 = vmatprep.mubr.bf16.mxu1 %v19951_v55  ;;  %v20281_v47 = vshrl.u32 %v1078_v37, 7  ;;  %v18357_v37 = vld [vmem:[#allocation13 + $0xe8] ss:$116 sps:$4 sm:$0xff]   ;;  %s19905_s23 = scalar_lea.vmem %s14644_s22, 3712  ;;  %p19910_p9 = scmp.lt.s32.totalorder %s14644_s22, %s14644_s22 }
 0x417   :  { %p19906_p8 = scmp.ne.s32.totalorder %s14644_s22, %s19905_s23  ;;  %p19911_p10 = scmp.lt.s32.totalorder %s19905_s23, %s19905_s23 }
 0x418   :  { %6417 = vmatpush1.bf16.msra.mxu0 %v18264_v50  ;;  %7032 = vmatpush1.bf16.msra.mxu1 %v18267_v51  ;;  %v20284_v48 = vsub.s32 0, %v20281_v47  ;;  %v20287_v49 = vsub.s32 2, %v20281_v47  ;;  %v1076_v50 = vld [vmem:[#allocation7] sm:$0xf]  ;;  %v20290_v51 = vsub.s32 1, %v20281_v47 }
 0x419   :  { %6418 = vmatprep.subr.bf16.mxu0 %v18272_v40  ;;  %7033 = vmatprep.subr.bf16.mxu1 %v18275_v52  ;;  %v20293_v40 = vsub.s32 3, %v20281_v47  ;;  %p19912_p11 = por %p19911_p10, %p19910_p9 }
 0x41a   :  { %v1081_v52 = vrot.slane %v1076_v50, %v20284_v48 }
 0x41b   :  { %p19913_p12 = pnand %p19912_p11, %p19906_p8 }
 0x41c   :  { %6419 = vmatpush1.bf16.msra.mxu0 %v18270_v53  ;;  %7034 = vmatpush1.bf16.msra.mxu1 %v18273_v54  ;;  %v1089_v53 = vrot.slane %v1076_v50, %v20287_v49  ;;  %v1085_v54 = vrot.slane %v1076_v50, %v20290_v51 }
 0x41d   :  { %6420 = vmatprep.subr.bf16.mxu0 %v18278_v43  ;;  %7035 = vmatprep.subr.bf16.mxu1 %v18281_v56  ;;  %v1093_v43 = vrot.slane %v1076_v50, %v20293_v40  ;;  %v18360_v50 = vld [vmem:[#allocation13 + $0xf0] ss:$116 sps:$4 sm:$0xff]  }
 0x420   :  { %6421 = vmatpush1.bf16.msra.mxu0 %v18276_v57  ;;  %7036 = vmatpush1.bf16.msra.mxu1 %v18279_v58 }
 0x421   :  { %6422 = vmatprep.subr.bf16.mxu0 %v18284_v59  ;;  %7037 = vmatprep.subr.bf16.mxu1 %v18287_v60 }
 0x424   :  { %6423 = vmatpush1.bf16.msra.mxu0 %v18282_v61  ;;  %7038 = vmatpush1.bf16.msra.mxu1 %v18285_v62 }
 0x425   :  { %6424 = vmatprep.subr.bf16.mxu0 %v18290_v63  ;;  %7039 = vmatprep.subr.bf16.mxu1 %v18293_v0 }
 0x428   :  { %6425 = vmatpush1.bf16.msra.mxu0 %v18288_v1  ;;  %7040 = vmatpush1.bf16.msra.mxu1 %v18291_v2 }
 0x429   :  { %6426 = vmatprep.subr.bf16.mxu0 %v18296_v3  ;;  %7041 = vmatprep.subr.bf16.mxu1 %v18299_v4 }
 0x42c   :  { %6427 = vmatpush1.bf16.msra.mxu0 %v18294_v5  ;;  %7042 = vmatpush1.bf16.msra.mxu1 %v18297_v6 }
 0x42d   :  { %6428 = vmatprep.subr.bf16.mxu0 %v18302_v7  ;;  %7043 = vmatprep.subr.bf16.mxu1 %v18305_v8 }
 0x430   :  { %6429 = vmatpush1.bf16.msra.mxu0 %v18300_v9  ;;  %7044 = vmatpush1.bf16.msra.mxu1 %v18303_v10 }
 0x431   :  { %16584 = vmatprep.subr.bf16.mxu0 %v18307_v12  ;;  %16606 = vmatprep.subr.bf16.mxu1 %v18308_v13 }
 0x433   :  { %6447 = vmatmul.mubr.bf16.vlgmr.msra.gmra.mrb[0].mxu0 %v18306_v15  ;;  %7062 = vmatmul.mubr.bf16.vlgmr.msra.gmra.mrb[0].mxu1 %v18306_v15 }
 0x434   :  { %16585 = vmatpush3.bf16.msra.mxu0 %v18309_v16  ;;  %16607 = vmatpush3.bf16.msra.mxu1 %v18310_v18 }
 0x435   :  { %16586 = vmatprep.subr.bf16.mxu0 %v18311_v20  ;;  %16608 = vmatprep.subr.bf16.mxu1 %v18312_v11  ;;  %v18341_v20 = vld [vmem:[#allocation10 + $0x4] ss:$16 sps:$4 sm:$0xff]   ;;  %v18344_v11 = vld [vmem:[#allocation10 + $0xc] ss:$16 sps:$4 sm:$0xff]  }
 0x438   :  { %16587 = vmatpush3.bf16.msra.mxu0 %v18313_v21  ;;  %16609 = vmatpush3.bf16.msra.mxu1 %v18314_v14  ;;  %v18339_v21 = vld [vmem:[#allocation10] ss:$16 sps:$4 sm:$0xff]   ;;  %v18342_v14 = vld [vmem:[#allocation10 + $0x8] ss:$16 sps:$4 sm:$0xff]  }
 0x439   :  { %16588 = vmatprep.subr.bf16.mxu0 %v18315_v23  ;;  %16610 = vmatprep.subr.bf16.mxu1 %v18316_v24  ;;  %v18347_v23 = vld [vmem:[#allocation10 + $0x24] ss:$16 sps:$4 sm:$0xff]   ;;  %v18350_v24 = vld [vmem:[#allocation10 + $0x2c] ss:$16 sps:$4 sm:$0xff]  }
 0x43c   :  { %16589 = vmatpush3.bf16.msra.mxu0 %v18317_v17  ;;  %16611 = vmatpush3.bf16.msra.mxu1 %v18318_v26  ;;  %v18345_v17 = vld [vmem:[#allocation10 + $0x20] ss:$16 sps:$4 sm:$0xff]   ;;  %v18348_v26 = vld [vmem:[#allocation10 + $0x28] ss:$16 sps:$4 sm:$0xff]  }
 0x43d   :  { %16590 = vmatprep.subr.bf16.mxu0 %v18319_v27  ;;  %16612 = vmatprep.subr.bf16.mxu1 %v18320_v19  ;;  %v18353_v27 = vld [vmem:[#allocation13 + $0x4] ss:$116 sps:$4 sm:$0xff]   ;;  %v18356_v19 = vld [vmem:[#allocation13 + $0xc] ss:$116 sps:$4 sm:$0xff]  }
 0x440   :  { %16591 = vmatpush3.bf16.msra.mxu0 %v18321_v29  ;;  %16613 = vmatpush3.bf16.msra.mxu1 %v18322_v30  ;;  %v15613_v30 = vld [vmem:[#allocation8] ss:$0 sm:$0xff] }
 0x441   :  { %16592 = vmatprep.subr.bf16.mxu0 %v18323_v22  ;;  %16614 = vmatprep.subr.bf16.mxu1 %v18324_v32 }
 0x444   :  { %16593 = vmatpush3.bf16.msra.mxu0 %v18325_v33  ;;  %16615 = vmatpush3.bf16.msra.mxu1 %v18326_v25 }
 0x445   :  { %16594 = vmatprep.subr.bf16.mxu0 %v18327_v35  ;;  %16616 = vmatprep.subr.bf16.mxu1 %v18328_v36 }
 0x448   :  { %16595 = vmatpush3.bf16.msra.mxu0 %v18329_v28  ;;  %16617 = vmatpush3.bf16.msra.mxu1 %v18330_v38 }
 0x449   :  { %16596 = vmatprep.subr.bf16.mxu0 %v18331_v39  ;;  %16618 = vmatprep.subr.bf16.mxu1 %v18332_v31 }
 0x44c   :  { %16597 = vmatpush3.bf16.msra.mxu0 %v18333_v41  ;;  %16619 = vmatpush3.bf16.msra.mxu1 %v18334_v42  ;;  %v18351_v42 = vld [vmem:[#allocation13] ss:$116 sps:$4 sm:$0xff]  }
 0x44d   :  { %16598 = vmatprep.subr.bf16.mxu0 %v18335_v34  ;;  %16620 = vmatprep.subr.bf16.mxu1 %v18336_v44  ;;  %v18354_v34 = vld [vmem:[#allocation13 + $0x8] ss:$116 sps:$4 sm:$0xff]  }
 0x450   :  { %16599 = vmatpush3.bf16.msra.mxu0 %v18337_v45  ;;  %16621 = vmatpush3.bf16.msra.mxu1 %v18338_v46  ;;  %v18359_v45 = vld [vmem:[#allocation13 + $0xec] ss:$116 sps:$4 sm:$0xff]   ;;  %v18362_v46 = vld [vmem:[#allocation13 + $0xf4] ss:$116 sps:$4 sm:$0xff]  }
 0x451   :  { %7505 = vmatprep.subr.bf16.mxu0 %v18341_v20  ;;  %7546 = vmatprep.subr.bf16.mxu1 %v18344_v11  ;;  %v18407_v20 = vld [vmem:[#allocation13 + $0x82c] ss:$116 sps:$4 sm:$0xff]   ;;  %v18410_v11 = vld [vmem:[#allocation13 + $0x834] ss:$116 sps:$4 sm:$0xff]  }
 0x506   :  { %v6448_v56 = vpop.f32.mrb[0].mxu0  ;;  %v7063_v57 = vpop.f32.mrb[0].mxu1 }
 0x507   :  { %v16672_v58 = vadd.f32 %v6448_v56, %v1081_v52  ;;  %v16674_v59 = vadd.f32 %v7063_v57, %v1089_v53  ;;  %v6450_v60 = vpop.f32.mrb[1].mxu0  ;;  %v7065_v61 = vpop.f32.mrb[1].mxu1  ;;  %v18365_v52 = vld [vmem:[#allocation13 + $0x1d4] ss:$116 sps:$4 sm:$0xff]   ;;  %v18368_v53 = vld [vmem:[#allocation13 + $0x1dc] ss:$116 sps:$4 sm:$0xff]  }
 0x508   :  { %v16673_v62 = vadd.f32 %v6450_v60, %v1085_v54  ;;  %v16675_v63 = vadd.f32 %v7065_v61, %v1093_v43  ;;  %v6452_v0 = vpop.f32.mrb[2].mxu0  ;;  %v7067_v1 = vpop.f32.mrb[2].mxu1  ;;  %v18363_v54 = vld [vmem:[#allocation13 + $0x1d0] ss:$116 sps:$4 sm:$0xff]   ;;  %v18366_v43 = vld [vmem:[#allocation13 + $0x1d8] ss:$116 sps:$4 sm:$0xff]  }
 0x509   :  { %vm7070_vm0 = vcmp.gt.f32.partialorder %v16672_v58, 0.0  ;;  %v7074_v2 = vmul.f32 0.2, %v16672_v58  ;;  %vm7072_vm1 = vcmp.gt.f32.partialorder %v16674_v59, 0.0  ;;  %v7076_v3 = vmul.f32 0.2, %v16674_v59 }
 0x50a   :  { %vm7071_vm2 = vcmp.gt.f32.partialorder %v16673_v62, 0.0  ;;  %v7075_v4 = vmul.f32 0.2, %v16673_v62  ;;  %vm7073_vm3 = vcmp.gt.f32.partialorder %v16675_v63, 0.0  ;;  %v7077_v5 = vmul.f32 0.2, %v16675_v63 }
 0x50b   :  { %v7078_v6 = vsel %vm7070_vm0, %v16672_v58, %v7074_v2  ;;  %v7080_v7 = vsel %vm7072_vm1, %v16674_v59, %v7076_v3  ;;  %v6453_v8 = vpop.f32.mrb[3].mxu0  ;;  %v7068_v9 = vpop.f32.mrb[3].mxu1  ;;  %v18371_v56 = vld [vmem:[#allocation13 + $0x2bc] ss:$116 sps:$4 sm:$0xff]   ;;  %v18374_v57 = vld [vmem:[#allocation13 + $0x2c4] ss:$116 sps:$4 sm:$0xff]  }
 0x50c   :  { %v7079_v10 = vsel %vm7071_vm2, %v16673_v62, %v7075_v4  ;;  %v7081_v12 = vsel %vm7073_vm3, %v16675_v63, %v7077_v5  ;;  %v7082_v16 = vpack.c.bf16 %v7078_v6, %v7078_v6  ;;  %v7084_v18 = vpack.c.bf16 %v7080_v7, %v7080_v7  ;;  %v18369_v58 = vld [vmem:[#allocation13 + $0x2b8] ss:$116 sps:$4 sm:$0xff]   ;;  %v18372_v59 = vld [vmem:[#allocation13 + $0x2c0] ss:$116 sps:$4 sm:$0xff]   ;;  %v18378_v63 = vld [vmem:[#allocation13 + $0x3a8] ss:$116 sps:$4 sm:$0xff]  }
 0x50d   :  { %v7083_v13 = vpack.c.bf16 %v7079_v10, %v7079_v10  ;;  %v7085_v15 = vpack.c.bf16 %v7081_v12, %v7081_v12  ;;  %v18377_v60 = vld [vmem:[#allocation13 + $0x3a4] ss:$116 sps:$4 sm:$0xff]   ;;  %v18380_v61 = vld [vmem:[#allocation13 + $0x3ac] ss:$116 sps:$4 sm:$0xff]   ;;  %v18386_v1 = vld [vmem:[#allocation13 + $0x494] ss:$116 sps:$4 sm:$0xff]  }
 0x50e   :  { %v18375_v62 = vld [vmem:[#allocation13 + $0x3a0] ss:$116 sps:$4 sm:$0xff]   ;;  %v18381_v2 = vld [vmem:[#allocation13 + $0x488] ss:$116 sps:$4 sm:$0xff]   ;;  %v18384_v3 = vld [vmem:[#allocation13 + $0x490] ss:$116 sps:$4 sm:$0xff]  }
 0x50f   :  { %7381 = vmatprep.mubr.bf16.mxu0 %v7083_v13  ;;  %7421 = vmatprep.mubr.bf16.mxu1 %v7085_v15  ;;  %v18383_v0 = vld [vmem:[#allocation13 + $0x48c] ss:$116 sps:$4 sm:$0xff]   ;;  %v18389_v4 = vld [vmem:[#allocation13 + $0x574] ss:$116 sps:$4 sm:$0xff]   ;;  %v18392_v5 = vld [vmem:[#allocation13 + $0x57c] ss:$116 sps:$4 sm:$0xff]  }
 0x510   :  { %7382 = vmatmul.mubr.bf16.vlgmr.msra.gmra.mrb[4].mxu0 %v7082_v16  ;;  %7422 = vmatmul.mubr.bf16.vlgmr.msra.gmra.mrb[4].mxu1 %v7084_v18  ;;  %v18387_v6 = vld [vmem:[#allocation13 + $0x570] ss:$116 sps:$4 sm:$0xff]   ;;  %v18390_v7 = vld [vmem:[#allocation13 + $0x578] ss:$116 sps:$4 sm:$0xff]   ;;  %v18396_v12 = vld [vmem:[#allocation13 + $0x660] ss:$116 sps:$4 sm:$0xff]  }
 0x511   :  { %7537 = vmatprep.mubr.bf16.mxu0 %v19951_v55  ;;  %7578 = vmatprep.mubr.bf16.mxu1 %v19951_v55  ;;  %v18395_v8 = vld [vmem:[#allocation13 + $0x65c] ss:$116 sps:$4 sm:$0xff]   ;;  %v18398_v9 = vld [vmem:[#allocation13 + $0x664] ss:$116 sps:$4 sm:$0xff]   ;;  %v18404_v15 = vld [vmem:[#allocation13 + $0x74c] ss:$116 sps:$4 sm:$0xff]  }
 0x512   :  { %7506 = vmatpush1.bf16.msra.mxu0 %v18339_v21  ;;  %7547 = vmatpush1.bf16.msra.mxu1 %v18342_v14  ;;  %v18393_v10 = vld [vmem:[#allocation13 + $0x658] ss:$116 sps:$4 sm:$0xff]   ;;  %v18399_v16 = vld [vmem:[#allocation13 + $0x740] ss:$116 sps:$4 sm:$0xff]   ;;  %v18402_v18 = vld [vmem:[#allocation13 + $0x748] ss:$116 sps:$4 sm:$0xff]  }
 0x513   :  { %7507 = vmatprep.subr.bf16.mxu0 %v18347_v23  ;;  %7548 = vmatprep.subr.bf16.mxu1 %v18350_v24  ;;  %v18401_v13 = vld [vmem:[#allocation13 + $0x744] ss:$116 sps:$4 sm:$0xff]   ;;  %v18405_v21 = vld [vmem:[#allocation13 + $0x828] ss:$116 sps:$4 sm:$0xff]  }
 0x514   :  { %v18408_v14 = vld [vmem:[#allocation13 + $0x830] ss:$116 sps:$4 sm:$0xff]   ;;  %v18413_v23 = vld [vmem:[#allocation13 + $0x914] ss:$116 sps:$4 sm:$0xff]  }
 0x515   :  { %v18416_v24 = vld [vmem:[#allocation13 + $0x91c] ss:$116 sps:$4 sm:$0xff]  }
 0x516   :  { %7508 = vmatpush1.bf16.msra.mxu0 %v18345_v17  ;;  %7549 = vmatpush1.bf16.msra.mxu1 %v18348_v26  ;;  %v18411_v17 = vld [vmem:[#allocation13 + $0x910] ss:$116 sps:$4 sm:$0xff]   ;;  %v18414_v26 = vld [vmem:[#allocation13 + $0x918] ss:$116 sps:$4 sm:$0xff]  }
 0x517   :  { %13380 = vmatprep.subr.bf16.mxu0 %v18353_v27  ;;  %13462 = vmatprep.subr.bf16.mxu1 %v18356_v19  ;;  %v18419_v27 = vld [vmem:[#allocation13 + $0x9fc] ss:$116 sps:$4 sm:$0xff]   ;;  %v18422_v19 = vld [vmem:[#allocation13 + $0xa04] ss:$116 sps:$4 sm:$0xff]  }
 0x5e3   :  { %v16600_v55 = vpop.f32.mrb[4].mxu0  ;;  %v16622_v29 = vpop.f32.mrb[4].mxu1 }
 0x5e4   :  { %v16601_v22 = vpop.f32.mrb[5].mxu0  ;;  %v16623_v32 = vpop.f32.mrb[5].mxu1 }
 0x5e5   :  { %v16602_v33 = vadd.f32 %v16601_v22, %v16600_v55  ;;  %v16624_v25 = vadd.f32 %v16623_v32, %v16622_v29  ;;  %v16603_v35 = vpop.f32.mrb[6].mxu0  ;;  %v16625_v36 = vpop.f32.mrb[6].mxu1  ;;  %v18417_v55 = vld [vmem:[#allocation13 + $0x9f8] ss:$116 sps:$4 sm:$0xff]   ;;  %v18420_v29 = vld [vmem:[#allocation13 + $0xa00] ss:$116 sps:$4 sm:$0xff]  }
 0x5e6   :  { %v16604_v28 = vpop.f32.mrb[7].mxu0  ;;  %v16626_v38 = vpop.f32.mrb[7].mxu1  ;;  %v18428_v22 = vld [vmem:[#allocation13 + $0xaec] ss:$116 sps:$4 sm:$0xff]   ;;  %v18434_v35 = vld [vmem:[#allocation13 + $0xbd4] ss:$116 sps:$4 sm:$0xff]  }
 0x5e7   :  { %v7384_v39 = vadd.f32 %v16602_v33, %v15613_v30  ;;  %v18425_v30 = vld [vmem:[#allocation13 + $0xae4] ss:$116 sps:$4 sm:$0xff]   ;;  %v18423_v32 = vld [vmem:[#allocation13 + $0xae0] ss:$116 sps:$4 sm:$0xff]   ;;  %v18426_v33 = vld [vmem:[#allocation13 + $0xae8] ss:$116 sps:$4 sm:$0xff]  }
 0x5e8   :  { %v18429_v36 = vld [vmem:[#allocation13 + $0xbc8] ss:$116 sps:$4 sm:$0xff]   ;;  %v18432_v28 = vld [vmem:[#allocation13 + $0xbd0] ss:$116 sps:$4 sm:$0xff]  }
 0x5e9   :  { %v7424_v31 = vadd.f32 %v16624_v25, %v7384_v39  ;;  %v18431_v25 = vld [vmem:[#allocation13 + $0xbcc] ss:$116 sps:$4 sm:$0xff]   ;;  %v18437_v38 = vld [vmem:[#allocation13 + $0xcb4] ss:$116 sps:$4 sm:$0xff]   ;;  %v18440_v39 = vld [vmem:[#allocation13 + $0xcbc] ss:$116 sps:$4 sm:$0xff]  }
 0x5eb   :  { %19727 = vtanh.f32 %v7424_v31  ;;  %v18435_v31 = vld [vmem:[#allocation13 + $0xcb0] ss:$116 sps:$4 sm:$0xff]  }
 0x5f5   :  { %v19728_v41 = vpop.eup %19727 }
 0x5f6   :  { %v7430_v44 = vpack.c.bf16 %v19728_v41, %v19728_v41  ;;  %v18438_v41 = vld [vmem:[#allocation13 + $0xcb8] ss:$116 sps:$4 sm:$0xff]  }
 0x5f8   :  { %15654 = vmatmul.mubr.msk.bf16.vlgmr.msra.gmra.mrb[8].mxu0 %vm7501_vm4, %v7430_v44  ;;  %15655 = vmatmul.mubr.msk.bf16.vlgmr.msra.gmra.mrb[8].mxu1 %vm7501_vm4, %v7430_v44  ;;  %v18441_v44 = vld [vmem:[#allocation13 + $0xd98] ss:$116 sps:$4 sm:$0xff]  }
 0x5f9   :  { %13381 = vmatpush1.bf16.msra.mxu0 %v18351_v42  ;;  %13463 = vmatpush1.bf16.msra.mxu1 %v18354_v34  ;;  %v18443_v42 = vld [vmem:[#allocation13 + $0xd9c] ss:$116 sps:$4 sm:$0xff]   ;;  %v18446_v34 = vld [vmem:[#allocation13 + $0xda4] ss:$116 sps:$4 sm:$0xff]  }
 0x5fa   :  { %13382 = vmatprep.subr.bf16.mxu0 %v18359_v45  ;;  %13464 = vmatprep.subr.bf16.mxu1 %v18362_v46  ;;  %v18444_v45 = vld [vmem:[#allocation13 + $0xda0] ss:$116 sps:$4 sm:$0xff]   ;;  %v18449_v46 = vld [vmem:[#allocation13 + $0xe84] ss:$116 sps:$4 sm:$0xff]  }
 0x5fd   :  { %13383 = vmatpush1.bf16.msra.mxu0 %v18357_v37  ;;  %13465 = vmatpush1.bf16.msra.mxu1 %v18360_v50  ;;  %v18452_v37 = vld [vmem:[#allocation13 + $0xe8c] ss:$116 sps:$4 sm:$0xff]   ;;  %v20301_v50 = vld [vmem:[#allocation11] sm:$0xf] }
 0x5fe   :  { %13384 = vmatprep.subr.bf16.mxu0 %v18365_v52  ;;  %13466 = vmatprep.subr.bf16.mxu1 %v18368_v53  ;;  %v7444_v52 = vrot.slane %v20301_v50, %v20284_v48  ;;  %v7448_v53 = vrot.slane %v20301_v50, %v20290_v51 }
 0x601   :  { %13385 = vmatpush1.bf16.msra.mxu0 %v18363_v54  ;;  %13467 = vmatpush1.bf16.msra.mxu1 %v18366_v43  ;;  %v7456_v54 = vrot.slane %v20301_v50, %v20293_v40 }
 0x602   :  { %13386 = vmatprep.subr.bf16.mxu0 %v18371_v56  ;;  %13468 = vmatprep.subr.bf16.mxu1 %v18374_v57 }
 0x605   :  { %13387 = vmatpush1.bf16.msra.mxu0 %v18369_v58  ;;  %13469 = vmatpush1.bf16.msra.mxu1 %v18372_v59 }
 0x606   :  { %13388 = vmatprep.subr.bf16.mxu0 %v18377_v60  ;;  %13470 = vmatprep.subr.bf16.mxu1 %v18380_v61 }
 0x609   :  { %13389 = vmatpush1.bf16.msra.mxu0 %v18375_v62  ;;  %13471 = vmatpush1.bf16.msra.mxu1 %v18378_v63 }
 0x60a   :  { %13390 = vmatprep.subr.bf16.mxu0 %v18383_v0  ;;  %13472 = vmatprep.subr.bf16.mxu1 %v18386_v1 }
 0x60d   :  { %13391 = vmatpush1.bf16.msra.mxu0 %v18381_v2  ;;  %13473 = vmatpush1.bf16.msra.mxu1 %v18384_v3 }
 0x60e   :  { %13392 = vmatprep.subr.bf16.mxu0 %v18389_v4  ;;  %13474 = vmatprep.subr.bf16.mxu1 %v18392_v5 }
 0x611   :  { %13393 = vmatpush1.bf16.msra.mxu0 %v18387_v6  ;;  %13475 = vmatpush1.bf16.msra.mxu1 %v18390_v7  ;;  %v18447_v6 = vld [vmem:[#allocation13 + $0xe80] ss:$116 sps:$4 sm:$0xff]   ;;  %v18450_v7 = vld [vmem:[#allocation13 + $0xe88] ss:$116 sps:$4 sm:$0xff]  }
 0x612   :  { %13394 = vmatprep.subr.bf16.mxu0 %v18395_v8  ;;  %13476 = vmatprep.subr.bf16.mxu1 %v18398_v9  ;;  %v18455_v9 = vld [vmem:[#allocation13 + $0xf6c] ss:$116 sps:$4 sm:$0xff]  }
 0x615   :  { %13395 = vmatpush1.bf16.msra.mxu0 %v18393_v10  ;;  %13477 = vmatpush1.bf16.msra.mxu1 %v18396_v12  ;;  %v18458_v10 = vld [vmem:[#allocation13 + $0xf74] ss:$116 sps:$4 sm:$0xff]  }
 0x616   :  { %13396 = vmatprep.subr.bf16.mxu0 %v18401_v13  ;;  %13478 = vmatprep.subr.bf16.mxu1 %v18404_v15  ;;  %v18453_v13 = vld [vmem:[#allocation13 + $0xf68] ss:$116 sps:$4 sm:$0xff]   ;;  %v18456_v15 = vld [vmem:[#allocation13 + $0xf70] ss:$116 sps:$4 sm:$0xff]  }
 0x619   :  { %13397 = vmatpush1.bf16.msra.mxu0 %v18399_v16  ;;  %13479 = vmatpush1.bf16.msra.mxu1 %v18402_v18  ;;  %v18461_v16 = vld [vmem:[#allocation13 + $0x1054] ss:$116 sps:$4 sm:$0xff]   ;;  %v18464_v18 = vld [vmem:[#allocation13 + $0x105c] ss:$116 sps:$4 sm:$0xff]  }
 0x61a   :  { %13398 = vmatprep.subr.bf16.mxu0 %v18407_v20  ;;  %13480 = vmatprep.subr.bf16.mxu1 %v18410_v11  ;;  %v18459_v20 = vld [vmem:[#allocation13 + $0x1050] ss:$116 sps:$4 sm:$0xff]   ;;  %v18462_v11 = vld [vmem:[#allocation13 + $0x1058] ss:$116 sps:$4 sm:$0xff]  }
 0x61d   :  { %13399 = vmatpush1.bf16.msra.mxu0 %v18405_v21  ;;  %13481 = vmatpush1.bf16.msra.mxu1 %v18408_v14  ;;  %v18467_v21 = vld [vmem:[#allocation13 + $0x113c] ss:$116 sps:$4 sm:$0xff]   ;;  %v18470_v14 = vld [vmem:[#allocation13 + $0x1144] ss:$116 sps:$4 sm:$0xff]  }
 0x61e   :  { %13400 = vmatprep.subr.bf16.mxu0 %v18413_v23  ;;  %13482 = vmatprep.subr.bf16.mxu1 %v18416_v24  ;;  %v18465_v23 = vld [vmem:[#allocation13 + $0x1138] ss:$116 sps:$4 sm:$0xff]   ;;  %v18468_v24 = vld [vmem:[#allocation13 + $0x1140] ss:$116 sps:$4 sm:$0xff]  }
 0x621   :  { %13401 = vmatpush1.bf16.msra.mxu0 %v18411_v17  ;;  %13483 = vmatpush1.bf16.msra.mxu1 %v18414_v26  ;;  %v18473_v17 = vld [vmem:[#allocation13 + $0x1224] ss:$116 sps:$4 sm:$0xff]   ;;  %v18476_v26 = vld [vmem:[#allocation13 + $0x122c] ss:$116 sps:$4 sm:$0xff]  }
 0x622   :  { %13402 = vmatprep.subr.bf16.mxu0 %v18419_v27  ;;  %13484 = vmatprep.subr.bf16.mxu1 %v18422_v19  ;;  %v18471_v27 = vld [vmem:[#allocation13 + $0x1220] ss:$116 sps:$4 sm:$0xff]   ;;  %v18474_v19 = vld [vmem:[#allocation13 + $0x1228] ss:$116 sps:$4 sm:$0xff]  }
 0x625   :  { %13403 = vmatpush1.bf16.msra.mxu0 %v18417_v55  ;;  %13485 = vmatpush1.bf16.msra.mxu1 %v18420_v29  ;;  %v18479_v55 = vld [vmem:[#allocation13 + $0x130c] ss:$116 sps:$4 sm:$0xff]   ;;  %v18482_v29 = vld [vmem:[#allocation13 + $0x1314] ss:$116 sps:$4 sm:$0xff]  }
 0x626   :  { %13404 = vmatprep.subr.bf16.mxu0 %v18425_v30  ;;  %13486 = vmatprep.subr.bf16.mxu1 %v18428_v22  ;;  %v18477_v30 = vld [vmem:[#allocation13 + $0x1308] ss:$116 sps:$4 sm:$0xff]   ;;  %v18480_v22 = vld [vmem:[#allocation13 + $0x1310] ss:$116 sps:$4 sm:$0xff]  }
 0x629   :  { %13405 = vmatpush1.bf16.msra.mxu0 %v18423_v32  ;;  %13487 = vmatpush1.bf16.msra.mxu1 %v18426_v33  ;;  %v18485_v32 = vld [vmem:[#allocation13 + $0x13f4] ss:$116 sps:$4 sm:$0xff]   ;;  %v18488_v33 = vld [vmem:[#allocation13 + $0x13fc] ss:$116 sps:$4 sm:$0xff]  }
 0x62a   :  { %13406 = vmatprep.subr.bf16.mxu0 %v18431_v25  ;;  %13488 = vmatprep.subr.bf16.mxu1 %v18434_v35  ;;  %v18483_v25 = vld [vmem:[#allocation13 + $0x13f0] ss:$116 sps:$4 sm:$0xff]   ;;  %v18486_v35 = vld [vmem:[#allocation13 + $0x13f8] ss:$116 sps:$4 sm:$0xff]  }
 0x62d   :  { %13407 = vmatpush1.bf16.msra.mxu0 %v18429_v36  ;;  %13489 = vmatpush1.bf16.msra.mxu1 %v18432_v28  ;;  %v18491_v36 = vld [vmem:[#allocation13 + $0x14dc] ss:$116 sps:$4 sm:$0xff]   ;;  %v18494_v28 = vld [vmem:[#allocation13 + $0x14e4] ss:$116 sps:$4 sm:$0xff]  }
 0x62e   :  { %13408 = vmatprep.subr.bf16.mxu0 %v18437_v38  ;;  %13490 = vmatprep.subr.bf16.mxu1 %v18440_v39  ;;  %v18489_v38 = vld [vmem:[#allocation13 + $0x14d8] ss:$116 sps:$4 sm:$0xff]   ;;  %v18492_v39 = vld [vmem:[#allocation13 + $0x14e0] ss:$116 sps:$4 sm:$0xff]  }
 0x631   :  { %13409 = vmatpush1.bf16.msra.mxu0 %v18435_v31  ;;  %13491 = vmatpush1.bf16.msra.mxu1 %v18438_v41  ;;  %v18497_v31 = vld [vmem:[#allocation13 + $0x15c4] ss:$116 sps:$4 sm:$0xff]   ;;  %v18500_v41 = vld [vmem:[#allocation13 + $0x15cc] ss:$116 sps:$4 sm:$0xff]  }
 0x632   :  { %13410 = vmatprep.subr.bf16.mxu0 %v18443_v42  ;;  %13492 = vmatprep.subr.bf16.mxu1 %v18446_v34  ;;  %v18495_v42 = vld [vmem:[#allocation13 + $0x15c0] ss:$116 sps:$4 sm:$0xff]   ;;  %v18498_v34 = vld [vmem:[#allocation13 + $0x15c8] ss:$116 sps:$4 sm:$0xff]  }
 0x635   :  { %13411 = vmatpush1.bf16.msra.mxu0 %v18441_v44  ;;  %13493 = vmatpush1.bf16.msra.mxu1 %v18444_v45  ;;  %v18503_v44 = vld [vmem:[#allocation13 + $0x16ac] ss:$116 sps:$4 sm:$0xff]   ;;  %v18506_v45 = vld [vmem:[#allocation13 + $0x16b4] ss:$116 sps:$4 sm:$0xff]  }
 0x636   :  { %13421 = vmatprep.subr.bf16.mxu0 %v18449_v46  ;;  %13503 = vmatprep.subr.bf16.mxu1 %v18452_v37  ;;  %v18501_v46 = vld [vmem:[#allocation13 + $0x16a8] ss:$116 sps:$4 sm:$0xff]   ;;  %v18504_v37 = vld [vmem:[#allocation13 + $0x16b0] ss:$116 sps:$4 sm:$0xff]  }
 0x6cb   :  { %v7539_v43 = vpop.f32.mrb[8].mxu0  ;;  %v20309_v56 = vpop.f32.mrb[8].mxu1 }
 0x6cc   :  { %v7540_v57 = vadd.f32 %v7539_v43, %v7444_v52  ;;  %v7541_v58 = vpop.f32.mrb[9].mxu0  ;;  %v7582_v59 = vpop.f32.mrb[9].mxu1  ;;  %v18509_v52 = vld [vmem:[#allocation13 + $0x1794] ss:$116 sps:$4 sm:$0xff]   ;;  %v18510_v43 = vld [vmem:[#allocation13 + $0x1798] ss:$116 sps:$4 sm:$0xff]  }
 0x6cd   :  { %v7542_v60 = vadd.f32 %v7541_v58, %v7448_v53  ;;  %v7583_v61 = vadd.f32 %v7582_v59, %v7456_v54  ;;  %v7543_v62 = vpop.f32.mrb[10].mxu0  ;;  %v7584_v63 = vpop.f32.mrb[10].mxu1  ;;  %v18512_v53 = vld [vmem:[#allocation13 + $0x179c] ss:$116 sps:$4 sm:$0xff]   ;;  %v18518_v58 = vld [vmem:[#allocation13 + $0x1884] ss:$116 sps:$4 sm:$0xff]  }
 0x6ce   :  { %v7587_v0 = vmax.f32 %v7540_v57, 0.0  ;;  %v7544_v1 = vpop.f32.mrb[11].mxu0  ;;  %v7585_v2 = vpop.f32.mrb[11].mxu1  ;;  %v18507_v54 = vld [vmem:[#allocation13 + $0x1790] ss:$116 sps:$4 sm:$0xff]  }
 0x6cf   :  { %v7588_v3 = vmax.f32 %v7542_v60, 0.0  ;;  %v7590_v4 = vmax.f32 %v7583_v61, 0.0  ;;  %v18515_v57 = vld [vmem:[#allocation13 + $0x187c] ss:$116 sps:$4 sm:$0xff]   ;;  %v18513_v59 = vld [vmem:[#allocation13 + $0x1878] ss:$116 sps:$4 sm:$0xff]  }
 0x6d0   :  { %v20313_v8 = vpack.c.bf16 %v7587_v0, %v7587_v0  ;;  %v18516_v60 = vld [vmem:[#allocation13 + $0x1880] ss:$116 sps:$4 sm:$0xff]   ;;  %v18521_v61 = vld [vmem:[#allocation13 + $0x1964] ss:$116 sps:$4 sm:$0xff]   ;;  %v18522_v0 = vld [vmem:[#allocation13 + $0x1968] ss:$116 sps:$4 sm:$0xff]  }
 0x6d1   :  { %v20311_v5 = vpack.c.bf16 %v7588_v3, %v7588_v3  ;;  %v20317_v12 = vpack.c.bf16 %v7590_v4, %v7590_v4  ;;  %v18524_v62 = vld [vmem:[#allocation13 + $0x196c] ss:$116 sps:$4 sm:$0xff]   ;;  %v18530_v2 = vld [vmem:[#allocation13 + $0x1a54] ss:$116 sps:$4 sm:$0xff]   ;;  %v18528_v4 = vld [vmem:[#allocation13 + $0x1a50] ss:$116 sps:$4 sm:$0xff]  }
 0x6d2   :  { %v18519_v63 = vld [vmem:[#allocation13 + $0x1960] ss:$116 sps:$4 sm:$0xff]   ;;  %v18525_v3 = vld [vmem:[#allocation13 + $0x1a48] ss:$116 sps:$4 sm:$0xff]  }
 0x6d3   :  { %13412 = vmatprep.mubr.bf16.mxu0 %v20311_v5  ;;  %13494 = vmatprep.mubr.bf16.mxu1 %v20311_v5  ;;  %v18527_v1 = vld [vmem:[#allocation13 + $0x1a4c] ss:$116 sps:$4 sm:$0xff]  }
 0x6d4   :  { %13413 = vmatmul.mubr.bf16.vlgmr.msra.gmra.mrb[12].mxu0 %v20313_v8  ;;  %13495 = vmatmul.mubr.bf16.vlgmr.msra.gmra.mrb[12].mxu1 %v20313_v8 }
 0x6d5   :  { %13422 = vmatpush1.bf16.msra.mxu0 %v18447_v6  ;;  %13504 = vmatpush1.bf16.msra.mxu1 %v18450_v7  ;;  %v7452_v6 = vrot.slane %v20301_v50, %v20287_v49  ;;  %v18533_v7 = vld [vmem:[#allocation13 + $0x1b34] ss:$116 sps:$4 sm:$0xff]  }
 0x6d6   :  { %13453 = vmatprep.mubr.bf16.mxu0 %v20317_v12  ;;  %13535 = vmatprep.mubr.bf16.mxu1 %v20317_v12  ;;  %v18545_v50 = vld [vmem:[#allocation13 + $0x14] ss:$116 sps:$4 sm:$0xff]  }
 0x6d7   :  { %13423 = vmatprep.subr.bf16.mxu0 %v18455_v9  ;;  %13505 = vmatprep.subr.bf16.mxu1 %v18458_v10  ;;  %v18536_v9 = vld [vmem:[#allocation13 + $0x1b3c] ss:$116 sps:$4 sm:$0xff]  }
 0x6d8   :  { %v18531_v10 = vld [vmem:[#allocation13 + $0x1b30] ss:$116 sps:$4 sm:$0xff]  }
 0x6d9   :  { %13424 = vmatpush1.bf16.msra.mxu0 %v18453_v13  ;;  %13506 = vmatpush1.bf16.msra.mxu1 %v18456_v15  ;;  %v18534_v13 = vld [vmem:[#allocation13 + $0x1b38] ss:$116 sps:$4 sm:$0xff]   ;;  %v7581_v15 = vadd.f32 %v20309_v56, %v7452_v6 }
 0x6da   :  { %13425 = vmatprep.subr.bf16.mxu0 %v18461_v16  ;;  %13507 = vmatprep.subr.bf16.mxu1 %v18464_v18  ;;  %v18539_v16 = vld [vmem:[#allocation13 + $0x1c1c] ss:$116 sps:$4 sm:$0xff]   ;;  %v18542_v18 = vld [vmem:[#allocation13 + $0x1c24] ss:$116 sps:$4 sm:$0xff]   ;;  %v18611_v6 = vld [vmem:[#allocation13 + $0xa0c] ss:$116 sps:$4 sm:$0xff]  }
 0x6db   :  { %v18546_v56 = vld [vmem:[#allocation13 + $0x18] ss:$116 sps:$4 sm:$0xff]  }
 0x6dd   :  { %13426 = vmatpush1.bf16.msra.mxu0 %v18459_v20  ;;  %13508 = vmatpush1.bf16.msra.mxu1 %v18462_v11  ;;  %v18537_v20 = vld [vmem:[#allocation13 + $0x1c18] ss:$116 sps:$4 sm:$0xff]   ;;  %v18540_v11 = vld [vmem:[#allocation13 + $0x1c20] ss:$116 sps:$4 sm:$0xff]  }
 0x6de   :  { %13427 = vmatprep.subr.bf16.mxu0 %v18467_v21  ;;  %13509 = vmatprep.subr.bf16.mxu1 %v18470_v14  ;;  %v7589_v21 = vmax.f32 %v7581_v15, 0.0  ;;  %v18548_v14 = vld [vmem:[#allocation13 + $0x1c] ss:$116 sps:$4 sm:$0xff]  }
 0x6df   :  { %v18620_v15 = vld [vmem:[#allocation13 + $0xafc] ss:$116 sps:$4 sm:$0xff]  }
 0x6e1   :  { %13428 = vmatpush1.bf16.msra.mxu0 %v18465_v23  ;;  %13510 = vmatpush1.bf16.msra.mxu1 %v18468_v24  ;;  %v18543_v23 = vld [vmem:[#allocation13 + $0x10] ss:$116 sps:$4 sm:$0xff]   ;;  %v20326_v24 = vpack.c.bf16 %v7589_v21, %v7589_v21  ;;  %v18621_v21 = vld [vmem:[#allocation13 + $0xbd8] ss:$116 sps:$4 sm:$0xff]  }
 0x6e2   :  { %13429 = vmatprep.subr.bf16.mxu0 %v18473_v17  ;;  %13511 = vmatprep.subr.bf16.mxu1 %v18476_v26  ;;  %v18551_v17 = vld [vmem:[#allocation13 + $0xfc] ss:$116 sps:$4 sm:$0xff]   ;;  %v18554_v26 = vld [vmem:[#allocation13 + $0x104] ss:$116 sps:$4 sm:$0xff]  }
 0x6e5   :  { %13430 = vmatpush1.bf16.msra.mxu0 %v18471_v27  ;;  %13512 = vmatpush1.bf16.msra.mxu1 %v18474_v19  ;;  %v18549_v27 = vld [vmem:[#allocation13 + $0xf8] ss:$116 sps:$4 sm:$0xff]   ;;  %v18552_v19 = vld [vmem:[#allocation13 + $0x100] ss:$116 sps:$4 sm:$0xff]  }
 0x6e6   :  { %13431 = vmatprep.subr.bf16.mxu0 %v18479_v55  ;;  %13513 = vmatprep.subr.bf16.mxu1 %v18482_v29  ;;  %v18557_v55 = vld [vmem:[#allocation13 + $0x1e4] ss:$116 sps:$4 sm:$0xff]   ;;  %v18560_v29 = vld [vmem:[#allocation13 + $0x1ec] ss:$116 sps:$4 sm:$0xff]  }
 0x6e9   :  { %13432 = vmatpush1.bf16.msra.mxu0 %v18477_v30  ;;  %13514 = vmatpush1.bf16.msra.mxu1 %v18480_v22  ;;  %v18555_v30 = vld [vmem:[#allocation13 + $0x1e0] ss:$116 sps:$4 sm:$0xff]   ;;  %v18558_v22 = vld [vmem:[#allocation13 + $0x1e8] ss:$116 sps:$4 sm:$0xff]  }
 0x6ea   :  { %13433 = vmatprep.subr.bf16.mxu0 %v18485_v32  ;;  %13515 = vmatprep.subr.bf16.mxu1 %v18488_v33  ;;  %v18563_v32 = vld [vmem:[#allocation13 + $0x2cc] ss:$116 sps:$4 sm:$0xff]   ;;  %v18566_v33 = vld [vmem:[#allocation13 + $0x2d4] ss:$116 sps:$4 sm:$0xff]  }
 0x6ed   :  { %13434 = vmatpush1.bf16.msra.mxu0 %v18483_v25  ;;  %13516 = vmatpush1.bf16.msra.mxu1 %v18486_v35  ;;  %v18561_v25 = vld [vmem:[#allocation13 + $0x2c8] ss:$116 sps:$4 sm:$0xff]   ;;  %v18564_v35 = vld [vmem:[#allocation13 + $0x2d0] ss:$116 sps:$4 sm:$0xff]  }
 0x6ee   :  { %13435 = vmatprep.subr.bf16.mxu0 %v18491_v36  ;;  %13517 = vmatprep.subr.bf16.mxu1 %v18494_v28  ;;  %v18569_v36 = vld [vmem:[#allocation13 + $0x3b4] ss:$116 sps:$4 sm:$0xff]   ;;  %v18572_v28 = vld [vmem:[#allocation13 + $0x3bc] ss:$116 sps:$4 sm:$0xff]  }
 0x6f1   :  { %13436 = vmatpush1.bf16.msra.mxu0 %v18489_v38  ;;  %13518 = vmatpush1.bf16.msra.mxu1 %v18492_v39  ;;  %v18567_v38 = vld [vmem:[#allocation13 + $0x3b0] ss:$116 sps:$4 sm:$0xff]   ;;  %v18570_v39 = vld [vmem:[#allocation13 + $0x3b8] ss:$116 sps:$4 sm:$0xff]  }
 0x6f2   :  { %13437 = vmatprep.subr.bf16.mxu0 %v18497_v31  ;;  %13519 = vmatprep.subr.bf16.mxu1 %v18500_v41  ;;  %v18575_v31 = vld [vmem:[#allocation13 + $0x49c] ss:$116 sps:$4 sm:$0xff]   ;;  %v18578_v41 = vld [vmem:[#allocation13 + $0x4a4] ss:$116 sps:$4 sm:$0xff]  }
 0x6f5   :  { %13438 = vmatpush1.bf16.msra.mxu0 %v18495_v42  ;;  %13520 = vmatpush1.bf16.msra.mxu1 %v18498_v34  ;;  %v18573_v42 = vld [vmem:[#allocation13 + $0x498] ss:$116 sps:$4 sm:$0xff]   ;;  %v18576_v34 = vld [vmem:[#allocation13 + $0x4a0] ss:$116 sps:$4 sm:$0xff]  }
 0x6f6   :  { %13439 = vmatprep.subr.bf16.mxu0 %v18503_v44  ;;  %13521 = vmatprep.subr.bf16.mxu1 %v18506_v45  ;;  %v18581_v44 = vld [vmem:[#allocation13 + $0x584] ss:$116 sps:$4 sm:$0xff]   ;;  %v18584_v45 = vld [vmem:[#allocation13 + $0x58c] ss:$116 sps:$4 sm:$0xff]  }
 0x6f9   :  { %13440 = vmatpush1.bf16.msra.mxu0 %v18501_v46  ;;  %13522 = vmatpush1.bf16.msra.mxu1 %v18504_v37  ;;  %v18579_v46 = vld [vmem:[#allocation13 + $0x580] ss:$116 sps:$4 sm:$0xff]   ;;  %v18582_v37 = vld [vmem:[#allocation13 + $0x588] ss:$116 sps:$4 sm:$0xff]  }
 0x6fa   :  { %13441 = vmatprep.subr.bf16.mxu0 %v18509_v52  ;;  %13523 = vmatprep.subr.bf16.mxu1 %v18512_v53  ;;  %v18587_v52 = vld [vmem:[#allocation13 + $0x66c] ss:$116 sps:$4 sm:$0xff]   ;;  %v18590_v53 = vld [vmem:[#allocation13 + $0x674] ss:$116 sps:$4 sm:$0xff]  }
 0x6fd   :  { %13442 = vmatpush1.bf16.msra.mxu0 %v18507_v54  ;;  %13524 = vmatpush1.bf16.msra.mxu1 %v18510_v43  ;;  %v18585_v54 = vld [vmem:[#allocation13 + $0x668] ss:$116 sps:$4 sm:$0xff]   ;;  %v18588_v43 = vld [vmem:[#allocation13 + $0x670] ss:$116 sps:$4 sm:$0xff]  }
 0x6fe   :  { %13443 = vmatprep.subr.bf16.mxu0 %v18515_v57  ;;  %13525 = vmatprep.subr.bf16.mxu1 %v18518_v58  ;;  %v18593_v57 = vld [vmem:[#allocation13 + $0x754] ss:$116 sps:$4 sm:$0xff]   ;;  %v18596_v58 = vld [vmem:[#allocation13 + $0x75c] ss:$116 sps:$4 sm:$0xff]  }
 0x701   :  { %13444 = vmatpush1.bf16.msra.mxu0 %v18513_v59  ;;  %13526 = vmatpush1.bf16.msra.mxu1 %v18516_v60  ;;  %v18591_v59 = vld [vmem:[#allocation13 + $0x750] ss:$116 sps:$4 sm:$0xff]   ;;  %v18594_v60 = vld [vmem:[#allocation13 + $0x758] ss:$116 sps:$4 sm:$0xff]  }
 0x702   :  { %13445 = vmatprep.subr.bf16.mxu0 %v18521_v61  ;;  %13527 = vmatprep.subr.bf16.mxu1 %v18524_v62  ;;  %v18599_v61 = vld [vmem:[#allocation13 + $0x83c] ss:$116 sps:$4 sm:$0xff]   ;;  %v18602_v62 = vld [vmem:[#allocation13 + $0x844] ss:$116 sps:$4 sm:$0xff]  }
 0x705   :  { %13446 = vmatpush1.bf16.msra.mxu0 %v18519_v63  ;;  %13528 = vmatpush1.bf16.msra.mxu1 %v18522_v0  ;;  %v18597_v63 = vld [vmem:[#allocation13 + $0x838] ss:$116 sps:$4 sm:$0xff]   ;;  %v18600_v0 = vld [vmem:[#allocation13 + $0x840] ss:$116 sps:$4 sm:$0xff]  }
 0x706   :  { %13447 = vmatprep.subr.bf16.mxu0 %v18527_v1  ;;  %13529 = vmatprep.subr.bf16.mxu1 %v18530_v2  ;;  %v18605_v1 = vld [vmem:[#allocation13 + $0x924] ss:$116 sps:$4 sm:$0xff]   ;;  %v18608_v2 = vld [vmem:[#allocation13 + $0x92c] ss:$116 sps:$4 sm:$0xff]  }
 0x709   :  { %13448 = vmatpush1.bf16.msra.mxu0 %v18525_v3  ;;  %13530 = vmatpush1.bf16.msra.mxu1 %v18528_v4  ;;  %v18603_v3 = vld [vmem:[#allocation13 + $0x920] ss:$116 sps:$4 sm:$0xff]   ;;  %v18606_v4 = vld [vmem:[#allocation13 + $0x928] ss:$116 sps:$4 sm:$0xff]  }
 0x70a   :  { %13449 = vmatprep.subr.bf16.mxu0 %v18533_v7  ;;  %13531 = vmatprep.subr.bf16.mxu1 %v18536_v9  ;;  %v18614_v7 = vld [vmem:[#allocation13 + $0xa14] ss:$116 sps:$4 sm:$0xff]  }
 0x70b   :  { %v18609_v9 = vld [vmem:[#allocation13 + $0xa08] ss:$116 sps:$4 sm:$0xff]  }
 0x70d   :  { %13450 = vmatpush1.bf16.msra.mxu0 %v18531_v10  ;;  %13532 = vmatpush1.bf16.msra.mxu1 %v18534_v13  ;;  %v18612_v10 = vld [vmem:[#allocation13 + $0xa10] ss:$116 sps:$4 sm:$0xff]   ;;  %v18617_v13 = vld [vmem:[#allocation13 + $0xaf4] ss:$116 sps:$4 sm:$0xff]  }
 0x70e   :  { %13451 = vmatprep.subr.bf16.mxu0 %v18539_v16  ;;  %13533 = vmatprep.subr.bf16.mxu1 %v18542_v18  ;;  %v18615_v16 = vld [vmem:[#allocation13 + $0xaf0] ss:$116 sps:$4 sm:$0xff]   ;;  %v18618_v18 = vld [vmem:[#allocation13 + $0xaf8] ss:$116 sps:$4 sm:$0xff]  }
 0x711   :  { %13452 = vmatpush1.bf16.msra.mxu0 %v18537_v20  ;;  %13534 = vmatpush1.bf16.msra.mxu1 %v18540_v11  ;;  %v18623_v20 = vld [vmem:[#allocation13 + $0xbdc] ss:$116 sps:$4 sm:$0xff]   ;;  %v18626_v11 = vld [vmem:[#allocation13 + $0xbe4] ss:$116 sps:$4 sm:$0xff]  }
 0x712   :  { %13544 = vmatprep.subr.bf16.mxu0 %v18545_v50  ;;  %13626 = vmatprep.subr.bf16.mxu1 %v18548_v14  ;;  %v18624_v50 = vld [vmem:[#allocation13 + $0xbe0] ss:$116 sps:$4 sm:$0xff]   ;;  %v18629_v14 = vld [vmem:[#allocation13 + $0xcc4] ss:$116 sps:$4 sm:$0xff]  }
 0x714   :  { %13454 = vmatmul.mubr.bf16.vlgmr.msra.gmra.mrb[12].mxu0 %v20326_v24  ;;  %13536 = vmatmul.mubr.bf16.vlgmr.msra.gmra.mrb[12].mxu1 %v20326_v24 }
 0x715   :  { %13545 = vmatpush1.bf16.msra.mxu0 %v18543_v23  ;;  %13576 = vmatprep.mubr.bf16.mxu0 %v20311_v5  ;;  %v18632_v23 = vld [vmem:[#allocation13 + $0xccc] ss:$116 sps:$4 sm:$0xff]  }
 0x716   :  { %13627 = vmatpush1.bf16.msra.mxu1 %v18546_v56  ;;  %13658 = vmatprep.mubr.bf16.mxu1 %v20311_v5  ;;  %v18627_v56 = vld [vmem:[#allocation13 + $0xcc0] ss:$116 sps:$4 sm:$0xff]  }
 0x717   :  { %13546 = vmatprep.subr.bf16.mxu0 %v18551_v17  ;;  %13628 = vmatprep.subr.bf16.mxu1 %v18554_v26  ;;  %v18630_v17 = vld [vmem:[#allocation13 + $0xcc8] ss:$116 sps:$4 sm:$0xff]   ;;  %v18635_v26 = vld [vmem:[#allocation13 + $0xdac] ss:$116 sps:$4 sm:$0xff]  }
 0x719   :  { %13547 = vmatpush1.bf16.msra.mxu0 %v18549_v27  ;;  %v18638_v27 = vld [vmem:[#allocation13 + $0xdb4] ss:$116 sps:$4 sm:$0xff]  }
 0x71a   :  { %13629 = vmatpush1.bf16.msra.mxu1 %v18552_v19  ;;  %13548 = vmatprep.subr.bf16.mxu0 %v18557_v55  ;;  %v18633_v19 = vld [vmem:[#allocation13 + $0xda8] ss:$116 sps:$4 sm:$0xff]   ;;  %v18636_v55 = vld [vmem:[#allocation13 + $0xdb0] ss:$116 sps:$4 sm:$0xff]  }
 0x71b   :  { %13630 = vmatprep.subr.bf16.mxu1 %v18560_v29  ;;  %v18641_v29 = vld [vmem:[#allocation13 + $0xe94] ss:$116 sps:$4 sm:$0xff]  }
 0x71d   :  { %13549 = vmatpush1.bf16.msra.mxu0 %v18555_v30  ;;  %v18644_v30 = vld [vmem:[#allocation13 + $0xe9c] ss:$116 sps:$4 sm:$0xff]  }
 0x71e   :  { %13631 = vmatpush1.bf16.msra.mxu1 %v18558_v22  ;;  %13550 = vmatprep.subr.bf16.mxu0 %v18563_v32  ;;  %v18639_v22 = vld [vmem:[#allocation13 + $0xe90] ss:$116 sps:$4 sm:$0xff]   ;;  %v18642_v32 = vld [vmem:[#allocation13 + $0xe98] ss:$116 sps:$4 sm:$0xff]  }
 0x71f   :  { %13632 = vmatprep.subr.bf16.mxu1 %v18566_v33  ;;  %v18647_v33 = vld [vmem:[#allocation13 + $0xf7c] ss:$116 sps:$4 sm:$0xff]  }
 0x721   :  { %13551 = vmatpush1.bf16.msra.mxu0 %v18561_v25  ;;  %v18650_v25 = vld [vmem:[#allocation13 + $0xf84] ss:$116 sps:$4 sm:$0xff]  }
 0x722   :  { %13633 = vmatpush1.bf16.msra.mxu1 %v18564_v35  ;;  %13552 = vmatprep.subr.bf16.mxu0 %v18569_v36  ;;  %v18645_v35 = vld [vmem:[#allocation13 + $0xf78] ss:$116 sps:$4 sm:$0xff]   ;;  %v18648_v36 = vld [vmem:[#allocation13 + $0xf80] ss:$116 sps:$4 sm:$0xff]  }
 0x723   :  { %13634 = vmatprep.subr.bf16.mxu1 %v18572_v28  ;;  %v18653_v28 = vld [vmem:[#allocation13 + $0x1064] ss:$116 sps:$4 sm:$0xff]  }
 0x725   :  { %13553 = vmatpush1.bf16.msra.mxu0 %v18567_v38  ;;  %v18656_v38 = vld [vmem:[#allocation13 + $0x106c] ss:$116 sps:$4 sm:$0xff]  }
 0x726   :  { %13635 = vmatpush1.bf16.msra.mxu1 %v18570_v39  ;;  %13554 = vmatprep.subr.bf16.mxu0 %v18575_v31  ;;  %v18651_v39 = vld [vmem:[#allocation13 + $0x1060] ss:$116 sps:$4 sm:$0xff]   ;;  %v18654_v31 = vld [vmem:[#allocation13 + $0x1068] ss:$116 sps:$4 sm:$0xff]  }
 0x727   :  { %13636 = vmatprep.subr.bf16.mxu1 %v18578_v41  ;;  %v18659_v41 = vld [vmem:[#allocation13 + $0x114c] ss:$116 sps:$4 sm:$0xff]  }
 0x729   :  { %13555 = vmatpush1.bf16.msra.mxu0 %v18573_v42  ;;  %v18662_v42 = vld [vmem:[#allocation13 + $0x1154] ss:$116 sps:$4 sm:$0xff]  }
 0x72a   :  { %13637 = vmatpush1.bf16.msra.mxu1 %v18576_v34  ;;  %13556 = vmatprep.subr.bf16.mxu0 %v18581_v44  ;;  %v18657_v34 = vld [vmem:[#allocation13 + $0x1148] ss:$116 sps:$4 sm:$0xff]   ;;  %v18660_v44 = vld [vmem:[#allocation13 + $0x1150] ss:$116 sps:$4 sm:$0xff]  }
 0x72b   :  { %13638 = vmatprep.subr.bf16.mxu1 %v18584_v45  ;;  %v18665_v45 = vld [vmem:[#allocation13 + $0x1234] ss:$116 sps:$4 sm:$0xff]  }
 0x72d   :  { %13557 = vmatpush1.bf16.msra.mxu0 %v18579_v46  ;;  %v18668_v46 = vld [vmem:[#allocation13 + $0x123c] ss:$116 sps:$4 sm:$0xff]  }
 0x72e   :  { %13639 = vmatpush1.bf16.msra.mxu1 %v18582_v37  ;;  %13558 = vmatprep.subr.bf16.mxu0 %v18587_v52  ;;  %v18663_v37 = vld [vmem:[#allocation13 + $0x1230] ss:$116 sps:$4 sm:$0xff]   ;;  %v18666_v52 = vld [vmem:[#allocation13 + $0x1238] ss:$116 sps:$4 sm:$0xff]  }
 0x72f   :  { %13640 = vmatprep.subr.bf16.mxu1 %v18590_v53  ;;  %v18671_v53 = vld [vmem:[#allocation13 + $0x131c] ss:$116 sps:$4 sm:$0xff]  }
 0x731   :  { %13559 = vmatpush1.bf16.msra.mxu0 %v18585_v54  ;;  %v18674_v54 = vld [vmem:[#allocation13 + $0x1324] ss:$116 sps:$4 sm:$0xff]  }
 0x732   :  { %13641 = vmatpush1.bf16.msra.mxu1 %v18588_v43  ;;  %13560 = vmatprep.subr.bf16.mxu0 %v18593_v57  ;;  %v18669_v43 = vld [vmem:[#allocation13 + $0x1318] ss:$116 sps:$4 sm:$0xff]   ;;  %v18672_v57 = vld [vmem:[#allocation13 + $0x1320] ss:$116 sps:$4 sm:$0xff]  }
 0x733   :  { %13642 = vmatprep.subr.bf16.mxu1 %v18596_v58  ;;  %v18677_v58 = vld [vmem:[#allocation13 + $0x1404] ss:$116 sps:$4 sm:$0xff]  }
 0x735   :  { %13561 = vmatpush1.bf16.msra.mxu0 %v18591_v59  ;;  %v18680_v59 = vld [vmem:[#allocation13 + $0x140c] ss:$116 sps:$4 sm:$0xff]  }
 0x736   :  { %13643 = vmatpush1.bf16.msra.mxu1 %v18594_v60  ;;  %13562 = vmatprep.subr.bf16.mxu0 %v18599_v61  ;;  %v18675_v60 = vld [vmem:[#allocation13 + $0x1400] ss:$116 sps:$4 sm:$0xff]   ;;  %v18678_v61 = vld [vmem:[#allocation13 + $0x1408] ss:$116 sps:$4 sm:$0xff]  }
 0x737   :  { %13644 = vmatprep.subr.bf16.mxu1 %v18602_v62  ;;  %v18683_v62 = vld [vmem:[#allocation13 + $0x14ec] ss:$116 sps:$4 sm:$0xff]  }
 0x739   :  { %13563 = vmatpush1.bf16.msra.mxu0 %v18597_v63  ;;  %v18686_v63 = vld [vmem:[#allocation13 + $0x14f4] ss:$116 sps:$4 sm:$0xff]  }
 0x73a   :  { %13645 = vmatpush1.bf16.msra.mxu1 %v18600_v0  ;;  %13564 = vmatprep.subr.bf16.mxu0 %v18605_v1  ;;  %v18681_v0 = vld [vmem:[#allocation13 + $0x14e8] ss:$116 sps:$4 sm:$0xff]   ;;  %v18684_v1 = vld [vmem:[#allocation13 + $0x14f0] ss:$116 sps:$4 sm:$0xff]  }
 0x73b   :  { %13646 = vmatprep.subr.bf16.mxu1 %v18608_v2  ;;  %v18689_v2 = vld [vmem:[#allocation13 + $0x15d4] ss:$116 sps:$4 sm:$0xff]  }
 0x73d   :  { %13565 = vmatpush1.bf16.msra.mxu0 %v18603_v3  ;;  %v18692_v3 = vld [vmem:[#allocation13 + $0x15dc] ss:$116 sps:$4 sm:$0xff]  }
 0x73e   :  { %13647 = vmatpush1.bf16.msra.mxu1 %v18606_v4  ;;  %13566 = vmatprep.subr.bf16.mxu0 %v18611_v6  ;;  %v18687_v4 = vld [vmem:[#allocation13 + $0x15d0] ss:$116 sps:$4 sm:$0xff]   ;;  %v18690_v6 = vld [vmem:[#allocation13 + $0x15d8] ss:$116 sps:$4 sm:$0xff]  }
 0x73f   :  { %13648 = vmatprep.subr.bf16.mxu1 %v18614_v7  ;;  %v18695_v7 = vld [vmem:[#allocation13 + $0x16bc] ss:$116 sps:$4 sm:$0xff]  }
 0x741   :  { %13567 = vmatpush1.bf16.msra.mxu0 %v18609_v9  ;;  %v18698_v9 = vld [vmem:[#allocation13 + $0x16c4] ss:$116 sps:$4 sm:$0xff]  }
 0x742   :  { %13649 = vmatpush1.bf16.msra.mxu1 %v18612_v10  ;;  %13568 = vmatprep.subr.bf16.mxu0 %v18617_v13  ;;  %v18693_v10 = vld [vmem:[#allocation13 + $0x16b8] ss:$116 sps:$4 sm:$0xff]   ;;  %v18696_v13 = vld [vmem:[#allocation13 + $0x16c0] ss:$116 sps:$4 sm:$0xff]  }
 0x743   :  { %13650 = vmatprep.subr.bf16.mxu1 %v18620_v15  ;;  %v18701_v15 = vld [vmem:[#allocation13 + $0x17a4] ss:$116 sps:$4 sm:$0xff]  }
 0x745   :  { %13569 = vmatpush1.bf16.msra.mxu0 %v18615_v16  ;;  %v18704_v16 = vld [vmem:[#allocation13 + $0x17ac] ss:$116 sps:$4 sm:$0xff]  }
 0x746   :  { %13651 = vmatpush1.bf16.msra.mxu1 %v18618_v18  ;;  %13570 = vmatprep.subr.bf16.mxu0 %v18623_v20  ;;  %v18699_v18 = vld [vmem:[#allocation13 + $0x17a0] ss:$116 sps:$4 sm:$0xff]   ;;  %v18702_v20 = vld [vmem:[#allocation13 + $0x17a8] ss:$116 sps:$4 sm:$0xff]  }
 0x747   :  { %13652 = vmatprep.subr.bf16.mxu1 %v18626_v11  ;;  %v18707_v11 = vld [vmem:[#allocation13 + $0x188c] ss:$116 sps:$4 sm:$0xff]  }
 0x749   :  { %13571 = vmatpush1.bf16.msra.mxu0 %v18621_v21  ;;  %v18710_v21 = vld [vmem:[#allocation13 + $0x1894] ss:$116 sps:$4 sm:$0xff]  }
 0x74a   :  { %13653 = vmatpush1.bf16.msra.mxu1 %v18624_v50  ;;  %13572 = vmatprep.subr.bf16.mxu0 %v18629_v14  ;;  %v18705_v50 = vld [vmem:[#allocation13 + $0x1888] ss:$116 sps:$4 sm:$0xff]   ;;  %v18708_v14 = vld [vmem:[#allocation13 + $0x1890] ss:$116 sps:$4 sm:$0xff]  }
 0x74b   :  { %13654 = vmatprep.subr.bf16.mxu1 %v18632_v23  ;;  %v18713_v23 = vld [vmem:[#allocation13 + $0x1974] ss:$116 sps:$4 sm:$0xff]  }
 0x74d   :  { %13573 = vmatpush1.bf16.msra.mxu0 %v18627_v56  ;;  %v18716_v56 = vld [vmem:[#allocation13 + $0x197c] ss:$116 sps:$4 sm:$0xff]  }
 0x74e   :  { %13655 = vmatpush1.bf16.msra.mxu1 %v18630_v17  ;;  %13574 = vmatprep.subr.bf16.mxu0 %v18635_v26  ;;  %v18711_v17 = vld [vmem:[#allocation13 + $0x1970] ss:$116 sps:$4 sm:$0xff]   ;;  %v18714_v26 = vld [vmem:[#allocation13 + $0x1978] ss:$116 sps:$4 sm:$0xff]  }
 0x74f   :  { %13656 = vmatprep.subr.bf16.mxu1 %v18638_v27  ;;  %v18719_v27 = vld [vmem:[#allocation13 + $0x1a5c] ss:$116 sps:$4 sm:$0xff]  }
 0x751   :  { %13575 = vmatpush1.bf16.msra.mxu0 %v18633_v19  ;;  %v18722_v19 = vld [vmem:[#allocation13 + $0x1a64] ss:$116 sps:$4 sm:$0xff]  }
 0x752   :  { %13657 = vmatpush1.bf16.msra.mxu1 %v18636_v55  ;;  %13585 = vmatprep.subr.bf16.mxu0 %v18641_v29  ;;  %v18717_v55 = vld [vmem:[#allocation13 + $0x1a58] ss:$116 sps:$4 sm:$0xff]   ;;  %v18720_v29 = vld [vmem:[#allocation13 + $0x1a60] ss:$116 sps:$4 sm:$0xff]  }
 0x753   :  { %13667 = vmatprep.subr.bf16.mxu1 %v18644_v30  ;;  %v18725_v30 = vld [vmem:[#allocation13 + $0x1b44] ss:$116 sps:$4 sm:$0xff]  }
 0x754   :  { %13577 = vmatmul.mubr.bf16.vlgmr.msra.gmra.mrb[16].mxu0 %v20313_v8 }
 0x755   :  { %13659 = vmatmul.mubr.bf16.vlgmr.msra.gmra.mrb[16].mxu1 %v20313_v8  ;;  %13586 = vmatpush1.bf16.msra.mxu0 %v18639_v22  ;;  %v18728_v22 = vld [vmem:[#allocation13 + $0x1b4c] ss:$116 sps:$4 sm:$0xff]  }
 0x756   :  { %13617 = vmatprep.mubr.bf16.mxu0 %v20317_v12  ;;  %13668 = vmatpush1.bf16.msra.mxu1 %v18642_v32  ;;  %v18723_v32 = vld [vmem:[#allocation13 + $0x1b40] ss:$116 sps:$4 sm:$0xff]  }
 0x757   :  { %13699 = vmatprep.mubr.bf16.mxu1 %v20317_v12  ;;  %13587 = vmatprep.subr.bf16.mxu0 %v18647_v33  ;;  %v18726_v33 = vld [vmem:[#allocation13 + $0x1b48] ss:$116 sps:$4 sm:$0xff]  }
 0x758   :  { %13669 = vmatprep.subr.bf16.mxu1 %v18650_v25  ;;  %v18731_v25 = vld [vmem:[#allocation13 + $0x1c2c] ss:$116 sps:$4 sm:$0xff]  }
 0x759   :  { %13588 = vmatpush1.bf16.msra.mxu0 %v18645_v35  ;;  %v18734_v35 = vld [vmem:[#allocation13 + $0x1c34] ss:$116 sps:$4 sm:$0xff]  }
 0x75a   :  { %13670 = vmatpush1.bf16.msra.mxu1 %v18648_v36  ;;  %13589 = vmatprep.subr.bf16.mxu0 %v18653_v28  ;;  %v18729_v36 = vld [vmem:[#allocation13 + $0x1c28] ss:$116 sps:$4 sm:$0xff]   ;;  %v18732_v28 = vld [vmem:[#allocation13 + $0x1c30] ss:$116 sps:$4 sm:$0xff]  }
 0x75b   :  { %13671 = vmatprep.subr.bf16.mxu1 %v18656_v38  ;;  %v18737_v38 = vld [vmem:[#allocation13 + $0x24] ss:$116 sps:$4 sm:$0xff]  }
 0x75d   :  { %13590 = vmatpush1.bf16.msra.mxu0 %v18651_v39  ;;  %v18740_v39 = vld [vmem:[#allocation13 + $0x2c] ss:$116 sps:$4 sm:$0xff]  }
 0x75e   :  { %13672 = vmatpush1.bf16.msra.mxu1 %v18654_v31  ;;  %13591 = vmatprep.subr.bf16.mxu0 %v18659_v41  ;;  %v18735_v31 = vld [vmem:[#allocation13 + $0x20] ss:$116 sps:$4 sm:$0xff]   ;;  %v18738_v41 = vld [vmem:[#allocation13 + $0x28] ss:$116 sps:$4 sm:$0xff]  }
 0x75f   :  { %13673 = vmatprep.subr.bf16.mxu1 %v18662_v42  ;;  %v18743_v42 = vld [vmem:[#allocation13 + $0x10c] ss:$116 sps:$4 sm:$0xff]  }
 0x761   :  { %13592 = vmatpush1.bf16.msra.mxu0 %v18657_v34  ;;  %v18746_v34 = vld [vmem:[#allocation13 + $0x114] ss:$116 sps:$4 sm:$0xff]  }
 0x762   :  { %13674 = vmatpush1.bf16.msra.mxu1 %v18660_v44  ;;  %13593 = vmatprep.subr.bf16.mxu0 %v18665_v45  ;;  %v18741_v44 = vld [vmem:[#allocation13 + $0x108] ss:$116 sps:$4 sm:$0xff]   ;;  %v18744_v45 = vld [vmem:[#allocation13 + $0x110] ss:$116 sps:$4 sm:$0xff]  }
 0x763   :  { %13675 = vmatprep.subr.bf16.mxu1 %v18668_v46  ;;  %v18749_v46 = vld [vmem:[#allocation13 + $0x1f4] ss:$116 sps:$4 sm:$0xff]  }
 0x765   :  { %13594 = vmatpush1.bf16.msra.mxu0 %v18663_v37  ;;  %v18752_v37 = vld [vmem:[#allocation13 + $0x1fc] ss:$116 sps:$4 sm:$0xff]  }
 0x766   :  { %13676 = vmatpush1.bf16.msra.mxu1 %v18666_v52  ;;  %13595 = vmatprep.subr.bf16.mxu0 %v18671_v53  ;;  %v18747_v52 = vld [vmem:[#allocation13 + $0x1f0] ss:$116 sps:$4 sm:$0xff]   ;;  %v18750_v53 = vld [vmem:[#allocation13 + $0x1f8] ss:$116 sps:$4 sm:$0xff]  }
 0x767   :  { %13677 = vmatprep.subr.bf16.mxu1 %v18674_v54  ;;  %v18755_v54 = vld [vmem:[#allocation13 + $0x2dc] ss:$116 sps:$4 sm:$0xff]  }
 0x769   :  { %13596 = vmatpush1.bf16.msra.mxu0 %v18669_v43  ;;  %v18758_v43 = vld [vmem:[#allocation13 + $0x2e4] ss:$116 sps:$4 sm:$0xff]  }
 0x76a   :  { %13678 = vmatpush1.bf16.msra.mxu1 %v18672_v57  ;;  %13597 = vmatprep.subr.bf16.mxu0 %v18677_v58  ;;  %v18753_v57 = vld [vmem:[#allocation13 + $0x2d8] ss:$116 sps:$4 sm:$0xff]   ;;  %v18756_v58 = vld [vmem:[#allocation13 + $0x2e0] ss:$116 sps:$4 sm:$0xff]  }
 0x76b   :  { %13679 = vmatprep.subr.bf16.mxu1 %v18680_v59  ;;  %v18761_v59 = vld [vmem:[#allocation13 + $0x3c4] ss:$116 sps:$4 sm:$0xff]  }
 0x76d   :  { %13598 = vmatpush1.bf16.msra.mxu0 %v18675_v60  ;;  %v18764_v60 = vld [vmem:[#allocation13 + $0x3cc] ss:$116 sps:$4 sm:$0xff]  }
 0x76e   :  { %13680 = vmatpush1.bf16.msra.mxu1 %v18678_v61  ;;  %13599 = vmatprep.subr.bf16.mxu0 %v18683_v62  ;;  %v18759_v61 = vld [vmem:[#allocation13 + $0x3c0] ss:$116 sps:$4 sm:$0xff]   ;;  %v18762_v62 = vld [vmem:[#allocation13 + $0x3c8] ss:$116 sps:$4 sm:$0xff]  }
 0x76f   :  { %13681 = vmatprep.subr.bf16.mxu1 %v18686_v63  ;;  %v18767_v63 = vld [vmem:[#allocation13 + $0x4ac] ss:$116 sps:$4 sm:$0xff]  }
 0x771   :  { %13600 = vmatpush1.bf16.msra.mxu0 %v18681_v0  ;;  %v18770_v0 = vld [vmem:[#allocation13 + $0x4b4] ss:$116 sps:$4 sm:$0xff]  }
 0x772   :  { %13682 = vmatpush1.bf16.msra.mxu1 %v18684_v1  ;;  %13601 = vmatprep.subr.bf16.mxu0 %v18689_v2  ;;  %v18765_v1 = vld [vmem:[#allocation13 + $0x4a8] ss:$116 sps:$4 sm:$0xff]   ;;  %v18768_v2 = vld [vmem:[#allocation13 + $0x4b0] ss:$116 sps:$4 sm:$0xff]  }
 0x773   :  { %13683 = vmatprep.subr.bf16.mxu1 %v18692_v3  ;;  %v18773_v3 = vld [vmem:[#allocation13 + $0x594] ss:$116 sps:$4 sm:$0xff]  }
 0x775   :  { %13602 = vmatpush1.bf16.msra.mxu0 %v18687_v4  ;;  %v18776_v4 = vld [vmem:[#allocation13 + $0x59c] ss:$116 sps:$4 sm:$0xff]  }
 0x776   :  { %13684 = vmatpush1.bf16.msra.mxu1 %v18690_v6  ;;  %13603 = vmatprep.subr.bf16.mxu0 %v18695_v7  ;;  %v18771_v6 = vld [vmem:[#allocation13 + $0x590] ss:$116 sps:$4 sm:$0xff]   ;;  %v18774_v7 = vld [vmem:[#allocation13 + $0x598] ss:$116 sps:$4 sm:$0xff]  }
 0x777   :  { %13685 = vmatprep.subr.bf16.mxu1 %v18698_v9  ;;  %v18779_v9 = vld [vmem:[#allocation13 + $0x67c] ss:$116 sps:$4 sm:$0xff]  }
 0x779   :  { %13604 = vmatpush1.bf16.msra.mxu0 %v18693_v10  ;;  %v18782_v10 = vld [vmem:[#allocation13 + $0x684] ss:$116 sps:$4 sm:$0xff]  }
 0x77a   :  { %13686 = vmatpush1.bf16.msra.mxu1 %v18696_v13  ;;  %13605 = vmatprep.subr.bf16.mxu0 %v18701_v15  ;;  %v18777_v13 = vld [vmem:[#allocation13 + $0x678] ss:$116 sps:$4 sm:$0xff]   ;;  %v18780_v15 = vld [vmem:[#allocation13 + $0x680] ss:$116 sps:$4 sm:$0xff]  }
 0x77b   :  { %13687 = vmatprep.subr.bf16.mxu1 %v18704_v16  ;;  %v18785_v16 = vld [vmem:[#allocation13 + $0x764] ss:$116 sps:$4 sm:$0xff]  }
 0x77d   :  { %13606 = vmatpush1.bf16.msra.mxu0 %v18699_v18  ;;  %v18788_v18 = vld [vmem:[#allocation13 + $0x76c] ss:$116 sps:$4 sm:$0xff]  }
 0x77e   :  { %13688 = vmatpush1.bf16.msra.mxu1 %v18702_v20  ;;  %13607 = vmatprep.subr.bf16.mxu0 %v18707_v11  ;;  %v18783_v20 = vld [vmem:[#allocation13 + $0x760] ss:$116 sps:$4 sm:$0xff]   ;;  %v18786_v11 = vld [vmem:[#allocation13 + $0x768] ss:$116 sps:$4 sm:$0xff]  }
 0x77f   :  { %13689 = vmatprep.subr.bf16.mxu1 %v18710_v21  ;;  %v18791_v21 = vld [vmem:[#allocation13 + $0x84c] ss:$116 sps:$4 sm:$0xff]  }
 0x781   :  { %13608 = vmatpush1.bf16.msra.mxu0 %v18705_v50  ;;  %v18794_v50 = vld [vmem:[#allocation13 + $0x854] ss:$116 sps:$4 sm:$0xff]  }
 0x782   :  { %13690 = vmatpush1.bf16.msra.mxu1 %v18708_v14  ;;  %13609 = vmatprep.subr.bf16.mxu0 %v18713_v23  ;;  %v18789_v14 = vld [vmem:[#allocation13 + $0x848] ss:$116 sps:$4 sm:$0xff]   ;;  %v18792_v23 = vld [vmem:[#allocation13 + $0x850] ss:$116 sps:$4 sm:$0xff]  }
 0x783   :  { %13691 = vmatprep.subr.bf16.mxu1 %v18716_v56  ;;  %v18797_v56 = vld [vmem:[#allocation13 + $0x934] ss:$116 sps:$4 sm:$0xff]  }
 0x785   :  { %13610 = vmatpush1.bf16.msra.mxu0 %v18711_v17  ;;  %v18800_v17 = vld [vmem:[#allocation13 + $0x93c] ss:$116 sps:$4 sm:$0xff]  }
 0x786   :  { %13692 = vmatpush1.bf16.msra.mxu1 %v18714_v26  ;;  %13611 = vmatprep.subr.bf16.mxu0 %v18719_v27  ;;  %v18795_v26 = vld [vmem:[#allocation13 + $0x930] ss:$116 sps:$4 sm:$0xff]   ;;  %v18798_v27 = vld [vmem:[#allocation13 + $0x938] ss:$116 sps:$4 sm:$0xff]  }
 0x787   :  { %13693 = vmatprep.subr.bf16.mxu1 %v18722_v19  ;;  %v18803_v19 = vld [vmem:[#allocation13 + $0xa1c] ss:$116 sps:$4 sm:$0xff]  }
 0x789   :  { %13612 = vmatpush1.bf16.msra.mxu0 %v18717_v55  ;;  %v18806_v55 = vld [vmem:[#allocation13 + $0xa24] ss:$116 sps:$4 sm:$0xff]  }
 0x78a   :  { %13694 = vmatpush1.bf16.msra.mxu1 %v18720_v29  ;;  %13613 = vmatprep.subr.bf16.mxu0 %v18725_v30  ;;  %v18801_v29 = vld [vmem:[#allocation13 + $0xa18] ss:$116 sps:$4 sm:$0xff]   ;;  %v18804_v30 = vld [vmem:[#allocation13 + $0xa20] ss:$116 sps:$4 sm:$0xff]  }
 0x78b   :  { %13695 = vmatprep.subr.bf16.mxu1 %v18728_v22  ;;  %v18809_v22 = vld [vmem:[#allocation13 + $0xb04] ss:$116 sps:$4 sm:$0xff]  }
 0x78d   :  { %13614 = vmatpush1.bf16.msra.mxu0 %v18723_v32  ;;  %v18812_v32 = vld [vmem:[#allocation13 + $0xb0c] ss:$116 sps:$4 sm:$0xff]  }
 0x78e   :  { %13696 = vmatpush1.bf16.msra.mxu1 %v18726_v33  ;;  %13615 = vmatprep.subr.bf16.mxu0 %v18731_v25  ;;  %v18807_v33 = vld [vmem:[#allocation13 + $0xb00] ss:$116 sps:$4 sm:$0xff]   ;;  %v18810_v25 = vld [vmem:[#allocation13 + $0xb08] ss:$116 sps:$4 sm:$0xff]  }
 0x78f   :  { %13697 = vmatprep.subr.bf16.mxu1 %v18734_v35  ;;  %v18815_v35 = vld [vmem:[#allocation13 + $0xbec] ss:$116 sps:$4 sm:$0xff]  }
 0x791   :  { %13616 = vmatpush1.bf16.msra.mxu0 %v18729_v36  ;;  %v18818_v36 = vld [vmem:[#allocation13 + $0xbf4] ss:$116 sps:$4 sm:$0xff]  }
 0x792   :  { %13698 = vmatpush1.bf16.msra.mxu1 %v18732_v28  ;;  %13708 = vmatprep.subr.bf16.mxu0 %v18737_v38  ;;  %v18813_v28 = vld [vmem:[#allocation13 + $0xbe8] ss:$116 sps:$4 sm:$0xff]   ;;  %v18816_v38 = vld [vmem:[#allocation13 + $0xbf0] ss:$116 sps:$4 sm:$0xff]  }
 0x793   :  { %13790 = vmatprep.subr.bf16.mxu1 %v18740_v39  ;;  %v18821_v39 = vld [vmem:[#allocation13 + $0xcd4] ss:$116 sps:$4 sm:$0xff]  }
 0x794   :  { %13618 = vmatmul.mubr.bf16.vlgmr.msra.gmra.mrb[16].mxu0 %v20326_v24 }
 0x795   :  { %13700 = vmatmul.mubr.bf16.vlgmr.msra.gmra.mrb[16].mxu1 %v20326_v24  ;;  %13709 = vmatpush1.bf16.msra.mxu0 %v18735_v31  ;;  %v18824_v31 = vld [vmem:[#allocation13 + $0xcdc] ss:$116 sps:$4 sm:$0xff]  }
 0x796   :  { %13740 = vmatprep.mubr.bf16.mxu0 %v20311_v5  ;;  %13791 = vmatpush1.bf16.msra.mxu1 %v18738_v41  ;;  %v18819_v41 = vld [vmem:[#allocation13 + $0xcd0] ss:$116 sps:$4 sm:$0xff]  }
 0x797   :  { %13822 = vmatprep.mubr.bf16.mxu1 %v20311_v5  ;;  %13710 = vmatprep.subr.bf16.mxu0 %v18743_v42  ;;  %v18822_v42 = vld [vmem:[#allocation13 + $0xcd8] ss:$116 sps:$4 sm:$0xff]  }
 0x798   :  { %13792 = vmatprep.subr.bf16.mxu1 %v18746_v34  ;;  %v18827_v34 = vld [vmem:[#allocation13 + $0xdbc] ss:$116 sps:$4 sm:$0xff]  }
 0x799   :  { %13711 = vmatpush1.bf16.msra.mxu0 %v18741_v44  ;;  %v18830_v44 = vld [vmem:[#allocation13 + $0xdc4] ss:$116 sps:$4 sm:$0xff]  }
 0x79a   :  { %13793 = vmatpush1.bf16.msra.mxu1 %v18744_v45  ;;  %13712 = vmatprep.subr.bf16.mxu0 %v18749_v46  ;;  %v18825_v45 = vld [vmem:[#allocation13 + $0xdb8] ss:$116 sps:$4 sm:$0xff]   ;;  %v18828_v46 = vld [vmem:[#allocation13 + $0xdc0] ss:$116 sps:$4 sm:$0xff]  }
 0x79b   :  { %13794 = vmatprep.subr.bf16.mxu1 %v18752_v37  ;;  %v18833_v37 = vld [vmem:[#allocation13 + $0xea4] ss:$116 sps:$4 sm:$0xff]  }
 0x79d   :  { %13713 = vmatpush1.bf16.msra.mxu0 %v18747_v52  ;;  %v18836_v52 = vld [vmem:[#allocation13 + $0xeac] ss:$116 sps:$4 sm:$0xff]  }
 0x79e   :  { %13795 = vmatpush1.bf16.msra.mxu1 %v18750_v53  ;;  %13714 = vmatprep.subr.bf16.mxu0 %v18755_v54  ;;  %v18831_v53 = vld [vmem:[#allocation13 + $0xea0] ss:$116 sps:$4 sm:$0xff]   ;;  %v18834_v54 = vld [vmem:[#allocation13 + $0xea8] ss:$116 sps:$4 sm:$0xff]  }
 0x79f   :  { %13796 = vmatprep.subr.bf16.mxu1 %v18758_v43  ;;  %v18839_v43 = vld [vmem:[#allocation13 + $0xf8c] ss:$116 sps:$4 sm:$0xff]  }
 0x7a1   :  { %13715 = vmatpush1.bf16.msra.mxu0 %v18753_v57  ;;  %v18842_v57 = vld [vmem:[#allocation13 + $0xf94] ss:$116 sps:$4 sm:$0xff]  }
 0x7a2   :  { %13797 = vmatpush1.bf16.msra.mxu1 %v18756_v58  ;;  %13716 = vmatprep.subr.bf16.mxu0 %v18761_v59  ;;  %v18837_v58 = vld [vmem:[#allocation13 + $0xf88] ss:$116 sps:$4 sm:$0xff]   ;;  %v18840_v59 = vld [vmem:[#allocation13 + $0xf90] ss:$116 sps:$4 sm:$0xff]  }
 0x7a3   :  { %13798 = vmatprep.subr.bf16.mxu1 %v18764_v60  ;;  %v18845_v60 = vld [vmem:[#allocation13 + $0x1074] ss:$116 sps:$4 sm:$0xff]  }
 0x7a5   :  { %13717 = vmatpush1.bf16.msra.mxu0 %v18759_v61  ;;  %v18848_v61 = vld [vmem:[#allocation13 + $0x107c] ss:$116 sps:$4 sm:$0xff]  }
 0x7a6   :  { %13799 = vmatpush1.bf16.msra.mxu1 %v18762_v62  ;;  %13718 = vmatprep.subr.bf16.mxu0 %v18767_v63  ;;  %v18843_v62 = vld [vmem:[#allocation13 + $0x1070] ss:$116 sps:$4 sm:$0xff]   ;;  %v18846_v63 = vld [vmem:[#allocation13 + $0x1078] ss:$116 sps:$4 sm:$0xff]  }
 0x7a7   :  { %13800 = vmatprep.subr.bf16.mxu1 %v18770_v0  ;;  %v18851_v0 = vld [vmem:[#allocation13 + $0x115c] ss:$116 sps:$4 sm:$0xff]  }
 0x7a9   :  { %13719 = vmatpush1.bf16.msra.mxu0 %v18765_v1  ;;  %v18854_v1 = vld [vmem:[#allocation13 + $0x1164] ss:$116 sps:$4 sm:$0xff]  }
 0x7aa   :  { %13801 = vmatpush1.bf16.msra.mxu1 %v18768_v2  ;;  %13720 = vmatprep.subr.bf16.mxu0 %v18773_v3  ;;  %v18849_v2 = vld [vmem:[#allocation13 + $0x1158] ss:$116 sps:$4 sm:$0xff]   ;;  %v18852_v3 = vld [vmem:[#allocation13 + $0x1160] ss:$116 sps:$4 sm:$0xff]  }
 0x7ab   :  { %13802 = vmatprep.subr.bf16.mxu1 %v18776_v4  ;;  %v18857_v4 = vld [vmem:[#allocation13 + $0x1244] ss:$116 sps:$4 sm:$0xff]  }
 0x7ad   :  { %13721 = vmatpush1.bf16.msra.mxu0 %v18771_v6  ;;  %v18860_v6 = vld [vmem:[#allocation13 + $0x124c] ss:$116 sps:$4 sm:$0xff]  }
 0x7ae   :  { %13803 = vmatpush1.bf16.msra.mxu1 %v18774_v7  ;;  %13722 = vmatprep.subr.bf16.mxu0 %v18779_v9  ;;  %v18855_v7 = vld [vmem:[#allocation13 + $0x1240] ss:$116 sps:$4 sm:$0xff]  }
 0x7af   :  { %13804 = vmatprep.subr.bf16.mxu1 %v18782_v10  ;;  %v20344_v9 = vld [vmem:[#allocation14] sm:$0xff]  ;;  %v18858_v10 = vld [vmem:[#allocation13 + $0x1248] ss:$116 sps:$4 sm:$0xff]  }
 0x7b1   :  { %13723 = vmatpush1.bf16.msra.mxu0 %v18777_v13  ;;  %v18863_v13 = vld [vmem:[#allocation13 + $0x132c] ss:$116 sps:$4 sm:$0xff]  }
 0x7b2   :  { %13805 = vmatpush1.bf16.msra.mxu1 %v18780_v15  ;;  %13724 = vmatprep.subr.bf16.mxu0 %v18785_v16  ;;  %v18866_v15 = vld [vmem:[#allocation13 + $0x1334] ss:$116 sps:$4 sm:$0xff]   ;;  %v8566_v16 = vrot.slane %v20344_v9, %v20284_v48 }
 0x7b3   :  { %13806 = vmatprep.subr.bf16.mxu1 %v18788_v18  ;;  %v8574_v18 = vrot.slane %v20344_v9, %v20287_v49 }
 0x7b5   :  { %13725 = vmatpush1.bf16.msra.mxu0 %v18783_v20  ;;  %v8570_v20 = vrot.slane %v20344_v9, %v20290_v51 }
 0x7b6   :  { %13807 = vmatpush1.bf16.msra.mxu1 %v18786_v11  ;;  %13726 = vmatprep.subr.bf16.mxu0 %v18791_v21  ;;  %v8578_v11 = vrot.slane %v20344_v9, %v20293_v40  ;;  %v18861_v21 = vld [vmem:[#allocation13 + $0x1328] ss:$116 sps:$4 sm:$0xff]  }
 0x7b7   :  { %13808 = vmatprep.subr.bf16.mxu1 %v18794_v50  ;;  %v18864_v50 = vld [vmem:[#allocation13 + $0x1330] ss:$116 sps:$4 sm:$0xff]  }
 0x7b9   :  { %13727 = vmatpush1.bf16.msra.mxu0 %v18789_v14  ;;  %v18869_v14 = vld [vmem:[#allocation13 + $0x1414] ss:$116 sps:$4 sm:$0xff]  }
 0x7ba   :  { %13809 = vmatpush1.bf16.msra.mxu1 %v18792_v23  ;;  %13728 = vmatprep.subr.bf16.mxu0 %v18797_v56 }
 0x7bb   :  { %13810 = vmatprep.subr.bf16.mxu1 %v18800_v17  ;;  %v18872_v17 = vld [vmem:[#allocation13 + $0x141c] ss:$116 sps:$4 sm:$0xff]  }
 0x7bd   :  { %13729 = vmatpush1.bf16.msra.mxu0 %v18795_v26 }
 0x7be   :  { %13811 = vmatpush1.bf16.msra.mxu1 %v18798_v27  ;;  %13730 = vmatprep.subr.bf16.mxu0 %v18803_v19 }
 0x7bf   :  { %13812 = vmatprep.subr.bf16.mxu1 %v18806_v55 }
 0x7c1   :  { %13731 = vmatpush1.bf16.msra.mxu0 %v18801_v29 }
 0x7c2   :  { %13813 = vmatpush1.bf16.msra.mxu1 %v18804_v30  ;;  %13732 = vmatprep.subr.bf16.mxu0 %v18809_v22 }
 0x7c3   :  { %13814 = vmatprep.subr.bf16.mxu1 %v18812_v32 }
 0x7c5   :  { %13733 = vmatpush1.bf16.msra.mxu0 %v18807_v33  ;;  %v18867_v33 = vld [vmem:[#allocation13 + $0x1410] ss:$116 sps:$4 sm:$0xff]  }
 0x7c6   :  { %13815 = vmatpush1.bf16.msra.mxu1 %v18810_v25  ;;  %13734 = vmatprep.subr.bf16.mxu0 %v18815_v35 }
 0x7c7   :  { %13816 = vmatprep.subr.bf16.mxu1 %v18818_v36  ;;  %v18870_v36 = vld [vmem:[#allocation13 + $0x1418] ss:$116 sps:$4 sm:$0xff]  }
 0x7c9   :  { %13735 = vmatpush1.bf16.msra.mxu0 %v18813_v28  ;;  %v18875_v28 = vld [vmem:[#allocation13 + $0x14fc] ss:$116 sps:$4 sm:$0xff]  }
 0x7ca   :  { %13817 = vmatpush1.bf16.msra.mxu1 %v18816_v38  ;;  %13736 = vmatprep.subr.bf16.mxu0 %v18821_v39  ;;  %v18878_v38 = vld [vmem:[#allocation13 + $0x1504] ss:$116 sps:$4 sm:$0xff]  }
 0x7cb   :  { %13818 = vmatprep.subr.bf16.mxu1 %v18824_v31  ;;  %v18873_v39 = vld [vmem:[#allocation13 + $0x14f8] ss:$116 sps:$4 sm:$0xff]   ;;  %v18876_v31 = vld [vmem:[#allocation13 + $0x1500] ss:$116 sps:$4 sm:$0xff]  }
 0x7cd   :  { %13737 = vmatpush1.bf16.msra.mxu0 %v18819_v41  ;;  %v18881_v41 = vld [vmem:[#allocation13 + $0x15e4] ss:$116 sps:$4 sm:$0xff]  }
 0x7ce   :  { %13819 = vmatpush1.bf16.msra.mxu1 %v18822_v42  ;;  %13738 = vmatprep.subr.bf16.mxu0 %v18827_v34  ;;  %v18884_v42 = vld [vmem:[#allocation13 + $0x15ec] ss:$116 sps:$4 sm:$0xff]  }
 0x7cf   :  { %13820 = vmatprep.subr.bf16.mxu1 %v18830_v44  ;;  %v18879_v34 = vld [vmem:[#allocation13 + $0x15e0] ss:$116 sps:$4 sm:$0xff]   ;;  %v18882_v44 = vld [vmem:[#allocation13 + $0x15e8] ss:$116 sps:$4 sm:$0xff]  }
 0x7d1   :  { %13739 = vmatpush1.bf16.msra.mxu0 %v18825_v45  ;;  %v18887_v45 = vld [vmem:[#allocation13 + $0x16cc] ss:$116 sps:$4 sm:$0xff]  }
 0x7d2   :  { %13821 = vmatpush1.bf16.msra.mxu1 %v18828_v46  ;;  %13749 = vmatprep.subr.bf16.mxu0 %v18833_v37  ;;  %v18890_v46 = vld [vmem:[#allocation13 + $0x16d4] ss:$116 sps:$4 sm:$0xff]  }
 0x7d3   :  { %13831 = vmatprep.subr.bf16.mxu1 %v18836_v52  ;;  %v18885_v37 = vld [vmem:[#allocation13 + $0x16c8] ss:$116 sps:$4 sm:$0xff]   ;;  %v18888_v52 = vld [vmem:[#allocation13 + $0x16d0] ss:$116 sps:$4 sm:$0xff]  }
 0x7d4   :  { %13741 = vmatmul.mubr.bf16.vlgmr.msra.gmra.mrb[20].mxu0 %v20313_v8 }
 0x7d5   :  { %13823 = vmatmul.mubr.bf16.vlgmr.msra.gmra.mrb[20].mxu1 %v20313_v8  ;;  %13750 = vmatpush1.bf16.msra.mxu0 %v18831_v53  ;;  %v18893_v53 = vld [vmem:[#allocation13 + $0x17b4] ss:$116 sps:$4 sm:$0xff]  }
 0x7d6   :  { %13781 = vmatprep.mubr.bf16.mxu0 %v20317_v12  ;;  %13832 = vmatpush1.bf16.msra.mxu1 %v18834_v54  ;;  %v18896_v54 = vld [vmem:[#allocation13 + $0x17bc] ss:$116 sps:$4 sm:$0xff]  }
 0x7d7   :  { %13863 = vmatprep.mubr.bf16.mxu1 %v20317_v12  ;;  %13751 = vmatprep.subr.bf16.mxu0 %v18839_v43  ;;  %v18891_v43 = vld [vmem:[#allocation13 + $0x17b0] ss:$116 sps:$4 sm:$0xff]  }
 0x7d8   :  { %13833 = vmatprep.subr.bf16.mxu1 %v18842_v57  ;;  %v18894_v57 = vld [vmem:[#allocation13 + $0x17b8] ss:$116 sps:$4 sm:$0xff]  }
 0x7d9   :  { %13752 = vmatpush1.bf16.msra.mxu0 %v18837_v58  ;;  %v18899_v58 = vld [vmem:[#allocation13 + $0x189c] ss:$116 sps:$4 sm:$0xff]  }
 0x7da   :  { %13834 = vmatpush1.bf16.msra.mxu1 %v18840_v59  ;;  %13753 = vmatprep.subr.bf16.mxu0 %v18845_v60  ;;  %v18902_v59 = vld [vmem:[#allocation13 + $0x18a4] ss:$116 sps:$4 sm:$0xff]  }
 0x7db   :  { %13835 = vmatprep.subr.bf16.mxu1 %v18848_v61  ;;  %v18897_v60 = vld [vmem:[#allocation13 + $0x1898] ss:$116 sps:$4 sm:$0xff]   ;;  %v18900_v61 = vld [vmem:[#allocation13 + $0x18a0] ss:$116 sps:$4 sm:$0xff]  }
 0x7dd   :  { %13754 = vmatpush1.bf16.msra.mxu0 %v18843_v62  ;;  %v18905_v62 = vld [vmem:[#allocation13 + $0x1984] ss:$116 sps:$4 sm:$0xff]  }
 0x7de   :  { %13836 = vmatpush1.bf16.msra.mxu1 %v18846_v63  ;;  %13755 = vmatprep.subr.bf16.mxu0 %v18851_v0  ;;  %v18908_v63 = vld [vmem:[#allocation13 + $0x198c] ss:$116 sps:$4 sm:$0xff]  }
 0x7df   :  { %13837 = vmatprep.subr.bf16.mxu1 %v18854_v1  ;;  %v18903_v0 = vld [vmem:[#allocation13 + $0x1980] ss:$116 sps:$4 sm:$0xff]   ;;  %v18906_v1 = vld [vmem:[#allocation13 + $0x1988] ss:$116 sps:$4 sm:$0xff]  }
 0x7e1   :  { %13756 = vmatpush1.bf16.msra.mxu0 %v18849_v2  ;;  %v18911_v2 = vld [vmem:[#allocation13 + $0x1a6c] ss:$116 sps:$4 sm:$0xff]  }
 0x7e2   :  { %13838 = vmatpush1.bf16.msra.mxu1 %v18852_v3  ;;  %13757 = vmatprep.subr.bf16.mxu0 %v18857_v4  ;;  %v18914_v3 = vld [vmem:[#allocation13 + $0x1a74] ss:$116 sps:$4 sm:$0xff]  }
 0x7e3   :  { %13839 = vmatprep.subr.bf16.mxu1 %v18860_v6  ;;  %v18909_v4 = vld [vmem:[#allocation13 + $0x1a68] ss:$116 sps:$4 sm:$0xff]   ;;  %v18912_v6 = vld [vmem:[#allocation13 + $0x1a70] ss:$116 sps:$4 sm:$0xff]  }
 0x7e5   :  { %13758 = vmatpush1.bf16.msra.mxu0 %v18855_v7  ;;  %v18917_v7 = vld [vmem:[#allocation13 + $0x1b54] ss:$116 sps:$4 sm:$0xff]  }
 0x7e6   :  { %13840 = vmatpush1.bf16.msra.mxu1 %v18858_v10  ;;  %13759 = vmatprep.subr.bf16.mxu0 %v18863_v13  ;;  %v18920_v10 = vld [vmem:[#allocation13 + $0x1b5c] ss:$116 sps:$4 sm:$0xff]  }
 0x7e7   :  { %v13455_v23 = vpop.f32.mrb[12].mxu0  ;;  %v13537_v56 = vpop.f32.mrb[12].mxu1  ;;  %13841 = vmatprep.subr.bf16.mxu1 %v18866_v15  ;;  %v18915_v13 = vld [vmem:[#allocation13 + $0x1b50] ss:$116 sps:$4 sm:$0xff]   ;;  %v18918_v15 = vld [vmem:[#allocation13 + $0x1b58] ss:$116 sps:$4 sm:$0xff]  }
 0x7e8   :  { %v16676_v26 = vadd.f32 %v13455_v23, %v8566_v16  ;;  %v16678_v27 = vadd.f32 %v13537_v56, %v8574_v18  ;;  %v13457_v19 = vpop.f32.mrb[13].mxu0  ;;  %v13539_v55 = vpop.f32.mrb[13].mxu1  ;;  %v18923_v16 = vld [vmem:[#allocation13 + $0x1c3c] ss:$116 sps:$4 sm:$0xff]   ;;  %v18926_v18 = vld [vmem:[#allocation13 + $0x1c44] ss:$116 sps:$4 sm:$0xff]  }
 0x7e9   :  { %v16677_v29 = vadd.f32 %v13457_v19, %v8570_v20  ;;  %v16679_v30 = vadd.f32 %v13539_v55, %v8578_v11  ;;  %v13459_v22 = vpop.f32.mrb[14].mxu0  ;;  %v13541_v32 = vpop.f32.mrb[14].mxu1  ;;  %13760 = vmatpush1.bf16.msra.mxu0 %v18861_v21  ;;  %v18921_v20 = vld [vmem:[#allocation13 + $0x1c38] ss:$116 sps:$4 sm:$0xff]   ;;  %v18924_v11 = vld [vmem:[#allocation13 + $0x1c40] ss:$116 sps:$4 sm:$0xff]  }
 0x7ea   :  { %14608 = vst [vmem:[#allocation16] sm:$0xff] %v16676_v26  ;;  %14610 = vst [vmem:[#allocation16 + $0x10] sm:$0xff] %v16678_v27  ;;  %13842 = vmatpush1.bf16.msra.mxu1 %v18864_v50  ;;  %v13460_v25 = vpop.f32.mrb[15].mxu0  ;;  %v13542_v35 = vpop.f32.mrb[15].mxu1  ;;  %13761 = vmatprep.subr.bf16.mxu0 %v18869_v14  ;;  %v18929_v21 = vld [vmem:[#allocation13 + $0x34] ss:$116 sps:$4 sm:$0xff]  }
 0x7eb   :  { %14609 = vst [vmem:[#allocation16 + $0x8] sm:$0xff] %v16677_v29  ;;  %14611 = vst [vmem:[#allocation16 + $0x18] sm:$0xff] %v16679_v30  ;;  %13843 = vmatprep.subr.bf16.mxu1 %v18872_v17  ;;  %v18932_v50 = vld [vmem:[#allocation13 + $0x3c] ss:$116 sps:$4 sm:$0xff]   ;;  %v18930_v23 = vld [vmem:[#allocation13 + $0x38] ss:$116 sps:$4 sm:$0xff]  }
 0x7ec   :  { %v18927_v14 = vld [vmem:[#allocation13 + $0x30] ss:$116 sps:$4 sm:$0xff]   ;;  %v18933_v26 = vld [vmem:[#allocation13 + $0x118] ss:$116 sps:$4 sm:$0xff]   ;;  %v18936_v27 = vld [vmem:[#allocation13 + $0x120] ss:$116 sps:$4 sm:$0xff]  }
 0x7ed   :  { %13762 = vmatpush1.bf16.msra.mxu0 %v18867_v33  ;;  %v18935_v56 = vld [vmem:[#allocation13 + $0x11c] ss:$116 sps:$4 sm:$0xff]   ;;  %v18938_v17 = vld [vmem:[#allocation13 + $0x124] ss:$116 sps:$4 sm:$0xff]   ;;  %v18944_v55 = vld [vmem:[#allocation13 + $0x20c] ss:$116 sps:$4 sm:$0xff]  }
 0x7ee   :  { %13844 = vmatpush1.bf16.msra.mxu1 %v18870_v36  ;;  %13763 = vmatprep.subr.bf16.mxu0 %v18875_v28  ;;  %v18941_v19 = vld [vmem:[#allocation13 + $0x204] ss:$116 sps:$4 sm:$0xff]   ;;  %v18939_v29 = vld [vmem:[#allocation13 + $0x200] ss:$116 sps:$4 sm:$0xff]   ;;  %v18942_v30 = vld [vmem:[#allocation13 + $0x208] ss:$116 sps:$4 sm:$0xff]  }
 0x7ef   :  { %13845 = vmatprep.subr.bf16.mxu1 %v18878_v38  ;;  %v18947_v22 = vld [vmem:[#allocation13 + $0x2ec] ss:$116 sps:$4 sm:$0xff]   ;;  %v18950_v32 = vld [vmem:[#allocation13 + $0x2f4] ss:$116 sps:$4 sm:$0xff]   ;;  %v18948_v25 = vld [vmem:[#allocation13 + $0x2f0] ss:$116 sps:$4 sm:$0xff]  }
 0x7f0   :  { %v18945_v33 = vld [vmem:[#allocation13 + $0x2e8] ss:$116 sps:$4 sm:$0xff]   ;;  %v18951_v28 = vld [vmem:[#allocation13 + $0x3d0] ss:$116 sps:$4 sm:$0xff]   ;;  %v18954_v38 = vld [vmem:[#allocation13 + $0x3d8] ss:$116 sps:$4 sm:$0xff]  }
 0x7f1   :  { %13764 = vmatpush1.bf16.msra.mxu0 %v18873_v39  ;;  %v18953_v35 = vld [vmem:[#allocation13 + $0x3d4] ss:$116 sps:$4 sm:$0xff]   ;;  %v18956_v36 = vld [vmem:[#allocation13 + $0x3dc] ss:$116 sps:$4 sm:$0xff]  }
 0x7f2   :  { %13846 = vmatpush1.bf16.msra.mxu1 %v18876_v31  ;;  %13765 = vmatprep.subr.bf16.mxu0 %v18881_v41  ;;  %v18959_v39 = vld [vmem:[#allocation13 + $0x4bc] ss:$116 sps:$4 sm:$0xff]   ;;  %v18962_v31 = vld [vmem:[#allocation13 + $0x4c4] ss:$116 sps:$4 sm:$0xff]  }
 0x7f3   :  { %13847 = vmatprep.subr.bf16.mxu1 %v18884_v42  ;;  %v18957_v41 = vld [vmem:[#allocation13 + $0x4b8] ss:$116 sps:$4 sm:$0xff]   ;;  %v18960_v42 = vld [vmem:[#allocation13 + $0x4c0] ss:$116 sps:$4 sm:$0xff]  }
 0x7f5   :  { %13766 = vmatpush1.bf16.msra.mxu0 %v18879_v34  ;;  %v18965_v34 = vld [vmem:[#allocation13 + $0x5a4] ss:$116 sps:$4 sm:$0xff]  }
 0x7f6   :  { %13848 = vmatpush1.bf16.msra.mxu1 %v18882_v44  ;;  %13767 = vmatprep.subr.bf16.mxu0 %v18887_v45  ;;  %v18968_v44 = vld [vmem:[#allocation13 + $0x5ac] ss:$116 sps:$4 sm:$0xff]  }
 0x7f7   :  { %13849 = vmatprep.subr.bf16.mxu1 %v18890_v46  ;;  %v18963_v45 = vld [vmem:[#allocation13 + $0x5a0] ss:$116 sps:$4 sm:$0xff]   ;;  %v18966_v46 = vld [vmem:[#allocation13 + $0x5a8] ss:$116 sps:$4 sm:$0xff]  }
 0x7f9   :  { %13768 = vmatpush1.bf16.msra.mxu0 %v18885_v37  ;;  %v18971_v37 = vld [vmem:[#allocation13 + $0x68c] ss:$116 sps:$4 sm:$0xff]  }
 0x7fa   :  { %13850 = vmatpush1.bf16.msra.mxu1 %v18888_v52  ;;  %13769 = vmatprep.subr.bf16.mxu0 %v18893_v53  ;;  %v18974_v52 = vld [vmem:[#allocation13 + $0x694] ss:$116 sps:$4 sm:$0xff]  }
 0x7fb   :  { %13851 = vmatprep.subr.bf16.mxu1 %v18896_v54  ;;  %v18969_v53 = vld [vmem:[#allocation13 + $0x688] ss:$116 sps:$4 sm:$0xff]   ;;  %v18972_v54 = vld [vmem:[#allocation13 + $0x690] ss:$116 sps:$4 sm:$0xff]  }
 0x7fd   :  { %13770 = vmatpush1.bf16.msra.mxu0 %v18891_v43  ;;  %v18977_v43 = vld [vmem:[#allocation13 + $0x774] ss:$116 sps:$4 sm:$0xff]  }
 0x7fe   :  { %13852 = vmatpush1.bf16.msra.mxu1 %v18894_v57  ;;  %13771 = vmatprep.subr.bf16.mxu0 %v18899_v58  ;;  %v18980_v57 = vld [vmem:[#allocation13 + $0x77c] ss:$116 sps:$4 sm:$0xff]  }
 0x7ff   :  { %13853 = vmatprep.subr.bf16.mxu1 %v18902_v59  ;;  %v18975_v58 = vld [vmem:[#allocation13 + $0x770] ss:$116 sps:$4 sm:$0xff]   ;;  %v18978_v59 = vld [vmem:[#allocation13 + $0x778] ss:$116 sps:$4 sm:$0xff]  }
 0x801   :  { %13772 = vmatpush1.bf16.msra.mxu0 %v18897_v60  ;;  %v18983_v60 = vld [vmem:[#allocation13 + $0x85c] ss:$116 sps:$4 sm:$0xff]  }
 0x802   :  { %13854 = vmatpush1.bf16.msra.mxu1 %v18900_v61  ;;  %13773 = vmatprep.subr.bf16.mxu0 %v18905_v62  ;;  %v18986_v61 = vld [vmem:[#allocation13 + $0x864] ss:$116 sps:$4 sm:$0xff]  }
 0x803   :  { %13855 = vmatprep.subr.bf16.mxu1 %v18908_v63  ;;  %v18981_v62 = vld [vmem:[#allocation13 + $0x858] ss:$116 sps:$4 sm:$0xff]   ;;  %v18984_v63 = vld [vmem:[#allocation13 + $0x860] ss:$116 sps:$4 sm:$0xff]  }
 0x805   :  { %13774 = vmatpush1.bf16.msra.mxu0 %v18903_v0  ;;  %v18989_v0 = vld [vmem:[#allocation13 + $0x944] ss:$116 sps:$4 sm:$0xff]  }
 0x806   :  { %13856 = vmatpush1.bf16.msra.mxu1 %v18906_v1  ;;  %13775 = vmatprep.subr.bf16.mxu0 %v18911_v2  ;;  %v18992_v1 = vld [vmem:[#allocation13 + $0x94c] ss:$116 sps:$4 sm:$0xff]  }
 0x807   :  { %13857 = vmatprep.subr.bf16.mxu1 %v18914_v3  ;;  %v18987_v2 = vld [vmem:[#allocation13 + $0x940] ss:$116 sps:$4 sm:$0xff]   ;;  %v18990_v3 = vld [vmem:[#allocation13 + $0x948] ss:$116 sps:$4 sm:$0xff]  }
 0x809   :  { %13776 = vmatpush1.bf16.msra.mxu0 %v18909_v4  ;;  %v18995_v4 = vld [vmem:[#allocation13 + $0xa2c] ss:$116 sps:$4 sm:$0xff]  }
 0x80a   :  { %13858 = vmatpush1.bf16.msra.mxu1 %v18912_v6  ;;  %13777 = vmatprep.subr.bf16.mxu0 %v18917_v7  ;;  %v18998_v6 = vld [vmem:[#allocation13 + $0xa34] ss:$116 sps:$4 sm:$0xff]  }
 0x80b   :  { %13859 = vmatprep.subr.bf16.mxu1 %v18920_v10  ;;  %v18993_v7 = vld [vmem:[#allocation13 + $0xa28] ss:$116 sps:$4 sm:$0xff]   ;;  %v18996_v10 = vld [vmem:[#allocation13 + $0xa30] ss:$116 sps:$4 sm:$0xff]  }
 0x80d   :  { %13778 = vmatpush1.bf16.msra.mxu0 %v18915_v13  ;;  %v19001_v13 = vld [vmem:[#allocation13 + $0xb14] ss:$116 sps:$4 sm:$0xff]  }
 0x80e   :  { %13860 = vmatpush1.bf16.msra.mxu1 %v18918_v15  ;;  %13779 = vmatprep.subr.bf16.mxu0 %v18923_v16  ;;  %v19004_v15 = vld [vmem:[#allocation13 + $0xb1c] ss:$116 sps:$4 sm:$0xff]  }
 0x80f   :  { %13861 = vmatprep.subr.bf16.mxu1 %v18926_v18  ;;  %v18999_v16 = vld [vmem:[#allocation13 + $0xb10] ss:$116 sps:$4 sm:$0xff]   ;;  %v19002_v18 = vld [vmem:[#allocation13 + $0xb18] ss:$116 sps:$4 sm:$0xff]  }
 0x811   :  { %13780 = vmatpush1.bf16.msra.mxu0 %v18921_v20  ;;  %v19007_v20 = vld [vmem:[#allocation13 + $0xbfc] ss:$116 sps:$4 sm:$0xff]  }
 0x812   :  { %13862 = vmatpush1.bf16.msra.mxu1 %v18924_v11  ;;  %13872 = vmatprep.subr.bf16.mxu0 %v18929_v21  ;;  %v19010_v11 = vld [vmem:[#allocation13 + $0xc04] ss:$116 sps:$4 sm:$0xff]  }
 0x813   :  { %13954 = vmatprep.subr.bf16.mxu1 %v18932_v50  ;;  %v19005_v21 = vld [vmem:[#allocation13 + $0xbf8] ss:$116 sps:$4 sm:$0xff]   ;;  %v19008_v50 = vld [vmem:[#allocation13 + $0xc00] ss:$116 sps:$4 sm:$0xff]  }
 0x814   :  { %13782 = vmatmul.mubr.bf16.vlgmr.msra.gmra.mrb[20].mxu0 %v20326_v24 }
 0x815   :  { %13864 = vmatmul.mubr.bf16.vlgmr.msra.gmra.mrb[20].mxu1 %v20326_v24  ;;  %13873 = vmatpush1.bf16.msra.mxu0 %v18927_v14  ;;  %v19013_v14 = vld [vmem:[#allocation13 + $0xce4] ss:$116 sps:$4 sm:$0xff]  }
 0x816   :  { %13904 = vmatprep.mubr.bf16.mxu0 %v20311_v5  ;;  %13955 = vmatpush1.bf16.msra.mxu1 %v18930_v23  ;;  %v19016_v23 = vld [vmem:[#allocation13 + $0xcec] ss:$116 sps:$4 sm:$0xff]  }
 0x817   :  { %13986 = vmatprep.mubr.bf16.mxu1 %v20311_v5  ;;  %13874 = vmatprep.subr.bf16.mxu0 %v18935_v56  ;;  %v19011_v56 = vld [vmem:[#allocation13 + $0xce0] ss:$116 sps:$4 sm:$0xff]  }
 0x818   :  { %13956 = vmatprep.subr.bf16.mxu1 %v18938_v17  ;;  %v19014_v17 = vld [vmem:[#allocation13 + $0xce8] ss:$116 sps:$4 sm:$0xff]  }
 0x819   :  { %13875 = vmatpush1.bf16.msra.mxu0 %v18933_v26  ;;  %v19019_v26 = vld [vmem:[#allocation13 + $0xdcc] ss:$116 sps:$4 sm:$0xff]  }
 0x81a   :  { %13957 = vmatpush1.bf16.msra.mxu1 %v18936_v27  ;;  %13876 = vmatprep.subr.bf16.mxu0 %v18941_v19  ;;  %v19022_v27 = vld [vmem:[#allocation13 + $0xdd4] ss:$116 sps:$4 sm:$0xff]  }
 0x81b   :  { %13958 = vmatprep.subr.bf16.mxu1 %v18944_v55  ;;  %v19017_v19 = vld [vmem:[#allocation13 + $0xdc8] ss:$116 sps:$4 sm:$0xff]   ;;  %v19020_v55 = vld [vmem:[#allocation13 + $0xdd0] ss:$116 sps:$4 sm:$0xff]  }
 0x81d   :  { %13877 = vmatpush1.bf16.msra.mxu0 %v18939_v29  ;;  %v19025_v29 = vld [vmem:[#allocation13 + $0xeb4] ss:$116 sps:$4 sm:$0xff]  }
 0x81e   :  { %13959 = vmatpush1.bf16.msra.mxu1 %v18942_v30  ;;  %13878 = vmatprep.subr.bf16.mxu0 %v18947_v22  ;;  %v19028_v30 = vld [vmem:[#allocation13 + $0xebc] ss:$116 sps:$4 sm:$0xff]  }
 0x81f   :  { %13960 = vmatprep.subr.bf16.mxu1 %v18950_v32  ;;  %v19023_v22 = vld [vmem:[#allocation13 + $0xeb0] ss:$116 sps:$4 sm:$0xff]   ;;  %v19026_v32 = vld [vmem:[#allocation13 + $0xeb8] ss:$116 sps:$4 sm:$0xff]  }
 0x821   :  { %13879 = vmatpush1.bf16.msra.mxu0 %v18945_v33  ;;  %v19031_v33 = vld [vmem:[#allocation13 + $0xf9c] ss:$116 sps:$4 sm:$0xff]  }
 0x822   :  { %13961 = vmatpush1.bf16.msra.mxu1 %v18948_v25  ;;  %13880 = vmatprep.subr.bf16.mxu0 %v18953_v35  ;;  %v19034_v25 = vld [vmem:[#allocation13 + $0xfa4] ss:$116 sps:$4 sm:$0xff]  }
 0x823   :  { %13962 = vmatprep.subr.bf16.mxu1 %v18956_v36  ;;  %v19029_v35 = vld [vmem:[#allocation13 + $0xf98] ss:$116 sps:$4 sm:$0xff]   ;;  %v19032_v36 = vld [vmem:[#allocation13 + $0xfa0] ss:$116 sps:$4 sm:$0xff]  }
 0x825   :  { %13881 = vmatpush1.bf16.msra.mxu0 %v18951_v28  ;;  %v19037_v28 = vld [vmem:[#allocation13 + $0x1084] ss:$116 sps:$4 sm:$0xff]  }
 0x826   :  { %13963 = vmatpush1.bf16.msra.mxu1 %v18954_v38  ;;  %13882 = vmatprep.subr.bf16.mxu0 %v18959_v39  ;;  %v19040_v38 = vld [vmem:[#allocation13 + $0x108c] ss:$116 sps:$4 sm:$0xff]  }
 0x827   :  { %13964 = vmatprep.subr.bf16.mxu1 %v18962_v31  ;;  %v19035_v39 = vld [vmem:[#allocation13 + $0x1080] ss:$116 sps:$4 sm:$0xff]   ;;  %v19038_v31 = vld [vmem:[#allocation13 + $0x1088] ss:$116 sps:$4 sm:$0xff]  }
 0x829   :  { %13883 = vmatpush1.bf16.msra.mxu0 %v18957_v41  ;;  %v19043_v41 = vld [vmem:[#allocation13 + $0x116c] ss:$116 sps:$4 sm:$0xff]  }
 0x82a   :  { %13965 = vmatpush1.bf16.msra.mxu1 %v18960_v42  ;;  %13884 = vmatprep.subr.bf16.mxu0 %v18965_v34  ;;  %v19046_v42 = vld [vmem:[#allocation13 + $0x1174] ss:$116 sps:$4 sm:$0xff]  }
 0x82b   :  { %13966 = vmatprep.subr.bf16.mxu1 %v18968_v44  ;;  %v19041_v34 = vld [vmem:[#allocation13 + $0x1168] ss:$116 sps:$4 sm:$0xff]   ;;  %v19044_v44 = vld [vmem:[#allocation13 + $0x1170] ss:$116 sps:$4 sm:$0xff]  }
 0x82d   :  { %13885 = vmatpush1.bf16.msra.mxu0 %v18963_v45  ;;  %v19049_v45 = vld [vmem:[#allocation13 + $0x1254] ss:$116 sps:$4 sm:$0xff]  }
 0x82e   :  { %13967 = vmatpush1.bf16.msra.mxu1 %v18966_v46  ;;  %13886 = vmatprep.subr.bf16.mxu0 %v18971_v37  ;;  %v19052_v46 = vld [vmem:[#allocation13 + $0x125c] ss:$116 sps:$4 sm:$0xff]   ;;  %v20363_v37 = vsub.s32 4, %v20281_v47 }
 0x82f   :  { %13968 = vmatprep.subr.bf16.mxu1 %v18974_v52  ;;  %v19047_v52 = vld [vmem:[#allocation13 + $0x1250] ss:$116 sps:$4 sm:$0xff]  }
 0x831   :  { %13887 = vmatpush1.bf16.msra.mxu0 %v18969_v53  ;;  %v20366_v53 = vsub.s32 6, %v20281_v47 }
 0x832   :  { %13969 = vmatpush1.bf16.msra.mxu1 %v18972_v54  ;;  %13888 = vmatprep.subr.bf16.mxu0 %v18977_v43  ;;  %v20369_v54 = vsub.s32 5, %v20281_v47  ;;  %v19050_v43 = vld [vmem:[#allocation13 + $0x1258] ss:$116 sps:$4 sm:$0xff]  }
 0x833   :  { %13970 = vmatprep.subr.bf16.mxu1 %v18980_v57  ;;  %v20372_v57 = vsub.s32 7, %v20281_v47  ;;  %v19056_v47 = vld [vmem:[#allocation13 + $0x1340] ss:$116 sps:$4 sm:$0xff]  }
 0x835   :  { %13889 = vmatpush1.bf16.msra.mxu0 %v18975_v58  ;;  %v19055_v58 = vld [vmem:[#allocation13 + $0x133c] ss:$116 sps:$4 sm:$0xff]  }
 0x836   :  { %13971 = vmatpush1.bf16.msra.mxu1 %v18978_v59  ;;  %13890 = vmatprep.subr.bf16.mxu0 %v18983_v60  ;;  %v19058_v59 = vld [vmem:[#allocation13 + $0x1344] ss:$116 sps:$4 sm:$0xff]   ;;  %v8582_v60 = vrot.slane %v20344_v9, %v20363_v37 }
 0x837   :  { %13972 = vmatprep.subr.bf16.mxu1 %v18986_v61  ;;  %v8590_v61 = vrot.slane %v20344_v9, %v20366_v53 }
 0x839   :  { %13891 = vmatpush1.bf16.msra.mxu0 %v18981_v62  ;;  %v8586_v62 = vrot.slane %v20344_v9, %v20369_v54 }
 0x83a   :  { %13973 = vmatpush1.bf16.msra.mxu1 %v18984_v63  ;;  %13892 = vmatprep.subr.bf16.mxu0 %v18989_v0  ;;  %v19053_v63 = vld [vmem:[#allocation13 + $0x1338] ss:$116 sps:$4 sm:$0xff]   ;;  %v8594_v0 = vrot.slane %v20344_v9, %v20372_v57 }
 0x83b   :  { %13974 = vmatprep.subr.bf16.mxu1 %v18992_v1  ;;  %v19061_v1 = vld [vmem:[#allocation13 + $0x1424] ss:$116 sps:$4 sm:$0xff]  }
 0x83d   :  { %13893 = vmatpush1.bf16.msra.mxu0 %v18987_v2 }
 0x83e   :  { %13975 = vmatpush1.bf16.msra.mxu1 %v18990_v3  ;;  %13894 = vmatprep.subr.bf16.mxu0 %v18995_v4  ;;  %v19064_v3 = vld [vmem:[#allocation13 + $0x142c] ss:$116 sps:$4 sm:$0xff]  }
 0x83f   :  { %13976 = vmatprep.subr.bf16.mxu1 %v18998_v6 }
 0x841   :  { %13895 = vmatpush1.bf16.msra.mxu0 %v18993_v7 }
 0x842   :  { %13977 = vmatpush1.bf16.msra.mxu1 %v18996_v10  ;;  %13896 = vmatprep.subr.bf16.mxu0 %v19001_v13 }
 0x843   :  { %13978 = vmatprep.subr.bf16.mxu1 %v19004_v15 }
 0x845   :  { %13897 = vmatpush1.bf16.msra.mxu0 %v18999_v16 }
 0x846   :  { %13979 = vmatpush1.bf16.msra.mxu1 %v19002_v18  ;;  %13898 = vmatprep.subr.bf16.mxu0 %v19007_v20  ;;  %v19059_v18 = vld [vmem:[#allocation13 + $0x1420] ss:$116 sps:$4 sm:$0xff]  }
 0x847   :  { %13980 = vmatprep.subr.bf16.mxu1 %v19010_v11 }
 0x849   :  { %13899 = vmatpush1.bf16.msra.mxu0 %v19005_v21  ;;  %v19062_v21 = vld [vmem:[#allocation13 + $0x1428] ss:$116 sps:$4 sm:$0xff]  }
 0x84a   :  { %13981 = vmatpush1.bf16.msra.mxu1 %v19008_v50  ;;  %13900 = vmatprep.subr.bf16.mxu0 %v19013_v14  ;;  %v19067_v50 = vld [vmem:[#allocation13 + $0x150c] ss:$116 sps:$4 sm:$0xff]  }
 0x84b   :  { %13982 = vmatprep.subr.bf16.mxu1 %v19016_v23  ;;  %v19070_v23 = vld [vmem:[#allocation13 + $0x1514] ss:$116 sps:$4 sm:$0xff]  }
 0x84d   :  { %13901 = vmatpush1.bf16.msra.mxu0 %v19011_v56  ;;  %v19065_v56 = vld [vmem:[#allocation13 + $0x1508] ss:$116 sps:$4 sm:$0xff]  }
 0x84e   :  { %13983 = vmatpush1.bf16.msra.mxu1 %v19014_v17  ;;  %13902 = vmatprep.subr.bf16.mxu0 %v19019_v26  ;;  %v19068_v17 = vld [vmem:[#allocation13 + $0x1510] ss:$116 sps:$4 sm:$0xff]   ;;  %v19073_v26 = vld [vmem:[#allocation13 + $0x15f4] ss:$116 sps:$4 sm:$0xff]  }
 0x84f   :  { %13984 = vmatprep.subr.bf16.mxu1 %v19022_v27  ;;  %v19076_v27 = vld [vmem:[#allocation13 + $0x15fc] ss:$116 sps:$4 sm:$0xff]  }
 0x851   :  { %13903 = vmatpush1.bf16.msra.mxu0 %v19017_v19  ;;  %v19071_v19 = vld [vmem:[#allocation13 + $0x15f0] ss:$116 sps:$4 sm:$0xff]  }
 0x852   :  { %13985 = vmatpush1.bf16.msra.mxu1 %v19020_v55  ;;  %13913 = vmatprep.subr.bf16.mxu0 %v19025_v29  ;;  %v19074_v55 = vld [vmem:[#allocation13 + $0x15f8] ss:$116 sps:$4 sm:$0xff]   ;;  %v19079_v29 = vld [vmem:[#allocation13 + $0x16dc] ss:$116 sps:$4 sm:$0xff]  }
 0x853   :  { %13995 = vmatprep.subr.bf16.mxu1 %v19028_v30  ;;  %v19082_v30 = vld [vmem:[#allocation13 + $0x16e4] ss:$116 sps:$4 sm:$0xff]  }
 0x854   :  { %13905 = vmatmul.mubr.bf16.vlgmr.msra.gmra.mrb[24].mxu0 %v20313_v8 }
 0x855   :  { %13987 = vmatmul.mubr.bf16.vlgmr.msra.gmra.mrb[24].mxu1 %v20313_v8  ;;  %13914 = vmatpush1.bf16.msra.mxu0 %v19023_v22  ;;  %v19077_v22 = vld [vmem:[#allocation13 + $0x16d8] ss:$116 sps:$4 sm:$0xff]  }
 0x856   :  { %13945 = vmatprep.mubr.bf16.mxu0 %v20317_v12  ;;  %13996 = vmatpush1.bf16.msra.mxu1 %v19026_v32  ;;  %v19080_v32 = vld [vmem:[#allocation13 + $0x16e0] ss:$116 sps:$4 sm:$0xff]  }
 0x857   :  { %14027 = vmatprep.mubr.bf16.mxu1 %v20317_v12  ;;  %13915 = vmatprep.subr.bf16.mxu0 %v19031_v33  ;;  %v19085_v33 = vld [vmem:[#allocation13 + $0x17c4] ss:$116 sps:$4 sm:$0xff]  }
 0x858   :  { %13997 = vmatprep.subr.bf16.mxu1 %v19034_v25  ;;  %v19088_v25 = vld [vmem:[#allocation13 + $0x17cc] ss:$116 sps:$4 sm:$0xff]  }
 0x859   :  { %13916 = vmatpush1.bf16.msra.mxu0 %v19029_v35  ;;  %v19083_v35 = vld [vmem:[#allocation13 + $0x17c0] ss:$116 sps:$4 sm:$0xff]  }
 0x85a   :  { %13998 = vmatpush1.bf16.msra.mxu1 %v19032_v36  ;;  %13917 = vmatprep.subr.bf16.mxu0 %v19037_v28  ;;  %v19086_v36 = vld [vmem:[#allocation13 + $0x17c8] ss:$116 sps:$4 sm:$0xff]   ;;  %v19091_v28 = vld [vmem:[#allocation13 + $0x18ac] ss:$116 sps:$4 sm:$0xff]  }
 0x85b   :  { %13999 = vmatprep.subr.bf16.mxu1 %v19040_v38  ;;  %v19094_v38 = vld [vmem:[#allocation13 + $0x18b4] ss:$116 sps:$4 sm:$0xff]  }
 0x85d   :  { %13918 = vmatpush1.bf16.msra.mxu0 %v19035_v39  ;;  %v19089_v39 = vld [vmem:[#allocation13 + $0x18a8] ss:$116 sps:$4 sm:$0xff]  }
 0x85e   :  { %14000 = vmatpush1.bf16.msra.mxu1 %v19038_v31  ;;  %13919 = vmatprep.subr.bf16.mxu0 %v19043_v41  ;;  %v19092_v31 = vld [vmem:[#allocation13 + $0x18b0] ss:$116 sps:$4 sm:$0xff]   ;;  %v19097_v41 = vld [vmem:[#allocation13 + $0x1994] ss:$116 sps:$4 sm:$0xff]  }
 0x85f   :  { %14001 = vmatprep.subr.bf16.mxu1 %v19046_v42  ;;  %v19100_v42 = vld [vmem:[#allocation13 + $0x199c] ss:$116 sps:$4 sm:$0xff]  }
 0x861   :  { %13920 = vmatpush1.bf16.msra.mxu0 %v19041_v34  ;;  %v19095_v34 = vld [vmem:[#allocation13 + $0x1990] ss:$116 sps:$4 sm:$0xff]  }
 0x862   :  { %14002 = vmatpush1.bf16.msra.mxu1 %v19044_v44  ;;  %13921 = vmatprep.subr.bf16.mxu0 %v19049_v45  ;;  %v19098_v44 = vld [vmem:[#allocation13 + $0x1998] ss:$116 sps:$4 sm:$0xff]   ;;  %v19103_v45 = vld [vmem:[#allocation13 + $0x1a7c] ss:$116 sps:$4 sm:$0xff]  }
 0x863   :  { %14003 = vmatprep.subr.bf16.mxu1 %v19052_v46  ;;  %v19106_v46 = vld [vmem:[#allocation13 + $0x1a84] ss:$116 sps:$4 sm:$0xff]  }
 0x865   :  { %13922 = vmatpush1.bf16.msra.mxu0 %v19047_v52  ;;  %v19101_v52 = vld [vmem:[#allocation13 + $0x1a78] ss:$116 sps:$4 sm:$0xff]  }
 0x866   :  { %14004 = vmatpush1.bf16.msra.mxu1 %v19050_v43  ;;  %13923 = vmatprep.subr.bf16.mxu0 %v19055_v58  ;;  %v19104_v43 = vld [vmem:[#allocation13 + $0x1a80] ss:$116 sps:$4 sm:$0xff]   ;;  %v19109_v58 = vld [vmem:[#allocation13 + $0x1b64] ss:$116 sps:$4 sm:$0xff]  }
 0x867   :  { %v13619_v2 = vpop.f32.mrb[16].mxu0  ;;  %14005 = vmatprep.subr.bf16.mxu1 %v19058_v59  ;;  %v19112_v59 = vld [vmem:[#allocation13 + $0x1b6c] ss:$116 sps:$4 sm:$0xff]  }
 0x868   :  { %v16680_v4 = vadd.f32 %v13619_v2, %v8582_v60  ;;  %v13701_v6 = vpop.f32.mrb[16].mxu1  ;;  %v13621_v7 = vpop.f32.mrb[17].mxu0  ;;  %v19107_v60 = vld [vmem:[#allocation13 + $0x1b60] ss:$116 sps:$4 sm:$0xff]  }
 0x869   :  { %v16682_v10 = vadd.f32 %v13701_v6, %v8590_v61  ;;  %v16681_v13 = vadd.f32 %v13621_v7, %v8586_v62  ;;  %v13703_v15 = vpop.f32.mrb[17].mxu1  ;;  %v13623_v16 = vpop.f32.mrb[18].mxu0  ;;  %13924 = vmatpush1.bf16.msra.mxu0 %v19053_v63  ;;  %v19110_v61 = vld [vmem:[#allocation13 + $0x1b68] ss:$116 sps:$4 sm:$0xff]   ;;  %v19115_v62 = vld [vmem:[#allocation13 + $0x1c4c] ss:$116 sps:$4 sm:$0xff]  }
 0x86a   :  { %14612 = vst [vmem:[#allocation16 + $0x20] sm:$0xff] %v16680_v4  ;;  %v16683_v20 = vadd.f32 %v13703_v15, %v8594_v0  ;;  %v13705_v11 = vpop.f32.mrb[18].mxu1  ;;  %14006 = vmatpush1.bf16.msra.mxu1 %v19056_v47  ;;  %v13624_v9 = vpop.f32.mrb[19].mxu0  ;;  %13925 = vmatprep.subr.bf16.mxu0 %v19061_v1  ;;  %v19118_v63 = vld [vmem:[#allocation13 + $0x1c54] ss:$116 sps:$4 sm:$0xff]  }
 0x86b   :  { %14614 = vst [vmem:[#allocation16 + $0x30] sm:$0xff] %v16682_v10  ;;  %14613 = vst [vmem:[#allocation16 + $0x28] sm:$0xff] %v16681_v13  ;;  %v13706_v14 = vpop.f32.mrb[19].mxu1  ;;  %14007 = vmatprep.subr.bf16.mxu1 %v19064_v3  ;;  %v19113_v0 = vld [vmem:[#allocation13 + $0x1c48] ss:$116 sps:$4 sm:$0xff]  }
 0x86c   :  { %14615 = vst [vmem:[#allocation16 + $0x38] sm:$0xff] %v16683_v20  ;;  %v19116_v47 = vld [vmem:[#allocation13 + $0x1c50] ss:$116 sps:$4 sm:$0xff]   ;;  %v19124_v2 = vld [vmem:[#allocation13 + $0x4c] ss:$116 sps:$4 sm:$0xff]  }
 0x86d   :  { %13926 = vmatpush1.bf16.msra.mxu0 %v19059_v18  ;;  %v19121_v1 = vld [vmem:[#allocation13 + $0x44] ss:$116 sps:$4 sm:$0xff]   ;;  %v19119_v3 = vld [vmem:[#allocation13 + $0x40] ss:$116 sps:$4 sm:$0xff]   ;;  %v19122_v4 = vld [vmem:[#allocation13 + $0x48] ss:$116 sps:$4 sm:$0xff]  }
 0x86e   :  { %14008 = vmatpush1.bf16.msra.mxu1 %v19062_v21  ;;  %13927 = vmatprep.subr.bf16.mxu0 %v19067_v50  ;;  %v19127_v6 = vld [vmem:[#allocation13 + $0x12c] ss:$116 sps:$4 sm:$0xff]   ;;  %v19130_v7 = vld [vmem:[#allocation13 + $0x134] ss:$116 sps:$4 sm:$0xff]   ;;  %v19128_v13 = vld [vmem:[#allocation13 + $0x130] ss:$116 sps:$4 sm:$0xff]  }
 0x86f   :  { %14009 = vmatprep.subr.bf16.mxu1 %v19070_v23  ;;  %v19125_v10 = vld [vmem:[#allocation13 + $0x128] ss:$116 sps:$4 sm:$0xff]   ;;  %v19131_v18 = vld [vmem:[#allocation13 + $0x210] ss:$116 sps:$4 sm:$0xff]   ;;  %v19134_v20 = vld [vmem:[#allocation13 + $0x218] ss:$116 sps:$4 sm:$0xff]  }
 0x870   :  { %v19133_v15 = vld [vmem:[#allocation13 + $0x214] ss:$116 sps:$4 sm:$0xff]   ;;  %v19136_v16 = vld [vmem:[#allocation13 + $0x21c] ss:$116 sps:$4 sm:$0xff]   ;;  %v19142_v9 = vld [vmem:[#allocation13 + $0x304] ss:$116 sps:$4 sm:$0xff]  }
 0x871   :  { %13928 = vmatpush1.bf16.msra.mxu0 %v19065_v56  ;;  %v19139_v11 = vld [vmem:[#allocation13 + $0x2fc] ss:$116 sps:$4 sm:$0xff]   ;;  %v19137_v21 = vld [vmem:[#allocation13 + $0x2f8] ss:$116 sps:$4 sm:$0xff]   ;;  %v19140_v50 = vld [vmem:[#allocation13 + $0x300] ss:$116 sps:$4 sm:$0xff]  }
 0x872   :  { %14010 = vmatpush1.bf16.msra.mxu1 %v19068_v17  ;;  %13929 = vmatprep.subr.bf16.mxu0 %v19073_v26  ;;  %v19145_v14 = vld [vmem:[#allocation13 + $0x3e4] ss:$116 sps:$4 sm:$0xff]   ;;  %v19148_v23 = vld [vmem:[#allocation13 + $0x3ec] ss:$116 sps:$4 sm:$0xff]   ;;  %v19146_v17 = vld [vmem:[#allocation13 + $0x3e8] ss:$116 sps:$4 sm:$0xff]  }
 0x873   :  { %14011 = vmatprep.subr.bf16.mxu1 %v19076_v27  ;;  %v19143_v56 = vld [vmem:[#allocation13 + $0x3e0] ss:$116 sps:$4 sm:$0xff]  }
 0x874   :  { %v19151_v26 = vld [vmem:[#allocation13 + $0x4cc] ss:$116 sps:$4 sm:$0xff]   ;;  %v19154_v27 = vld [vmem:[#allocation13 + $0x4d4] ss:$116 sps:$4 sm:$0xff]  }
 0x875   :  { %13930 = vmatpush1.bf16.msra.mxu0 %v19071_v19  ;;  %v19149_v19 = vld [vmem:[#allocation13 + $0x4c8] ss:$116 sps:$4 sm:$0xff]  }
 0x876   :  { %14012 = vmatpush1.bf16.msra.mxu1 %v19074_v55  ;;  %13931 = vmatprep.subr.bf16.mxu0 %v19079_v29  ;;  %v19152_v55 = vld [vmem:[#allocation13 + $0x4d0] ss:$116 sps:$4 sm:$0xff]   ;;  %v19157_v29 = vld [vmem:[#allocation13 + $0x5b4] ss:$116 sps:$4 sm:$0xff]  }
 0x877   :  { %14013 = vmatprep.subr.bf16.mxu1 %v19082_v30  ;;  %v19160_v30 = vld [vmem:[#allocation13 + $0x5bc] ss:$116 sps:$4 sm:$0xff]  }
 0x879   :  { %13932 = vmatpush1.bf16.msra.mxu0 %v19077_v22  ;;  %v19155_v22 = vld [vmem:[#allocation13 + $0x5b0] ss:$116 sps:$4 sm:$0xff]  }
 0x87a   :  { %14014 = vmatpush1.bf16.msra.mxu1 %v19080_v32  ;;  %13933 = vmatprep.subr.bf16.mxu0 %v19085_v33  ;;  %v19158_v32 = vld [vmem:[#allocation13 + $0x5b8] ss:$116 sps:$4 sm:$0xff]   ;;  %v19163_v33 = vld [vmem:[#allocation13 + $0x69c] ss:$116 sps:$4 sm:$0xff]  }
 0x87b   :  { %14015 = vmatprep.subr.bf16.mxu1 %v19088_v25  ;;  %v19166_v25 = vld [vmem:[#allocation13 + $0x6a4] ss:$116 sps:$4 sm:$0xff]  }
 0x87d   :  { %13934 = vmatpush1.bf16.msra.mxu0 %v19083_v35  ;;  %v19161_v35 = vld [vmem:[#allocation13 + $0x698] ss:$116 sps:$4 sm:$0xff]  }
 0x87e   :  { %14016 = vmatpush1.bf16.msra.mxu1 %v19086_v36  ;;  %13935 = vmatprep.subr.bf16.mxu0 %v19091_v28  ;;  %v19164_v36 = vld [vmem:[#allocation13 + $0x6a0] ss:$116 sps:$4 sm:$0xff]   ;;  %v19169_v28 = vld [vmem:[#allocation13 + $0x784] ss:$116 sps:$4 sm:$0xff]  }
 0x87f   :  { %14017 = vmatprep.subr.bf16.mxu1 %v19094_v38  ;;  %v19172_v38 = vld [vmem:[#allocation13 + $0x78c] ss:$116 sps:$4 sm:$0xff]  }
 0x881   :  { %13936 = vmatpush1.bf16.msra.mxu0 %v19089_v39  ;;  %v19167_v39 = vld [vmem:[#allocation13 + $0x780] ss:$116 sps:$4 sm:$0xff]  }
 0x882   :  { %14018 = vmatpush1.bf16.msra.mxu1 %v19092_v31  ;;  %13937 = vmatprep.subr.bf16.mxu0 %v19097_v41  ;;  %v19170_v31 = vld [vmem:[#allocation13 + $0x788] ss:$116 sps:$4 sm:$0xff]   ;;  %v19175_v41 = vld [vmem:[#allocation13 + $0x86c] ss:$116 sps:$4 sm:$0xff]  }
 0x883   :  { %14019 = vmatprep.subr.bf16.mxu1 %v19100_v42  ;;  %v19178_v42 = vld [vmem:[#allocation13 + $0x874] ss:$116 sps:$4 sm:$0xff]  }
 0x885   :  { %13938 = vmatpush1.bf16.msra.mxu0 %v19095_v34  ;;  %v19173_v34 = vld [vmem:[#allocation13 + $0x868] ss:$116 sps:$4 sm:$0xff]  }
 0x886   :  { %14020 = vmatpush1.bf16.msra.mxu1 %v19098_v44  ;;  %13939 = vmatprep.subr.bf16.mxu0 %v19103_v45  ;;  %v19176_v44 = vld [vmem:[#allocation13 + $0x870] ss:$116 sps:$4 sm:$0xff]   ;;  %v19181_v45 = vld [vmem:[#allocation13 + $0x954] ss:$116 sps:$4 sm:$0xff]  }
 0x887   :  { %14021 = vmatprep.subr.bf16.mxu1 %v19106_v46  ;;  %v19184_v46 = vld [vmem:[#allocation13 + $0x95c] ss:$116 sps:$4 sm:$0xff]  }
 0x889   :  { %13940 = vmatpush1.bf16.msra.mxu0 %v19101_v52  ;;  %v19179_v52 = vld [vmem:[#allocation13 + $0x950] ss:$116 sps:$4 sm:$0xff]  }
 0x88a   :  { %14022 = vmatpush1.bf16.msra.mxu1 %v19104_v43  ;;  %13941 = vmatprep.subr.bf16.mxu0 %v19109_v58  ;;  %v19182_v43 = vld [vmem:[#allocation13 + $0x958] ss:$116 sps:$4 sm:$0xff]   ;;  %v19187_v58 = vld [vmem:[#allocation13 + $0xa3c] ss:$116 sps:$4 sm:$0xff]  }
 0x88b   :  { %14023 = vmatprep.subr.bf16.mxu1 %v19112_v59  ;;  %v19190_v59 = vld [vmem:[#allocation13 + $0xa44] ss:$116 sps:$4 sm:$0xff]  }
 0x88d   :  { %13942 = vmatpush1.bf16.msra.mxu0 %v19107_v60  ;;  %v19185_v60 = vld [vmem:[#allocation13 + $0xa38] ss:$116 sps:$4 sm:$0xff]  }
 0x88e   :  { %14024 = vmatpush1.bf16.msra.mxu1 %v19110_v61  ;;  %13943 = vmatprep.subr.bf16.mxu0 %v19115_v62  ;;  %v19188_v61 = vld [vmem:[#allocation13 + $0xa40] ss:$116 sps:$4 sm:$0xff]   ;;  %v19193_v62 = vld [vmem:[#allocation13 + $0xb24] ss:$116 sps:$4 sm:$0xff]  }
 0x88f   :  { %14025 = vmatprep.subr.bf16.mxu1 %v19118_v63  ;;  %v19196_v63 = vld [vmem:[#allocation13 + $0xb2c] ss:$116 sps:$4 sm:$0xff]  }
 0x891   :  { %13944 = vmatpush1.bf16.msra.mxu0 %v19113_v0  ;;  %v19191_v0 = vld [vmem:[#allocation13 + $0xb20] ss:$116 sps:$4 sm:$0xff]  }
 0x892   :  { %14026 = vmatpush1.bf16.msra.mxu1 %v19116_v47  ;;  %14036 = vmatprep.subr.bf16.mxu0 %v19121_v1  ;;  %v19194_v47 = vld [vmem:[#allocation13 + $0xb28] ss:$116 sps:$4 sm:$0xff]   ;;  %v19199_v1 = vld [vmem:[#allocation13 + $0xc0c] ss:$116 sps:$4 sm:$0xff]  }
 0x893   :  { %14118 = vmatprep.subr.bf16.mxu1 %v19124_v2  ;;  %v19202_v2 = vld [vmem:[#allocation13 + $0xc14] ss:$116 sps:$4 sm:$0xff]  }
 0x894   :  { %13946 = vmatmul.mubr.bf16.vlgmr.msra.gmra.mrb[24].mxu0 %v20326_v24 }
 0x895   :  { %14028 = vmatmul.mubr.bf16.vlgmr.msra.gmra.mrb[24].mxu1 %v20326_v24  ;;  %14037 = vmatpush1.bf16.msra.mxu0 %v19119_v3  ;;  %v19197_v3 = vld [vmem:[#allocation13 + $0xc08] ss:$116 sps:$4 sm:$0xff]  }
 0x896   :  { %14068 = vmatprep.mubr.bf16.mxu0 %v20311_v5  ;;  %14119 = vmatpush1.bf16.msra.mxu1 %v19122_v4  ;;  %v19200_v4 = vld [vmem:[#allocation13 + $0xc10] ss:$116 sps:$4 sm:$0xff]  }
 0x897   :  { %14150 = vmatprep.mubr.bf16.mxu1 %v20311_v5  ;;  %14038 = vmatprep.subr.bf16.mxu0 %v19127_v6  ;;  %v19205_v6 = vld [vmem:[#allocation13 + $0xcf4] ss:$116 sps:$4 sm:$0xff]  }
 0x898   :  { %14120 = vmatprep.subr.bf16.mxu1 %v19130_v7  ;;  %v19208_v7 = vld [vmem:[#allocation13 + $0xcfc] ss:$116 sps:$4 sm:$0xff]  }
 0x899   :  { %14039 = vmatpush1.bf16.msra.mxu0 %v19125_v10  ;;  %v19203_v10 = vld [vmem:[#allocation13 + $0xcf0] ss:$116 sps:$4 sm:$0xff]  }
 0x89a   :  { %14121 = vmatpush1.bf16.msra.mxu1 %v19128_v13  ;;  %14040 = vmatprep.subr.bf16.mxu0 %v19133_v15  ;;  %v19206_v13 = vld [vmem:[#allocation13 + $0xcf8] ss:$116 sps:$4 sm:$0xff]   ;;  %v19211_v15 = vld [vmem:[#allocation13 + $0xddc] ss:$116 sps:$4 sm:$0xff]  }
 0x89b   :  { %14122 = vmatprep.subr.bf16.mxu1 %v19136_v16  ;;  %v19214_v16 = vld [vmem:[#allocation13 + $0xde4] ss:$116 sps:$4 sm:$0xff]  }
 0x89d   :  { %14041 = vmatpush1.bf16.msra.mxu0 %v19131_v18  ;;  %v19209_v18 = vld [vmem:[#allocation13 + $0xdd8] ss:$116 sps:$4 sm:$0xff]  }
 0x89e   :  { %14123 = vmatpush1.bf16.msra.mxu1 %v19134_v20  ;;  %14042 = vmatprep.subr.bf16.mxu0 %v19139_v11  ;;  %v19212_v20 = vld [vmem:[#allocation13 + $0xde0] ss:$116 sps:$4 sm:$0xff]   ;;  %v19217_v11 = vld [vmem:[#allocation13 + $0xec4] ss:$116 sps:$4 sm:$0xff]  }
 0x89f   :  { %14124 = vmatprep.subr.bf16.mxu1 %v19142_v9  ;;  %v19220_v9 = vld [vmem:[#allocation13 + $0xecc] ss:$116 sps:$4 sm:$0xff]  }
 0x8a1   :  { %14043 = vmatpush1.bf16.msra.mxu0 %v19137_v21  ;;  %v19215_v21 = vld [vmem:[#allocation13 + $0xec0] ss:$116 sps:$4 sm:$0xff]  }
 0x8a2   :  { %14125 = vmatpush1.bf16.msra.mxu1 %v19140_v50  ;;  %14044 = vmatprep.subr.bf16.mxu0 %v19145_v14  ;;  %v19218_v50 = vld [vmem:[#allocation13 + $0xec8] ss:$116 sps:$4 sm:$0xff]   ;;  %v19223_v14 = vld [vmem:[#allocation13 + $0xfac] ss:$116 sps:$4 sm:$0xff]  }
 0x8a3   :  { %14126 = vmatprep.subr.bf16.mxu1 %v19148_v23  ;;  %v19226_v23 = vld [vmem:[#allocation13 + $0xfb4] ss:$116 sps:$4 sm:$0xff]  }
 0x8a5   :  { %14045 = vmatpush1.bf16.msra.mxu0 %v19143_v56  ;;  %v19221_v56 = vld [vmem:[#allocation13 + $0xfa8] ss:$116 sps:$4 sm:$0xff]  }
 0x8a6   :  { %14127 = vmatpush1.bf16.msra.mxu1 %v19146_v17  ;;  %14046 = vmatprep.subr.bf16.mxu0 %v19151_v26  ;;  %v19224_v17 = vld [vmem:[#allocation13 + $0xfb0] ss:$116 sps:$4 sm:$0xff]   ;;  %v19229_v26 = vld [vmem:[#allocation13 + $0x1094] ss:$116 sps:$4 sm:$0xff]  }
 0x8a7   :  { %14128 = vmatprep.subr.bf16.mxu1 %v19154_v27  ;;  %v19232_v27 = vld [vmem:[#allocation13 + $0x109c] ss:$116 sps:$4 sm:$0xff]  }
 0x8a9   :  { %14047 = vmatpush1.bf16.msra.mxu0 %v19149_v19  ;;  %v19227_v19 = vld [vmem:[#allocation13 + $0x1090] ss:$116 sps:$4 sm:$0xff]  }
 0x8aa   :  { %14129 = vmatpush1.bf16.msra.mxu1 %v19152_v55  ;;  %14048 = vmatprep.subr.bf16.mxu0 %v19157_v29  ;;  %v19230_v55 = vld [vmem:[#allocation13 + $0x1098] ss:$116 sps:$4 sm:$0xff]   ;;  %v19235_v29 = vld [vmem:[#allocation13 + $0x117c] ss:$116 sps:$4 sm:$0xff]  }
 0x8ab   :  { %14130 = vmatprep.subr.bf16.mxu1 %v19160_v30  ;;  %v19238_v30 = vld [vmem:[#allocation13 + $0x1184] ss:$116 sps:$4 sm:$0xff]  }
 0x8ad   :  { %14049 = vmatpush1.bf16.msra.mxu0 %v19155_v22  ;;  %v19233_v22 = vld [vmem:[#allocation13 + $0x1178] ss:$116 sps:$4 sm:$0xff]  }
 0x8ae   :  { %14131 = vmatpush1.bf16.msra.mxu1 %v19158_v32  ;;  %14050 = vmatprep.subr.bf16.mxu0 %v19163_v33  ;;  %v19236_v32 = vld [vmem:[#allocation13 + $0x1180] ss:$116 sps:$4 sm:$0xff]   ;;  %v19241_v33 = vld [vmem:[#allocation13 + $0x1264] ss:$116 sps:$4 sm:$0xff]  }
 0x8af   :  { %14132 = vmatprep.subr.bf16.mxu1 %v19166_v25  ;;  %v19244_v25 = vld [vmem:[#allocation13 + $0x126c] ss:$116 sps:$4 sm:$0xff]  }
 0x8b1   :  { %14051 = vmatpush1.bf16.msra.mxu0 %v19161_v35  ;;  %v19239_v35 = vld [vmem:[#allocation13 + $0x1260] ss:$116 sps:$4 sm:$0xff]  }
 0x8b2   :  { %14133 = vmatpush1.bf16.msra.mxu1 %v19164_v36  ;;  %14052 = vmatprep.subr.bf16.mxu0 %v19169_v28  ;;  %v20390_v36 = vld [vmem:[#allocation14 + $0x8] sm:$0xff] }
 0x8b3   :  { %14134 = vmatprep.subr.bf16.mxu1 %v19172_v38  ;;  %v19242_v28 = vld [vmem:[#allocation13 + $0x1268] ss:$116 sps:$4 sm:$0xff]   ;;  %v19247_v38 = vld [vmem:[#allocation13 + $0x134c] ss:$116 sps:$4 sm:$0xff]  }
 0x8b5   :  { %14053 = vmatpush1.bf16.msra.mxu0 %v19167_v39  ;;  %v19250_v39 = vld [vmem:[#allocation13 + $0x1354] ss:$116 sps:$4 sm:$0xff]  }
 0x8b6   :  { %14135 = vmatpush1.bf16.msra.mxu1 %v19170_v31  ;;  %14054 = vmatprep.subr.bf16.mxu0 %v19175_v41  ;;  %v8598_v31 = vrot.slane %v20390_v36, %v20284_v48  ;;  %v8606_v41 = vrot.slane %v20390_v36, %v20287_v49 }
 0x8b7   :  { %14136 = vmatprep.subr.bf16.mxu1 %v19178_v42  ;;  %v8602_v42 = vrot.slane %v20390_v36, %v20290_v51 }
 0x8b9   :  { %14055 = vmatpush1.bf16.msra.mxu0 %v19173_v34  ;;  %v19245_v34 = vld [vmem:[#allocation13 + $0x1348] ss:$116 sps:$4 sm:$0xff]  }
 0x8ba   :  { %14137 = vmatpush1.bf16.msra.mxu1 %v19176_v44  ;;  %14056 = vmatprep.subr.bf16.mxu0 %v19181_v45  ;;  %v8610_v44 = vrot.slane %v20390_v36, %v20293_v40  ;;  %v19248_v45 = vld [vmem:[#allocation13 + $0x1350] ss:$116 sps:$4 sm:$0xff]  }
 0x8bb   :  { %14138 = vmatprep.subr.bf16.mxu1 %v19184_v46  ;;  %v19253_v46 = vld [vmem:[#allocation13 + $0x1434] ss:$116 sps:$4 sm:$0xff]  }
 0x8bd   :  { %14057 = vmatpush1.bf16.msra.mxu0 %v19179_v52 }
 0x8be   :  { %14139 = vmatpush1.bf16.msra.mxu1 %v19182_v43  ;;  %14058 = vmatprep.subr.bf16.mxu0 %v19187_v58  ;;  %v19256_v43 = vld [vmem:[#allocation13 + $0x143c] ss:$116 sps:$4 sm:$0xff]  }
 0x8bf   :  { %14140 = vmatprep.subr.bf16.mxu1 %v19190_v59 }
 0x8c1   :  { %14059 = vmatpush1.bf16.msra.mxu0 %v19185_v60 }
 0x8c2   :  { %14141 = vmatpush1.bf16.msra.mxu1 %v19188_v61  ;;  %14060 = vmatprep.subr.bf16.mxu0 %v19193_v62 }
 0x8c3   :  { %14142 = vmatprep.subr.bf16.mxu1 %v19196_v63 }
 0x8c5   :  { %14061 = vmatpush1.bf16.msra.mxu0 %v19191_v0 }
 0x8c6   :  { %14143 = vmatpush1.bf16.msra.mxu1 %v19194_v47  ;;  %14062 = vmatprep.subr.bf16.mxu0 %v19199_v1  ;;  %v19251_v47 = vld [vmem:[#allocation13 + $0x1430] ss:$116 sps:$4 sm:$0xff]  }
 0x8c7   :  { %14144 = vmatprep.subr.bf16.mxu1 %v19202_v2 }
 0x8c9   :  { %14063 = vmatpush1.bf16.msra.mxu0 %v19197_v3 }
 0x8ca   :  { %14145 = vmatpush1.bf16.msra.mxu1 %v19200_v4  ;;  %14064 = vmatprep.subr.bf16.mxu0 %v19205_v6  ;;  %v19254_v4 = vld [vmem:[#allocation13 + $0x1438] ss:$116 sps:$4 sm:$0xff]   ;;  %v19259_v6 = vld [vmem:[#allocation13 + $0x151c] ss:$116 sps:$4 sm:$0xff]  }
 0x8cb   :  { %14146 = vmatprep.subr.bf16.mxu1 %v19208_v7 }
 0x8cd   :  { %14065 = vmatpush1.bf16.msra.mxu0 %v19203_v10  ;;  %v19262_v10 = vld [vmem:[#allocation13 + $0x1524] ss:$116 sps:$4 sm:$0xff]  }
 0x8ce   :  { %14147 = vmatpush1.bf16.msra.mxu1 %v19206_v13  ;;  %14066 = vmatprep.subr.bf16.mxu0 %v19211_v15  ;;  %v19257_v13 = vld [vmem:[#allocation13 + $0x1518] ss:$116 sps:$4 sm:$0xff]   ;;  %v19260_v15 = vld [vmem:[#allocation13 + $0x1520] ss:$116 sps:$4 sm:$0xff]  }
 0x8cf   :  { %14148 = vmatprep.subr.bf16.mxu1 %v19214_v16  ;;  %v19265_v16 = vld [vmem:[#allocation13 + $0x1604] ss:$116 sps:$4 sm:$0xff]  }
 0x8d1   :  { %14067 = vmatpush1.bf16.msra.mxu0 %v19209_v18  ;;  %v19268_v18 = vld [vmem:[#allocation13 + $0x160c] ss:$116 sps:$4 sm:$0xff]  }
 0x8d2   :  { %14149 = vmatpush1.bf16.msra.mxu1 %v19212_v20  ;;  %14077 = vmatprep.subr.bf16.mxu0 %v19217_v11  ;;  %v19263_v20 = vld [vmem:[#allocation13 + $0x1600] ss:$116 sps:$4 sm:$0xff]   ;;  %v19266_v11 = vld [vmem:[#allocation13 + $0x1608] ss:$116 sps:$4 sm:$0xff]  }
 0x8d3   :  { %14159 = vmatprep.subr.bf16.mxu1 %v19220_v9  ;;  %v19271_v9 = vld [vmem:[#allocation13 + $0x16ec] ss:$116 sps:$4 sm:$0xff]  }
 0x8d4   :  { %14069 = vmatmul.mubr.bf16.vlgmr.msra.gmra.mrb[28].mxu0 %v20313_v8 }
 0x8d5   :  { %14151 = vmatmul.mubr.bf16.vlgmr.msra.gmra.mrb[28].mxu1 %v20313_v8  ;;  %14078 = vmatpush1.bf16.msra.mxu0 %v19215_v21  ;;  %v19274_v21 = vld [vmem:[#allocation13 + $0x16f4] ss:$116 sps:$4 sm:$0xff]  }
 0x8d6   :  { %14109 = vmatprep.mubr.bf16.mxu0 %v20317_v12  ;;  %14160 = vmatpush1.bf16.msra.mxu1 %v19218_v50  ;;  %v19269_v50 = vld [vmem:[#allocation13 + $0x16e8] ss:$116 sps:$4 sm:$0xff]  }
 0x8d7   :  { %14191 = vmatprep.mubr.bf16.mxu1 %v20317_v12  ;;  %14079 = vmatprep.subr.bf16.mxu0 %v19223_v14  ;;  %v19272_v14 = vld [vmem:[#allocation13 + $0x16f0] ss:$116 sps:$4 sm:$0xff]  }
 0x8d8   :  { %14161 = vmatprep.subr.bf16.mxu1 %v19226_v23  ;;  %v19277_v23 = vld [vmem:[#allocation13 + $0x17d4] ss:$116 sps:$4 sm:$0xff]  }
 0x8d9   :  { %14080 = vmatpush1.bf16.msra.mxu0 %v19221_v56  ;;  %v19280_v56 = vld [vmem:[#allocation13 + $0x17dc] ss:$116 sps:$4 sm:$0xff]  }
 0x8da   :  { %14162 = vmatpush1.bf16.msra.mxu1 %v19224_v17  ;;  %14081 = vmatprep.subr.bf16.mxu0 %v19229_v26  ;;  %v19275_v17 = vld [vmem:[#allocation13 + $0x17d0] ss:$116 sps:$4 sm:$0xff]   ;;  %v19278_v26 = vld [vmem:[#allocation13 + $0x17d8] ss:$116 sps:$4 sm:$0xff]  }
 0x8db   :  { %14163 = vmatprep.subr.bf16.mxu1 %v19232_v27  ;;  %v19283_v27 = vld [vmem:[#allocation13 + $0x18bc] ss:$116 sps:$4 sm:$0xff]  }
 0x8dd   :  { %14082 = vmatpush1.bf16.msra.mxu0 %v19227_v19  ;;  %v19286_v19 = vld [vmem:[#allocation13 + $0x18c4] ss:$116 sps:$4 sm:$0xff]  }
 0x8de   :  { %14164 = vmatpush1.bf16.msra.mxu1 %v19230_v55  ;;  %14083 = vmatprep.subr.bf16.mxu0 %v19235_v29  ;;  %v19281_v55 = vld [vmem:[#allocation13 + $0x18b8] ss:$116 sps:$4 sm:$0xff]   ;;  %v19284_v29 = vld [vmem:[#allocation13 + $0x18c0] ss:$116 sps:$4 sm:$0xff]  }
 0x8df   :  { %14165 = vmatprep.subr.bf16.mxu1 %v19238_v30  ;;  %v19289_v30 = vld [vmem:[#allocation13 + $0x19a4] ss:$116 sps:$4 sm:$0xff]  }
 0x8e1   :  { %14084 = vmatpush1.bf16.msra.mxu0 %v19233_v22  ;;  %v19292_v22 = vld [vmem:[#allocation13 + $0x19ac] ss:$116 sps:$4 sm:$0xff]  }
 0x8e2   :  { %14166 = vmatpush1.bf16.msra.mxu1 %v19236_v32  ;;  %14085 = vmatprep.subr.bf16.mxu0 %v19241_v33  ;;  %v19287_v32 = vld [vmem:[#allocation13 + $0x19a0] ss:$116 sps:$4 sm:$0xff]   ;;  %v19290_v33 = vld [vmem:[#allocation13 + $0x19a8] ss:$116 sps:$4 sm:$0xff]  }
 0x8e3   :  { %14167 = vmatprep.subr.bf16.mxu1 %v19244_v25  ;;  %v19295_v25 = vld [vmem:[#allocation13 + $0x1a8c] ss:$116 sps:$4 sm:$0xff]  }
 0x8e5   :  { %14086 = vmatpush1.bf16.msra.mxu0 %v19239_v35  ;;  %v19298_v35 = vld [vmem:[#allocation13 + $0x1a94] ss:$116 sps:$4 sm:$0xff]  }
 0x8e6   :  { %14168 = vmatpush1.bf16.msra.mxu1 %v19242_v28  ;;  %14087 = vmatprep.subr.bf16.mxu0 %v19247_v38  ;;  %v19293_v28 = vld [vmem:[#allocation13 + $0x1a88] ss:$116 sps:$4 sm:$0xff]   ;;  %v19296_v38 = vld [vmem:[#allocation13 + $0x1a90] ss:$116 sps:$4 sm:$0xff]  }
 0x8e7   :  { %v13783_v52 = vpop.f32.mrb[20].mxu0  ;;  %14169 = vmatprep.subr.bf16.mxu1 %v19250_v39  ;;  %v19301_v39 = vld [vmem:[#allocation13 + $0x1b74] ss:$116 sps:$4 sm:$0xff]  }
 0x8e8   :  { %v16684_v58 = vadd.f32 %v13783_v52, %v8598_v31  ;;  %v13865_v59 = vpop.f32.mrb[20].mxu1  ;;  %v13785_v60 = vpop.f32.mrb[21].mxu0  ;;  %v19304_v31 = vld [vmem:[#allocation13 + $0x1b7c] ss:$116 sps:$4 sm:$0xff]   ;;  %v19313_v52 = vld [vmem:[#allocation13 + $0x54] ss:$116 sps:$4 sm:$0xff]  }
 0x8e9   :  { %v16686_v61 = vadd.f32 %v13865_v59, %v8606_v41  ;;  %v16685_v62 = vadd.f32 %v13785_v60, %v8602_v42  ;;  %v13867_v63 = vpop.f32.mrb[21].mxu1  ;;  %v13787_v0 = vpop.f32.mrb[22].mxu0  ;;  %14088 = vmatpush1.bf16.msra.mxu0 %v19245_v34  ;;  %v19299_v41 = vld [vmem:[#allocation13 + $0x1b70] ss:$116 sps:$4 sm:$0xff]   ;;  %v19302_v42 = vld [vmem:[#allocation13 + $0x1b78] ss:$116 sps:$4 sm:$0xff]  }
 0x8ea   :  { %14616 = vst [vmem:[#allocation16 + $0x40] sm:$0xff] %v16684_v58  ;;  %v16687_v1 = vadd.f32 %v13867_v63, %v8610_v44  ;;  %v13869_v2 = vpop.f32.mrb[22].mxu1  ;;  %14170 = vmatpush1.bf16.msra.mxu1 %v19248_v45  ;;  %v13788_v3 = vpop.f32.mrb[23].mxu0  ;;  %14089 = vmatprep.subr.bf16.mxu0 %v19253_v46  ;;  %v19307_v34 = vld [vmem:[#allocation13 + $0x1c5c] ss:$116 sps:$4 sm:$0xff]  }
 0x8eb   :  { %14618 = vst [vmem:[#allocation16 + $0x50] sm:$0xff] %v16686_v61  ;;  %14617 = vst [vmem:[#allocation16 + $0x48] sm:$0xff] %v16685_v62  ;;  %v13870_v7 = vpop.f32.mrb[23].mxu1  ;;  %14171 = vmatprep.subr.bf16.mxu1 %v19256_v43  ;;  %v19310_v44 = vld [vmem:[#allocation13 + $0x1c64] ss:$116 sps:$4 sm:$0xff]  }
 0x8ec   :  { %14619 = vst [vmem:[#allocation16 + $0x58] sm:$0xff] %v16687_v1  ;;  %v19305_v45 = vld [vmem:[#allocation13 + $0x1c58] ss:$116 sps:$4 sm:$0xff]   ;;  %v19308_v46 = vld [vmem:[#allocation13 + $0x1c60] ss:$116 sps:$4 sm:$0xff]  }
 0x8ed   :  { %14090 = vmatpush1.bf16.msra.mxu0 %v19251_v47  ;;  %v19316_v43 = vld [vmem:[#allocation13 + $0x5c] ss:$116 sps:$4 sm:$0xff]   ;;  %v19314_v59 = vld [vmem:[#allocation13 + $0x58] ss:$116 sps:$4 sm:$0xff]   ;;  %v19320_v63 = vld [vmem:[#allocation13 + $0x140] ss:$116 sps:$4 sm:$0xff]  }
 0x8ee   :  { %14172 = vmatpush1.bf16.msra.mxu1 %v19254_v4  ;;  %14091 = vmatprep.subr.bf16.mxu0 %v19259_v6  ;;  %v19311_v58 = vld [vmem:[#allocation13 + $0x50] ss:$116 sps:$4 sm:$0xff]   ;;  %v19317_v62 = vld [vmem:[#allocation13 + $0x138] ss:$116 sps:$4 sm:$0xff]   ;;  %v19323_v1 = vld [vmem:[#allocation13 + $0x220] ss:$116 sps:$4 sm:$0xff]  }
 0x8ef   :  { %14173 = vmatprep.subr.bf16.mxu1 %v19262_v10  ;;  %v19319_v60 = vld [vmem:[#allocation13 + $0x13c] ss:$116 sps:$4 sm:$0xff]   ;;  %v19322_v61 = vld [vmem:[#allocation13 + $0x144] ss:$116 sps:$4 sm:$0xff]   ;;  %v19328_v47 = vld [vmem:[#allocation13 + $0x22c] ss:$116 sps:$4 sm:$0xff]  }
 0x8f0   :  { %v19325_v0 = vld [vmem:[#allocation13 + $0x224] ss:$116 sps:$4 sm:$0xff]   ;;  %v19326_v2 = vld [vmem:[#allocation13 + $0x228] ss:$116 sps:$4 sm:$0xff]   ;;  %v19331_v3 = vld [vmem:[#allocation13 + $0x30c] ss:$116 sps:$4 sm:$0xff]  }
 0x8f1   :  { %14092 = vmatpush1.bf16.msra.mxu0 %v19257_v13  ;;  %v19334_v4 = vld [vmem:[#allocation13 + $0x314] ss:$116 sps:$4 sm:$0xff]   ;;  %v19332_v7 = vld [vmem:[#allocation13 + $0x310] ss:$116 sps:$4 sm:$0xff]  }
 0x8f2   :  { %14174 = vmatpush1.bf16.msra.mxu1 %v19260_v15  ;;  %14093 = vmatprep.subr.bf16.mxu0 %v19265_v16  ;;  %v19329_v6 = vld [vmem:[#allocation13 + $0x308] ss:$116 sps:$4 sm:$0xff]   ;;  %v19335_v15 = vld [vmem:[#allocation13 + $0x3f0] ss:$116 sps:$4 sm:$0xff]   ;;  %v19338_v16 = vld [vmem:[#allocation13 + $0x3f8] ss:$116 sps:$4 sm:$0xff]  }
 0x8f3   :  { %14175 = vmatprep.subr.bf16.mxu1 %v19268_v18  ;;  %v19337_v10 = vld [vmem:[#allocation13 + $0x3f4] ss:$116 sps:$4 sm:$0xff]   ;;  %v19340_v13 = vld [vmem:[#allocation13 + $0x3fc] ss:$116 sps:$4 sm:$0xff]  }
 0x8f4   :  { %v19343_v18 = vld [vmem:[#allocation13 + $0x4dc] ss:$116 sps:$4 sm:$0xff]  }
 0x8f5   :  { %14094 = vmatpush1.bf16.msra.mxu0 %v19263_v20  ;;  %v19346_v20 = vld [vmem:[#allocation13 + $0x4e4] ss:$116 sps:$4 sm:$0xff]  }
 0x8f6   :  { %14176 = vmatpush1.bf16.msra.mxu1 %v19266_v11  ;;  %14095 = vmatprep.subr.bf16.mxu0 %v19271_v9  ;;  %v19341_v11 = vld [vmem:[#allocation13 + $0x4d8] ss:$116 sps:$4 sm:$0xff]   ;;  %v19344_v9 = vld [vmem:[#allocation13 + $0x4e0] ss:$116 sps:$4 sm:$0xff]  }
 0x8f7   :  { %14177 = vmatprep.subr.bf16.mxu1 %v19274_v21  ;;  %v19349_v21 = vld [vmem:[#allocation13 + $0x5c4] ss:$116 sps:$4 sm:$0xff]  }
 0x8f9   :  { %14096 = vmatpush1.bf16.msra.mxu0 %v19269_v50  ;;  %v19352_v50 = vld [vmem:[#allocation13 + $0x5cc] ss:$116 sps:$4 sm:$0xff]  }
 0x8fa   :  { %14178 = vmatpush1.bf16.msra.mxu1 %v19272_v14  ;;  %14097 = vmatprep.subr.bf16.mxu0 %v19277_v23  ;;  %v19347_v14 = vld [vmem:[#allocation13 + $0x5c0] ss:$116 sps:$4 sm:$0xff]   ;;  %v19350_v23 = vld [vmem:[#allocation13 + $0x5c8] ss:$116 sps:$4 sm:$0xff]  }
 0x8fb   :  { %14179 = vmatprep.subr.bf16.mxu1 %v19280_v56  ;;  %v19355_v56 = vld [vmem:[#allocation13 + $0x6ac] ss:$116 sps:$4 sm:$0xff]  }
 0x8fd   :  { %14098 = vmatpush1.bf16.msra.mxu0 %v19275_v17  ;;  %v19358_v17 = vld [vmem:[#allocation13 + $0x6b4] ss:$116 sps:$4 sm:$0xff]  }
 0x8fe   :  { %14180 = vmatpush1.bf16.msra.mxu1 %v19278_v26  ;;  %14099 = vmatprep.subr.bf16.mxu0 %v19283_v27  ;;  %v19353_v26 = vld [vmem:[#allocation13 + $0x6a8] ss:$116 sps:$4 sm:$0xff]   ;;  %v19356_v27 = vld [vmem:[#allocation13 + $0x6b0] ss:$116 sps:$4 sm:$0xff]  }
 0x8ff   :  { %14181 = vmatprep.subr.bf16.mxu1 %v19286_v19  ;;  %v19361_v19 = vld [vmem:[#allocation13 + $0x794] ss:$116 sps:$4 sm:$0xff]  }
 0x901   :  { %14100 = vmatpush1.bf16.msra.mxu0 %v19281_v55  ;;  %v19364_v55 = vld [vmem:[#allocation13 + $0x79c] ss:$116 sps:$4 sm:$0xff]  }
 0x902   :  { %14182 = vmatpush1.bf16.msra.mxu1 %v19284_v29  ;;  %14101 = vmatprep.subr.bf16.mxu0 %v19289_v30  ;;  %v19359_v29 = vld [vmem:[#allocation13 + $0x790] ss:$116 sps:$4 sm:$0xff]   ;;  %v19362_v30 = vld [vmem:[#allocation13 + $0x798] ss:$116 sps:$4 sm:$0xff]  }
 0x903   :  { %14183 = vmatprep.subr.bf16.mxu1 %v19292_v22  ;;  %v19367_v22 = vld [vmem:[#allocation13 + $0x87c] ss:$116 sps:$4 sm:$0xff]  }
 0x905   :  { %14102 = vmatpush1.bf16.msra.mxu0 %v19287_v32  ;;  %v19370_v32 = vld [vmem:[#allocation13 + $0x884] ss:$116 sps:$4 sm:$0xff]  }
 0x906   :  { %14184 = vmatpush1.bf16.msra.mxu1 %v19290_v33  ;;  %14103 = vmatprep.subr.bf16.mxu0 %v19295_v25  ;;  %v19365_v33 = vld [vmem:[#allocation13 + $0x878] ss:$116 sps:$4 sm:$0xff]   ;;  %v19368_v25 = vld [vmem:[#allocation13 + $0x880] ss:$116 sps:$4 sm:$0xff]  }
 0x907   :  { %14185 = vmatprep.subr.bf16.mxu1 %v19298_v35  ;;  %v19373_v35 = vld [vmem:[#allocation13 + $0x964] ss:$116 sps:$4 sm:$0xff]  }
 0x909   :  { %14104 = vmatpush1.bf16.msra.mxu0 %v19293_v28  ;;  %v19376_v28 = vld [vmem:[#allocation13 + $0x96c] ss:$116 sps:$4 sm:$0xff]  }
 0x90a   :  { %14186 = vmatpush1.bf16.msra.mxu1 %v19296_v38  ;;  %14105 = vmatprep.subr.bf16.mxu0 %v19301_v39  ;;  %v19371_v38 = vld [vmem:[#allocation13 + $0x960] ss:$116 sps:$4 sm:$0xff]   ;;  %v19374_v39 = vld [vmem:[#allocation13 + $0x968] ss:$116 sps:$4 sm:$0xff]  }
 0x90b   :  { %14187 = vmatprep.subr.bf16.mxu1 %v19304_v31  ;;  %v19379_v31 = vld [vmem:[#allocation13 + $0xa4c] ss:$116 sps:$4 sm:$0xff]  }
 0x90d   :  { %14106 = vmatpush1.bf16.msra.mxu0 %v19299_v41  ;;  %v19382_v41 = vld [vmem:[#allocation13 + $0xa54] ss:$116 sps:$4 sm:$0xff]  }
 0x90e   :  { %14188 = vmatpush1.bf16.msra.mxu1 %v19302_v42  ;;  %14107 = vmatprep.subr.bf16.mxu0 %v19307_v34  ;;  %v19377_v42 = vld [vmem:[#allocation13 + $0xa48] ss:$116 sps:$4 sm:$0xff]   ;;  %v19380_v34 = vld [vmem:[#allocation13 + $0xa50] ss:$116 sps:$4 sm:$0xff]  }
 0x90f   :  { %14189 = vmatprep.subr.bf16.mxu1 %v19310_v44  ;;  %v19385_v44 = vld [vmem:[#allocation13 + $0xb34] ss:$116 sps:$4 sm:$0xff]  }
 0x911   :  { %14108 = vmatpush1.bf16.msra.mxu0 %v19305_v45  ;;  %v19388_v45 = vld [vmem:[#allocation13 + $0xb3c] ss:$116 sps:$4 sm:$0xff]  }
 0x912   :  { %14190 = vmatpush1.bf16.msra.mxu1 %v19308_v46  ;;  %14200 = vmatprep.subr.bf16.mxu0 %v19313_v52  ;;  %v19383_v46 = vld [vmem:[#allocation13 + $0xb30] ss:$116 sps:$4 sm:$0xff]   ;;  %v19386_v52 = vld [vmem:[#allocation13 + $0xb38] ss:$116 sps:$4 sm:$0xff]  }
 0x913   :  { %14282 = vmatprep.subr.bf16.mxu1 %v19316_v43  ;;  %v19391_v43 = vld [vmem:[#allocation13 + $0xc1c] ss:$116 sps:$4 sm:$0xff]  }
 0x914   :  { %14110 = vmatmul.mubr.bf16.vlgmr.msra.gmra.mrb[28].mxu0 %v20326_v24 }
 0x915   :  { %14192 = vmatmul.mubr.bf16.vlgmr.msra.gmra.mrb[28].mxu1 %v20326_v24  ;;  %14201 = vmatpush1.bf16.msra.mxu0 %v19311_v58  ;;  %v19394_v58 = vld [vmem:[#allocation13 + $0xc24] ss:$116 sps:$4 sm:$0xff]  }
 0x916   :  { %14232 = vmatprep.mubr.bf16.mxu0 %v20311_v5  ;;  %14283 = vmatpush1.bf16.msra.mxu1 %v19314_v59  ;;  %v19389_v59 = vld [vmem:[#allocation13 + $0xc18] ss:$116 sps:$4 sm:$0xff]  }
 0x917   :  { %14314 = vmatprep.mubr.bf16.mxu1 %v20311_v5  ;;  %14202 = vmatprep.subr.bf16.mxu0 %v19319_v60  ;;  %v19392_v60 = vld [vmem:[#allocation13 + $0xc20] ss:$116 sps:$4 sm:$0xff]  }
 0x918   :  { %14284 = vmatprep.subr.bf16.mxu1 %v19322_v61  ;;  %v19397_v61 = vld [vmem:[#allocation13 + $0xd04] ss:$116 sps:$4 sm:$0xff]  }
 0x919   :  { %14203 = vmatpush1.bf16.msra.mxu0 %v19317_v62  ;;  %v19400_v62 = vld [vmem:[#allocation13 + $0xd0c] ss:$116 sps:$4 sm:$0xff]  }
 0x91a   :  { %14285 = vmatpush1.bf16.msra.mxu1 %v19320_v63  ;;  %14204 = vmatprep.subr.bf16.mxu0 %v19325_v0  ;;  %v19395_v63 = vld [vmem:[#allocation13 + $0xd00] ss:$116 sps:$4 sm:$0xff]   ;;  %v19398_v0 = vld [vmem:[#allocation13 + $0xd08] ss:$116 sps:$4 sm:$0xff]  }
 0x91b   :  { %14286 = vmatprep.subr.bf16.mxu1 %v19328_v47  ;;  %v19403_v47 = vld [vmem:[#allocation13 + $0xdec] ss:$116 sps:$4 sm:$0xff]  }
 0x91d   :  { %14205 = vmatpush1.bf16.msra.mxu0 %v19323_v1  ;;  %v19406_v1 = vld [vmem:[#allocation13 + $0xdf4] ss:$116 sps:$4 sm:$0xff]  }
 0x91e   :  { %14287 = vmatpush1.bf16.msra.mxu1 %v19326_v2  ;;  %14206 = vmatprep.subr.bf16.mxu0 %v19331_v3  ;;  %v19401_v2 = vld [vmem:[#allocation13 + $0xde8] ss:$116 sps:$4 sm:$0xff]   ;;  %v19404_v3 = vld [vmem:[#allocation13 + $0xdf0] ss:$116 sps:$4 sm:$0xff]  }
 0x91f   :  { %14288 = vmatprep.subr.bf16.mxu1 %v19334_v4  ;;  %v19409_v4 = vld [vmem:[#allocation13 + $0xed4] ss:$116 sps:$4 sm:$0xff]  }
 0x921   :  { %14207 = vmatpush1.bf16.msra.mxu0 %v19329_v6  ;;  %v19412_v6 = vld [vmem:[#allocation13 + $0xedc] ss:$116 sps:$4 sm:$0xff]  }
 0x922   :  { %14289 = vmatpush1.bf16.msra.mxu1 %v19332_v7  ;;  %14208 = vmatprep.subr.bf16.mxu0 %v19337_v10  ;;  %v19407_v7 = vld [vmem:[#allocation13 + $0xed0] ss:$116 sps:$4 sm:$0xff]   ;;  %v19410_v10 = vld [vmem:[#allocation13 + $0xed8] ss:$116 sps:$4 sm:$0xff]  }
 0x923   :  { %14290 = vmatprep.subr.bf16.mxu1 %v19340_v13  ;;  %v19415_v13 = vld [vmem:[#allocation13 + $0xfbc] ss:$116 sps:$4 sm:$0xff]  }
 0x925   :  { %14209 = vmatpush1.bf16.msra.mxu0 %v19335_v15  ;;  %v19418_v15 = vld [vmem:[#allocation13 + $0xfc4] ss:$116 sps:$4 sm:$0xff]  }
 0x926   :  { %14291 = vmatpush1.bf16.msra.mxu1 %v19338_v16  ;;  %14210 = vmatprep.subr.bf16.mxu0 %v19343_v18  ;;  %v19413_v16 = vld [vmem:[#allocation13 + $0xfb8] ss:$116 sps:$4 sm:$0xff]   ;;  %v19416_v18 = vld [vmem:[#allocation13 + $0xfc0] ss:$116 sps:$4 sm:$0xff]  }
 0x927   :  { %14292 = vmatprep.subr.bf16.mxu1 %v19346_v20  ;;  %v19421_v20 = vld [vmem:[#allocation13 + $0x10a4] ss:$116 sps:$4 sm:$0xff]  }
 0x929   :  { %14211 = vmatpush1.bf16.msra.mxu0 %v19341_v11  ;;  %v19424_v11 = vld [vmem:[#allocation13 + $0x10ac] ss:$116 sps:$4 sm:$0xff]  }
 0x92a   :  { %14293 = vmatpush1.bf16.msra.mxu1 %v19344_v9  ;;  %14212 = vmatprep.subr.bf16.mxu0 %v19349_v21  ;;  %v19419_v9 = vld [vmem:[#allocation13 + $0x10a0] ss:$116 sps:$4 sm:$0xff]   ;;  %v19422_v21 = vld [vmem:[#allocation13 + $0x10a8] ss:$116 sps:$4 sm:$0xff]  }
 0x92b   :  { %14294 = vmatprep.subr.bf16.mxu1 %v19352_v50  ;;  %v19427_v50 = vld [vmem:[#allocation13 + $0x118c] ss:$116 sps:$4 sm:$0xff]  }
 0x92d   :  { %14213 = vmatpush1.bf16.msra.mxu0 %v19347_v14  ;;  %v19430_v14 = vld [vmem:[#allocation13 + $0x1194] ss:$116 sps:$4 sm:$0xff]  }
 0x92e   :  { %14295 = vmatpush1.bf16.msra.mxu1 %v19350_v23  ;;  %14214 = vmatprep.subr.bf16.mxu0 %v19355_v56  ;;  %v19425_v23 = vld [vmem:[#allocation13 + $0x1188] ss:$116 sps:$4 sm:$0xff]   ;;  %v19428_v56 = vld [vmem:[#allocation13 + $0x1190] ss:$116 sps:$4 sm:$0xff]  }
 0x92f   :  { %14296 = vmatprep.subr.bf16.mxu1 %v19358_v17  ;;  %v19433_v17 = vld [vmem:[#allocation13 + $0x1274] ss:$116 sps:$4 sm:$0xff]  }
 0x931   :  { %14215 = vmatpush1.bf16.msra.mxu0 %v19353_v26  ;;  %v19436_v26 = vld [vmem:[#allocation13 + $0x127c] ss:$116 sps:$4 sm:$0xff]  }
 0x932   :  { %14297 = vmatpush1.bf16.msra.mxu1 %v19356_v27  ;;  %14216 = vmatprep.subr.bf16.mxu0 %v19361_v19  ;;  %v19431_v27 = vld [vmem:[#allocation13 + $0x1270] ss:$116 sps:$4 sm:$0xff]   ;;  %v19434_v19 = vld [vmem:[#allocation13 + $0x1278] ss:$116 sps:$4 sm:$0xff]  }
 0x933   :  { %14298 = vmatprep.subr.bf16.mxu1 %v19364_v55  ;;  %v19439_v55 = vld [vmem:[#allocation13 + $0x135c] ss:$116 sps:$4 sm:$0xff]  }
 0x935   :  { %14217 = vmatpush1.bf16.msra.mxu0 %v19359_v29  ;;  %v19442_v29 = vld [vmem:[#allocation13 + $0x1364] ss:$116 sps:$4 sm:$0xff]  }
 0x936   :  { %14299 = vmatpush1.bf16.msra.mxu1 %v19362_v30  ;;  %14218 = vmatprep.subr.bf16.mxu0 %v19367_v22  ;;  %v8614_v30 = vrot.slane %v20390_v36, %v20363_v37  ;;  %v8622_v22 = vrot.slane %v20390_v36, %v20366_v53 }
 0x937   :  { %14300 = vmatprep.subr.bf16.mxu1 %v19370_v32  ;;  %v8618_v32 = vrot.slane %v20390_v36, %v20369_v54 }
 0x939   :  { %14219 = vmatpush1.bf16.msra.mxu0 %v19365_v33  ;;  %v19437_v33 = vld [vmem:[#allocation13 + $0x1358] ss:$116 sps:$4 sm:$0xff]  }
 0x93a   :  { %14301 = vmatpush1.bf16.msra.mxu1 %v19368_v25  ;;  %14220 = vmatprep.subr.bf16.mxu0 %v19373_v35  ;;  %v8626_v25 = vrot.slane %v20390_v36, %v20372_v57  ;;  %v19440_v35 = vld [vmem:[#allocation13 + $0x1360] ss:$116 sps:$4 sm:$0xff]  }
 0x93b   :  { %14302 = vmatprep.subr.bf16.mxu1 %v19376_v28  ;;  %v19445_v28 = vld [vmem:[#allocation13 + $0x1444] ss:$116 sps:$4 sm:$0xff]  }
 0x93d   :  { %14221 = vmatpush1.bf16.msra.mxu0 %v19371_v38 }
 0x93e   :  { %14303 = vmatpush1.bf16.msra.mxu1 %v19374_v39  ;;  %14222 = vmatprep.subr.bf16.mxu0 %v19379_v31  ;;  %v19448_v39 = vld [vmem:[#allocation13 + $0x144c] ss:$116 sps:$4 sm:$0xff]  }
 0x93f   :  { %14304 = vmatprep.subr.bf16.mxu1 %v19382_v41 }
 0x941   :  { %14223 = vmatpush1.bf16.msra.mxu0 %v19377_v42 }
 0x942   :  { %14305 = vmatpush1.bf16.msra.mxu1 %v19380_v34  ;;  %14224 = vmatprep.subr.bf16.mxu0 %v19385_v44 }
 0x943   :  { %14306 = vmatprep.subr.bf16.mxu1 %v19388_v45 }
 0x945   :  { %14225 = vmatpush1.bf16.msra.mxu0 %v19383_v46 }
 0x946   :  { %14307 = vmatpush1.bf16.msra.mxu1 %v19386_v52  ;;  %14226 = vmatprep.subr.bf16.mxu0 %v19391_v43  ;;  %v19443_v52 = vld [vmem:[#allocation13 + $0x1440] ss:$116 sps:$4 sm:$0xff]  }
 0x947   :  { %14308 = vmatprep.subr.bf16.mxu1 %v19394_v58 }
 0x949   :  { %14227 = vmatpush1.bf16.msra.mxu0 %v19389_v59  ;;  %v19446_v59 = vld [vmem:[#allocation13 + $0x1448] ss:$116 sps:$4 sm:$0xff]  }
 0x94a   :  { %14309 = vmatpush1.bf16.msra.mxu1 %v19392_v60  ;;  %14228 = vmatprep.subr.bf16.mxu0 %v19397_v61  ;;  %v19451_v60 = vld [vmem:[#allocation13 + $0x152c] ss:$116 sps:$4 sm:$0xff]  }
 0x94b   :  { %14310 = vmatprep.subr.bf16.mxu1 %v19400_v62  ;;  %v19454_v62 = vld [vmem:[#allocation13 + $0x1534] ss:$116 sps:$4 sm:$0xff]  }
 0x94d   :  { %14229 = vmatpush1.bf16.msra.mxu0 %v19395_v63  ;;  %v19449_v63 = vld [vmem:[#allocation13 + $0x1528] ss:$116 sps:$4 sm:$0xff]  }
 0x94e   :  { %14311 = vmatpush1.bf16.msra.mxu1 %v19398_v0  ;;  %14230 = vmatprep.subr.bf16.mxu0 %v19403_v47  ;;  %v19452_v0 = vld [vmem:[#allocation13 + $0x1530] ss:$116 sps:$4 sm:$0xff]   ;;  %v19457_v47 = vld [vmem:[#allocation13 + $0x1614] ss:$116 sps:$4 sm:$0xff]  }
 0x94f   :  { %14312 = vmatprep.subr.bf16.mxu1 %v19406_v1  ;;  %v19460_v1 = vld [vmem:[#allocation13 + $0x161c] ss:$116 sps:$4 sm:$0xff]  }
 0x951   :  { %14231 = vmatpush1.bf16.msra.mxu0 %v19401_v2  ;;  %v19455_v2 = vld [vmem:[#allocation13 + $0x1610] ss:$116 sps:$4 sm:$0xff]  }
 0x952   :  { %14313 = vmatpush1.bf16.msra.mxu1 %v19404_v3  ;;  %14241 = vmatprep.subr.bf16.mxu0 %v19409_v4  ;;  %v19458_v3 = vld [vmem:[#allocation13 + $0x1618] ss:$116 sps:$4 sm:$0xff]   ;;  %v19463_v4 = vld [vmem:[#allocation13 + $0x16fc] ss:$116 sps:$4 sm:$0xff]  }
 0x953   :  { %14323 = vmatprep.subr.bf16.mxu1 %v19412_v6  ;;  %v19466_v6 = vld [vmem:[#allocation13 + $0x1704] ss:$116 sps:$4 sm:$0xff]  }
 0x954   :  { %14233 = vmatmul.mubr.bf16.vlgmr.msra.gmra.mrb[32].mxu0 %v20313_v8 }
 0x955   :  { %14315 = vmatmul.mubr.bf16.vlgmr.msra.gmra.mrb[32].mxu1 %v20313_v8  ;;  %14242 = vmatpush1.bf16.msra.mxu0 %v19407_v7  ;;  %v19461_v7 = vld [vmem:[#allocation13 + $0x16f8] ss:$116 sps:$4 sm:$0xff]  }
 0x956   :  { %14273 = vmatprep.mubr.bf16.mxu0 %v20317_v12  ;;  %14324 = vmatpush1.bf16.msra.mxu1 %v19410_v10  ;;  %v19464_v10 = vld [vmem:[#allocation13 + $0x1700] ss:$116 sps:$4 sm:$0xff]  }
 0x957   :  { %14355 = vmatprep.mubr.bf16.mxu1 %v20317_v12  ;;  %14243 = vmatprep.subr.bf16.mxu0 %v19415_v13  ;;  %v19469_v13 = vld [vmem:[#allocation13 + $0x17e4] ss:$116 sps:$4 sm:$0xff]  }
 0x958   :  { %14325 = vmatprep.subr.bf16.mxu1 %v19418_v15  ;;  %v19472_v15 = vld [vmem:[#allocation13 + $0x17ec] ss:$116 sps:$4 sm:$0xff]  }
 0x959   :  { %14244 = vmatpush1.bf16.msra.mxu0 %v19413_v16  ;;  %v19467_v16 = vld [vmem:[#allocation13 + $0x17e0] ss:$116 sps:$4 sm:$0xff]  }
 0x95a   :  { %14326 = vmatpush1.bf16.msra.mxu1 %v19416_v18  ;;  %14245 = vmatprep.subr.bf16.mxu0 %v19421_v20  ;;  %v19470_v18 = vld [vmem:[#allocation13 + $0x17e8] ss:$116 sps:$4 sm:$0xff]   ;;  %v19475_v20 = vld [vmem:[#allocation13 + $0x18cc] ss:$116 sps:$4 sm:$0xff]  }
 0x95b   :  { %14327 = vmatprep.subr.bf16.mxu1 %v19424_v11  ;;  %v19478_v11 = vld [vmem:[#allocation13 + $0x18d4] ss:$116 sps:$4 sm:$0xff]  }
 0x95d   :  { %14246 = vmatpush1.bf16.msra.mxu0 %v19419_v9  ;;  %v19473_v9 = vld [vmem:[#allocation13 + $0x18c8] ss:$116 sps:$4 sm:$0xff]  }
 0x95e   :  { %14328 = vmatpush1.bf16.msra.mxu1 %v19422_v21  ;;  %14247 = vmatprep.subr.bf16.mxu0 %v19427_v50  ;;  %v19476_v21 = vld [vmem:[#allocation13 + $0x18d0] ss:$116 sps:$4 sm:$0xff]   ;;  %v19481_v50 = vld [vmem:[#allocation13 + $0x19b4] ss:$116 sps:$4 sm:$0xff]  }
 0x95f   :  { %14329 = vmatprep.subr.bf16.mxu1 %v19430_v14  ;;  %v19484_v14 = vld [vmem:[#allocation13 + $0x19bc] ss:$116 sps:$4 sm:$0xff]  }
 0x961   :  { %14248 = vmatpush1.bf16.msra.mxu0 %v19425_v23  ;;  %v19479_v23 = vld [vmem:[#allocation13 + $0x19b0] ss:$116 sps:$4 sm:$0xff]  }
 0x962   :  { %14330 = vmatpush1.bf16.msra.mxu1 %v19428_v56  ;;  %14249 = vmatprep.subr.bf16.mxu0 %v19433_v17  ;;  %v19482_v56 = vld [vmem:[#allocation13 + $0x19b8] ss:$116 sps:$4 sm:$0xff]   ;;  %v19487_v17 = vld [vmem:[#allocation13 + $0x1a9c] ss:$116 sps:$4 sm:$0xff]  }
 0x963   :  { %14331 = vmatprep.subr.bf16.mxu1 %v19436_v26  ;;  %v19490_v26 = vld [vmem:[#allocation13 + $0x1aa4] ss:$116 sps:$4 sm:$0xff]  }
 0x965   :  { %14250 = vmatpush1.bf16.msra.mxu0 %v19431_v27  ;;  %v19485_v27 = vld [vmem:[#allocation13 + $0x1a98] ss:$116 sps:$4 sm:$0xff]  }
 0x966   :  { %14332 = vmatpush1.bf16.msra.mxu1 %v19434_v19  ;;  %14251 = vmatprep.subr.bf16.mxu0 %v19439_v55  ;;  %v19488_v19 = vld [vmem:[#allocation13 + $0x1aa0] ss:$116 sps:$4 sm:$0xff]   ;;  %v19493_v55 = vld [vmem:[#allocation13 + $0x1b84] ss:$116 sps:$4 sm:$0xff]  }
 0x967   :  { %v13947_v38 = vpop.f32.mrb[24].mxu0  ;;  %14333 = vmatprep.subr.bf16.mxu1 %v19442_v29  ;;  %v19496_v29 = vld [vmem:[#allocation13 + $0x1b8c] ss:$116 sps:$4 sm:$0xff]  }
 0x968   :  { %v16688_v31 = vadd.f32 %v13947_v38, %v8614_v30  ;;  %v14029_v41 = vpop.f32.mrb[24].mxu1  ;;  %v13949_v42 = vpop.f32.mrb[25].mxu0  ;;  %v19491_v30 = vld [vmem:[#allocation13 + $0x1b80] ss:$116 sps:$4 sm:$0xff]  }
 0x969   :  { %v16690_v34 = vadd.f32 %v14029_v41, %v8622_v22  ;;  %v16689_v44 = vadd.f32 %v13949_v42, %v8618_v32  ;;  %v14031_v45 = vpop.f32.mrb[25].mxu1  ;;  %v13951_v46 = vpop.f32.mrb[26].mxu0  ;;  %14252 = vmatpush1.bf16.msra.mxu0 %v19437_v33  ;;  %v19494_v22 = vld [vmem:[#allocation13 + $0x1b88] ss:$116 sps:$4 sm:$0xff]   ;;  %v19499_v32 = vld [vmem:[#allocation13 + $0x1c6c] ss:$116 sps:$4 sm:$0xff]  }
 0x96a   :  { %14620 = vst [vmem:[#allocation16 + $0x60] sm:$0xff] %v16688_v31  ;;  %v16691_v43 = vadd.f32 %v14031_v45, %v8626_v25  ;;  %v14033_v58 = vpop.f32.mrb[26].mxu1  ;;  %14334 = vmatpush1.bf16.msra.mxu1 %v19440_v35  ;;  %v13952_v36 = vpop.f32.mrb[27].mxu0  ;;  %14253 = vmatprep.subr.bf16.mxu0 %v19445_v28  ;;  %v19502_v33 = vld [vmem:[#allocation13 + $0x1c74] ss:$116 sps:$4 sm:$0xff]  }
 0x96b   :  { %14622 = vst [vmem:[#allocation16 + $0x70] sm:$0xff] %v16690_v34  ;;  %14621 = vst [vmem:[#allocation16 + $0x68] sm:$0xff] %v16689_v44  ;;  %v14034_v61 = vpop.f32.mrb[27].mxu1  ;;  %14335 = vmatprep.subr.bf16.mxu1 %v19448_v39  ;;  %v19497_v25 = vld [vmem:[#allocation13 + $0x1c68] ss:$116 sps:$4 sm:$0xff]  }
 0x96c   :  { %14623 = vst [vmem:[#allocation16 + $0x78] sm:$0xff] %v16691_v43  ;;  %v19500_v35 = vld [vmem:[#allocation13 + $0x1c70] ss:$116 sps:$4 sm:$0xff]   ;;  %v19508_v38 = vld [vmem:[#allocation13 + $0x6c] ss:$116 sps:$4 sm:$0xff]  }
 0x96d   :  { %14254 = vmatpush1.bf16.msra.mxu0 %v19443_v52  ;;  %v19505_v28 = vld [vmem:[#allocation13 + $0x64] ss:$116 sps:$4 sm:$0xff]   ;;  %v19503_v39 = vld [vmem:[#allocation13 + $0x60] ss:$116 sps:$4 sm:$0xff]   ;;  %v19506_v31 = vld [vmem:[#allocation13 + $0x68] ss:$116 sps:$4 sm:$0xff]  }
 0x96e   :  { %14336 = vmatpush1.bf16.msra.mxu1 %v19446_v59  ;;  %14255 = vmatprep.subr.bf16.mxu0 %v19451_v60  ;;  %v19511_v41 = vld [vmem:[#allocation13 + $0x14c] ss:$116 sps:$4 sm:$0xff]   ;;  %v19514_v42 = vld [vmem:[#allocation13 + $0x154] ss:$116 sps:$4 sm:$0xff]   ;;  %v19512_v44 = vld [vmem:[#allocation13 + $0x150] ss:$116 sps:$4 sm:$0xff]  }
 0x96f   :  { %14337 = vmatprep.subr.bf16.mxu1 %v19454_v62  ;;  %v19509_v34 = vld [vmem:[#allocation13 + $0x148] ss:$116 sps:$4 sm:$0xff]   ;;  %v19515_v52 = vld [vmem:[#allocation13 + $0x230] ss:$116 sps:$4 sm:$0xff]   ;;  %v19518_v43 = vld [vmem:[#allocation13 + $0x238] ss:$116 sps:$4 sm:$0xff]  }
 0x970   :  { %v19517_v45 = vld [vmem:[#allocation13 + $0x234] ss:$116 sps:$4 sm:$0xff]   ;;  %v19520_v46 = vld [vmem:[#allocation13 + $0x23c] ss:$116 sps:$4 sm:$0xff]   ;;  %v19526_v36 = vld [vmem:[#allocation13 + $0x324] ss:$116 sps:$4 sm:$0xff]  }
 0x971   :  { %14256 = vmatpush1.bf16.msra.mxu0 %v19449_v63  ;;  %v19523_v58 = vld [vmem:[#allocation13 + $0x31c] ss:$116 sps:$4 sm:$0xff]   ;;  %v19521_v59 = vld [vmem:[#allocation13 + $0x318] ss:$116 sps:$4 sm:$0xff]   ;;  %v19524_v60 = vld [vmem:[#allocation13 + $0x320] ss:$116 sps:$4 sm:$0xff]  }
 0x972   :  { %14338 = vmatpush1.bf16.msra.mxu1 %v19452_v0  ;;  %14257 = vmatprep.subr.bf16.mxu0 %v19457_v47  ;;  %v19529_v61 = vld [vmem:[#allocation13 + $0x404] ss:$116 sps:$4 sm:$0xff]   ;;  %v19532_v62 = vld [vmem:[#allocation13 + $0x40c] ss:$116 sps:$4 sm:$0xff]   ;;  %v19530_v0 = vld [vmem:[#allocation13 + $0x408] ss:$116 sps:$4 sm:$0xff]  }
 0x973   :  { %14339 = vmatprep.subr.bf16.mxu1 %v19460_v1  ;;  %v19527_v63 = vld [vmem:[#allocation13 + $0x400] ss:$116 sps:$4 sm:$0xff]  }
 0x974   :  { %v19535_v47 = vld [vmem:[#allocation13 + $0x4ec] ss:$116 sps:$4 sm:$0xff]   ;;  %v19538_v1 = vld [vmem:[#allocation13 + $0x4f4] ss:$116 sps:$4 sm:$0xff]  }
 0x975   :  { %14258 = vmatpush1.bf16.msra.mxu0 %v19455_v2  ;;  %v19533_v2 = vld [vmem:[#allocation13 + $0x4e8] ss:$116 sps:$4 sm:$0xff]  }
 0x976   :  { %14340 = vmatpush1.bf16.msra.mxu1 %v19458_v3  ;;  %14259 = vmatprep.subr.bf16.mxu0 %v19463_v4  ;;  %v19536_v3 = vld [vmem:[#allocation13 + $0x4f0] ss:$116 sps:$4 sm:$0xff]   ;;  %v19541_v4 = vld [vmem:[#allocation13 + $0x5d4] ss:$116 sps:$4 sm:$0xff]  }
 0x977   :  { %14341 = vmatprep.subr.bf16.mxu1 %v19466_v6  ;;  %v19544_v6 = vld [vmem:[#allocation13 + $0x5dc] ss:$116 sps:$4 sm:$0xff]  }
 0x979   :  { %14260 = vmatpush1.bf16.msra.mxu0 %v19461_v7  ;;  %v19539_v7 = vld [vmem:[#allocation13 + $0x5d0] ss:$116 sps:$4 sm:$0xff]  }
 0x97a   :  { %14342 = vmatpush1.bf16.msra.mxu1 %v19464_v10  ;;  %14261 = vmatprep.subr.bf16.mxu0 %v19469_v13  ;;  %v19542_v10 = vld [vmem:[#allocation13 + $0x5d8] ss:$116 sps:$4 sm:$0xff]   ;;  %v19547_v13 = vld [vmem:[#allocation13 + $0x6bc] ss:$116 sps:$4 sm:$0xff]  }
 0x97b   :  { %14343 = vmatprep.subr.bf16.mxu1 %v19472_v15  ;;  %v19550_v15 = vld [vmem:[#allocation13 + $0x6c4] ss:$116 sps:$4 sm:$0xff]  }
 0x97d   :  { %14262 = vmatpush1.bf16.msra.mxu0 %v19467_v16  ;;  %v19545_v16 = vld [vmem:[#allocation13 + $0x6b8] ss:$116 sps:$4 sm:$0xff]  }
 0x97e   :  { %14344 = vmatpush1.bf16.msra.mxu1 %v19470_v18  ;;  %14263 = vmatprep.subr.bf16.mxu0 %v19475_v20  ;;  %v19548_v18 = vld [vmem:[#allocation13 + $0x6c0] ss:$116 sps:$4 sm:$0xff]   ;;  %v19553_v20 = vld [vmem:[#allocation13 + $0x7a4] ss:$116 sps:$4 sm:$0xff]  }
 0x97f   :  { %14345 = vmatprep.subr.bf16.mxu1 %v19478_v11  ;;  %v19556_v11 = vld [vmem:[#allocation13 + $0x7ac] ss:$116 sps:$4 sm:$0xff]  }
 0x981   :  { %14264 = vmatpush1.bf16.msra.mxu0 %v19473_v9  ;;  %v19551_v9 = vld [vmem:[#allocation13 + $0x7a0] ss:$116 sps:$4 sm:$0xff]  }
 0x982   :  { %14346 = vmatpush1.bf16.msra.mxu1 %v19476_v21  ;;  %14265 = vmatprep.subr.bf16.mxu0 %v19481_v50  ;;  %v19554_v21 = vld [vmem:[#allocation13 + $0x7a8] ss:$116 sps:$4 sm:$0xff]   ;;  %v19559_v50 = vld [vmem:[#allocation13 + $0x88c] ss:$116 sps:$4 sm:$0xff]  }
 0x983   :  { %14347 = vmatprep.subr.bf16.mxu1 %v19484_v14  ;;  %v19562_v14 = vld [vmem:[#allocation13 + $0x894] ss:$116 sps:$4 sm:$0xff]  }
 0x985   :  { %14266 = vmatpush1.bf16.msra.mxu0 %v19479_v23  ;;  %v19557_v23 = vld [vmem:[#allocation13 + $0x888] ss:$116 sps:$4 sm:$0xff]  }
 0x986   :  { %14348 = vmatpush1.bf16.msra.mxu1 %v19482_v56  ;;  %14267 = vmatprep.subr.bf16.mxu0 %v19487_v17  ;;  %v19560_v56 = vld [vmem:[#allocation13 + $0x890] ss:$116 sps:$4 sm:$0xff]   ;;  %v19565_v17 = vld [vmem:[#allocation13 + $0x974] ss:$116 sps:$4 sm:$0xff]  }
 0x987   :  { %14349 = vmatprep.subr.bf16.mxu1 %v19490_v26  ;;  %v19568_v26 = vld [vmem:[#allocation13 + $0x97c] ss:$116 sps:$4 sm:$0xff]  }
 0x989   :  { %14268 = vmatpush1.bf16.msra.mxu0 %v19485_v27  ;;  %v19563_v27 = vld [vmem:[#allocation13 + $0x970] ss:$116 sps:$4 sm:$0xff]  }
 0x98a   :  { %14350 = vmatpush1.bf16.msra.mxu1 %v19488_v19  ;;  %14269 = vmatprep.subr.bf16.mxu0 %v19493_v55  ;;  %v19566_v19 = vld [vmem:[#allocation13 + $0x978] ss:$116 sps:$4 sm:$0xff]   ;;  %v19571_v55 = vld [vmem:[#allocation13 + $0xa5c] ss:$116 sps:$4 sm:$0xff]  }
 0x98b   :  { %14351 = vmatprep.subr.bf16.mxu1 %v19496_v29  ;;  %v19574_v29 = vld [vmem:[#allocation13 + $0xa64] ss:$116 sps:$4 sm:$0xff]  }
 0x98d   :  { %14270 = vmatpush1.bf16.msra.mxu0 %v19491_v30  ;;  %v19569_v30 = vld [vmem:[#allocation13 + $0xa58] ss:$116 sps:$4 sm:$0xff]  }
 0x98e   :  { %14352 = vmatpush1.bf16.msra.mxu1 %v19494_v22  ;;  %14271 = vmatprep.subr.bf16.mxu0 %v19499_v32  ;;  %v19572_v22 = vld [vmem:[#allocation13 + $0xa60] ss:$116 sps:$4 sm:$0xff]   ;;  %v19577_v32 = vld [vmem:[#allocation13 + $0xb44] ss:$116 sps:$4 sm:$0xff]  }
 0x98f   :  { %14353 = vmatprep.subr.bf16.mxu1 %v19502_v33  ;;  %v19580_v33 = vld [vmem:[#allocation13 + $0xb4c] ss:$116 sps:$4 sm:$0xff]  }
 0x991   :  { %14272 = vmatpush1.bf16.msra.mxu0 %v19497_v25  ;;  %v19575_v25 = vld [vmem:[#allocation13 + $0xb40] ss:$116 sps:$4 sm:$0xff]  }
 0x992   :  { %14354 = vmatpush1.bf16.msra.mxu1 %v19500_v35  ;;  %14364 = vmatprep.subr.bf16.mxu0 %v19505_v28  ;;  %v19578_v35 = vld [vmem:[#allocation13 + $0xb48] ss:$116 sps:$4 sm:$0xff]   ;;  %v19583_v28 = vld [vmem:[#allocation13 + $0xc2c] ss:$116 sps:$4 sm:$0xff]  }
 0x993   :  { %14446 = vmatprep.subr.bf16.mxu1 %v19508_v38  ;;  %v19586_v38 = vld [vmem:[#allocation13 + $0xc34] ss:$116 sps:$4 sm:$0xff]  }
 0x994   :  { %14274 = vmatmul.mubr.bf16.vlgmr.msra.gmra.mrb[32].mxu0 %v20326_v24 }
 0x995   :  { %14356 = vmatmul.mubr.bf16.vlgmr.msra.gmra.mrb[32].mxu1 %v20326_v24  ;;  %14365 = vmatpush1.bf16.msra.mxu0 %v19503_v39  ;;  %v19581_v39 = vld [vmem:[#allocation13 + $0xc28] ss:$116 sps:$4 sm:$0xff]  }
 0x996   :  { %14396 = vmatprep.mubr.bf16.mxu0 %v20311_v5  ;;  %14447 = vmatpush1.bf16.msra.mxu1 %v19506_v31  ;;  %v19584_v31 = vld [vmem:[#allocation13 + $0xc30] ss:$116 sps:$4 sm:$0xff]  }
 0x997   :  { %14478 = vmatprep.mubr.bf16.mxu1 %v20311_v5  ;;  %14366 = vmatprep.subr.bf16.mxu0 %v19511_v41  ;;  %v19589_v41 = vld [vmem:[#allocation13 + $0xd14] ss:$116 sps:$4 sm:$0xff]  }
 0x998   :  { %14448 = vmatprep.subr.bf16.mxu1 %v19514_v42  ;;  %v19592_v42 = vld [vmem:[#allocation13 + $0xd1c] ss:$116 sps:$4 sm:$0xff]  }
 0x999   :  { %14367 = vmatpush1.bf16.msra.mxu0 %v19509_v34  ;;  %v19587_v34 = vld [vmem:[#allocation13 + $0xd10] ss:$116 sps:$4 sm:$0xff]  }
 0x99a   :  { %14449 = vmatpush1.bf16.msra.mxu1 %v19512_v44  ;;  %14368 = vmatprep.subr.bf16.mxu0 %v19517_v45  ;;  %v19590_v44 = vld [vmem:[#allocation13 + $0xd18] ss:$116 sps:$4 sm:$0xff]   ;;  %v19595_v45 = vld [vmem:[#allocation13 + $0xdfc] ss:$116 sps:$4 sm:$0xff]  }
 0x99b   :  { %14450 = vmatprep.subr.bf16.mxu1 %v19520_v46  ;;  %v19598_v46 = vld [vmem:[#allocation13 + $0xe04] ss:$116 sps:$4 sm:$0xff]  }
 0x99d   :  { %14369 = vmatpush1.bf16.msra.mxu0 %v19515_v52  ;;  %v19593_v52 = vld [vmem:[#allocation13 + $0xdf8] ss:$116 sps:$4 sm:$0xff]  }
 0x99e   :  { %14451 = vmatpush1.bf16.msra.mxu1 %v19518_v43  ;;  %14370 = vmatprep.subr.bf16.mxu0 %v19523_v58  ;;  %v19596_v43 = vld [vmem:[#allocation13 + $0xe00] ss:$116 sps:$4 sm:$0xff]   ;;  %v19601_v58 = vld [vmem:[#allocation13 + $0xee4] ss:$116 sps:$4 sm:$0xff]  }
 0x99f   :  { %14452 = vmatprep.subr.bf16.mxu1 %v19526_v36  ;;  %v19604_v36 = vld [vmem:[#allocation13 + $0xeec] ss:$116 sps:$4 sm:$0xff]  }
 0x9a1   :  { %14371 = vmatpush1.bf16.msra.mxu0 %v19521_v59  ;;  %v19599_v59 = vld [vmem:[#allocation13 + $0xee0] ss:$116 sps:$4 sm:$0xff]  }
 0x9a2   :  { %14453 = vmatpush1.bf16.msra.mxu1 %v19524_v60  ;;  %14372 = vmatprep.subr.bf16.mxu0 %v19529_v61  ;;  %v19602_v60 = vld [vmem:[#allocation13 + $0xee8] ss:$116 sps:$4 sm:$0xff]   ;;  %v19607_v61 = vld [vmem:[#allocation13 + $0xfcc] ss:$116 sps:$4 sm:$0xff]  }
 0x9a3   :  { %14454 = vmatprep.subr.bf16.mxu1 %v19532_v62  ;;  %v19610_v62 = vld [vmem:[#allocation13 + $0xfd4] ss:$116 sps:$4 sm:$0xff]  }
 0x9a5   :  { %14373 = vmatpush1.bf16.msra.mxu0 %v19527_v63  ;;  %v19605_v63 = vld [vmem:[#allocation13 + $0xfc8] ss:$116 sps:$4 sm:$0xff]  }
 0x9a6   :  { %14455 = vmatpush1.bf16.msra.mxu1 %v19530_v0  ;;  %14374 = vmatprep.subr.bf16.mxu0 %v19535_v47  ;;  %v19608_v0 = vld [vmem:[#allocation13 + $0xfd0] ss:$116 sps:$4 sm:$0xff]   ;;  %v19613_v47 = vld [vmem:[#allocation13 + $0x10b4] ss:$116 sps:$4 sm:$0xff]  }
 0x9a7   :  { %14456 = vmatprep.subr.bf16.mxu1 %v19538_v1  ;;  %v19616_v1 = vld [vmem:[#allocation13 + $0x10bc] ss:$116 sps:$4 sm:$0xff]  }
 0x9a9   :  { %14375 = vmatpush1.bf16.msra.mxu0 %v19533_v2  ;;  %v19611_v2 = vld [vmem:[#allocation13 + $0x10b0] ss:$116 sps:$4 sm:$0xff]  }
 0x9aa   :  { %14457 = vmatpush1.bf16.msra.mxu1 %v19536_v3  ;;  %14376 = vmatprep.subr.bf16.mxu0 %v19541_v4  ;;  %v19614_v3 = vld [vmem:[#allocation13 + $0x10b8] ss:$116 sps:$4 sm:$0xff]   ;;  %v19619_v4 = vld [vmem:[#allocation13 + $0x119c] ss:$116 sps:$4 sm:$0xff]  }
 0x9ab   :  { %14458 = vmatprep.subr.bf16.mxu1 %v19544_v6  ;;  %v19622_v6 = vld [vmem:[#allocation13 + $0x11a4] ss:$116 sps:$4 sm:$0xff]  }
 0x9ad   :  { %14377 = vmatpush1.bf16.msra.mxu0 %v19539_v7  ;;  %v19617_v7 = vld [vmem:[#allocation13 + $0x1198] ss:$116 sps:$4 sm:$0xff]  }
 0x9ae   :  { %14459 = vmatpush1.bf16.msra.mxu1 %v19542_v10  ;;  %14378 = vmatprep.subr.bf16.mxu0 %v19547_v13  ;;  %v19620_v10 = vld [vmem:[#allocation13 + $0x11a0] ss:$116 sps:$4 sm:$0xff]   ;;  %v19625_v13 = vld [vmem:[#allocation13 + $0x1284] ss:$116 sps:$4 sm:$0xff]  }
 0x9af   :  { %14460 = vmatprep.subr.bf16.mxu1 %v19550_v15  ;;  %v19628_v15 = vld [vmem:[#allocation13 + $0x128c] ss:$116 sps:$4 sm:$0xff]  }
 0x9b1   :  { %14379 = vmatpush1.bf16.msra.mxu0 %v19545_v16  ;;  %v19623_v16 = vld [vmem:[#allocation13 + $0x1280] ss:$116 sps:$4 sm:$0xff]  }
 0x9b2   :  { %14461 = vmatpush1.bf16.msra.mxu1 %v19548_v18  ;;  %14380 = vmatprep.subr.bf16.mxu0 %v19553_v20  ;;  %v20424_v18 = vld [vmem:[#allocation14 + $0x10] sm:$0xff]  ;;  %v19626_v20 = vld [vmem:[#allocation13 + $0x1288] ss:$116 sps:$4 sm:$0xff]  }
 0x9b3   :  { %14462 = vmatprep.subr.bf16.mxu1 %v19556_v11  ;;  %v19631_v11 = vld [vmem:[#allocation13 + $0x136c] ss:$116 sps:$4 sm:$0xff]  }
 0x9b5   :  { %14381 = vmatpush1.bf16.msra.mxu0 %v19551_v9  ;;  %v19634_v9 = vld [vmem:[#allocation13 + $0x1374] ss:$116 sps:$4 sm:$0xff]  }
 0x9b6   :  { %14463 = vmatpush1.bf16.msra.mxu1 %v19554_v21  ;;  %14382 = vmatprep.subr.bf16.mxu0 %v19559_v50  ;;  %v8630_v21 = vrot.slane %v20424_v18, %v20284_v48  ;;  %v8638_v50 = vrot.slane %v20424_v18, %v20287_v49 }
 0x9b7   :  { %14464 = vmatprep.subr.bf16.mxu1 %v19562_v14  ;;  %v8634_v14 = vrot.slane %v20424_v18, %v20290_v51 }
 0x9b9   :  { %14383 = vmatpush1.bf16.msra.mxu0 %v19557_v23  ;;  %v19629_v23 = vld [vmem:[#allocation13 + $0x1368] ss:$116 sps:$4 sm:$0xff]  }
 0x9ba   :  { %14465 = vmatpush1.bf16.msra.mxu1 %v19560_v56  ;;  %14384 = vmatprep.subr.bf16.mxu0 %v19565_v17  ;;  %v8642_v56 = vrot.slane %v20424_v18, %v20293_v40  ;;  %v19632_v17 = vld [vmem:[#allocation13 + $0x1370] ss:$116 sps:$4 sm:$0xff]  }
 0x9bb   :  { %14466 = vmatprep.subr.bf16.mxu1 %v19568_v26  ;;  %v19637_v26 = vld [vmem:[#allocation13 + $0x1454] ss:$116 sps:$4 sm:$0xff]  }
 0x9bd   :  { %14385 = vmatpush1.bf16.msra.mxu0 %v19563_v27 }
 0x9be   :  { %14467 = vmatpush1.bf16.msra.mxu1 %v19566_v19  ;;  %14386 = vmatprep.subr.bf16.mxu0 %v19571_v55  ;;  %v19640_v19 = vld [vmem:[#allocation13 + $0x145c] ss:$116 sps:$4 sm:$0xff]  }
 0x9bf   :  { %14468 = vmatprep.subr.bf16.mxu1 %v19574_v29 }
 0x9c1   :  { %14387 = vmatpush1.bf16.msra.mxu0 %v19569_v30 }
 0x9c2   :  { %14469 = vmatpush1.bf16.msra.mxu1 %v19572_v22  ;;  %14388 = vmatprep.subr.bf16.mxu0 %v19577_v32 }
 0x9c3   :  { %14470 = vmatprep.subr.bf16.mxu1 %v19580_v33 }
 0x9c5   :  { %14389 = vmatpush1.bf16.msra.mxu0 %v19575_v25 }
 0x9c6   :  { %14471 = vmatpush1.bf16.msra.mxu1 %v19578_v35  ;;  %14390 = vmatprep.subr.bf16.mxu0 %v19583_v28  ;;  %v19635_v35 = vld [vmem:[#allocation13 + $0x1450] ss:$116 sps:$4 sm:$0xff]  }
 0x9c7   :  { %14472 = vmatprep.subr.bf16.mxu1 %v19586_v38 }
 0x9c9   :  { %14391 = vmatpush1.bf16.msra.mxu0 %v19581_v39 }
 0x9ca   :  { %14473 = vmatpush1.bf16.msra.mxu1 %v19584_v31  ;;  %14392 = vmatprep.subr.bf16.mxu0 %v19589_v41  ;;  %v19638_v31 = vld [vmem:[#allocation13 + $0x1458] ss:$116 sps:$4 sm:$0xff]   ;;  %v19643_v41 = vld [vmem:[#allocation13 + $0x153c] ss:$116 sps:$4 sm:$0xff]  }
 0x9cb   :  { %14474 = vmatprep.subr.bf16.mxu1 %v19592_v42 }
 0x9cd   :  { %14393 = vmatpush1.bf16.msra.mxu0 %v19587_v34  ;;  %v19646_v34 = vld [vmem:[#allocation13 + $0x1544] ss:$116 sps:$4 sm:$0xff]  }
 0x9ce   :  { %14475 = vmatpush1.bf16.msra.mxu1 %v19590_v44  ;;  %14394 = vmatprep.subr.bf16.mxu0 %v19595_v45  ;;  %v19641_v44 = vld [vmem:[#allocation13 + $0x1538] ss:$116 sps:$4 sm:$0xff]   ;;  %v19644_v45 = vld [vmem:[#allocation13 + $0x1540] ss:$116 sps:$4 sm:$0xff]  }
 0x9cf   :  { %14476 = vmatprep.subr.bf16.mxu1 %v19598_v46  ;;  %v19649_v46 = vld [vmem:[#allocation13 + $0x1624] ss:$116 sps:$4 sm:$0xff]  }
 0x9d1   :  { %14395 = vmatpush1.bf16.msra.mxu0 %v19593_v52  ;;  %v19652_v52 = vld [vmem:[#allocation13 + $0x162c] ss:$116 sps:$4 sm:$0xff]  }
 0x9d2   :  { %14477 = vmatpush1.bf16.msra.mxu1 %v19596_v43  ;;  %14405 = vmatprep.subr.bf16.mxu0 %v19601_v58  ;;  %v19647_v43 = vld [vmem:[#allocation13 + $0x1620] ss:$116 sps:$4 sm:$0xff]   ;;  %v19650_v58 = vld [vmem:[#allocation13 + $0x1628] ss:$116 sps:$4 sm:$0xff]  }
 0x9d3   :  { %14487 = vmatprep.subr.bf16.mxu1 %v19604_v36  ;;  %v19655_v36 = vld [vmem:[#allocation13 + $0x170c] ss:$116 sps:$4 sm:$0xff]  }
 0x9d4   :  { %14397 = vmatmul.mubr.bf16.vlgmr.msra.gmra.mrb[36].mxu0 %v20313_v8 }
 0x9d5   :  { %14479 = vmatmul.mubr.bf16.vlgmr.msra.gmra.mrb[36].mxu1 %v20313_v8  ;;  %14406 = vmatpush1.bf16.msra.mxu0 %v19599_v59  ;;  %v19658_v59 = vld [vmem:[#allocation13 + $0x1714] ss:$116 sps:$4 sm:$0xff]  }
 0x9d6   :  { %14437 = vmatprep.mubr.bf16.mxu0 %v20317_v12  ;;  %14488 = vmatpush1.bf16.msra.mxu1 %v19602_v60  ;;  %v19653_v60 = vld [vmem:[#allocation13 + $0x1708] ss:$116 sps:$4 sm:$0xff]  }
 0x9d7   :  { %14519 = vmatprep.mubr.bf16.mxu1 %v20317_v12  ;;  %14407 = vmatprep.subr.bf16.mxu0 %v19607_v61  ;;  %v19656_v61 = vld [vmem:[#allocation13 + $0x1710] ss:$116 sps:$4 sm:$0xff]  }
 0x9d8   :  { %14489 = vmatprep.subr.bf16.mxu1 %v19610_v62  ;;  %v19661_v62 = vld [vmem:[#allocation13 + $0x17f4] ss:$116 sps:$4 sm:$0xff]  }
 0x9d9   :  { %14408 = vmatpush1.bf16.msra.mxu0 %v19605_v63  ;;  %v19664_v63 = vld [vmem:[#allocation13 + $0x17fc] ss:$116 sps:$4 sm:$0xff]  }
 0x9da   :  { %14490 = vmatpush1.bf16.msra.mxu1 %v19608_v0  ;;  %14409 = vmatprep.subr.bf16.mxu0 %v19613_v47  ;;  %v19659_v0 = vld [vmem:[#allocation13 + $0x17f0] ss:$116 sps:$4 sm:$0xff]   ;;  %v19662_v47 = vld [vmem:[#allocation13 + $0x17f8] ss:$116 sps:$4 sm:$0xff]  }
 0x9db   :  { %14491 = vmatprep.subr.bf16.mxu1 %v19616_v1  ;;  %v19667_v1 = vld [vmem:[#allocation13 + $0x18dc] ss:$116 sps:$4 sm:$0xff]  }
 0x9dd   :  { %14410 = vmatpush1.bf16.msra.mxu0 %v19611_v2  ;;  %v19670_v2 = vld [vmem:[#allocation13 + $0x18e4] ss:$116 sps:$4 sm:$0xff]  }
 0x9de   :  { %14492 = vmatpush1.bf16.msra.mxu1 %v19614_v3  ;;  %14411 = vmatprep.subr.bf16.mxu0 %v19619_v4  ;;  %v19665_v3 = vld [vmem:[#allocation13 + $0x18d8] ss:$116 sps:$4 sm:$0xff]   ;;  %v19668_v4 = vld [vmem:[#allocation13 + $0x18e0] ss:$116 sps:$4 sm:$0xff]  }
 0x9df   :  { %14493 = vmatprep.subr.bf16.mxu1 %v19622_v6  ;;  %v19673_v6 = vld [vmem:[#allocation13 + $0x19c4] ss:$116 sps:$4 sm:$0xff]  }
 0x9e1   :  { %14412 = vmatpush1.bf16.msra.mxu0 %v19617_v7  ;;  %v19676_v7 = vld [vmem:[#allocation13 + $0x19cc] ss:$116 sps:$4 sm:$0xff]  }
 0x9e2   :  { %14494 = vmatpush1.bf16.msra.mxu1 %v19620_v10  ;;  %14413 = vmatprep.subr.bf16.mxu0 %v19625_v13  ;;  %v19671_v10 = vld [vmem:[#allocation13 + $0x19c0] ss:$116 sps:$4 sm:$0xff]   ;;  %v19674_v13 = vld [vmem:[#allocation13 + $0x19c8] ss:$116 sps:$4 sm:$0xff]  }
 0x9e3   :  { %14495 = vmatprep.subr.bf16.mxu1 %v19628_v15  ;;  %v19679_v15 = vld [vmem:[#allocation13 + $0x1aac] ss:$116 sps:$4 sm:$0xff]  }
 0x9e5   :  { %14414 = vmatpush1.bf16.msra.mxu0 %v19623_v16  ;;  %v19682_v16 = vld [vmem:[#allocation13 + $0x1ab4] ss:$116 sps:$4 sm:$0xff]  }
 0x9e6   :  { %14496 = vmatpush1.bf16.msra.mxu1 %v19626_v20  ;;  %14415 = vmatprep.subr.bf16.mxu0 %v19631_v11  ;;  %v19677_v20 = vld [vmem:[#allocation13 + $0x1aa8] ss:$116 sps:$4 sm:$0xff]   ;;  %v19680_v11 = vld [vmem:[#allocation13 + $0x1ab0] ss:$116 sps:$4 sm:$0xff]  }
 0x9e7   :  { %v14111_v27 = vpop.f32.mrb[28].mxu0  ;;  %14497 = vmatprep.subr.bf16.mxu1 %v19634_v9  ;;  %v19685_v9 = vld [vmem:[#allocation13 + $0x1b94] ss:$116 sps:$4 sm:$0xff]  }
 0x9e8   :  { %v16692_v55 = vadd.f32 %v14111_v27, %v8630_v21  ;;  %v14193_v29 = vpop.f32.mrb[28].mxu1  ;;  %v14113_v30 = vpop.f32.mrb[29].mxu0  ;;  %v19688_v21 = vld [vmem:[#allocation13 + $0x1b9c] ss:$116 sps:$4 sm:$0xff]  }
 0x9e9   :  { %v16694_v22 = vadd.f32 %v14193_v29, %v8638_v50  ;;  %v16693_v32 = vadd.f32 %v14113_v30, %v8634_v14  ;;  %v14195_v33 = vpop.f32.mrb[29].mxu1  ;;  %v14115_v25 = vpop.f32.mrb[30].mxu0  ;;  %14416 = vmatpush1.bf16.msra.mxu0 %v19629_v23  ;;  %v19683_v50 = vld [vmem:[#allocation13 + $0x1b90] ss:$116 sps:$4 sm:$0xff]   ;;  %v19686_v14 = vld [vmem:[#allocation13 + $0x1b98] ss:$116 sps:$4 sm:$0xff]  }
 0x9ea   :  { %14624 = vst [vmem:[#allocation16 + $0x80] sm:$0xff] %v16692_v55  ;;  %v16695_v28 = vadd.f32 %v14195_v33, %v8642_v56  ;;  %v14197_v38 = vpop.f32.mrb[30].mxu1  ;;  %14498 = vmatpush1.bf16.msra.mxu1 %v19632_v17  ;;  %v14116_v39 = vpop.f32.mrb[31].mxu0  ;;  %14417 = vmatprep.subr.bf16.mxu0 %v19637_v26  ;;  %v19691_v23 = vld [vmem:[#allocation13 + $0x1c7c] ss:$116 sps:$4 sm:$0xff]  }
 0x9eb   :  { %14626 = vst [vmem:[#allocation16 + $0x90] sm:$0xff] %v16694_v22  ;;  %14625 = vst [vmem:[#allocation16 + $0x88] sm:$0xff] %v16693_v32  ;;  %v14198_v42 = vpop.f32.mrb[31].mxu1  ;;  %14499 = vmatprep.subr.bf16.mxu1 %v19640_v19  ;;  %v19694_v56 = vld [vmem:[#allocation13 + $0x1c84] ss:$116 sps:$4 sm:$0xff]  }
 0x9ec   :  { %14627 = vst [vmem:[#allocation16 + $0x98] sm:$0xff] %v16695_v28  ;;  %v19689_v17 = vld [vmem:[#allocation13 + $0x1c78] ss:$116 sps:$4 sm:$0xff]   ;;  %v19692_v26 = vld [vmem:[#allocation13 + $0x1c80] ss:$116 sps:$4 sm:$0xff]  }
 0x9ed   :  { %14418 = vmatpush1.bf16.msra.mxu0 %v19635_v35  ;;  %v19695_v27 = vld [vmem:[#allocation13 + $0x7b0] ss:$116 sps:$4 sm:$0xff]   ;;  %v19699_v30 = vld [vmem:[#allocation13 + $0x898] ss:$116 sps:$4 sm:$0xff]   ;;  %v19703_v25 = vld [vmem:[#allocation13 + $0x980] ss:$116 sps:$4 sm:$0xff]  }
 0x9ee   :  { %14500 = vmatpush1.bf16.msra.mxu1 %v19638_v31  ;;  %14419 = vmatprep.subr.bf16.mxu0 %v19643_v41  ;;  %v19696_v19 = vld [vmem:[#allocation13 + $0x1630] ss:$116 sps:$4 sm:$0xff]   ;;  %v19700_v22 = vld [vmem:[#allocation13 + $0x1718] ss:$116 sps:$4 sm:$0xff]   ;;  %v19704_v35 = vld [vmem:[#allocation13 + $0x1800] ss:$116 sps:$4 sm:$0xff]  }
 0x9ef   :  { %14501 = vmatprep.subr.bf16.mxu1 %v19646_v34  ;;  %v19697_v55 = vld [vmem:[#allocation13 + $0x70] ss:$116 sps:$4 sm:$0xff]   ;;  %v19701_v32 = vld [vmem:[#allocation13 + $0x158] ss:$116 sps:$4 sm:$0xff]   ;;  %v19705_v28 = vld [vmem:[#allocation13 + $0x240] ss:$116 sps:$4 sm:$0xff]  }
 0x9f0   :  { %v19698_v29 = vld [vmem:[#allocation13 + $0xef0] ss:$116 sps:$4 sm:$0xff]   ;;  %v19702_v33 = vld [vmem:[#allocation13 + $0xfd8] ss:$116 sps:$4 sm:$0xff]   ;;  %v19706_v38 = vld [vmem:[#allocation13 + $0x10c0] ss:$116 sps:$4 sm:$0xff]  }
 0x9f1   :  { %14420 = vmatpush1.bf16.msra.mxu0 %v19641_v44  ;;  %v19707_v39 = vld [vmem:[#allocation13 + $0xa68] ss:$116 sps:$4 sm:$0xff]   ;;  %v19711_v42 = vld [vmem:[#allocation13 + $0xb50] ss:$116 sps:$4 sm:$0xff]  }
 0x9f2   :  { %14502 = vmatpush1.bf16.msra.mxu1 %v19644_v45  ;;  %14421 = vmatprep.subr.bf16.mxu0 %v19649_v46  ;;  %v19708_v31 = vld [vmem:[#allocation13 + $0x18e8] ss:$116 sps:$4 sm:$0xff]   ;;  %v19712_v34 = vld [vmem:[#allocation13 + $0x19d0] ss:$116 sps:$4 sm:$0xff]   ;;  %v19715_v45 = vld [vmem:[#allocation13 + $0xc38] ss:$116 sps:$4 sm:$0xff]  }
 0x9f3   :  { %14503 = vmatprep.subr.bf16.mxu1 %v19652_v52  ;;  %v19709_v41 = vld [vmem:[#allocation13 + $0x328] ss:$116 sps:$4 sm:$0xff]   ;;  %v19714_v44 = vld [vmem:[#allocation13 + $0x1290] ss:$116 sps:$4 sm:$0xff]   ;;  %v19716_v46 = vld [vmem:[#allocation13 + $0x1ab8] ss:$116 sps:$4 sm:$0xff]  }
 0x9f4   :  { %v19717_v52 = vld [vmem:[#allocation13 + $0x4f8] ss:$116 sps:$4 sm:$0xff]  }
 0x9f5   :  { %14422 = vmatpush1.bf16.msra.mxu0 %v19647_v43  ;;  %v19718_v43 = vld [vmem:[#allocation13 + $0x1378] ss:$116 sps:$4 sm:$0xff]  }
 0x9f6   :  { %14504 = vmatpush1.bf16.msra.mxu1 %v19650_v58  ;;  %14423 = vmatprep.subr.bf16.mxu0 %v19655_v36  ;;  %v19719_v58 = vld [vmem:[#allocation13 + $0xd20] ss:$116 sps:$4 sm:$0xff]  }
 0x9f7   :  { %14505 = vmatprep.subr.bf16.mxu1 %v19658_v59  ;;  %v19720_v36 = vld [vmem:[#allocation13 + $0x1ba0] ss:$116 sps:$4 sm:$0xff]  }
 0x9f8   :  { %v19721_v59 = vld [vmem:[#allocation13 + $0x5e0] ss:$116 sps:$4 sm:$0xff]  }
 0x9f9   :  { %14424 = vmatpush1.bf16.msra.mxu0 %v19653_v60  ;;  %v19722_v60 = vld [vmem:[#allocation13 + $0x1460] ss:$116 sps:$4 sm:$0xff]  }
 0x9fa   :  { %14506 = vmatpush1.bf16.msra.mxu1 %v19656_v61  ;;  %14425 = vmatprep.subr.bf16.mxu0 %v19661_v62  ;;  %v19723_v61 = vld [vmem:[#allocation13 + $0xe08] ss:$116 sps:$4 sm:$0xff]  }
 0x9fb   :  { %14507 = vmatprep.subr.bf16.mxu1 %v19664_v63  ;;  %v19724_v62 = vld [vmem:[#allocation13 + $0x1c88] ss:$116 sps:$4 sm:$0xff]  }
 0x9fc   :  { %v19725_v63 = vld [vmem:[#allocation13 + $0x6c8] ss:$116 sps:$4 sm:$0xff]  }
 0x9fd   :  { %14426 = vmatpush1.bf16.msra.mxu0 %v19659_v0  ;;  %v19726_v0 = vld [vmem:[#allocation13 + $0x1548] ss:$116 sps:$4 sm:$0xff]  }
 0x9fe   :  { %14508 = vmatpush1.bf16.msra.mxu1 %v19662_v47  ;;  %14427 = vmatprep.subr.bf16.mxu0 %v19667_v1  ;;  %v8646_v47 = vrot.slane %v20424_v18, %v20363_v37  ;;  %v8654_v1 = vrot.slane %v20424_v18, %v20366_v53 }
 0x9ff   :  { %14509 = vmatprep.subr.bf16.mxu1 %v19670_v2  ;;  %v8650_v2 = vrot.slane %v20424_v18, %v20369_v54  ;;  %v8558_v54 = vld [vmem:[#allocation14 + $0x18] sm:$0x1f] }
 0xa01   :  { %14428 = vmatpush1.bf16.msra.mxu0 %v19665_v3  ;;  %v8658_v3 = vrot.slane %v20424_v18, %v20372_v57  ;;  %v8670_v57 = vrot.slane %v8558_v54, %v20287_v49  ;;  %v8666_v18 = vrot.slane %v8558_v54, %v20290_v51  ;;  %v8678_v51 = vrot.slane %v8558_v54, %v20363_v37 }
 0xa02   :  { %14510 = vmatpush1.bf16.msra.mxu1 %v19668_v4  ;;  %14429 = vmatprep.subr.bf16.mxu0 %v19673_v6 }
 0xa03   :  { %14511 = vmatprep.subr.bf16.mxu1 %v19676_v7 }
 0xa05   :  { %14430 = vmatpush1.bf16.msra.mxu0 %v19671_v10 }
 0xa06   :  { %14512 = vmatpush1.bf16.msra.mxu1 %v19674_v13  ;;  %14431 = vmatprep.subr.bf16.mxu0 %v19679_v15 }
 0xa07   :  { %14513 = vmatprep.subr.bf16.mxu1 %v19682_v16 }
 0xa09   :  { %14432 = vmatpush1.bf16.msra.mxu0 %v19677_v20 }
 0xa0a   :  { %14514 = vmatpush1.bf16.msra.mxu1 %v19680_v11  ;;  %14433 = vmatprep.subr.bf16.mxu0 %v19685_v9  ;;  %v8662_v9 = vrot.slane %v8558_v54, %v20284_v48 }
 0xa0b   :  { %14515 = vmatprep.subr.bf16.mxu1 %v19688_v21  ;;  %v8674_v21 = vrot.slane %v8558_v54, %v20293_v40 }
 0xa0d   :  { %14434 = vmatpush1.bf16.msra.mxu0 %v19683_v50 }
 0xa0e   :  { %14516 = vmatpush1.bf16.msra.mxu1 %v19686_v14  ;;  %14435 = vmatprep.subr.bf16.mxu0 %v19691_v23 }
 0xa0f   :  { %14517 = vmatprep.subr.bf16.mxu1 %v19694_v56 }
 0xa11   :  { %14436 = vmatpush1.bf16.msra.mxu0 %v19689_v17 }
 0xa12   :  { %14518 = vmatpush1.bf16.msra.mxu1 %v19692_v26  ;;  %16628 = vmatprep.subr.bf16.mxu0 %v19695_v27 }
 0xa13   :  { %16650 = vmatprep.subr.bf16.mxu1 %v19696_v19 }
 0xa14   :  { %14438 = vmatmul.mubr.bf16.vlgmr.msra.gmra.mrb[36].mxu0 %v20326_v24 }
 0xa15   :  { %14520 = vmatmul.mubr.bf16.vlgmr.msra.gmra.mrb[36].mxu1 %v20326_v24  ;;  %16629 = vmatpush3.bf16.msra.mxu0 %v19697_v55 }
 0xa16   :  { %14560 = vmatprep.mubr.bf16.mxu0 %v20311_v5  ;;  %16651 = vmatpush3.bf16.msra.mxu1 %v19698_v29  ;;  %v19710_v5 = vld [vmem:[#allocation13 + $0x11a8] ss:$116 sps:$4 sm:$0xff]  }
 0xa17   :  { %14600 = vmatprep.mubr.bf16.mxu1 %v20317_v12  ;;  %16630 = vmatprep.subr.bf16.mxu0 %v19699_v30  ;;  %v19713_v12 = vld [vmem:[#allocation13 + $0x410] ss:$116 sps:$4 sm:$0xff]  }
 0xa18   :  { %16652 = vmatprep.subr.bf16.mxu1 %v19700_v22 }
 0xa19   :  { %16631 = vmatpush3.bf16.msra.mxu0 %v19701_v32 }
 0xa1a   :  { %16653 = vmatpush3.bf16.msra.mxu1 %v19702_v33  ;;  %16632 = vmatprep.subr.bf16.mxu0 %v19703_v25 }
 0xa1b   :  { %16654 = vmatprep.subr.bf16.mxu1 %v19704_v35 }
 0xa1d   :  { %16633 = vmatpush3.bf16.msra.mxu0 %v19705_v28 }
 0xa1e   :  { %16655 = vmatpush3.bf16.msra.mxu1 %v19706_v38  ;;  %16634 = vmatprep.subr.bf16.mxu0 %v19707_v39 }
 0xa1f   :  { %16656 = vmatprep.subr.bf16.mxu1 %v19708_v31 }
 0xa21   :  { %16635 = vmatpush3.bf16.msra.mxu0 %v19709_v41 }
 0xa22   :  { %16657 = vmatpush3.bf16.msra.mxu1 %v19710_v5  ;;  %16636 = vmatprep.subr.bf16.mxu0 %v19711_v42 }
 0xa23   :  { %16658 = vmatprep.subr.bf16.mxu1 %v19712_v34 }
 0xa25   :  { %16637 = vmatpush3.bf16.msra.mxu0 %v19713_v12 }
 0xa26   :  { %16659 = vmatpush3.bf16.msra.mxu1 %v19714_v44  ;;  %16638 = vmatprep.subr.bf16.mxu0 %v19715_v45 }
 0xa27   :  { %16660 = vmatprep.subr.bf16.mxu1 %v19716_v46 }
 0xa29   :  { %16639 = vmatpush3.bf16.msra.mxu0 %v19717_v52 }
 0xa2a   :  { %16661 = vmatpush3.bf16.msra.mxu1 %v19718_v43  ;;  %16640 = vmatprep.subr.bf16.mxu0 %v19719_v58 }
 0xa2b   :  { %16662 = vmatprep.subr.bf16.mxu1 %v19720_v36 }
 0xa2d   :  { %16641 = vmatpush3.bf16.msra.mxu0 %v19721_v59 }
 0xa2e   :  { %16663 = vmatpush3.bf16.msra.mxu1 %v19722_v60  ;;  %16642 = vmatprep.subr.bf16.mxu0 %v19723_v61 }
 0xa2f   :  { %16664 = vmatprep.subr.bf16.mxu1 %v19724_v62 }
 0xa31   :  { %16643 = vmatpush3.bf16.msra.mxu0 %v19725_v63 }
 0xa32   :  { %16665 = vmatpush3.bf16.msra.mxu1 %v19726_v0 }
 0xa34   :  { %14561 = vmatmul.mubr.bf16.vlgmr.msra.gmra.mrb[40].mxu0 %v20313_v8 }
 0xa35   :  { %14601 = vmatmul.mubr.bf16.vlgmr.msra.gmra.mrb[40].mxu1 %v20326_v24 }
 0xa67   :  { %v14275_v4 = vpop.f32.mrb[32].mxu0 }
 0xa68   :  { %v16696_v6 = vadd.f32 %v14275_v4, %v8646_v47  ;;  %v14357_v7 = vpop.f32.mrb[32].mxu1  ;;  %v14277_v10 = vpop.f32.mrb[33].mxu0 }
 0xa69   :  { %v16698_v13 = vadd.f32 %v14357_v7, %v8654_v1  ;;  %v16697_v8 = vadd.f32 %v14277_v10, %v8650_v2  ;;  %v14359_v15 = vpop.f32.mrb[33].mxu1  ;;  %v14279_v24 = vpop.f32.mrb[34].mxu0 }
 0xa6a   :  { %14628 = vst [vmem:[#allocation16 + $0xa0] sm:$0xff] %v16696_v6  ;;  %v16699_v16 = vadd.f32 %v14359_v15, %v8658_v3  ;;  %v14361_v20 = vpop.f32.mrb[34].mxu1  ;;  %v14280_v11 = vpop.f32.mrb[35].mxu0 }
 0xa6b   :  { %14630 = vst [vmem:[#allocation16 + $0xb0] sm:$0xff] %v16698_v13  ;;  %14629 = vst [vmem:[#allocation16 + $0xa8] sm:$0xff] %v16697_v8  ;;  %v14362_v53 = vpop.f32.mrb[35].mxu1 }
 0xa6c   :  { %14631 = vst [vmem:[#allocation16 + $0xb8] sm:$0xff] %v16699_v16 }
 0xae7   :  { %v14439_v50 = vpop.f32.mrb[36].mxu0 }
 0xae8   :  { %v16700_v14 = vadd.f32 %v14439_v50, %v8662_v9  ;;  %v14521_v23 = vpop.f32.mrb[36].mxu1  ;;  %v14441_v56 = vpop.f32.mrb[37].mxu0 }
 0xae9   :  { %v16702_v17 = vadd.f32 %v14521_v23, %v8670_v57  ;;  %v16701_v26 = vadd.f32 %v14441_v56, %v8666_v18  ;;  %v14523_v27 = vpop.f32.mrb[37].mxu1  ;;  %v14443_v19 = vpop.f32.mrb[38].mxu0 }
 0xaea   :  { %14632 = vst [vmem:[#allocation16 + $0xc0] sm:$0xff] %v16700_v14  ;;  %v16703_v55 = vadd.f32 %v14523_v27, %v8674_v21  ;;  %v14525_v29 = vpop.f32.mrb[38].mxu1  ;;  %v14444_v30 = vpop.f32.mrb[39].mxu0 }
 0xaeb   :  { %14634 = vst [vmem:[#allocation16 + $0xd0] sm:$0xff] %v16702_v17  ;;  %14633 = vst [vmem:[#allocation16 + $0xc8] sm:$0xff] %v16701_v26  ;;  %v14526_v48 = vpop.f32.mrb[39].mxu1 }
 0xaec   :  { %14635 = vst [vmem:[#allocation16 + $0xd8] sm:$0xff] %v16703_v55 }
 0xb07   :  { %v16644_v49 = vpop.f32.mrb[40].mxu0 }
 0xb08   :  { %v16666_v40 = vpop.f32.mrb[40].mxu1  ;;  %v16645_v22 = vpop.f32.mrb[41].mxu0 }
 0xb09   :  { %v16646_v32 = vadd.f32 %v16645_v22, %v16644_v49  ;;  %v16667_v33 = vpop.f32.mrb[41].mxu1  ;;  %v16647_v25 = vpop.f32.mrb[42].mxu0 }
 0xb0a   :  { %v16668_v35 = vadd.f32 %v16667_v33, %v16666_v40  ;;  %v16669_v28 = vpop.f32.mrb[42].mxu1  ;;  %v16648_v38 = vpop.f32.mrb[43].mxu0 }
 0xb0b   :  { %v14563_v39 = vadd.f32 %v16646_v32, %v8678_v51  ;;  %v16670_v31 = vpop.f32.mrb[43].mxu1 }
 0xb0d   :  { %v14603_v41 = vadd.f32 %v16668_v35, %v14563_v39 }
 0xb0f   :  { %14636 = vst [vmem:[#allocation16 + $0xe0] sm:$0xff] %v14603_v41 }
 0xb10   :  { %19916 = shalt.err (!%p19913_p12)
}
 0xb11   :  { %s19917_s4 = scalar_lea.hbm %s20474_s9, 3712 }
 0xb12   :  { %p19918_p13 = scmp.ne.s32.totalorder %s20474_s9, %s19917_s4  ;;  %p19921_p0 = scmp.lt.u32.totalorder %s19917_s4, %s20474_s9 }
 0xb14   :  { %p19923_p1 = pnand %p19921_p0, %p19918_p13 }
 0xb16   :  { %19926 = shalt.err (!%p19923_p1)
}
 0xb17   :  { %14646 = dma.vmem_to_hbm [thread:$0]  %s14644_s22, 3712, %s20474_s9, [#allocation4]  }
 0xb18   :  { %19937 = dma.done.wait [#allocation4], 3712  }
 0xb19   :  { %19938 = vsyncadd [#allocation4], 4294963584 }
 0xb1a   :  { %14650 = vsyncpa [#allocation3], 1 }
 0xb1b   :  { %14651 = vsyncpa [#allocation6], 1 }
 0xb1c   :  { %14652 = vsyncpa [#allocation9], 1 }
 0xb1d   :  { %14653 = vsyncpa [#allocation12], 1 }
 0xb1e   :  { %14654 = vsyncpa [#allocation15], 1 }
 0xb1f   :  { %14655 = vsyncpa [#allocation4], 1 }

</bundles_post_ra>
